<compile_context>
chip_gen: v7x
topology: tpu7x:2x2x1
jax: 0.10.0
libtpu: 0.0.40
codegen_flags: <defaults>
</compile_context>

<pallas_src>
import functools
import math

import jax
import jax.numpy as jnp
from jax.experimental import pallas as pl
from jax.experimental.pallas import tpu as pltpu

_BN_EPS = 1e-5
_LN_EPS = 1e-5
_MXU_DTYPE = jnp.bfloat16            # MXU operand dtype; accumulation is always f32
_VMEM_LIMIT = 48 * 1024 * 1024       # explicit scoped-VMEM budget (<= physical on all gens)


# --------------------------------------------------------------------------------------
# Math helpers shared (verbatim) by the Pallas kernels and the pure-JAX reference.
# --------------------------------------------------------------------------------------
def _gelu(x):
    # PyTorch nn.GELU() default: exact erf form (tanh-approx would route to the EUP slot).
    return 0.5 * x * (1.0 + jax.lax.erf(x * (1.0 / math.sqrt(2.0))))


def _dot_bias(h, w, b):
    """h @ w + b with bf16 MXU operands and f32 accumulation."""
    return jnp.dot(h.astype(_MXU_DTYPE), w.astype(_MXU_DTYPE),
                   preferred_element_type=jnp.float32) + b.astype(jnp.float32)


def _layer_norm(h, gamma, beta):
    """LayerNorm over the feature (lane) axis, centered two-pass variance. h: [rows,H] f32."""
    mean = jnp.mean(h, axis=-1, keepdims=True)
    c = h - mean
    var = jnp.mean(c * c, axis=-1, keepdims=True)
    return c * jax.lax.rsqrt(var + _LN_EPS) * gamma.astype(jnp.float32) \
        + beta.astype(jnp.float32)


def _bn_fold(h, gamma, beta):
    """Global training-mode BatchNorm1d stats folded to per-feature scale/shift. h: [N,F] f32."""
    mean = jnp.mean(h, axis=0, keepdims=True)
    c = h - mean
    var = jnp.mean(c * c, axis=0, keepdims=True)          # biased, centered two-pass
    scale = gamma.astype(jnp.float32) * jax.lax.rsqrt(var + _BN_EPS)
    shift = beta.astype(jnp.float32) - mean * scale
    return scale, shift


def _encoder_layer(h, w_sa, b_sa, g1, b1, w_ff1, b_ff1, w_ff2, b_ff2, g2, b2):
    """One nn.TransformerEncoderLayer (post-norm, relu FFN) evaluated at seq_len == 1.

    MHA collapses to a single linear (W_sa = Wv@Wo folded at init); dropout -> identity.
    """
    sa = _dot_bias(h, w_sa, b_sa)
    h = _layer_norm(h + sa, g1, b1)
    ff = jnp.maximum(_dot_bias(h, w_ff1, b_ff1), 0.0)     # default activation: relu
    ff = _dot_bias(ff, w_ff2, b_ff2)
    return _layer_norm(h + ff, g2, b2)


# --------------------------------------------------------------------------------------
# Pallas kernels
# --------------------------------------------------------------------------------------
def _encoder_kernel(scale1_ref, shift1_ref, x_ref, w_in_ref, b_in_ref,
                    w_sa_ref, b_sa_ref, ln1_g_ref, ln1_b_ref,
                    w_ff1_ref, b_ff1_ref, w_ff2_ref, b_ff2_ref,
                    ln2_g_ref, ln2_b_ref, h_ref):
    """Per batch-tile: folded BN1 -> Linear -> GELU -> 2 encoder layers. Writes f32 h_enc."""
    h = x_ref[...].astype(jnp.float32) * scale1_ref[...] + shift1_ref[...]
    h = _gelu(_dot_bias(h, w_in_ref[...], b_in_ref[...]))
    for l in range(w_sa_ref.shape[0]):                    # static unroll over 2 layers
        h = _encoder_layer(h,
                           w_sa_ref[l], b_sa_ref[l],
                           ln1_g_ref[l], ln1_b_ref[l],
                           w_ff1_ref[l], b_ff1_ref[l],
                           w_ff2_ref[l], b_ff2_ref[l],
                           ln2_g_ref[l], ln2_b_ref[l])
    h_ref[...] = h


def _output_kernel(scale2_ref, shift2_ref, h_ref, w_out_ref, b_out_ref, o_ref):
    """Per batch-tile: folded BN2 -> Linear -> GELU."""
    h = h_ref[...].astype(jnp.float32) * scale2_ref[...] + shift2_ref[...]
    o_ref[...] = _gelu(_dot_bias(h, w_out_ref[...], b_out_ref[...])).astype(o_ref.dtype)


# --------------------------------------------------------------------------------------
# Wrapper: global BN stats in the wrapper, two gridded pallas_calls around the BN2 boundary.
# --------------------------------------------------------------------------------------
@functools.partial(jax.jit, static_argnames=("block_m",))
def adapter_forward(x, params, block_m=256):
    """x: [N, in_features] -> [N, in_features]. block_m: rows per grid step (128 on v5e,
    256 on v6e/v7x; keep it a multiple of 16 for bf16 sublane packing)."""
    (bn1_g, bn1_b, w_in, b_in, w_sa, b_sa, ln1_g, ln1_b,
     w_ff1, b_ff1, w_ff2, b_ff2, ln2_g, ln2_b,
     bn2_g, bn2_b, w_out, b_out) = params

    n, f_in = x.shape
    h_dim = w_in.shape[1]
    d_ff = w_ff1.shape[-1]
    n_layers = w_sa.shape[0]
    tm = min(block_m, n)
    grid = (pl.cdiv(n, tm),)

    cp = pltpu.CompilerParams(dimension_semantics=("parallel",),
                              vmem_limit_bytes=_VMEM_LIMIT)

    # Activation tiles move with the grid; weights/biases use constant index_maps so the
    # pipeline keeps them resident in VMEM (no re-DMA across steps).
    def row_spec(f):
        return pl.BlockSpec((tm, f), lambda i: (i, 0))

    def vec_spec(f):
        return pl.BlockSpec((1, f), lambda i: (0, 0))

    def mat_spec(a, b):
        return pl.BlockSpec((a, b), lambda i: (0, 0))

    def lmat_spec(a, b):
        return pl.BlockSpec((n_layers, a, b), lambda i: (0, 0, 0))

    # ---- stage 1 (wrapper): global BN1 stats folded to scale/shift [1, F] ----
    scale1, shift1 = _bn_fold(x.astype(jnp.float32), bn1_g, bn1_b)

    # ---- stage 2 (kernel A, gridded over batch): BN1 fold -> Linear -> GELU -> encoder ----
    h_enc = pl.pallas_call(
        _encoder_kernel,
        out_shape=jax.ShapeDtypeStruct((n, h_dim), jnp.float32),
        grid=grid,
        in_specs=[vec_spec(f_in), vec_spec(f_in), row_spec(f_in),
                  mat_spec(f_in, h_dim), vec_spec(h_dim),
                  lmat_spec(h_dim, h_dim), lmat_spec(1, h_dim),
                  lmat_spec(1, h_dim), lmat_spec(1, h_dim),
                  lmat_spec(h_dim, d_ff), lmat_spec(1, d_ff),
                  lmat_spec(d_ff, h_dim), lmat_spec(1, h_dim),
                  lmat_spec(1, h_dim), lmat_spec(1, h_dim)],
        out_specs=row_spec(h_dim),
        compiler_params=cp,
    )(scale1, shift1, x, w_in, b_in, w_sa, b_sa, ln1_g, ln1_b,
      w_ff1, b_ff1, w_ff2, b_ff2, ln2_g, ln2_b)

    # ---- stage 3 (wrapper): global BN2 stats on the full encoder output ----
    scale2, shift2 = _bn_fold(h_enc, bn2_g, bn2_b)

    # ---- stage 4 (kernel B, gridded over batch): BN2 fold -> Linear -> GELU ----
    out = pl.pallas_call(
        _output_kernel,
        out_shape=jax.ShapeDtypeStruct((n, f_in), x.dtype),
        grid=grid,
        in_specs=[vec_spec(h_dim), vec_spec(h_dim), row_spec(h_dim),
                  mat_spec(h_dim, f_in), vec_spec(f_in)],
        out_specs=row_spec(f_in),
        compiler_params=cp,
    )(scale2, shift2, h_enc, w_out, b_out)
    return out


# --------------------------------------------------------------------------------------
# Parameter init (PyTorch-style uniform Linear init; BN/LN gamma=1, beta=0).
# Matmul weights are stored pre-transposed [fan_in, fan_out] in bf16 (MXU-native);
# biases / norm params stay f32.  The seq_len==1 attention collapse is folded at init:
#   W_sa = Wv @ Wo,  b_sa = bv @ Wo + bo.
# --------------------------------------------------------------------------------------
def init_adapter_params(key, in_features, hidden_features, num_layers=2,
                        dim_feedforward=2048, weight_dtype=jnp.bfloat16):
    def linear(k, fan_in, fan_out):
        kw, kb = jax.random.split(k)
        bound = 1.0 / math.sqrt(fan_in)
        w_t = jax.random.uniform(kw, (fan_in, fan_out), jnp.float32, -bound, bound)
        b = jax.random.uniform(kb, (1, fan_out), jnp.float32, -bound, bound)
        return w_t, b

    ks = jax.random.split(key, 2 + 4 * num_layers)
    w_in, b_in = linear(ks[0], in_features, hidden_features)

    w_sa, b_sa, w_ff1, b_ff1, w_ff2, b_ff2 = ([] for _ in range(6))
    for l in range(num_layers):
        base = 1 + 4 * l
        wv, bv = linear(ks[base + 0], hidden_features, hidden_features)
        wo, bo = linear(ks[base + 1], hidden_features, hidden_features)
        w_sa.append(wv @ wo)                 # fold out_proj(v_proj(.)) into one [H,H]
        b_sa.append(bv @ wo + bo)
        w, b = linear(ks[base + 2], hidden_features, dim_feedforward)
        w_ff1.append(w); b_ff1.append(b)
        w, b = linear(ks[base + 3], dim_feedforward, hidden_features)
        w_ff2.append(w); b_ff2.append(b)
    w_out, b_out = linear(ks[1 + 4 * num_layers], hidden_features, in_features)

    ones_lh = jnp.ones((num_layers, 1, hidden_features), jnp.float32)
    zeros_lh = jnp.zeros((num_layers, 1, hidden_features), jnp.float32)
    wd = weight_dtype
    return (
        jnp.ones((1, in_features), jnp.float32),       # bn1 gamma
        jnp.zeros((1, in_features), jnp.float32),      # bn1 beta
        w_in.astype(wd), b_in,                         # input Linear
        jnp.stack(w_sa).astype(wd), jnp.stack(b_sa),   # folded attention [L,H,H], [L,1,H]
        ones_lh, zeros_lh,                             # LN1 gamma/beta
        jnp.stack(w_ff1).astype(wd), jnp.stack(b_ff1), # FFN linear1 [L,H,Dff], [L,1,Dff]
        jnp.stack(w_ff2).astype(wd), jnp.stack(b_ff2), # FFN linear2 [L,Dff,H], [L,1,H]
        ones_lh, zeros_lh,                             # LN2 gamma/beta
        jnp.ones((1, hidden_features), jnp.float32),   # bn2 gamma
        jnp.zeros((1, hidden_features), jnp.float32),  # bn2 beta
        w_out.astype(wd), b_out,                       # output Linear
    )


# --------------------------------------------------------------------------------------
# Pure-JAX reference (identical math, no Pallas) for correctness checking.
# --------------------------------------------------------------------------------------
def adapter_reference(x, params):
    (bn1_g, bn1_b, w_in, b_in, w_sa, b_sa, ln1_g, ln1_b,
     w_ff1, b_ff1, w_ff2, b_ff2, ln2_g, ln2_b,
     bn2_g, bn2_b, w_out, b_out) = params
    scale1, shift1 = _bn_fold(x.astype(jnp.float32), bn1_g, bn1_b)
    h = x.astype(jnp.float32) * scale1 + shift1
    h = _gelu(_dot_bias(h, w_in, b_in))
    for l in range(w_sa.shape[0]):
        h = _encoder_layer(h, w_sa[l], b_sa[l], ln1_g[l], ln1_b[l],
                           w_ff1[l], b_ff1[l], w_ff2[l], b_ff2[l],
                           ln2_g[l], ln2_b[l])
    scale2, shift2 = _bn_fold(h, bn2_g, bn2_b)
    h = h * scale2 + shift2
    return _gelu(_dot_bias(h, w_out, b_out)).astype(x.dtype)


# --------------------------------------------------------------------------------------
# Demo / self-test
# --------------------------------------------------------------------------------------
if __name__ == "__main__":
    # Lane/sublane-friendly small shapes: features are multiples of 128 (full vreg lanes,
    # unmasked stores), batch is a multiple of the 128-row tile so the grid has 2 steps
    # and the activation DMA actually pipelines; hidden % nhead(=8) == 0.
    batch = 256
    in_features = 128
    hidden_features = 128   # d_model
    key = jax.random.PRNGKey(0)
    kx, kp = jax.random.split(key)

    params = init_adapter_params(kp, in_features, hidden_features)
    x = jax.random.normal(kx, (batch, in_features), jnp.float32)

    out = jax.block_until_ready(adapter_forward(x, params, block_m=128))
    ref = adapter_reference(x, params)

    assert out.shape == (batch, in_features)
    err = float(jnp.max(jnp.abs(out.astype(jnp.float32) - ref.astype(jnp.float32))))
    assert err < 3e-2, err

    print("KERNEL_OK")
</pallas_src>

<mosaic_0001>
module attributes {stable_mosaic.version = 11 : i64} {
  func.func @_output_kernel(%arg0: i32, %arg1: memref<1x128xf32, #tpu.memory_space<vmem>>, %arg2: memref<1x128xf32, #tpu.memory_space<vmem>>, %arg3: memref<128x128xf32, #tpu.memory_space<vmem>>, %arg4: memref<128x128xbf16, #tpu.memory_space<vmem>>, %arg5: memref<1x128xf32, #tpu.memory_space<vmem>>, %arg6: memref<128x128xf32, #tpu.memory_space<vmem>>) attributes {dimension_semantics = [#tpu.dimension_semantics<parallel>], iteration_bounds = array<i64: 2>, scalar_prefetch = 0 : i64, scratch_operands = 0 : i64, tpu.core_type = #tpu.core_type<tc>, window_params = [{pipeline_mode = #tpu.pipeline_mode<synchronous>, transform_indices = @transform_0, window_bounds = array<i64: 1, 128>}, {pipeline_mode = #tpu.pipeline_mode<synchronous>, transform_indices = @transform_1, window_bounds = array<i64: 1, 128>}, {transform_indices = @transform_2, window_bounds = array<i64: 128, 128>}, {pipeline_mode = #tpu.pipeline_mode<synchronous>, transform_indices = @transform_3, window_bounds = array<i64: 128, 128>}, {pipeline_mode = #tpu.pipeline_mode<synchronous>, transform_indices = @transform_4, window_bounds = array<i64: 1, 128>}, {transform_indices = @transform_5, window_bounds = array<i64: 128, 128>}]} {
    %c0 = arith.constant 0 : index
    %c0_0 = arith.constant 0 : index
    %0 = vector.load %arg3[%c0, %c0_0] : memref<128x128xf32, #tpu.memory_space<vmem>>, vector<128x128xf32>
    %c0_1 = arith.constant 0 : index
    %c0_2 = arith.constant 0 : index
    %1 = vector.load %arg1[%c0_1, %c0_2] : memref<1x128xf32, #tpu.memory_space<vmem>>, vector<1x128xf32>
    %2 = vector.broadcast %1 : vector<1x128xf32> to vector<128x128xf32>
    %3 = arith.mulf %0, %2 : vector<128x128xf32>
    %c0_3 = arith.constant 0 : index
    %c0_4 = arith.constant 0 : index
    %4 = vector.load %arg2[%c0_3, %c0_4] : memref<1x128xf32, #tpu.memory_space<vmem>>, vector<1x128xf32>
    %5 = vector.broadcast %4 : vector<1x128xf32> to vector<128x128xf32>
    %6 = arith.addf %3, %5 : vector<128x128xf32>
    %c0_5 = arith.constant 0 : index
    %c0_6 = arith.constant 0 : index
    %7 = vector.load %arg4[%c0_5, %c0_6] : memref<128x128xbf16, #tpu.memory_space<vmem>>, vector<128x128xbf16>
    %c0_7 = arith.constant 0 : index
    %c0_8 = arith.constant 0 : index
    %8 = vector.load %arg5[%c0_7, %c0_8] : memref<1x128xf32, #tpu.memory_space<vmem>>, vector<1x128xf32>
    %9 = arith.truncf %6 : vector<128x128xf32> to vector<128x128xbf16>
    %cst = arith.constant dense<0.000000e+00> : vector<128x128xf32>
    %10 = tpu.matmul %9, %7, %cst {dimension_numbers = #tpu.dot_dimension_numbers<[1], [0], [0], [1], [0, 0, 1, 1], [], []>} : vector<128x128xbf16>, vector<128x128xbf16>, vector<128x128xf32> -> vector<128x128xf32>
    %11 = vector.broadcast %8 : vector<1x128xf32> to vector<128x128xf32>
    %12 = arith.addf %10, %11 : vector<128x128xf32>
    %cst_9 = arith.constant 5.000000e-01 : f32
    %13 = vector.broadcast %cst_9 : f32 to vector<128x128xf32>
    %14 = arith.mulf %13, %12 : vector<128x128xf32>
    %cst_10 = arith.constant 0.707106769 : f32
    %15 = vector.broadcast %cst_10 : f32 to vector<128x128xf32>
    %16 = arith.mulf %12, %15 : vector<128x128xf32>
    %17 = math.erf %16 : vector<128x128xf32>
    %cst_11 = arith.constant 1.000000e+00 : f32
    %18 = vector.broadcast %cst_11 : f32 to vector<128x128xf32>
    %19 = arith.addf %18, %17 : vector<128x128xf32>
    %20 = arith.mulf %14, %19 : vector<128x128xf32>
    %c0_12 = arith.constant 0 : index
    %c0_13 = arith.constant 0 : index
    %21 = vector.load %arg6[%c0_12, %c0_13] : memref<128x128xf32, #tpu.memory_space<vmem>>, vector<128x128xf32>
    tpu.vector_store %arg6[%c0_12, %c0_13], %20 {strides = array<i32>} : memref<128x128xf32, #tpu.memory_space<vmem>>, vector<128x128xf32>,
    return
  }
  func.func @transform_0(%arg0: i32) -> (i32, i32) {
    %c0_i32 = arith.constant 0 : i32
    %c0_i32_0 = arith.constant 0 : i32
    %c0_i32_1 = arith.constant 0 : i32
    return %c0_i32, %c0_i32_0 : i32, i32
  }
  func.func @transform_1(%arg0: i32) -> (i32, i32) {
    %c0_i32 = arith.constant 0 : i32
    %c0_i32_0 = arith.constant 0 : i32
    %c0_i32_1 = arith.constant 0 : i32
    return %c0_i32, %c0_i32_0 : i32, i32
  }
  func.func @transform_2(%arg0: i32) -> (i32, i32) {
    %c0_i32 = arith.constant 0 : i32
    %c0_i32_0 = arith.constant 0 : i32
    return %arg0, %c0_i32 : i32, i32
  }
  func.func @transform_3(%arg0: i32) -> (i32, i32) {
    %c0_i32 = arith.constant 0 : i32
    %c0_i32_0 = arith.constant 0 : i32
    %c0_i32_1 = arith.constant 0 : i32
    return %c0_i32, %c0_i32_0 : i32, i32
  }
  func.func @transform_4(%arg0: i32) -> (i32, i32) {
    %c0_i32 = arith.constant 0 : i32
    %c0_i32_0 = arith.constant 0 : i32
    %c0_i32_1 = arith.constant 0 : i32
    return %c0_i32, %c0_i32_0 : i32, i32
  }
  func.func @transform_5(%arg0: i32) -> (i32, i32) {
    %c0_i32 = arith.constant 0 : i32
    %c0_i32_0 = arith.constant 0 : i32
    return %arg0, %c0_i32 : i32, i32
  }
}

module attributes {stable_mosaic.version = 11 : i64} {
  func.func @_encoder_kernel(%arg0: i32, %arg1: memref<1x128xf32, #tpu.memory_space<vmem>>, %arg2: memref<1x128xf32, #tpu.memory_space<vmem>>, %arg3: memref<128x128xf32, #tpu.memory_space<vmem>>, %arg4: memref<128x128xbf16, #tpu.memory_space<vmem>>, %arg5: memref<1x128xf32, #tpu.memory_space<vmem>>, %arg6: memref<2x128x128xbf16, #tpu.memory_space<vmem>>, %arg7: memref<2x1x128xf32, #tpu.memory_space<vmem>>, %arg8: memref<2x1x128xf32, #tpu.memory_space<vmem>>, %arg9: memref<2x1x128xf32, #tpu.memory_space<vmem>>, %arg10: memref<2x128x2048xbf16, #tpu.memory_space<vmem>>, %arg11: memref<2x1x2048xf32, #tpu.memory_space<vmem>>, %arg12: memref<2x2048x128xbf16, #tpu.memory_space<vmem>>, %arg13: memref<2x1x128xf32, #tpu.memory_space<vmem>>, %arg14: memref<2x1x128xf32, #tpu.memory_space<vmem>>, %arg15: memref<2x1x128xf32, #tpu.memory_space<vmem>>, %arg16: memref<128x128xf32, #tpu.memory_space<vmem>>) attributes {dimension_semantics = [#tpu.dimension_semantics<parallel>], iteration_bounds = array<i64: 2>, scalar_prefetch = 0 : i64, scratch_operands = 0 : i64, tpu.core_type = #tpu.core_type<tc>, window_params = [{pipeline_mode = #tpu.pipeline_mode<synchronous>, transform_indices = @transform_0, window_bounds = array<i64: 1, 128>}, {pipeline_mode = #tpu.pipeline_mode<synchronous>, transform_indices = @transform_1, window_bounds = array<i64: 1, 128>}, {transform_indices = @transform_2, window_bounds = array<i64: 128, 128>}, {pipeline_mode = #tpu.pipeline_mode<synchronous>, transform_indices = @transform_3, window_bounds = array<i64: 128, 128>}, {pipeline_mode = #tpu.pipeline_mode<synchronous>, transform_indices = @transform_4, window_bounds = array<i64: 1, 128>}, {pipeline_mode = #tpu.pipeline_mode<synchronous>, transform_indices = @transform_5, window_bounds = array<i64: 2, 128, 128>}, {pipeline_mode = #tpu.pipeline_mode<synchronous>, transform_indices = @transform_6, window_bounds = array<i64: 2, 1, 128>}, {pipeline_mode = #tpu.pipeline_mode<synchronous>, transform_indices = @transform_7, window_bounds = array<i64: 2, 1, 128>}, {pipeline_mode = #tpu.pipeline_mode<synchronous>, transform_indices = @transform_8, window_bounds = array<i64: 2, 1, 128>}, {pipeline_mode = #tpu.pipeline_mode<synchronous>, transform_indices = @transform_9, window_bounds = array<i64: 2, 128, 2048>}, {pipeline_mode = #tpu.pipeline_mode<synchronous>, transform_indices = @transform_10, window_bounds = array<i64: 2, 1, 2048>}, {pipeline_mode = #tpu.pipeline_mode<synchronous>, transform_indices = @transform_11, window_bounds = array<i64: 2, 2048, 128>}, {pipeline_mode = #tpu.pipeline_mode<synchronous>, transform_indices = @transform_12, window_bounds = array<i64: 2, 1, 128>}, {pipeline_mode = #tpu.pipeline_mode<synchronous>, transform_indices = @transform_13, window_bounds = array<i64: 2, 1, 128>}, {pipeline_mode = #tpu.pipeline_mode<synchronous>, transform_indices = @transform_14, window_bounds = array<i64: 2, 1, 128>}, {transform_indices = @transform_15, window_bounds = array<i64: 128, 128>}]} {
    %c0 = arith.constant 0 : index
    %c0_0 = arith.constant 0 : index
    %0 = vector.load %arg3[%c0, %c0_0] : memref<128x128xf32, #tpu.memory_space<vmem>>, vector<128x128xf32>
    %c0_1 = arith.constant 0 : index
    %c0_2 = arith.constant 0 : index
    %1 = vector.load %arg1[%c0_1, %c0_2] : memref<1x128xf32, #tpu.memory_space<vmem>>, vector<1x128xf32>
    %2 = vector.broadcast %1 : vector<1x128xf32> to vector<128x128xf32>
    %3 = arith.mulf %0, %2 : vector<128x128xf32>
    %c0_3 = arith.constant 0 : index
    %c0_4 = arith.constant 0 : index
    %4 = vector.load %arg2[%c0_3, %c0_4] : memref<1x128xf32, #tpu.memory_space<vmem>>, vector<1x128xf32>
    %5 = vector.broadcast %4 : vector<1x128xf32> to vector<128x128xf32>
    %6 = arith.addf %3, %5 : vector<128x128xf32>
    %c0_5 = arith.constant 0 : index
    %c0_6 = arith.constant 0 : index
    %7 = vector.load %arg4[%c0_5, %c0_6] : memref<128x128xbf16, #tpu.memory_space<vmem>>, vector<128x128xbf16>
    %c0_7 = arith.constant 0 : index
    %c0_8 = arith.constant 0 : index
    %8 = vector.load %arg5[%c0_7, %c0_8] : memref<1x128xf32, #tpu.memory_space<vmem>>, vector<1x128xf32>
    %9 = arith.truncf %6 : vector<128x128xf32> to vector<128x128xbf16>
    %cst = arith.constant dense<0.000000e+00> : vector<128x128xf32>
    %10 = tpu.matmul %9, %7, %cst {dimension_numbers = #tpu.dot_dimension_numbers<[1], [0], [0], [1], [0, 0, 1, 1], [], []>} : vector<128x128xbf16>, vector<128x128xbf16>, vector<128x128xf32> -> vector<128x128xf32>
    %11 = vector.broadcast %8 : vector<1x128xf32> to vector<128x128xf32>
    %12 = arith.addf %10, %11 : vector<128x128xf32>
    %cst_9 = arith.constant 5.000000e-01 : f32
    %13 = vector.broadcast %cst_9 : f32 to vector<128x128xf32>
    %14 = arith.mulf %13, %12 : vector<128x128xf32>
    %cst_10 = arith.constant 0.707106769 : f32
    %15 = vector.broadcast %cst_10 : f32 to vector<128x128xf32>
    %16 = arith.mulf %12, %15 : vector<128x128xf32>
    %17 = math.erf %16 : vector<128x128xf32>
    %cst_11 = arith.constant 1.000000e+00 : f32
    %18 = vector.broadcast %cst_11 : f32 to vector<128x128xf32>
    %19 = arith.addf %18, %17 : vector<128x128xf32>
    %20 = arith.mulf %14, %19 : vector<128x128xf32>
    %c0_12 = arith.constant 0 : index
    %c0_13 = arith.constant 0 : index
    %c0_14 = arith.constant 0 : index
    %21 = vector.load %arg6[%c0_12, %c0_13, %c0_14] : memref<2x128x128xbf16, #tpu.memory_space<vmem>>, vector<1x128x128xbf16>
    %22 = vector.shape_cast %21 : vector<1x128x128xbf16> to vector<128x128xbf16>
    %c0_15 = arith.constant 0 : index
    %c0_16 = arith.constant 0 : index
    %c0_17 = arith.constant 0 : index
    %23 = vector.load %arg7[%c0_15, %c0_16, %c0_17] : memref<2x1x128xf32, #tpu.memory_space<vmem>>, vector<1x1x128xf32>
    %24 = vector.shape_cast %23 : vector<1x1x128xf32> to vector<1x128xf32>
    %c0_18 = arith.constant 0 : index
    %c0_19 = arith.constant 0 : index
    %c0_20 = arith.constant 0 : index
    %25 = vector.load %arg8[%c0_18, %c0_19, %c0_20] : memref<2x1x128xf32, #tpu.memory_space<vmem>>, vector<1x1x128xf32>
    %26 = vector.shape_cast %25 : vector<1x1x128xf32> to vector<1x128xf32>
    %c0_21 = arith.constant 0 : index
    %c0_22 = arith.constant 0 : index
    %c0_23 = arith.constant 0 : index
    %27 = vector.load %arg9[%c0_21, %c0_22, %c0_23] : memref<2x1x128xf32, #tpu.memory_space<vmem>>, vector<1x1x128xf32>
    %28 = vector.shape_cast %27 : vector<1x1x128xf32> to vector<1x128xf32>
    %c0_24 = arith.constant 0 : index
    %c0_25 = arith.constant 0 : index
    %c0_26 = arith.constant 0 : index
    %29 = vector.load %arg10[%c0_24, %c0_25, %c0_26] : memref<2x128x2048xbf16, #tpu.memory_space<vmem>>, vector<1x128x2048xbf16>
    %30 = vector.shape_cast %29 : vector<1x128x2048xbf16> to vector<128x2048xbf16>
    %c0_27 = arith.constant 0 : index
    %c0_28 = arith.constant 0 : index
    %c0_29 = arith.constant 0 : index
    %31 = vector.load %arg11[%c0_27, %c0_28, %c0_29] : memref<2x1x2048xf32, #tpu.memory_space<vmem>>, vector<1x1x2048xf32>
    %32 = vector.shape_cast %31 : vector<1x1x2048xf32> to vector<1x2048xf32>
    %c0_30 = arith.constant 0 : index
    %c0_31 = arith.constant 0 : index
    %c0_32 = arith.constant 0 : index
    %33 = vector.load %arg12[%c0_30, %c0_31, %c0_32] : memref<2x2048x128xbf16, #tpu.memory_space<vmem>>, vector<1x2048x128xbf16>
    %34 = vector.shape_cast %33 : vector<1x2048x128xbf16> to vector<2048x128xbf16>
    %c0_33 = arith.constant 0 : index
    %c0_34 = arith.constant 0 : index
    %c0_35 = arith.constant 0 : index
    %35 = vector.load %arg13[%c0_33, %c0_34, %c0_35] : memref<2x1x128xf32, #tpu.memory_space<vmem>>, vector<1x1x128xf32>
    %36 = vector.shape_cast %35 : vector<1x1x128xf32> to vector<1x128xf32>
    %c0_36 = arith.constant 0 : index
    %c0_37 = arith.constant 0 : index
    %c0_38 = arith.constant 0 : index
    %37 = vector.load %arg14[%c0_36, %c0_37, %c0_38] : memref<2x1x128xf32, #tpu.memory_space<vmem>>, vector<1x1x128xf32>
    %38 = vector.shape_cast %37 : vector<1x1x128xf32> to vector<1x128xf32>
    %c0_39 = arith.constant 0 : index
    %c0_40 = arith.constant 0 : index
    %c0_41 = arith.constant 0 : index
    %39 = vector.load %arg15[%c0_39, %c0_40, %c0_41] : memref<2x1x128xf32, #tpu.memory_space<vmem>>, vector<1x1x128xf32>
    %40 = vector.shape_cast %39 : vector<1x1x128xf32> to vector<1x128xf32>
    %41 = arith.truncf %20 : vector<128x128xf32> to vector<128x128xbf16>
    %cst_42 = arith.constant dense<0.000000e+00> : vector<128x128xf32>
    %42 = tpu.matmul %41, %22, %cst_42 {dimension_numbers = #tpu.dot_dimension_numbers<[1], [0], [0], [1], [0, 0, 1, 1], [], []>} : vector<128x128xbf16>, vector<128x128xbf16>, vector<128x128xf32> -> vector<128x128xf32>
    %43 = vector.broadcast %24 : vector<1x128xf32> to vector<128x128xf32>
    %44 = arith.addf %42, %43 : vector<128x128xf32>
    %45 = arith.addf %20, %44 : vector<128x128xf32>
    %cst_43 = arith.constant dense<0.000000e+00> : vector<128xf32>
    %46 = vector.multi_reduction <add>, %45, %cst_43 [1] : vector<128x128xf32> to vector<128xf32>
    %47 = vector.shape_cast %46 : vector<128xf32> to vector<128x1xf32>
    %cst_44 = arith.constant 1.280000e+02 : f32
    %48 = vector.broadcast %cst_44 : f32 to vector<128x1xf32>
    %49 = arith.divf %47, %48 : vector<128x1xf32>
    %50 = vector.broadcast %49 : vector<128x1xf32> to vector<128x128xf32>
    %51 = arith.subf %45, %50 : vector<128x128xf32>
    %52 = arith.mulf %51, %51 : vector<128x128xf32>
    %cst_45 = arith.constant dense<0.000000e+00> : vector<128xf32>
    %53 = vector.multi_reduction <add>, %52, %cst_45 [1] : vector<128x128xf32> to vector<128xf32>
    %54 = vector.shape_cast %53 : vector<128xf32> to vector<128x1xf32>
    %cst_46 = arith.constant 1.280000e+02 : f32
    %55 = vector.broadcast %cst_46 : f32 to vector<128x1xf32>
    %56 = arith.divf %54, %55 : vector<128x1xf32>
    %cst_47 = arith.constant 9.99999974E-6 : f32
    %57 = vector.broadcast %cst_47 : f32 to vector<128x1xf32>
    %58 = arith.addf %56, %57 : vector<128x1xf32>
    %59 = math.rsqrt %58 : vector<128x1xf32>
    %60 = vector.broadcast %59 : vector<128x1xf32> to vector<128x128xf32>
    %61 = arith.mulf %51, %60 : vector<128x128xf32>
    %62 = vector.broadcast %26 : vector<1x128xf32> to vector<128x128xf32>
    %63 = arith.mulf %61, %62 : vector<128x128xf32>
    %64 = vector.broadcast %28 : vector<1x128xf32> to vector<128x128xf32>
    %65 = arith.addf %63, %64 : vector<128x128xf32>
    %66 = arith.truncf %65 : vector<128x128xf32> to vector<128x128xbf16>
    %cst_48 = arith.constant dense<0.000000e+00> : vector<128x2048xf32>
    %67 = tpu.matmul %66, %30, %cst_48 {dimension_numbers = #tpu.dot_dimension_numbers<[1], [0], [0], [1], [0, 0, 1, 1], [], []>} : vector<128x128xbf16>, vector<128x2048xbf16>, vector<128x2048xf32> -> vector<128x2048xf32>
    %68 = vector.broadcast %32 : vector<1x2048xf32> to vector<128x2048xf32>
    %69 = arith.addf %67, %68 : vector<128x2048xf32>
    %cst_49 = arith.constant 0.000000e+00 : f32
    %70 = vector.broadcast %cst_49 : f32 to vector<128x2048xf32>
    %71 = arith.maximumf %69, %70 : vector<128x2048xf32>
    %72 = arith.truncf %71 : vector<128x2048xf32> to vector<128x2048xbf16>
    %cst_50 = arith.constant dense<0.000000e+00> : vector<128x128xf32>
    %73 = tpu.matmul %72, %34, %cst_50 {dimension_numbers = #tpu.dot_dimension_numbers<[1], [0], [0], [1], [0, 0, 1, 1], [], []>} : vector<128x2048xbf16>, vector<2048x128xbf16>, vector<128x128xf32> -> vector<128x128xf32>
    %74 = vector.broadcast %36 : vector<1x128xf32> to vector<128x128xf32>
    %75 = arith.addf %73, %74 : vector<128x128xf32>
    %76 = arith.addf %65, %75 : vector<128x128xf32>
    %cst_51 = arith.constant dense<0.000000e+00> : vector<128xf32>
    %77 = vector.multi_reduction <add>, %76, %cst_51 [1] : vector<128x128xf32> to vector<128xf32>
    %78 = vector.shape_cast %77 : vector<128xf32> to vector<128x1xf32>
    %cst_52 = arith.constant 1.280000e+02 : f32
    %79 = vector.broadcast %cst_52 : f32 to vector<128x1xf32>
    %80 = arith.divf %78, %79 : vector<128x1xf32>
    %81 = vector.broadcast %80 : vector<128x1xf32> to vector<128x128xf32>
    %82 = arith.subf %76, %81 : vector<128x128xf32>
    %83 = arith.mulf %82, %82 : vector<128x128xf32>
    %cst_53 = arith.constant dense<0.000000e+00> : vector<128xf32>
    %84 = vector.multi_reduction <add>, %83, %cst_53 [1] : vector<128x128xf32> to vector<128xf32>
    %85 = vector.shape_cast %84 : vector<128xf32> to vector<128x1xf32>
    %cst_54 = arith.constant 1.280000e+02 : f32
    %86 = vector.broadcast %cst_54 : f32 to vector<128x1xf32>
    %87 = arith.divf %85, %86 : vector<128x1xf32>
    %cst_55 = arith.constant 9.99999974E-6 : f32
    %88 = vector.broadcast %cst_55 : f32 to vector<128x1xf32>
    %89 = arith.addf %87, %88 : vector<128x1xf32>
    %90 = math.rsqrt %89 : vector<128x1xf32>
    %91 = vector.broadcast %90 : vector<128x1xf32> to vector<128x128xf32>
    %92 = arith.mulf %82, %91 : vector<128x128xf32>
    %93 = vector.broadcast %38 : vector<1x128xf32> to vector<128x128xf32>
    %94 = arith.mulf %92, %93 : vector<128x128xf32>
    %95 = vector.broadcast %40 : vector<1x128xf32> to vector<128x128xf32>
    %96 = arith.addf %94, %95 : vector<128x128xf32>
    %c1 = arith.constant 1 : index
    %c0_56 = arith.constant 0 : index
    %c0_57 = arith.constant 0 : index
    %97 = vector.load %arg6[%c1, %c0_56, %c0_57] : memref<2x128x128xbf16, #tpu.memory_space<vmem>>, vector<1x128x128xbf16>
    %98 = vector.shape_cast %97 : vector<1x128x128xbf16> to vector<128x128xbf16>
    %c1_58 = arith.constant 1 : index
    %c0_59 = arith.constant 0 : index
    %c0_60 = arith.constant 0 : index
    %99 = vector.load %arg7[%c1_58, %c0_59, %c0_60] : memref<2x1x128xf32, #tpu.memory_space<vmem>>, vector<1x1x128xf32>
    %100 = vector.shape_cast %99 : vector<1x1x128xf32> to vector<1x128xf32>
    %c1_61 = arith.constant 1 : index
    %c0_62 = arith.constant 0 : index
    %c0_63 = arith.constant 0 : index
    %101 = vector.load %arg8[%c1_61, %c0_62, %c0_63] : memref<2x1x128xf32, #tpu.memory_space<vmem>>, vector<1x1x128xf32>
    %102 = vector.shape_cast %101 : vector<1x1x128xf32> to vector<1x128xf32>
    %c1_64 = arith.constant 1 : index
    %c0_65 = arith.constant 0 : index
    %c0_66 = arith.constant 0 : index
    %103 = vector.load %arg9[%c1_64, %c0_65, %c0_66] : memref<2x1x128xf32, #tpu.memory_space<vmem>>, vector<1x1x128xf32>
    %104 = vector.shape_cast %103 : vector<1x1x128xf32> to vector<1x128xf32>
    %c1_67 = arith.constant 1 : index
    %c0_68 = arith.constant 0 : index
    %c0_69 = arith.constant 0 : index
    %105 = vector.load %arg10[%c1_67, %c0_68, %c0_69] : memref<2x128x2048xbf16, #tpu.memory_space<vmem>>, vector<1x128x2048xbf16>
    %106 = vector.shape_cast %105 : vector<1x128x2048xbf16> to vector<128x2048xbf16>
    %c1_70 = arith.constant 1 : index
    %c0_71 = arith.constant 0 : index
    %c0_72 = arith.constant 0 : index
    %107 = vector.load %arg11[%c1_70, %c0_71, %c0_72] : memref<2x1x2048xf32, #tpu.memory_space<vmem>>, vector<1x1x2048xf32>
    %108 = vector.shape_cast %107 : vector<1x1x2048xf32> to vector<1x2048xf32>
    %c1_73 = arith.constant 1 : index
    %c0_74 = arith.constant 0 : index
    %c0_75 = arith.constant 0 : index
    %109 = vector.load %arg12[%c1_73, %c0_74, %c0_75] : memref<2x2048x128xbf16, #tpu.memory_space<vmem>>, vector<1x2048x128xbf16>
    %110 = vector.shape_cast %109 : vector<1x2048x128xbf16> to vector<2048x128xbf16>
    %c1_76 = arith.constant 1 : index
    %c0_77 = arith.constant 0 : index
    %c0_78 = arith.constant 0 : index
    %111 = vector.load %arg13[%c1_76, %c0_77, %c0_78] : memref<2x1x128xf32, #tpu.memory_space<vmem>>, vector<1x1x128xf32>
    %112 = vector.shape_cast %111 : vector<1x1x128xf32> to vector<1x128xf32>
    %c1_79 = arith.constant 1 : index
    %c0_80 = arith.constant 0 : index
    %c0_81 = arith.constant 0 : index
    %113 = vector.load %arg14[%c1_79, %c0_80, %c0_81] : memref<2x1x128xf32, #tpu.memory_space<vmem>>, vector<1x1x128xf32>
    %114 = vector.shape_cast %113 : vector<1x1x128xf32> to vector<1x128xf32>
    %c1_82 = arith.constant 1 : index
    %c0_83 = arith.constant 0 : index
    %c0_84 = arith.constant 0 : index
    %115 = vector.load %arg15[%c1_82, %c0_83, %c0_84] : memref<2x1x128xf32, #tpu.memory_space<vmem>>, vector<1x1x128xf32>
    %116 = vector.shape_cast %115 : vector<1x1x128xf32> to vector<1x128xf32>
    %117 = arith.truncf %96 : vector<128x128xf32> to vector<128x128xbf16>
    %cst_85 = arith.constant dense<0.000000e+00> : vector<128x128xf32>
    %118 = tpu.matmul %117, %98, %cst_85 {dimension_numbers = #tpu.dot_dimension_numbers<[1], [0], [0], [1], [0, 0, 1, 1], [], []>} : vector<128x128xbf16>, vector<128x128xbf16>, vector<128x128xf32> -> vector<128x128xf32>
    %119 = vector.broadcast %100 : vector<1x128xf32> to vector<128x128xf32>
    %120 = arith.addf %118, %119 : vector<128x128xf32>
    %121 = arith.addf %96, %120 : vector<128x128xf32>
    %cst_86 = arith.constant dense<0.000000e+00> : vector<128xf32>
    %122 = vector.multi_reduction <add>, %121, %cst_86 [1] : vector<128x128xf32> to vector<128xf32>
    %123 = vector.shape_cast %122 : vector<128xf32> to vector<128x1xf32>
    %cst_87 = arith.constant 1.280000e+02 : f32
    %124 = vector.broadcast %cst_87 : f32 to vector<128x1xf32>
    %125 = arith.divf %123, %124 : vector<128x1xf32>
    %126 = vector.broadcast %125 : vector<128x1xf32> to vector<128x128xf32>
    %127 = arith.subf %121, %126 : vector<128x128xf32>
    %128 = arith.mulf %127, %127 : vector<128x128xf32>
    %cst_88 = arith.constant dense<0.000000e+00> : vector<128xf32>
    %129 = vector.multi_reduction <add>, %128, %cst_88 [1] : vector<128x128xf32> to vector<128xf32>
    %130 = vector.shape_cast %129 : vector<128xf32> to vector<128x1xf32>
    %cst_89 = arith.constant 1.280000e+02 : f32
    %131 = vector.broadcast %cst_89 : f32 to vector<128x1xf32>
    %132 = arith.divf %130, %131 : vector<128x1xf32>
    %cst_90 = arith.constant 9.99999974E-6 : f32
    %133 = vector.broadcast %cst_90 : f32 to vector<128x1xf32>
    %134 = arith.addf %132, %133 : vector<128x1xf32>
    %135 = math.rsqrt %134 : vector<128x1xf32>
    %136 = vector.broadcast %135 : vector<128x1xf32> to vector<128x128xf32>
    %137 = arith.mulf %127, %136 : vector<128x128xf32>
    %138 = vector.broadcast %102 : vector<1x128xf32> to vector<128x128xf32>
    %139 = arith.mulf %137, %138 : vector<128x128xf32>
    %140 = vector.broadcast %104 : vector<1x128xf32> to vector<128x128xf32>
    %141 = arith.addf %139, %140 : vector<128x128xf32>
    %142 = arith.truncf %141 : vector<128x128xf32> to vector<128x128xbf16>
    %cst_91 = arith.constant dense<0.000000e+00> : vector<128x2048xf32>
    %143 = tpu.matmul %142, %106, %cst_91 {dimension_numbers = #tpu.dot_dimension_numbers<[1], [0], [0], [1], [0, 0, 1, 1], [], []>} : vector<128x128xbf16>, vector<128x2048xbf16>, vector<128x2048xf32> -> vector<128x2048xf32>
    %144 = vector.broadcast %108 : vector<1x2048xf32> to vector<128x2048xf32>
    %145 = arith.addf %143, %144 : vector<128x2048xf32>
    %cst_92 = arith.constant 0.000000e+00 : f32
    %146 = vector.broadcast %cst_92 : f32 to vector<128x2048xf32>
    %147 = arith.maximumf %145, %146 : vector<128x2048xf32>
    %148 = arith.truncf %147 : vector<128x2048xf32> to vector<128x2048xbf16>
    %cst_93 = arith.constant dense<0.000000e+00> : vector<128x128xf32>
    %149 = tpu.matmul %148, %110, %cst_93 {dimension_numbers = #tpu.dot_dimension_numbers<[1], [0], [0], [1], [0, 0, 1, 1], [], []>} : vector<128x2048xbf16>, vector<2048x128xbf16>, vector<128x128xf32> -> vector<128x128xf32>
    %150 = vector.broadcast %112 : vector<1x128xf32> to vector<128x128xf32>
    %151 = arith.addf %149, %150 : vector<128x128xf32>
    %152 = arith.addf %141, %151 : vector<128x128xf32>
    %cst_94 = arith.constant dense<0.000000e+00> : vector<128xf32>
    %153 = vector.multi_reduction <add>, %152, %cst_94 [1] : vector<128x128xf32> to vector<128xf32>
    %154 = vector.shape_cast %153 : vector<128xf32> to vector<128x1xf32>
    %cst_95 = arith.constant 1.280000e+02 : f32
    %155 = vector.broadcast %cst_95 : f32 to vector<128x1xf32>
    %156 = arith.divf %154, %155 : vector<128x1xf32>
    %157 = vector.broadcast %156 : vector<128x1xf32> to vector<128x128xf32>
    %158 = arith.subf %152, %157 : vector<128x128xf32>
    %159 = arith.mulf %158, %158 : vector<128x128xf32>
    %cst_96 = arith.constant dense<0.000000e+00> : vector<128xf32>
    %160 = vector.multi_reduction <add>, %159, %cst_96 [1] : vector<128x128xf32> to vector<128xf32>
    %161 = vector.shape_cast %160 : vector<128xf32> to vector<128x1xf32>
    %cst_97 = arith.constant 1.280000e+02 : f32
    %162 = vector.broadcast %cst_97 : f32 to vector<128x1xf32>
    %163 = arith.divf %161, %162 : vector<128x1xf32>
    %cst_98 = arith.constant 9.99999974E-6 : f32
    %164 = vector.broadcast %cst_98 : f32 to vector<128x1xf32>
    %165 = arith.addf %163, %164 : vector<128x1xf32>
    %166 = math.rsqrt %165 : vector<128x1xf32>
    %167 = vector.broadcast %166 : vector<128x1xf32> to vector<128x128xf32>
    %168 = arith.mulf %158, %167 : vector<128x128xf32>
    %169 = vector.broadcast %114 : vector<1x128xf32> to vector<128x128xf32>
    %170 = arith.mulf %168, %169 : vector<128x128xf32>
    %171 = vector.broadcast %116 : vector<1x128xf32> to vector<128x128xf32>
    %172 = arith.addf %170, %171 : vector<128x128xf32>
    %c0_99 = arith.constant 0 : index
    %c0_100 = arith.constant 0 : index
    %173 = vector.load %arg16[%c0_99, %c0_100] : memref<128x128xf32, #tpu.memory_space<vmem>>, vector<128x128xf32>
    tpu.vector_store %arg16[%c0_99, %c0_100], %172 {strides = array<i32>} : memref<128x128xf32, #tpu.memory_space<vmem>>, vector<128x128xf32>,
    return
  }
  func.func @transform_0(%arg0: i32) -> (i32, i32) {
    %c0_i32 = arith.constant 0 : i32
    %c0_i32_0 = arith.constant 0 : i32
    %c0_i32_1 = arith.constant 0 : i32
    return %c0_i32, %c0_i32_0 : i32, i32
  }
  func.func @transform_1(%arg0: i32) -> (i32, i32) {
    %c0_i32 = arith.constant 0 : i32
    %c0_i32_0 = arith.constant 0 : i32
    %c0_i32_1 = arith.constant 0 : i32
    return %c0_i32, %c0_i32_0 : i32, i32
  }
  func.func @transform_2(%arg0: i32) -> (i32, i32) {
    %c0_i32 = arith.constant 0 : i32
    %c0_i32_0 = arith.constant 0 : i32
    return %arg0, %c0_i32 : i32, i32
  }
  func.func @transform_3(%arg0: i32) -> (i32, i32) {
    %c0_i32 = arith.constant 0 : i32
    %c0_i32_0 = arith.constant 0 : i32
    %c0_i32_1 = arith.constant 0 : i32
    return %c0_i32, %c0_i32_0 : i32, i32
  }
  func.func @transform_4(%arg0: i32) -> (i32, i32) {
    %c0_i32 = arith.constant 0 : i32
    %c0_i32_0 = arith.constant 0 : i32
    %c0_i32_1 = arith.constant 0 : i32
    return %c0_i32, %c0_i32_0 : i32, i32
  }
  func.func @transform_5(%arg0: i32) -> (i32, i32, i32) {
    %c0_i32 = arith.constant 0 : i32
    %c0_i32_0 = arith.constant 0 : i32
    %c0_i32_1 = arith.constant 0 : i32
    %c0_i32_2 = arith.constant 0 : i32
    return %c0_i32, %c0_i32_0, %c0_i32_1 : i32, i32, i32
  }
  func.func @transform_6(%arg0: i32) -> (i32, i32, i32) {
    %c0_i32 = arith.constant 0 : i32
    %c0_i32_0 = arith.constant 0 : i32
    %c0_i32_1 = arith.constant 0 : i32
    %c0_i32_2 = arith.constant 0 : i32
    return %c0_i32, %c0_i32_0, %c0_i32_1 : i32, i32, i32
  }
  func.func @transform_7(%arg0: i32) -> (i32, i32, i32) {
    %c0_i32 = arith.constant 0 : i32
    %c0_i32_0 = arith.constant 0 : i32
    %c0_i32_1 = arith.constant 0 : i32
    %c0_i32_2 = arith.constant 0 : i32
    return %c0_i32, %c0_i32_0, %c0_i32_1 : i32, i32, i32
  }
  func.func @transform_8(%arg0: i32) -> (i32, i32, i32) {
    %c0_i32 = arith.constant 0 : i32
    %c0_i32_0 = arith.constant 0 : i32
    %c0_i32_1 = arith.constant 0 : i32
    %c0_i32_2 = arith.constant 0 : i32
    return %c0_i32, %c0_i32_0, %c0_i32_1 : i32, i32, i32
  }
  func.func @transform_9(%arg0: i32) -> (i32, i32, i32) {
    %c0_i32 = arith.constant 0 : i32
    %c0_i32_0 = arith.constant 0 : i32
    %c0_i32_1 = arith.constant 0 : i32
    %c0_i32_2 = arith.constant 0 : i32
    return %c0_i32, %c0_i32_0, %c0_i32_1 : i32, i32, i32
  }
  func.func @transform_10(%arg0: i32) -> (i32, i32, i32) {
    %c0_i32 = arith.constant 0 : i32
    %c0_i32_0 = arith.constant 0 : i32
    %c0_i32_1 = arith.constant 0 : i32
    %c0_i32_2 = arith.constant 0 : i32
    return %c0_i32, %c0_i32_0, %c0_i32_1 : i32, i32, i32
  }
  func.func @transform_11(%arg0: i32) -> (i32, i32, i32) {
    %c0_i32 = arith.constant 0 : i32
    %c0_i32_0 = arith.constant 0 : i32
    %c0_i32_1 = arith.constant 0 : i32
    %c0_i32_2 = arith.constant 0 : i32
    return %c0_i32, %c0_i32_0, %c0_i32_1 : i32, i32, i32
  }
  func.func @transform_12(%arg0: i32) -> (i32, i32, i32) {
    %c0_i32 = arith.constant 0 : i32
    %c0_i32_0 = arith.constant 0 : i32
    %c0_i32_1 = arith.constant 0 : i32
    %c0_i32_2 = arith.constant 0 : i32
    return %c0_i32, %c0_i32_0, %c0_i32_1 : i32, i32, i32
  }
  func.func @transform_13(%arg0: i32) -> (i32, i32, i32) {
    %c0_i32 = arith.constant 0 : i32
    %c0_i32_0 = arith.constant 0 : i32
    %c0_i32_1 = arith.constant 0 : i32
    %c0_i32_2 = arith.constant 0 : i32
    return %c0_i32, %c0_i32_0, %c0_i32_1 : i32, i32, i32
  }
  func.func @transform_14(%arg0: i32) -> (i32, i32, i32) {
    %c0_i32 = arith.constant 0 : i32
    %c0_i32_0 = arith.constant 0 : i32
    %c0_i32_1 = arith.constant 0 : i32
    %c0_i32_2 = arith.constant 0 : i32
    return %c0_i32, %c0_i32_0, %c0_i32_1 : i32, i32, i32
  }
  func.func @transform_15(%arg0: i32) -> (i32, i32) {
    %c0_i32 = arith.constant 0 : i32
    %c0_i32_0 = arith.constant 0 : i32
    return %arg0, %c0_i32 : i32, i32
  }
}

</mosaic_0001>

<bundles_post_ra>
// kernel: adapter_forward.3
= control target key start
LH: loop header
LB: loop body
LE: loop exit
PB: predicated region body
PF: predicated region fallthrough
CT: control target
= control target key end

     0   :  { %10 = vsyncpa [#allocation3], 0  ;;  %s1177_s0 = inlined_call_operand.vmem [shape: f32[1,128], index: 0, kind: input, shape index: {}]   ;;  %s1178_s1 = inlined_call_operand.vmem [shape: f32[1,128], index: 1, kind: input, shape index: {}]   ;;  %s1179_s2 = inlined_call_operand.vmem [shape: f32[256,128], index: 2, kind: input, shape index: {}]   ;;  %s1180_s3 = inlined_call_operand.vmem [shape: bf16[128,128], index: 3, kind: input, shape index: {}]   ;;  %s1181_s4 = inlined_call_operand.vmem [shape: f32[1,128], index: 4, kind: input, shape index: {}]   ;;  %s1182_s5 = inlined_call_operand.hbm [shape: f32[256,128], index: 5, kind: output, shape index: {}]  }
   0x1   :  { %12 = vsyncpa [#allocation3 + $0x1], 0  ;;  %s903_s18 = smov 0   ;;  %s905_s19 = smov 0  }
   0x2   :  { %s907_s20 = smov 0   ;;  %s909_s21 = smov 0  }
   0x3 LB: > { %s924_s22 = sadd.s32 4294967295, %s868_s21   ;;  %s637_s23 = sadd.s32 4294967294, %s868_s21   ;;  %s868_s21 = sphi %s909_s21, %s1188_s21   ;;  %s864_s20 = sphi %s907_s20, %s1187_s20   ;;  %s860_s19 = sphi %s905_s19, %s1186_s19   ;;  %s856_s18 = sphi %s903_s18, %s1185_s18  }
   0x4   : > { %s928_s24 = sadd.s32 1, %s868_s21   ;;  %s135_s25 = sadd.s32 1, %s864_s20 }
   0x5   : > { %s132_s26 = ssub.s32 %s868_s21, %s928_s24  ;;  %p145_p0 = scmp.ne.s32.totalorder %s864_s20, %s860_s19 }
   0x6   : > { %p133_p1 = scmp.eq.s32.totalorder %s132_s26, 0  ;;  %p146_p2 = scmp.eq.s32.totalorder %s924_s22, 1 }
   0x7   : > { %p151_p3 = scmp.ne.s32.totalorder %s860_s19, %s856_s18  ;;  %p152_p4 = scmp.eq.s32.totalorder %s637_s23, 1 }
   0x8   : > { %s939_s27 = scalar_select %p133_p1, %s864_s20, %s135_s25  }
   0x9   : > { %p941_p5 = por %p146_p2, %p145_p0  ;;  %p945_p6 = por %p152_p4, %p151_p3 }
   0xa   : > { %p640_p7 = scmp.ge.s32.totalorder %s868_s21, 1  ;;  %p191_p8 = scmp.lt.s32.totalorder %s868_s21, 3 }
   0xc   : > { %p192_p9 = pnand %p640_p7, %p191_p8 }
   0xd   : > { %v766_v0 = vld [vmem:[%s1180_s3] sm:$0xff] (!%p192_p9)   ;;  %s642_s7 = sshll.u32 (!%p192_p9), %s924_s22, 4  ;;  %v767_v1 = vld [vmem:[%s1180_s3 + $0x8] sm:$0xff] (!%p192_p9)   ;;  %v768_v2 = vld [vmem:[%s1180_s3 + $0x10] sm:$0xff] (!%p192_p9)   ;;  %s216_s16 = sand.u32 (!%p192_p9), 1, %s860_s19  }
   0xe   : > { %195 = sbr.rel (%p192_p9) target bundleno = 307 (0x133), region = 40  ;;  %p220_p10 = scmp.lt.s32.totalorder (!%p192_p9), %s642_s7, 31  ;;  %677 = vmatprep.subr.bf16.mxu0 (!%p192_p9), %v766_v0  ;;  %709 = vmatprep.subr.bf16.mxu1 (!%p192_p9), %v766_v0  ;;  %v769_v3 = vld [vmem:[%s1180_s3 + $0x18] sm:$0xff] (!%p192_p9)   ;;  %v974_v6 = vld [vmem:[%s1177_s0] ss:$0 sm:$0xff] (!%p192_p9)  ;;  %v771_v21 = vld [vmem:[%s1180_s3 + $0x28] sm:$0xff] (!%p192_p9)  }
   0xf   : > { %678 = vmatpush3.bf16.msra.mxu0 (!%p192_p9), %v766_v0  ;;  %717 = vmatpush3.bf16.msra.mxu1 (!%p192_p9), %v766_v0  ;;  %v981_v9 = vld [vmem:[%s1178_s1] ss:$0 sm:$0xff] (!%p192_p9)  ;;  %v772_v22 = vld [vmem:[%s1180_s3 + $0x30] sm:$0xff] (!%p192_p9)   ;;  %v773_v39 = vld [vmem:[%s1180_s3 + $0x38] sm:$0xff] (!%p192_p9)   ;;  %s641_s17 = sshll.u32 (!%p192_p9), %s216_s16, 7  ;;  %s660_s25 = sshll.u32 (!%p192_p9), %s924_s22, 11 }
  0x10   : > { %679 = vmatprep.subr.bf16.mxu0 (!%p192_p9), %v767_v1  ;;  %710 = vmatprep.subr.bf16.mxu1 (!%p192_p9), %v767_v1  ;;  %v770_v16 = vld [vmem:[%s1180_s3 + $0x20] sm:$0xff] (!%p192_p9)   ;;  %s1095_s23 = scalar_lea.vmem (!%p192_p9), [#allocation2], %s641_s17  ;;  %s1136_s22 = scalar_lea.sflag (!%p192_p9), [#allocation3], %s216_s16 }
  0x11   : > { %s575_s26 = sshll.u32 (!%p192_p9), %s1095_s23, 4  ;;  %s870_s9 = smov (!%p192_p9), [#allocation2]   ;;  %s1130_s26 = int_to_ptr.vmem [resolvable:$true] %s575_s26 }
  0x12   : > { %s806_s8 = scalar_lea.vmem (!%p192_p9), %s1130_s26, 2048  ;;  %s810_s10 = sshll.u32 (!%p192_p9), %s870_s9, 4  ;;  %s811_s10 = int_to_ptr.vmem [resolvable:$false] %s810_s10 }
  0x13   : > { %680 = vmatpush3.bf16.msra.mxu0 (!%p192_p9), %v767_v1  ;;  %718 = vmatpush3.bf16.msra.mxu1 (!%p192_p9), %v767_v1  ;;  %p807_p11 = scmp.ne.s32.totalorder (!%p192_p9), %s1130_s26, %s806_s8  ;;  %s812_s11 = scalar_lea.vmem (!%p192_p9), %s811_s10, 4096 }
  0x14   : > { %681 = vmatprep.subr.bf16.mxu0 (!%p192_p9), %v768_v2  ;;  %711 = vmatprep.subr.bf16.mxu1 (!%p192_p9), %v768_v2  ;;  %p813_p0 = scmp.lt.s32.totalorder (!%p192_p9), %s1130_s26, %s811_s10  ;;  %p814_p1 = scmp.lt.s32.totalorder (!%p192_p9), %s812_s11, %s806_s8 }
  0x15   : > { %s1190_s7 = smov (!%p220_p10, %s642_s7), 31  ;;  %p808_p12 = pnand %p807_p11, %p941_p5 }
  0x16   : > { %s643_s12 = sshll.u32 %s1190_s7, 3  ;;  %s1128_s7 = scalar_lea.hbm %s1182_s5, %s660_s25 }
  0x17   : > { %s964_s15 = scalar_lea.vmem %s1179_s2, %s643_s12  ;;  %682 = vmatpush3.bf16.msra.mxu0 %v768_v2  ;;  %719 = vmatpush3.bf16.msra.mxu1 %v768_v2  ;;  %v1042_v2 = vld [vmem:[%s1181_s4] ss:$0 sm:$0xff]  ;;  %p809_p13 = pneg %p808_p12 }
  0x18   : > { %v227_v4 = vld [vmem:[%s964_s15] sm:$0xff]  ;;  %v228_v5 = vld [vmem:[%s964_s15 + $0x8] sm:$0xff]  ;;  %683 = vmatprep.subr.bf16.mxu0 %v769_v3  ;;  %712 = vmatprep.subr.bf16.mxu1 %v769_v3  ;;  %v229_v23 = vld [vmem:[%s964_s15 + $0x10] sm:$0xff]  ;;  %p815_p2 = por %p814_p1, %p813_p0 }
  0x19   : > { %v250_v7 = vmul.f32 %v974_v6, %v227_v4  ;;  %v251_v8 = vmul.f32 %v974_v6, %v228_v5  ;;  %v235_v10 = vld [vmem:[%s964_s15 + $0x40] sm:$0xff]  ;;  %v236_v11 = vld [vmem:[%s964_s15 + $0x48] sm:$0xff]  ;;  %v230_v24 = vld [vmem:[%s964_s15 + $0x18] sm:$0xff]  ;;  %v252_v31 = vmul.f32 %v974_v6, %v229_v23 }
  0x1a   : > { %v258_v12 = vmul.f32 %v974_v6, %v235_v10  ;;  %v259_v13 = vmul.f32 %v974_v6, %v236_v11  ;;  %v237_v25 = vld [vmem:[%s964_s15 + $0x50] sm:$0xff]  ;;  %v238_v26 = vld [vmem:[%s964_s15 + $0x58] sm:$0xff]  ;;  %v231_v27 = vld [vmem:[%s964_s15 + $0x20] sm:$0xff]  ;;  %v253_v32 = vmul.f32 %v974_v6, %v230_v24  ;;  %p816_p3 = pnand %p815_p2, %p809_p13 }
  0x1b   : > { %v273_v14 = vadd.f32 %v981_v9, %v250_v7  ;;  %v274_v15 = vadd.f32 %v981_v9, %v251_v8  ;;  %684 = vmatpush3.bf16.msra.mxu0 %v769_v3  ;;  %720 = vmatpush3.bf16.msra.mxu1 %v769_v3  ;;  %v232_v28 = vld [vmem:[%s964_s15 + $0x28] sm:$0xff]  ;;  %v239_v29 = vld [vmem:[%s964_s15 + $0x60] sm:$0xff]  ;;  %v260_v33 = vmul.f32 %v974_v6, %v237_v25  ;;  %v233_v45 = vld [vmem:[%s964_s15 + $0x30] sm:$0xff] }
  0x1c   : > { %v281_v17 = vadd.f32 %v981_v9, %v258_v12  ;;  %v282_v18 = vadd.f32 %v981_v9, %v259_v13  ;;  %685 = vmatprep.subr.bf16.mxu0 %v770_v16  ;;  %713 = vmatprep.subr.bf16.mxu1 %v770_v16  ;;  %v240_v30 = vld [vmem:[%s964_s15 + $0x68] sm:$0xff]  ;;  %v261_v34 = vmul.f32 %v974_v6, %v238_v26  ;;  %v234_v49 = vld [vmem:[%s964_s15 + $0x38] sm:$0xff]  ;;  %v241_v50 = vld [vmem:[%s964_s15 + $0x70] sm:$0xff] }
  0x1d   : > { %v306_v19 = vpack.c.bf16 %v274_v15, %v273_v14  ;;  %v254_v35 = vmul.f32 %v974_v6, %v231_v27  ;;  %v255_v36 = vmul.f32 %v974_v6, %v232_v28  ;;  %v262_v37 = vmul.f32 %v974_v6, %v239_v29  ;;  %v242_v51 = vld [vmem:[%s964_s15 + $0x78] sm:$0xff] }
  0x1e   : > { %v310_v20 = vpack.c.bf16 %v282_v18, %v281_v17  ;;  %v263_v38 = vmul.f32 %v974_v6, %v240_v30  ;;  %v275_v40 = vadd.f32 %v981_v9, %v252_v31  ;;  %v276_v41 = vadd.f32 %v981_v9, %v253_v32 }
  0x1f   : > { %693 = vmatprep.mubr.bf16.mxu0 %v306_v19  ;;  %686 = vmatpush3.bf16.msra.mxu0 %v770_v16  ;;  %v283_v42 = vadd.f32 %v981_v9, %v260_v33  ;;  %v284_v43 = vadd.f32 %v981_v9, %v261_v34  ;;  %v277_v44 = vadd.f32 %v981_v9, %v254_v35 }
  0x20   : > { %701 = vmatprep.mubr.bf16.mxu1 %v310_v20  ;;  %721 = vmatpush3.bf16.msra.mxu1 %v770_v16  ;;  %v278_v46 = vadd.f32 %v981_v9, %v255_v36  ;;  %v285_v47 = vadd.f32 %v981_v9, %v262_v37  ;;  %v286_v48 = vadd.f32 %v981_v9, %v263_v38 }
  0x21   : > { %687 = vmatprep.subr.bf16.mxu0 %v771_v21  ;;  %714 = vmatprep.subr.bf16.mxu1 %v771_v21  ;;  %v307_v52 = vpack.c.bf16 %v276_v41, %v275_v40  ;;  %v256_v53 = vmul.f32 %v974_v6, %v233_v45  ;;  %v311_v54 = vpack.c.bf16 %v284_v43, %v283_v42 }
  0x22   : > { %v257_v55 = vmul.f32 %v974_v6, %v234_v49  ;;  %v264_v56 = vmul.f32 %v974_v6, %v241_v50  ;;  %v265_v57 = vmul.f32 %v974_v6, %v242_v51  ;;  %v308_v58 = vpack.c.bf16 %v278_v46, %v277_v44 }
  0x23   : > { %688 = vmatpush3.bf16.msra.mxu0 %v771_v21  ;;  %v312_v59 = vpack.c.bf16 %v286_v48, %v285_v47  ;;  %v279_v60 = vadd.f32 %v981_v9, %v256_v53 }
  0x24   : > { %722 = vmatpush3.bf16.msra.mxu1 %v771_v21  ;;  %689 = vmatprep.subr.bf16.mxu0 %v772_v22  ;;  %v280_v61 = vadd.f32 %v981_v9, %v257_v55  ;;  %v287_v62 = vadd.f32 %v981_v9, %v264_v56  ;;  %v288_v63 = vadd.f32 %v981_v9, %v265_v57 }
  0x25   : > { %715 = vmatprep.subr.bf16.mxu1 %v772_v22 }
  0x26   : > { %v309_v0 = vpack.c.bf16 %v280_v61, %v279_v60  ;;  %v313_v1 = vpack.c.bf16 %v288_v63, %v287_v62 }
  0x27   : > { %690 = vmatpush3.bf16.msra.mxu0 %v772_v22 }
  0x28   : > { %723 = vmatpush3.bf16.msra.mxu1 %v772_v22  ;;  %691 = vmatprep.subr.bf16.mxu0 %v773_v39 }
  0x29   : > { %716 = vmatprep.subr.bf16.mxu1 %v773_v39 }
  0x2b   : > { %692 = vmatpush3.bf16.msra.mxu0 %v773_v39 }
  0x2c   : > { %724 = vmatpush3.bf16.msra.mxu1 %v773_v39 }
  0x2e   : > { %694 = vmatmul.mubr.bf16.vlgmr.msra.gmra.mrb[0].mxu0 %v307_v52 }
  0x2f   : > { %702 = vmatmul.mubr.bf16.vlgmr.msra.gmra.mrb[0].mxu1 %v311_v54  ;;  %697 = vmatprep.mubr.bf16.mxu0 %v308_v58 }
  0x30   : > { %705 = vmatprep.mubr.bf16.mxu1 %v312_v59 }
  0x36   : > { %698 = vmatmul.mubr.bf16.gmra.mrb[4].mxu0 %v309_v0 }
  0x37   : > { %706 = vmatmul.mubr.bf16.gmra.mrb[4].mxu1 %v313_v1 }
 0x101   : > { %v695_v3 = vpop.f32.mrb[0].mxu0 }
 0x102   : > { %v703_v4 = vpop.f32.mrb[0].mxu1  ;;  %v411_v5 = vadd.f32 %v695_v3, %v1042_v2  ;;  %v402_v7 = vpop.f32.mrb[1].mxu0 }
 0x103   : > { %v443_v6 = vadd.f32 %v703_v4, %v1042_v2  ;;  %v434_v8 = vpop.f32.mrb[1].mxu1  ;;  %v403_v9 = vadd.f32 %v1042_v2, %v402_v7  ;;  %v696_v11 = vpop.f32.mrb[2].mxu0 }
 0x104   : > { %v435_v10 = vadd.f32 %v1042_v2, %v434_v8  ;;  %v704_v12 = vpop.f32.mrb[2].mxu1  ;;  %v483_v13 = vmul.f32 0.70710677, %v411_v5  ;;  %v414_v17 = vadd.f32 %v696_v11, %v1042_v2  ;;  %v405_v19 = vpop.f32.mrb[3].mxu0  ;;  %v467_v47 = vmul.f32 0.5, %v411_v5 }
 0x105   : > { %v491_v14 = vmul.f32 0.70710677, %v443_v6  ;;  %v481_v15 = vmul.f32 0.70710677, %v403_v9  ;;  %v1050_v18 = vadd.f32 %v704_v12, %v1042_v2  ;;  %v437_v20 = vpop.f32.mrb[3].mxu1  ;;  %v1053_v21 = vadd.f32 %v1042_v2, %v405_v19 }
 0x106   : > { %v489_v16 = vmul.f32 0.70710677, %v435_v10  ;;  %774 = verf.f32 %v483_v13  ;;  %v1056_v22 = vadd.f32 %v1042_v2, %v437_v20  ;;  %v484_v23 = vmul.f32 0.70710677, %v414_v17 }
 0x107   : > { %776 = verf.f32 %v491_v14  ;;  %v492_v24 = vmul.f32 0.70710677, %v1050_v18  ;;  %v482_v25 = vmul.f32 0.70710677, %v1053_v21  ;;  %v475_v48 = vmul.f32 0.5, %v443_v6 }
 0x108   : > { %778 = verf.f32 %v481_v15  ;;  %v490_v27 = vmul.f32 0.70710677, %v1056_v22  ;;  %v465_v55 = vmul.f32 0.5, %v403_v9  ;;  %v473_v56 = vmul.f32 0.5, %v435_v10 }
 0x109   : > { %780 = verf.f32 %v489_v16  ;;  %v699_v26 = vpop.f32.mrb[4].mxu0  ;;  %v468_v1 = vmul.f32 0.5, %v414_v17  ;;  %v476_v8 = vmul.f32 0.5, %v1050_v18  ;;  %v466_v12 = vmul.f32 0.5, %v1053_v21 }
 0x10a   : > { %782 = verf.f32 %v484_v23  ;;  %v1062_v28 = vadd.f32 %v699_v26, %v1042_v2  ;;  %v707_v29 = vpop.f32.mrb[4].mxu1  ;;  %v418_v30 = vpop.f32.mrb[5].mxu0  ;;  %v474_v16 = vmul.f32 0.5, %v1056_v22 }
 0x10b   : > { %784 = verf.f32 %v492_v24  ;;  %v1065_v31 = vadd.f32 %v707_v29, %v1042_v2  ;;  %v1068_v32 = vadd.f32 %v1042_v2, %v418_v30  ;;  %v450_v33 = vpop.f32.mrb[5].mxu1  ;;  %v700_v34 = vpop.f32.mrb[6].mxu0 }
 0x10c   : > { %786 = verf.f32 %v482_v25  ;;  %v487_v35 = vmul.f32 0.70710677, %v1062_v28  ;;  %v1073_v36 = vadd.f32 %v1042_v2, %v450_v33  ;;  %v708_v37 = vpop.f32.mrb[6].mxu1  ;;  %v421_v38 = vpop.f32.mrb[7].mxu0  ;;  %v1081_v43 = vadd.f32 %v700_v34, %v1042_v2 }
 0x10d   : > { %788 = verf.f32 %v490_v27  ;;  %v495_v39 = vmul.f32 0.70710677, %v1065_v31  ;;  %v453_v40 = vpop.f32.mrb[7].mxu1  ;;  %v485_v41 = vmul.f32 0.70710677, %v1068_v32  ;;  %v1084_v44 = vadd.f32 %v708_v37, %v1042_v2 }
 0x10e   : > { %790 = verf.f32 %v487_v35  ;;  %v493_v42 = vmul.f32 0.70710677, %v1073_v36  ;;  %v1087_v45 = vadd.f32 %v1042_v2, %v421_v38  ;;  %v488_v51 = vmul.f32 0.70710677, %v1081_v43 }
 0x10f   : > { %792 = verf.f32 %v495_v39  ;;  %v1091_v52 = vadd.f32 %v1042_v2, %v453_v40  ;;  %v496_v57 = vmul.f32 0.70710677, %v1084_v44  ;;  %v471_v20 = vmul.f32 0.5, %v1062_v28 }
 0x110   : > { %v775_v46 = vpop.eup %774  ;;  %794 = verf.f32 %v485_v41  ;;  %v486_v61 = vmul.f32 0.70710677, %v1087_v45  ;;  %v479_v25 = vmul.f32 0.5, %v1065_v31  ;;  %v469_v22 = vmul.f32 0.5, %v1068_v32 }
 0x111   : > { %v777_v49 = vpop.eup %776  ;;  %v515_v50 = vadd.f32 1.0, %v775_v46  ;;  %796 = verf.f32 %v493_v42  ;;  %v494_v5 = vmul.f32 0.70710677, %v1091_v52  ;;  %v477_v28 = vmul.f32 0.5, %v1073_v36 }
 0x112   : > { %v779_v53 = vpop.eup %778  ;;  %v523_v54 = vadd.f32 1.0, %v777_v49  ;;  %798 = verf.f32 %v488_v51  ;;  %v472_v39 = vmul.f32 0.5, %v1081_v43  ;;  %v480_v41 = vmul.f32 0.5, %v1084_v44 }
 0x113   : > { %v781_v58 = vpop.eup %780  ;;  %v531_v59 = vmul.f32 %v515_v50, %v467_v47  ;;  %v513_v60 = vadd.f32 1.0, %v779_v53  ;;  %800 = verf.f32 %v496_v57  ;;  %v470_v46 = vmul.f32 0.5, %v1087_v45 }
 0x114   : > { %v783_v62 = vpop.eup %782  ;;  %v539_v63 = vmul.f32 %v523_v54, %v475_v48  ;;  %v521_v0 = vadd.f32 1.0, %v781_v58  ;;  %802 = verf.f32 %v486_v61  ;;  %v478_v50 = vmul.f32 0.5, %v1091_v52 }
 0x115   : > { %v785_v3 = vpop.eup %784  ;;  %547 = vst [vmem:[%s1095_s23 + $0x10] sm:$0xff] %v531_v59  ;;  %v529_v2 = vmul.f32 %v513_v60, %v465_v55  ;;  %v516_v4 = vadd.f32 1.0, %v783_v62  ;;  %804 = verf.f32 %v494_v5 }
 0x116   : > { %v787_v6 = vpop.eup %786  ;;  %555 = vst [vmem:[%s1095_s23 + $0x50] sm:$0xff] %v539_v63  ;;  %v537_v7 = vmul.f32 %v521_v0, %v473_v56  ;;  %v524_v9 = vadd.f32 1.0, %v785_v3 }
 0x117   : > { %v789_v10 = vpop.eup %788  ;;  %545 = vst [vmem:[%s1095_s23] sm:$0xff] %v529_v2  ;;  %v532_v11 = vmul.f32 %v516_v4, %v468_v1  ;;  %v514_v13 = vadd.f32 1.0, %v787_v6 }
 0x118   : > { %v791_v14 = vpop.eup %790  ;;  %553 = vst [vmem:[%s1095_s23 + $0x40] sm:$0xff] %v537_v7  ;;  %v540_v15 = vmul.f32 %v524_v9, %v476_v8  ;;  %v522_v17 = vadd.f32 1.0, %v789_v10 }
 0x119   : > { %v793_v19 = vpop.eup %792  ;;  %548 = vst [vmem:[%s1095_s23 + $0x18] sm:$0xff] %v532_v11  ;;  %v530_v18 = vmul.f32 %v514_v13, %v466_v12  ;;  %v519_v23 = vadd.f32 1.0, %v791_v14 }
 0x11a   : > { %v795_v24 = vpop.eup %794  ;;  %556 = vst [vmem:[%s1095_s23 + $0x58] sm:$0xff] %v540_v15  ;;  %v538_v21 = vmul.f32 %v522_v17, %v474_v16  ;;  %v527_v26 = vadd.f32 1.0, %v793_v19 }
 0x11b   : > { %v797_v27 = vpop.eup %796  ;;  %546 = vst [vmem:[%s1095_s23 + $0x8] sm:$0xff] %v530_v18  ;;  %v535_v29 = vmul.f32 %v519_v23, %v471_v20  ;;  %v517_v30 = vadd.f32 1.0, %v795_v24 }
 0x11c   : > { %554 = vst [vmem:[%s1095_s23 + $0x48] sm:$0xff] %v538_v21  ;;  %v543_v33 = vmul.f32 %v527_v26, %v479_v25  ;;  %v525_v34 = vadd.f32 1.0, %v797_v27  ;;  %v799_v35 = vpop.eup %798 }
 0x11d   : > { %551 = vst [vmem:[%s1095_s23 + $0x30] sm:$0xff] %v535_v29  ;;  %v533_v37 = vmul.f32 %v517_v30, %v469_v22  ;;  %v801_v31 = vpop.eup %800  ;;  %v520_v40 = vadd.f32 1.0, %v799_v35 }
 0x11e   : > { %559 = vst [vmem:[%s1095_s23 + $0x70] sm:$0xff] %v543_v33  ;;  %v541_v38 = vmul.f32 %v525_v34, %v477_v28  ;;  %v803_v32 = vpop.eup %802  ;;  %v528_v42 = vadd.f32 1.0, %v801_v31 }
 0x11f   : > { %549 = vst [vmem:[%s1095_s23 + $0x20] sm:$0xff] %v533_v37  ;;  %v536_v36 = vmul.f32 %v520_v40, %v472_v39  ;;  %v518_v47 = vadd.f32 1.0, %v803_v32  ;;  %v805_v48 = vpop.eup %804 }
 0x120   : > { %557 = vst [vmem:[%s1095_s23 + $0x60] sm:$0xff] %v541_v38  ;;  %v544_v43 = vmul.f32 %v528_v42, %v480_v41  ;;  %v526_v51 = vadd.f32 1.0, %v805_v48 }
 0x121   : > { %552 = vst [vmem:[%s1095_s23 + $0x38] sm:$0xff] %v536_v36  ;;  %v534_v49 = vmul.f32 %v518_v47, %v470_v46 }
 0x122   : > { %560 = vst [vmem:[%s1095_s23 + $0x78] sm:$0xff] %v544_v43  ;;  %v542_v44 = vmul.f32 %v526_v51, %v478_v50 }
 0x123   : > { %550 = vst [vmem:[%s1095_s23 + $0x28] sm:$0xff] %v534_v49 }
 0x124   : > { %558 = vst [vmem:[%s1095_s23 + $0x68] sm:$0xff] %v542_v44 }
 0x125   : > { %819 = shalt.err (!%p816_p3)
}
 0x126   : > { %s820_s12 = scalar_lea.hbm %s1128_s7, 2048  ;;  %s824_s15 = scalar_lea.hbm %s1182_s5, 4096 }
 0x127   : > { %p821_p4 = scmp.ne.s32.totalorder %s1128_s7, %s820_s12  ;;  %p825_p9 = scmp.lt.u32.totalorder %s1128_s7, %s1182_s5 }
 0x128   : > { %p826_p10 = scmp.lt.u32.totalorder %s824_s15, %s820_s12  ;;  %p828_p12 = scmp.lt.u32.totalorder %s820_s12, %s1128_s7 }
 0x129   : > { %p822_p7 = pnand %p821_p4, %p941_p5 }
 0x12a   : > { %p827_p11 = por %p826_p10, %p825_p9 }
 0x12b   : > { %p823_p8 = pneg %p822_p7 }
 0x12c   : > { %p829_p13 = por %p828_p12, %p827_p11 }
 0x12e   : > { %p830_p0 = pnand %p829_p13, %p823_p8 }
 0x130   : > { %833 = shalt.err (!%p830_p0)
}
 0x131   : > { %s871_s23 = smov 128   ;;  %s872_s25 = smov 8  }
 0x132   : > { %725 = dma.vmem_to_hbm [thread:$0]  (%p941_p5), %s1130_s26, 2048, %s1128_s7, %s1136_s22, %s871_s23, %s871_s23, %s872_s25  }
 0x133 PF: > { %p731_p1 = scmp.ge.s32.totalorder %s868_s21, 2  ;;  %s590_s30 = sand.u32 1, %s856_s18  }
 0x134   : > { %s591_s6 = scalar_lea.sflag [#allocation3], %s590_s30 }
 0x135   : > { %p728_p2 = pnand %p731_p1, %p945_p6 }
 0x137   : > { %851 = dma.done.wait (!%p728_p2), %s591_s6, 2048  }
 0x138   : > { %853 = vsyncadd (!%p728_p2), %s591_s6, 4294965248  ;;  %p15_p3 = scmp.ge.s32.totalorder %s928_s24, 4   ;;  %s1185_s18 = smov %s860_s19 }
 0x139   : > { %s1186_s19 = smov %s864_s20  ;;  %s1187_s20 = smov %s939_s27 }
 0x13a   : > { %s1188_s21 = smov %s928_s24  ;;  %17 = sbr.rel (!%p15_p3) target bundleno = 3 (0x3), region = 75 }
 0x141   :  { %596 = vsyncpa [#allocation3], 1 }
 0x142   :  { %598 = vsyncpa [#allocation3 + $0x1], 1 }

// kernel: adapter_forward.2
= control target key start
LH: loop header
LB: loop body
LE: loop exit
PB: predicated region body
PF: predicated region fallthrough
CT: control target
= control target key end

     0   :  { %s16075_s0 = inlined_call_operand.vmem [shape: f32[1,128], index: 0, kind: input, shape index: {}]   ;;  %s16076_s1 = inlined_call_operand.vmem [shape: f32[1,128], index: 1, kind: input, shape index: {}]   ;;  %s16077_s2 = inlined_call_operand.vmem [shape: f32[256,128], index: 2, kind: input, shape index: {}]   ;;  %s16078_s3 = inlined_call_operand.vmem [shape: bf16[128,128], index: 3, kind: input, shape index: {}]   ;;  %s16079_s4 = inlined_call_operand.vmem [shape: f32[1,128], index: 4, kind: input, shape index: {}]   ;;  %s16080_s5 = inlined_call_operand.vmem [shape: bf16[2,128,128], index: 5, kind: input, shape index: {}]   ;;  %s16081_s6 = inlined_call_operand.vmem [shape: f32[2,1,128], index: 6, kind: input, shape index: {}]   ;;  %s16082_s7 = inlined_call_operand.vmem [shape: f32[2,1,128], index: 7, kind: input, shape index: {}]   ;;  %s16083_s8 = inlined_call_operand.vmem [shape: f32[2,1,128], index: 8, kind: input, shape index: {}]   ;;  %s16084_s9 = inlined_call_operand.hbm [shape: bf16[2,128,2048], index: 9, kind: input, shape index: {}]   ;;  %s16085_s10 = inlined_call_operand.vmem [shape: f32[2,1,2048], index: 10, kind: input, shape index: {}]   ;;  %s16086_s11 = inlined_call_operand.hbm [shape: bf16[2,2048,128], index: 11, kind: input, shape index: {}]   ;;  %s16087_s12 = inlined_call_operand.vmem [shape: f32[2,1,128], index: 12, kind: input, shape index: {}]   ;;  %s16088_s13 = inlined_call_operand.vmem [shape: f32[2,1,128], index: 13, kind: input, shape index: {}]   ;;  %s16089_s14 = inlined_call_operand.vmem [shape: f32[2,1,128], index: 14, kind: input, shape index: {}]   ;;  %s16090_s15 = inlined_call_operand.vmem [shape: f32[256,128], index: 15, kind: output, shape index: {}]  }
   0x1   :  { %16113 = sst [smem:[#allocation16_spill]] %s16089_s14 }
   0x2   :  { %16114 = sst [smem:[#allocation17_spill]] %s16090_s15 }
   0x3   :  { %20 = vsyncpa [#allocation3], 0 }
   0x4   :  { %21 = vsyncpa [#allocation5], 0  ;;  %s12571_s18 = smov 0  }
   0x5 LB: > { %s16094_s19 = sadd.s32 4294967295, %s12483_s18   ;;  %p10168_p0 = scmp.ge.s32.totalorder %s12483_s18, 1  ;;  %s12483_s18 = sphi %s12571_s18, %s27_s18  }
   0x6   : > { %p378_p1 = scmp.lt.s32.totalorder %s12483_s18, 3  ;;  %s12485_s20 = smov [#allocation2]  }
   0x7   : > { %s414_s21 = sshll.u32 %s12485_s20, 4  ;;  %p12585_p3 = scmp.eq.s32.totalorder %s16094_s19, 0  ;;  %s415_s21 = int_to_ptr.vmem [resolvable:$true] %s414_s21 }
   0x8   : > { %p12579_p2 = pnand %p10168_p0, %p378_p1  ;;  %s12486_s24 = smov [#allocation4]  }
   0x9   : > { %s16116_s23 = scalar_select %p12585_p3, 1, 0 }
   0xa   : > { %s16115_s22 = scalar_select %p12579_p2, 1, 0 }
   0xb   : > { %p11948_p4 = pneg %p12579_p2  ;;  %s430_s25 = sshll.u32 %s12486_s24, 4  ;;  %s12597_s25 = int_to_ptr.vmem [resolvable:$true] %s430_s25 }
   0xc   : > { %s12413_s29 = scalar_lea.hbm %s16084_s9, 32768 }
   0xd   : > { %p12593_p5 = pnand %p12585_p3, %p11948_p4  ;;  %p12414_p6 = scmp.ne.s32.totalorder %s16084_s9, %s12413_s29 }
   0xe   : > { %p12420_p10 = scmp.lt.u32.totalorder %s12413_s29, %s16084_s9 }
   0xf   : > { %p12415_p7 = pneg %p12593_p5 }
  0x11   : > { %p12416_p8 = pnand %p12415_p7, %p12414_p6 }
  0x13   : > { %p12417_p9 = pneg %p12416_p8 }
  0x15   : > { %p12422_p11 = pnand %p12420_p10, %p12417_p9 }
  0x17   : > { %12425 = shalt.err (!%p12422_p11)
}
  0x18   : > { %s12426_s24 = scalar_lea.vmem %s415_s21, 32768  ;;  %p12434_p1 = scmp.lt.s32.totalorder %s415_s21, %s415_s21 }
  0x19   : > { %p12427_p12 = scmp.ne.s32.totalorder %s415_s21, %s12426_s24  ;;  %p12435_p4 = scmp.lt.s32.totalorder %s12426_s24, %s12426_s24 }
  0x1b   : > { %p12429_p13 = pnand %p12427_p12, %p12415_p7  ;;  %p12436_p3 = por %p12435_p4, %p12434_p1 }
  0x1d   : > { %p12430_p0 = pneg %p12429_p13 }
  0x1f   : > { %p12437_p2 = pnand %p12436_p3, %p12430_p0 }
  0x21   : > { %12440 = shalt.err (!%p12437_p2)
}
  0x22   : > { %s12487_s27 = smov 1024   ;;  %s12488_s28 = smov 64  }
  0x23   : > { %11951 = dma.hbm_to_vmem [thread:$0]  (!%p12593_p5), %s16084_s9, 32768, %s415_s21, [#allocation3], %s12487_s27, %s12487_s27, %s12488_s28  }
  0x24   : > { %s12441_s20 = scalar_lea.hbm %s16086_s11, 32768 }
  0x25   : > { %p12442_p6 = scmp.ne.s32.totalorder %s16086_s11, %s12441_s20  ;;  %p12448_p8 = scmp.lt.u32.totalorder %s12441_s20, %s16086_s11 }
  0x27   : > { %p12444_p2 = pnand %p12442_p6, %p12415_p7 }
  0x29   : > { %p12445_p3 = pneg %p12444_p2 }
  0x2b   : > { %p12450_p9 = pnand %p12448_p8, %p12445_p3 }
  0x2d   : > { %12453 = shalt.err (!%p12450_p9)
}
  0x2e   : > { %s12454_s21 = scalar_lea.vmem %s12597_s25, 32768  ;;  %p12462_p13 = scmp.lt.s32.totalorder %s12597_s25, %s12597_s25 }
  0x2f   : > { %p12455_p10 = scmp.ne.s32.totalorder %s12597_s25, %s12454_s21  ;;  %p12463_p0 = scmp.lt.s32.totalorder %s12454_s21, %s12454_s21 }
  0x31   : > { %p12457_p11 = pnand %p12455_p10, %p12415_p7  ;;  %p12464_p1 = por %p12463_p0, %p12462_p13 }
  0x33   : > { %p12458_p12 = pneg %p12457_p11 }
  0x35   : > { %p12465_p4 = pnand %p12464_p1, %p12458_p12 }
  0x37   : > { %12468 = shalt.err (!%p12465_p4)
}
  0x38   : > { %s12489_s14 = smov 4   ;;  %p16118_p6 = scmp.ne.s32.totalorder %s16115_s22, 0 }
  0x39   : > { %11954 = dma.hbm_to_vmem [thread:$0]  (!%p12593_p5), %s16086_s11, 32768, %s12597_s25, [#allocation5], %s12488_s28, %s12488_s28, %s12489_s14  }
  0x3a   : > { %464 = sbr.rel (%p16118_p6) target bundleno = 3451 (0xd7b), region = 80 }
  0x41   : > { %p16119_p7 = scmp.ne.s32.totalorder %s16116_s23, 0 }
  0x43   : > { %12474 = dma.done.wait (%p16119_p7), [#allocation3], 32768  }
  0x44   : > { %12476 = vsyncadd (%p16119_p7), [#allocation3], 4294934528 }
  0x45   : > { %12478 = dma.done.wait (%p16119_p7), [#allocation5], 32768  }
  0x46   : > { %12480 = vsyncadd (%p16119_p7), [#allocation5], 4294934528  ;;  %s16120_s26 = sadd.s32 4294967295, %s12483_s18   ;;  %v11973_v0 = vld [vmem:[%s16078_s3] sm:$0xff]   ;;  %v11974_v1 = vld [vmem:[%s16078_s3 + $0x8] sm:$0xff]   ;;  %s16136_s29 = sld [smem:[#allocation16_spill]] }
  0x47   : > { %s10175_s27 = sshll.u32 %s16120_s26, 4  ;;  %11828 = vmatprep.subr.bf16.mxu0 %v11973_v0  ;;  %v11975_v2 = vld [vmem:[%s16078_s3 + $0x10] sm:$0xff]   ;;  %v11976_v3 = vld [vmem:[%s16078_s3 + $0x18] sm:$0xff]   ;;  %v12685_v6 = vld [vmem:[%s16075_s0] ss:$0 sm:$0xff]  ;;  %s16153_s14 = sld [smem:[#allocation17_spill]] }
  0x48   : > { %p517_p2 = scmp.lt.s32.totalorder %s10175_s27, 31  ;;  %11829 = vmatpush3.bf16.msra.mxu0 %v11973_v0  ;;  %v12692_v9 = vld [vmem:[%s16076_s1] ss:$0 sm:$0xff]  ;;  %v11978_v14 = vld [vmem:[%s16078_s3 + $0x28] sm:$0xff]   ;;  %v11979_v19 = vld [vmem:[%s16078_s3 + $0x30] sm:$0xff]  }
  0x49   : > { %11830 = vmatprep.subr.bf16.mxu0 %v11974_v1  ;;  %v11977_v12 = vld [vmem:[%s16078_s3 + $0x20] sm:$0xff]   ;;  %v11982_v16 = vld [vmem:[%s16080_s5 + $0x8] sm:$0xff]   ;;  %v11980_v22 = vld [vmem:[%s16078_s3 + $0x38] sm:$0xff]  }
  0x4a   : > { %s16155_s27 = smov (!%p517_p2, %s10175_s27), 31  ;;  %v11981_v15 = vld [vmem:[%s16080_s5] sm:$0xff]  }
  0x4b   : > { %s10176_s30 = sshll.u32 %s16155_s27, 3  ;;  %11860 = vmatprep.subr.bf16.mxu1 %v11981_v15 }
  0x4c   : > { %s12675_s24 = scalar_lea.vmem %s16077_s2, %s10176_s30  ;;  %11831 = vmatpush3.bf16.msra.mxu0 %v11974_v1  ;;  %11861 = vmatpush3.bf16.msra.mxu1 %v11981_v15 }
  0x4d   : > { %11832 = vmatprep.subr.bf16.mxu0 %v11975_v2  ;;  %v529_v4 = vld [vmem:[%s12675_s24] sm:$0xff]  ;;  %v530_v5 = vld [vmem:[%s12675_s24 + $0x8] sm:$0xff]  ;;  %v531_v17 = vld [vmem:[%s12675_s24 + $0x10] sm:$0xff]  ;;  %11862 = vmatprep.subr.bf16.mxu1 %v11982_v16  ;;  %s16009_s15 = scalar_lea.vmem %s16153_s14, %s10176_s30 }
  0x4e   : > { %v552_v7 = vmul.f32 %v12685_v6, %v529_v4  ;;  %v553_v8 = vmul.f32 %v12685_v6, %v530_v5  ;;  %v532_v18 = vld [vmem:[%s12675_s24 + $0x18] sm:$0xff]  ;;  %v533_v20 = vld [vmem:[%s12675_s24 + $0x20] sm:$0xff]  ;;  %v534_v21 = vld [vmem:[%s12675_s24 + $0x28] sm:$0xff]  ;;  %v554_v23 = vmul.f32 %v12685_v6, %v531_v17 }
  0x4f   : > { %v555_v24 = vmul.f32 %v12685_v6, %v532_v18  ;;  %v556_v25 = vmul.f32 %v12685_v6, %v533_v20  ;;  %v557_v26 = vmul.f32 %v12685_v6, %v534_v21  ;;  %v535_v27 = vld [vmem:[%s12675_s24 + $0x30] sm:$0xff]  ;;  %v536_v28 = vld [vmem:[%s12675_s24 + $0x38] sm:$0xff]  ;;  %v537_v31 = vld [vmem:[%s12675_s24 + $0x40] sm:$0xff] }
  0x50   : > { %11833 = vmatpush3.bf16.msra.mxu0 %v11975_v2  ;;  %v575_v10 = vadd.f32 %v12692_v9, %v552_v7  ;;  %v576_v11 = vadd.f32 %v12692_v9, %v553_v8  ;;  %11863 = vmatpush3.bf16.msra.mxu1 %v11982_v16  ;;  %v577_v29 = vadd.f32 %v12692_v9, %v554_v23  ;;  %v538_v32 = vld [vmem:[%s12675_s24 + $0x48] sm:$0xff]  ;;  %v539_v41 = vld [vmem:[%s12675_s24 + $0x50] sm:$0xff]  ;;  %v540_v42 = vld [vmem:[%s12675_s24 + $0x58] sm:$0xff] }
  0x51   : > { %11834 = vmatprep.subr.bf16.mxu0 %v11976_v3  ;;  %v578_v30 = vadd.f32 %v12692_v9, %v555_v24  ;;  %v579_v33 = vadd.f32 %v12692_v9, %v556_v25  ;;  %v580_v34 = vadd.f32 %v12692_v9, %v557_v26  ;;  %v558_v36 = vmul.f32 %v12685_v6, %v535_v27  ;;  %v541_v45 = vld [vmem:[%s12675_s24 + $0x60] sm:$0xff]  ;;  %v542_v46 = vld [vmem:[%s12675_s24 + $0x68] sm:$0xff]  ;;  %v543_v55 = vld [vmem:[%s12675_s24 + $0x70] sm:$0xff] }
  0x52   : > { %v608_v13 = vpack.c.bf16 %v576_v11, %v575_v10  ;;  %v559_v37 = vmul.f32 %v12685_v6, %v536_v28  ;;  %v560_v39 = vmul.f32 %v12685_v6, %v537_v31  ;;  %v561_v40 = vmul.f32 %v12685_v6, %v538_v32  ;;  %v544_v56 = vld [vmem:[%s12675_s24 + $0x78] sm:$0xff]  ;;  %v11983_v4 = vld [vmem:[%s16080_s5 + $0x10] sm:$0xff]   ;;  %v11986_v7 = vld [vmem:[%s16080_s5 + $0x28] sm:$0xff]  }
  0x53   : > { %v609_v35 = vpack.c.bf16 %v578_v30, %v577_v29  ;;  %v610_v38 = vpack.c.bf16 %v580_v34, %v579_v33  ;;  %v581_v43 = vadd.f32 %v12692_v9, %v558_v36  ;;  %v562_v50 = vmul.f32 %v12685_v6, %v539_v41  ;;  %11864 = vmatprep.subr.bf16.mxu1 %v11983_v4  ;;  %v11984_v5 = vld [vmem:[%s16080_s5 + $0x18] sm:$0xff]   ;;  %v11987_v8 = vld [vmem:[%s16080_s5 + $0x30] sm:$0xff]   ;;  %v12777_v10 = vld [vmem:[%s16079_s4] ss:$0 sm:$0xff] }
  0x54   : > { %11835 = vmatpush3.bf16.msra.mxu0 %v11976_v3  ;;  %11844 = vmatprep.mubr.bf16.mxu0 %v608_v13  ;;  %v582_v44 = vadd.f32 %v12692_v9, %v559_v37  ;;  %v583_v47 = vadd.f32 %v12692_v9, %v560_v39  ;;  %v584_v48 = vadd.f32 %v12692_v9, %v561_v40 }
  0x55   : > { %11836 = vmatprep.subr.bf16.mxu0 %v11977_v12  ;;  %v563_v51 = vmul.f32 %v12685_v6, %v540_v42  ;;  %v564_v53 = vmul.f32 %v12685_v6, %v541_v45  ;;  %v565_v54 = vmul.f32 %v12685_v6, %v542_v46  ;;  %v585_v57 = vadd.f32 %v12692_v9, %v562_v50 }
  0x56   : > { %v611_v49 = vpack.c.bf16 %v582_v44, %v581_v43  ;;  %v612_v52 = vpack.c.bf16 %v584_v48, %v583_v47  ;;  %v566_v62 = vmul.f32 %v12685_v6, %v543_v55  ;;  %v567_v63 = vmul.f32 %v12685_v6, %v544_v56  ;;  %11865 = vmatpush3.bf16.msra.mxu1 %v11983_v4  ;;  %v11985_v6 = vld [vmem:[%s16080_s5 + $0x20] sm:$0xff]  }
  0x57   : > { %v586_v58 = vadd.f32 %v12692_v9, %v563_v51  ;;  %v587_v59 = vadd.f32 %v12692_v9, %v564_v53  ;;  %v588_v60 = vadd.f32 %v12692_v9, %v565_v54  ;;  %11866 = vmatprep.subr.bf16.mxu1 %v11984_v5 }
  0x58   : > { %11837 = vmatpush3.bf16.msra.mxu0 %v11977_v12  ;;  %v589_v1 = vadd.f32 %v12692_v9, %v566_v62  ;;  %v590_v2 = vadd.f32 %v12692_v9, %v567_v63  ;;  %v11988_v9 = vld [vmem:[%s16080_s5 + $0x38] sm:$0xff]  }
  0x59   : > { %11838 = vmatprep.subr.bf16.mxu0 %v11978_v14  ;;  %v613_v61 = vpack.c.bf16 %v586_v58, %v585_v57  ;;  %v614_v0 = vpack.c.bf16 %v588_v60, %v587_v59 }
  0x5a   : > { %v615_v3 = vpack.c.bf16 %v590_v2, %v589_v1  ;;  %11867 = vmatpush3.bf16.msra.mxu1 %v11984_v5 }
  0x5b   : > { %11868 = vmatprep.subr.bf16.mxu1 %v11985_v6 }
  0x5c   : > { %11839 = vmatpush3.bf16.msra.mxu0 %v11978_v14 }
  0x5d   : > { %11840 = vmatprep.subr.bf16.mxu0 %v11979_v19 }
  0x5e   : > { %11869 = vmatpush3.bf16.msra.mxu1 %v11985_v6 }
  0x5f   : > { %11870 = vmatprep.subr.bf16.mxu1 %v11986_v7 }
  0x60   : > { %11841 = vmatpush3.bf16.msra.mxu0 %v11979_v19 }
  0x61   : > { %11842 = vmatprep.subr.bf16.mxu0 %v11980_v22 }
  0x62   : > { %11871 = vmatpush3.bf16.msra.mxu1 %v11986_v7 }
  0x63   : > { %11872 = vmatprep.subr.bf16.mxu1 %v11987_v8 }
  0x64   : > { %11843 = vmatpush3.bf16.msra.mxu0 %v11980_v22 }
  0x66   : > { %11873 = vmatpush3.bf16.msra.mxu1 %v11987_v8 }
  0x67   : > { %11845 = vmatmul.mubr.bf16.vlgmr.msra.gmra.mrb[0].mxu0 %v609_v35  ;;  %11874 = vmatprep.subr.bf16.mxu1 %v11988_v9 }
  0x68   : > { %11848 = vmatprep.mubr.bf16.mxu0 %v610_v38 }
  0x6a   : > { %11875 = vmatpush3.bf16.msra.mxu1 %v11988_v9 }
  0x6f   : > { %11849 = vmatmul.mubr.bf16.gmra.mrb[4].mxu0 %v611_v49 }
  0x70   : > { %11852 = vmatprep.mubr.bf16.mxu0 %v612_v52 }
  0x77   : > { %11853 = vmatmul.mubr.bf16.gmra.mrb[8].mxu0 %v613_v61 }
  0x78   : > { %11856 = vmatprep.mubr.bf16.mxu0 %v614_v0 }
  0x7f   : > { %11857 = vmatmul.mubr.bf16.gmra.mrb[12].mxu0 %v615_v3 }
 0x13a   : > { %v11846_v11 = vpop.f32.mrb[0].mxu0 }
 0x13b   : > { %v713_v12 = vadd.f32 %v11846_v11, %v12777_v10  ;;  %v704_v13 = vpop.f32.mrb[1].mxu0 }
 0x13c   : > { %v705_v14 = vadd.f32 %v12777_v10, %v704_v13  ;;  %v11847_v15 = vpop.f32.mrb[2].mxu0 }
 0x13d   : > { %v785_v16 = vmul.f32 0.70710677, %v713_v12  ;;  %v716_v17 = vadd.f32 %v11847_v15, %v12777_v10  ;;  %v707_v18 = vpop.f32.mrb[3].mxu0  ;;  %v769_v53 = vmul.f32 0.5, %v713_v12 }
 0x13e   : > { %v783_v19 = vmul.f32 0.70710677, %v705_v14  ;;  %v708_v20 = vadd.f32 %v12777_v10, %v707_v18  ;;  %v767_v45 = vmul.f32 0.5, %v705_v14 }
 0x13f   : > { %12253 = verf.f32 %v785_v16  ;;  %v786_v21 = vmul.f32 0.70710677, %v716_v17  ;;  %v770_v54 = vmul.f32 0.5, %v716_v17 }
 0x140   : > { %12255 = verf.f32 %v783_v19  ;;  %v784_v22 = vmul.f32 0.70710677, %v708_v20  ;;  %v768_v51 = vmul.f32 0.5, %v708_v20 }
 0x141   : > { %12257 = verf.f32 %v786_v21 }
 0x142   : > { %12259 = verf.f32 %v784_v22  ;;  %v11850_v23 = vpop.f32.mrb[4].mxu0 }
 0x143   : > { %v729_v24 = vadd.f32 %v11850_v23, %v12777_v10  ;;  %v720_v25 = vpop.f32.mrb[5].mxu0 }
 0x144   : > { %v721_v26 = vadd.f32 %v12777_v10, %v720_v25  ;;  %v11851_v27 = vpop.f32.mrb[6].mxu0 }
 0x145   : > { %v789_v28 = vmul.f32 0.70710677, %v729_v24  ;;  %v12786_v29 = vadd.f32 %v11851_v27, %v12777_v10  ;;  %v723_v30 = vpop.f32.mrb[7].mxu0  ;;  %v773_v5 = vmul.f32 0.5, %v729_v24 }
 0x146   : > { %v787_v31 = vmul.f32 0.70710677, %v721_v26  ;;  %v724_v32 = vadd.f32 %v12777_v10, %v723_v30  ;;  %v771_v11 = vmul.f32 0.5, %v721_v26 }
 0x147   : > { %12261 = verf.f32 %v789_v28  ;;  %v790_v33 = vmul.f32 0.70710677, %v12786_v29  ;;  %v774_v21 = vmul.f32 0.5, %v12786_v29 }
 0x148   : > { %12263 = verf.f32 %v787_v31  ;;  %v788_v34 = vmul.f32 0.70710677, %v724_v32  ;;  %v772_v16 = vmul.f32 0.5, %v724_v32 }
 0x149   : > { %v12254_v35 = vpop.eup %12253  ;;  %12265 = verf.f32 %v790_v33 }
 0x14a   : > { %v12256_v36 = vpop.eup %12255  ;;  %12267 = verf.f32 %v788_v34  ;;  %v11854_v37 = vpop.f32.mrb[8].mxu0  ;;  %v817_v46 = vadd.f32 1.0, %v12254_v35 }
 0x14b   : > { %v12258_v38 = vpop.eup %12257  ;;  %v745_v39 = vadd.f32 %v11854_v37, %v12777_v10  ;;  %v736_v40 = vpop.f32.mrb[9].mxu0  ;;  %v815_v41 = vadd.f32 1.0, %v12256_v36 }
 0x14c   : > { %v12260_v42 = vpop.eup %12259  ;;  %v737_v43 = vadd.f32 %v12777_v10, %v736_v40  ;;  %v11855_v44 = vpop.f32.mrb[10].mxu0  ;;  %v818_v47 = vadd.f32 1.0, %v12258_v38  ;;  %v12798_v61 = vmul.f32 %v817_v46, %v769_v53 }
 0x14d   : > { %v793_v48 = vmul.f32 0.70710677, %v745_v39  ;;  %v748_v49 = vadd.f32 %v11855_v44, %v12777_v10  ;;  %v739_v50 = vpop.f32.mrb[11].mxu0  ;;  %v816_v52 = vadd.f32 1.0, %v12260_v42  ;;  %v12794_v58 = vmul.f32 %v815_v41, %v767_v45 }
 0x14e   : > { %v791_v55 = vmul.f32 0.70710677, %v737_v43  ;;  %v740_v56 = vadd.f32 %v12777_v10, %v739_v50  ;;  %v12800_v62 = vmul.f32 %v818_v47, %v770_v54  ;;  %v777_v22 = vmul.f32 0.5, %v745_v39 }
 0x14f   : > { %12269 = verf.f32 %v793_v48  ;;  %v794_v57 = vmul.f32 0.70710677, %v748_v49  ;;  %v12796_v59 = vmul.f32 %v816_v52, %v768_v51  ;;  %v775_v33 = vmul.f32 0.5, %v737_v43 }
 0x150   : > { %12271 = verf.f32 %v791_v55  ;;  %v792_v60 = vmul.f32 0.70710677, %v740_v56  ;;  %v1256_v3 = vpack.c.bf16 %v12800_v62, %v12798_v61  ;;  %v776_v38 = vmul.f32 0.5, %v740_v56 }
 0x151   : > { %v12262_v63 = vpop.eup %12261  ;;  %12273 = verf.f32 %v794_v57  ;;  %v1255_v0 = vpack.c.bf16 %v12796_v59, %v12794_v58 }
 0x152   : > { %v12264_v1 = vpop.eup %12263  ;;  %12275 = verf.f32 %v792_v60  ;;  %v11858_v2 = vpop.f32.mrb[12].mxu0  ;;  %v821_v14 = vadd.f32 1.0, %v12262_v63 }
 0x153   : > { %v12266_v4 = vpop.eup %12265  ;;  %v761_v6 = vadd.f32 %v11858_v2, %v12777_v10  ;;  %v752_v7 = vpop.f32.mrb[13].mxu0  ;;  %11876 = vmatprep.mubr.bf16.mxu1 %v1255_v0  ;;  %v819_v8 = vadd.f32 1.0, %v12264_v1 }
 0x154   : > { %v12268_v9 = vpop.eup %12267  ;;  %v753_v12 = vadd.f32 %v12777_v10, %v752_v7  ;;  %v11859_v13 = vpop.f32.mrb[14].mxu0  ;;  %11877 = vmatmul.mubr.bf16.vlgmr.msra.gmra.mrb[0].mxu1 %v1256_v3  ;;  %v822_v15 = vadd.f32 1.0, %v12266_v4  ;;  %v12815_v30 = vmul.f32 %v821_v14, %v773_v5  ;;  %v10190_v7 = vld [vmem:[%s16081_s6] ss:$0 sm:$0xff] }
 0x155   : > { %v797_v17 = vmul.f32 0.70710677, %v761_v6  ;;  %v764_v18 = vadd.f32 %v11859_v13, %v12777_v10  ;;  %v755_v19 = vpop.f32.mrb[15].mxu0  ;;  %v820_v20 = vadd.f32 1.0, %v12268_v9  ;;  %v12811_v26 = vmul.f32 %v819_v8, %v771_v11 }
 0x156   : > { %v795_v23 = vmul.f32 0.70710677, %v753_v12  ;;  %v756_v24 = vadd.f32 %v12777_v10, %v755_v19  ;;  %v12817_v31 = vmul.f32 %v822_v15, %v774_v21  ;;  %v778_v10 = vmul.f32 0.5, %v748_v49 }
 0x157   : > { %12277 = verf.f32 %v797_v17  ;;  %v798_v25 = vmul.f32 0.70710677, %v764_v18  ;;  %v12813_v27 = vmul.f32 %v820_v20, %v772_v16  ;;  %v781_v47 = vmul.f32 0.5, %v761_v6 }
 0x158   : > { %12279 = verf.f32 %v795_v23  ;;  %v796_v28 = vmul.f32 0.70710677, %v756_v24  ;;  %v1258_v35 = vpack.c.bf16 %v12817_v31, %v12815_v30  ;;  %v779_v50 = vmul.f32 0.5, %v753_v12 }
 0x159   : > { %v12270_v32 = vpop.eup %12269  ;;  %12281 = verf.f32 %v798_v25  ;;  %v1257_v29 = vpack.c.bf16 %v12813_v27, %v12811_v26  ;;  %v782_v53 = vmul.f32 0.5, %v764_v18  ;;  %v780_v56 = vmul.f32 0.5, %v756_v24 }
 0x15a   : > { %v12272_v34 = vpop.eup %12271  ;;  %12283 = verf.f32 %v796_v28  ;;  %v825_v36 = vadd.f32 1.0, %v12270_v32 }
 0x15b   : > { %v12274_v37 = vpop.eup %12273  ;;  %11880 = vmatprep.mubr.bf16.mxu1 %v1257_v29  ;;  %v823_v39 = vadd.f32 1.0, %v12272_v34 }
 0x15c   : > { %v12276_v40 = vpop.eup %12275  ;;  %11881 = vmatmul.mubr.bf16.gmra.mrb[4].mxu1 %v1258_v35  ;;  %v826_v41 = vadd.f32 1.0, %v12274_v37  ;;  %v12823_v42 = vmul.f32 %v825_v36, %v777_v22 }
 0x15d   : > { %v824_v43 = vadd.f32 1.0, %v12276_v40  ;;  %v12825_v44 = vmul.f32 %v823_v39, %v775_v33 }
 0x15e   : > { %v12827_v45 = vmul.f32 %v826_v41, %v778_v10 }
 0x15f   : > { %v12829_v46 = vmul.f32 %v824_v43, %v776_v38 }
 0x160   : > { %v1260_v48 = vpack.c.bf16 %v12827_v45, %v12823_v42 }
 0x161   : > { %v12278_v49 = vpop.eup %12277  ;;  %v1259_v51 = vpack.c.bf16 %v12829_v46, %v12825_v44 }
 0x162   : > { %v12280_v52 = vpop.eup %12279  ;;  %v829_v54 = vadd.f32 1.0, %v12278_v49 }
 0x163   : > { %v12282_v55 = vpop.eup %12281  ;;  %11884 = vmatprep.mubr.bf16.mxu1 %v1259_v51  ;;  %v827_v57 = vadd.f32 1.0, %v12280_v52  ;;  %v866_v52 = vld [vmem:[#allocation2] sm:$0xff] }
 0x164   : > { %v12284_v60 = vpop.eup %12283  ;;  %11885 = vmatmul.mubr.bf16.gmra.mrb[8].mxu1 %v1260_v48  ;;  %v830_v63 = vadd.f32 1.0, %v12282_v55  ;;  %v12835_v0 = vmul.f32 %v829_v54, %v781_v47  ;;  %v867_v54 = vld [vmem:[#allocation2 + $0x8] sm:$0xff] }
 0x165   : > { %v828_v1 = vadd.f32 1.0, %v12284_v60  ;;  %v843_v2 = vmul.f32 %v827_v57, %v779_v50  ;;  %v875_v57 = vld [vmem:[#allocation2 + $0x48] sm:$0xff]  ;;  %v882_v60 = vld [vmem:[#allocation2 + $0x80] sm:$0xff] }
 0x166   : > { %v12837_v3 = vmul.f32 %v830_v63, %v782_v53  ;;  %v874_v53 = vld [vmem:[#allocation2 + $0x40] sm:$0xff] }
 0x167   : > { %v12839_v4 = vmul.f32 %v828_v1, %v780_v56  ;;  %v10201_v55 = vcombine.low %v866_v52, %v874_v53  ;;  %v10202_v56 = vcombine.high %v866_v52, %v874_v53  ;;  %v890_v63 = vld [vmem:[#allocation2 + $0xc0] sm:$0xff]  ;;  %v10203_v1 = vcombine.low %v867_v54, %v875_v57 }
 0x168   : > { %v1262_v5 = vpack.c.bf16 %v12837_v3, %v12835_v0 }
 0x169   : > { %v1261_v6 = vpack.c.bf16 %v12839_v4, %v843_v2  ;;  %2381 = vmatprep.subr.bf16.mxu0 %v10202_v56  ;;  %v906_v56 = vld [vmem:[#allocation2 + $0x140] sm:$0xff] }
 0x16a   : > { %2382 = vmatpush1.bf16.msra.mxu0 %v10201_v55 }
 0x16b   : > { %11888 = vmatprep.mubr.bf16.mxu1 %v1261_v6 }
 0x16c   : > { %11889 = vmatmul.mubr.bf16.gmra.mrb[12].mxu1 %v1262_v5  ;;  %v891_v5 = vld [vmem:[#allocation2 + $0xc8] sm:$0xff] }
 0x227   : > { %v11878_v8 = vpop.f32.mrb[0].mxu1 }
 0x228   : > { %v1351_v9 = vpop.f32.mrb[1].mxu1  ;;  %v1360_v11 = vadd.f32 %v11878_v8, %v10190_v7 }
 0x229   : > { %v11879_v12 = vpop.f32.mrb[2].mxu1  ;;  %v1352_v13 = vadd.f32 %v10190_v7, %v1351_v9 }
 0x22a   : > { %v1354_v14 = vpop.f32.mrb[3].mxu1  ;;  %v12848_v15 = vadd.f32 %v1360_v11, %v12798_v61  ;;  %v1363_v16 = vadd.f32 %v11879_v12, %v10190_v7 }
 0x22b   : > { %v12851_v17 = vadd.f32 %v1352_v13, %v12794_v58  ;;  %v1355_v18 = vadd.f32 %v10190_v7, %v1354_v14 }
 0x22c   : > { %1434 = vadd.xlane.f32.xlu1 %v12848_v15  ;;  %v12856_v19 = vadd.f32 %v1363_v16, %v12800_v62 }
 0x22d   : > { %1430 = vadd.xlane.f32.xlu0 %v12851_v17  ;;  %v12859_v21 = vadd.f32 %v1355_v18, %v12796_v59 }
 0x22f   : > { %v11882_v20 = vpop.f32.mrb[4].mxu1 }
 0x230   : > { %1436 = vadd.xlane.f32.xlu1 %v12856_v19  ;;  %v1367_v61 = vpop.f32.mrb[5].mxu1  ;;  %v1376_v28 = vadd.f32 %v11882_v20, %v10190_v7 }
 0x231   : > { %v11883_v22 = vpop.f32.mrb[6].mxu1  ;;  %1432 = vadd.xlane.f32.xlu0 %v12859_v21  ;;  %v1368_v58 = vadd.f32 %v10190_v7, %v1367_v61 }
 0x232   : > { %v1370_v23 = vpop.f32.mrb[7].mxu1  ;;  %v1379_v59 = vadd.f32 %v11883_v22, %v10190_v7  ;;  %v12872_v33 = vadd.f32 %v1376_v28, %v12815_v30 }
 0x233   : > { %v12864_v24 = vadd.f32 %v1368_v58, %v12811_v26  ;;  %v1371_v25 = vadd.f32 %v10190_v7, %v1370_v23 }
 0x234   : > { %v12876_v26 = vadd.f32 %v1379_v59, %v12817_v31 }
 0x235   : > { %1438 = vadd.xlane.f32.xlu0 %v12864_v24  ;;  %v12868_v62 = vadd.f32 %v1371_v25, %v12813_v27 }
 0x237   : > { %v11886_v32 = vpop.f32.mrb[8].mxu1  ;;  %1440 = vadd.xlane.f32.xlu1 %v12868_v62 }
 0x238   : > { %v1383_v29 = vpop.f32.mrb[9].mxu1  ;;  %v1392_v37 = vadd.f32 %v11886_v32, %v10190_v7 }
 0x239   : > { %v11887_v34 = vpop.f32.mrb[10].mxu1  ;;  %1442 = vadd.xlane.f32.xlu0 %v12872_v33  ;;  %v1384_v10 = vadd.f32 %v10190_v7, %v1383_v29 }
 0x23a   : > { %v1386_v35 = vpop.f32.mrb[11].mxu1  ;;  %v1395_v38 = vadd.f32 %v11887_v34, %v10190_v7  ;;  %v12888_v31 = vadd.f32 %v1392_v37, %v12823_v42 }
 0x23b   : > { %1444 = vadd.xlane.f32.xlu1 %v12876_v26  ;;  %v12880_v27 = vadd.f32 %v1384_v10, %v12825_v44  ;;  %v1387_v36 = vadd.f32 %v10190_v7, %v1386_v35 }
 0x23c   : > { %v12892_v43 = vadd.f32 %v1395_v38, %v12827_v45 }
 0x23d   : > { %1446 = vadd.xlane.f32.xlu0 %v12880_v27  ;;  %v12884_v30 = vadd.f32 %v1387_v36, %v12829_v46 }
 0x23f   : > { %v11890_v39 = vpop.f32.mrb[12].mxu1  ;;  %1448 = vadd.xlane.f32.xlu1 %v12884_v30 }
 0x240   : > { %v1399_v40 = vpop.f32.mrb[13].mxu1  ;;  %v1408_v49 = vadd.f32 %v11890_v39, %v10190_v7 }
 0x241   : > { %v11891_v41 = vpop.f32.mrb[14].mxu1  ;;  %1450 = vadd.xlane.f32.xlu0 %v12888_v31  ;;  %v1400_v44 = vadd.f32 %v10190_v7, %v1399_v40 }
 0x242   : > { %v1402_v47 = vpop.f32.mrb[15].mxu1  ;;  %v1411_v50 = vadd.f32 %v11891_v41, %v10190_v7  ;;  %v12903_v51 = vadd.f32 %v1408_v49, %v12835_v0  ;;  %v883_v0 = vld [vmem:[#allocation2 + $0x88] sm:$0xff] }
 0x243   : > { %1452 = vadd.xlane.f32.xlu1 %v12892_v43  ;;  %v12895_v46 = vadd.f32 %v1400_v44, %v843_v2  ;;  %v1403_v48 = vadd.f32 %v10190_v7, %v1402_v47  ;;  %v10204_v2 = vcombine.high %v867_v54, %v875_v57  ;;  %v10220_v6 = vcombine.high %v883_v0, %v891_v5  ;;  %v899_v57 = vld [vmem:[#allocation2 + $0x108] sm:$0xff] }
 0x244   : > { %v12907_v45 = vadd.f32 %v1411_v50, %v12837_v3  ;;  %v10217_v3 = vcombine.low %v882_v60, %v890_v63  ;;  %v10219_v7 = vcombine.low %v883_v0, %v891_v5 }
 0x245   : > { %1454 = vadd.xlane.f32.xlu0 %v12895_v46  ;;  %v12899_v42 = vadd.f32 %v1403_v48, %v12839_v4  ;;  %v10218_v4 = vcombine.high %v882_v60, %v890_v63  ;;  %2494 = vmatprep.subr.bf16.mxu1 %v10204_v2  ;;  %v907_v2 = vld [vmem:[#allocation2 + $0x148] sm:$0xff] }
 0x246   : > { %2495 = vmatpush1.bf16.msra.mxu1 %v10203_v1 }
 0x247   : > { %1456 = vadd.xlane.f32.xlu1 %v12899_v42  ;;  %2383 = vmatprep.subr.bf16.mxu0 %v10218_v4 }
 0x248   : > { %2496 = vmatprep.subr.bf16.mxu1 %v10220_v6  ;;  %2384 = vmatpush1.bf16.msra.mxu0 %v10217_v3  ;;  %v10236_v3 = vcombine.high %v899_v57, %v907_v2 }
 0x249   : > { %1458 = vadd.xlane.f32.xlu0 %v12903_v51 }
 0x24a   : > { %2497 = vmatpush1.bf16.msra.mxu1 %v10219_v7 }
 0x24b   : > { %1460 = vadd.xlane.f32.xlu1 %v12907_v45  ;;  %2498 = vmatprep.subr.bf16.mxu1 %v10236_v3 }
 0x2b9   : > { %v1435_v8 = vpop.xlane.xlu1 %1434 }
 0x2ba   : > { %v1431_v9 = vpop.xlane.xlu0 %1430  ;;  %v1465_v11 = vmul.f32 0.0078125, %v1435_v8 }
 0x2bb   : > { %v1463_v12 = vmul.f32 0.0078125, %v1431_v9  ;;  %v914_v9 = vld [vmem:[#allocation2 + $0x180] sm:$0xff] }
 0x2bc   : > { %v12916_v22 = vsub.f32 %v12848_v15, %v1465_v11  ;;  %v922_v11 = vld [vmem:[#allocation2 + $0x1c0] sm:$0xff] }
 0x2bd   : > { %v1437_v13 = vpop.xlane.xlu1 %1436  ;;  %v12911_v14 = vsub.f32 %v12851_v17, %v1463_v12  ;;  %v915_v12 = vld [vmem:[#allocation2 + $0x188] sm:$0xff] }
 0x2be   : > { %v1433_v16 = vpop.xlane.xlu0 %1432  ;;  %v1466_v18 = vmul.f32 0.0078125, %v1437_v13  ;;  %v1497_v28 = vmul.f32 %v12916_v22, %v12916_v22 }
 0x2bf   : > { %v1464_v20 = vmul.f32 0.0078125, %v1433_v16  ;;  %v1495_v61 = vmul.f32 %v12911_v14, %v12911_v14 }
 0x2c0   : > { %v12926_v59 = vsub.f32 %v12856_v19, %v1466_v18  ;;  %v923_v18 = vld [vmem:[#allocation2 + $0x1c8] sm:$0xff] }
 0x2c1   : > { %1511 = vadd.xlane.f32.xlu0 %v1495_v61  ;;  %v12919_v58 = vsub.f32 %v12859_v21, %v1464_v20 }
 0x2c2   : > { %v1439_v23 = vpop.xlane.xlu0 %1438  ;;  %v1498_v10 = vmul.f32 %v12926_v59, %v12926_v59 }
 0x2c3   : > { %v1467_v25 = vmul.f32 0.0078125, %v1439_v23  ;;  %v1496_v17 = vmul.f32 %v12919_v58, %v12919_v58 }
 0x2c4   : > { %v1441_v32 = vpop.xlane.xlu1 %1440 }
 0x2c5   : > { %v1468_v29 = vmul.f32 0.0078125, %v1441_v32  ;;  %1515 = vadd.xlane.f32.xlu0 %v1497_v28  ;;  %1513 = vadd.xlane.f32.xlu1 %v1496_v17  ;;  %v12929_v15 = vsub.f32 %v12864_v24, %v1467_v25  ;;  %v10251_v28 = vcombine.low %v915_v12, %v923_v18  ;;  %v10252_v17 = vcombine.high %v915_v12, %v923_v18  ;;  %v12992_v12 = vld [vmem:[#allocation2 + $0x10] sm:$0xff]  ;;  %v13000_v18 = vld [vmem:[#allocation2 + $0x18] sm:$0xff] }
 0x2c6   : > { %v1443_v21 = vpop.xlane.xlu0 %1442 }
 0x2c7   : > { %v1469_v34 = vmul.f32 0.0078125, %v1443_v21  ;;  %v1499_v35 = vmul.f32 %v12929_v15, %v12929_v15  ;;  %v12936_v36 = vsub.f32 %v12868_v62, %v1468_v29  ;;  %v930_v21 = vld [vmem:[#allocation2 + $0x200] sm:$0xff] }
 0x2c8   : > { %v1445_v19 = vpop.xlane.xlu1 %1444 }
 0x2c9   : > { %v1470_v37 = vmul.f32 0.0078125, %v1445_v19  ;;  %1517 = vadd.xlane.f32.xlu1 %v1498_v10  ;;  %1519 = vadd.xlane.f32.xlu0 %v1499_v35  ;;  %v12939_v38 = vsub.f32 %v12872_v33, %v1469_v34  ;;  %v1500_v40 = vmul.f32 %v12936_v36, %v12936_v36  ;;  %v938_v34 = vld [vmem:[#allocation2 + $0x240] sm:$0xff]  ;;  %v931_v10 = vld [vmem:[#allocation2 + $0x208] sm:$0xff] }
 0x2ca   : > { %v1447_v24 = vpop.xlane.xlu0 %1446  ;;  %v939_v19 = vld [vmem:[#allocation2 + $0x248] sm:$0xff] }
 0x2cb   : > { %v1471_v39 = vmul.f32 0.0078125, %v1447_v24  ;;  %v1501_v41 = vmul.f32 %v12939_v38, %v12939_v38  ;;  %v12946_v44 = vsub.f32 %v12876_v26, %v1470_v37 }
 0x2cc   : > { %v1449_v62 = vpop.xlane.xlu1 %1448 }
 0x2cd   : > { %v1472_v47 = vmul.f32 0.0078125, %v1449_v62  ;;  %1521 = vadd.xlane.f32.xlu1 %v1500_v40  ;;  %1523 = vadd.xlane.f32.xlu0 %v1501_v41  ;;  %v12949_v48 = vsub.f32 %v12880_v27, %v1471_v39  ;;  %v1502_v50 = vmul.f32 %v12946_v44, %v12946_v44  ;;  %v898_v27 = vld [vmem:[#allocation2 + $0x100] sm:$0xff]  ;;  %v10265_v39 = vcombine.low %v930_v21, %v938_v34 }
 0x2ce   : > { %v1451_v33 = vpop.xlane.xlu0 %1450  ;;  %v10234_v1 = vcombine.high %v898_v27, %v906_v56  ;;  %v10233_v5 = vcombine.low %v898_v27, %v906_v56  ;;  %v10268_v40 = vcombine.high %v931_v10, %v939_v19  ;;  %v946_v41 = vld [vmem:[#allocation2 + $0x280] sm:$0xff]  ;;  %v963_v56 = vld [vmem:[#allocation2 + $0x308] sm:$0xff] }
 0x2cf   : > { %v1473_v49 = vmul.f32 0.0078125, %v1451_v33  ;;  %v1503_v52 = vmul.f32 %v12949_v48, %v12949_v48  ;;  %v12956_v53 = vsub.f32 %v12884_v30, %v1472_v47  ;;  %v954_v62 = vld [vmem:[#allocation2 + $0x2c0] sm:$0xff]  ;;  %v947_v47 = vld [vmem:[#allocation2 + $0x288] sm:$0xff] }
 0x2d0   : > { %v1453_v26 = vpop.xlane.xlu1 %1452  ;;  %2385 = vmatprep.subr.bf16.mxu0 %v10234_v1  ;;  %v10282_v33 = vcombine.high %v946_v41, %v954_v62  ;;  %v970_v27 = vld [vmem:[#allocation2 + $0x340] sm:$0xff] }
 0x2d1   : > { %v1474_v54 = vmul.f32 0.0078125, %v1453_v26  ;;  %1525 = vadd.xlane.f32.xlu1 %v1502_v50  ;;  %1527 = vadd.xlane.f32.xlu0 %v1503_v52  ;;  %v12959_v55 = vsub.f32 %v12888_v31, %v1473_v49  ;;  %v1504_v63 = vmul.f32 %v12956_v53, %v12956_v53  ;;  %v10235_v31 = vcombine.low %v899_v57, %v907_v2  ;;  %v955_v49 = vld [vmem:[#allocation2 + $0x2c8] sm:$0xff] }
 0x2d2   : > { %v1455_v60 = vpop.xlane.xlu0 %1454  ;;  %2386 = vmatpush1.bf16.msra.mxu0 %v10233_v5  ;;  %v10283_v52 = vcombine.low %v947_v47, %v955_v49  ;;  %v10284_v26 = vcombine.high %v947_v47, %v955_v49  ;;  %v979_v5 = vld [vmem:[#allocation2 + $0x388] sm:$0xff] }
 0x2d3   : > { %v1475_v4 = vmul.f32 0.0078125, %v1455_v60  ;;  %v1505_v30 = vmul.f32 %v12959_v55, %v12959_v55  ;;  %v12966_v0 = vsub.f32 %v12892_v43, %v1474_v54  ;;  %v10250_v43 = vcombine.high %v914_v9, %v922_v11  ;;  %2499 = vmatpush1.bf16.msra.mxu1 %v10235_v31  ;;  %v962_v54 = vld [vmem:[#allocation2 + $0x300] sm:$0xff]  ;;  %v971_v60 = vld [vmem:[#allocation2 + $0x348] sm:$0xff] }
 0x2d4   : > { %v1457_v6 = vpop.xlane.xlu1 %1456  ;;  %2500 = vmatprep.subr.bf16.mxu1 %v10252_v17  ;;  %v10298_v57 = vcombine.high %v962_v54, %v970_v27  ;;  %v10299_v1 = vcombine.low %v963_v56, %v971_v60  ;;  %v10300_v2 = vcombine.high %v963_v56, %v971_v60  ;;  %v987_v31 = vld [vmem:[#allocation2 + $0x3c8] sm:$0xff] }
 0x2d5   : > { %v1476_v7 = vmul.f32 0.0078125, %v1457_v6  ;;  %1529 = vadd.xlane.f32.xlu1 %v1504_v63  ;;  %1531 = vadd.xlane.f32.xlu0 %v1505_v30  ;;  %v12969_v8 = vsub.f32 %v12895_v46, %v1475_v4  ;;  %v1506_v16 = vmul.f32 %v12966_v0, %v12966_v0  ;;  %v10249_v46 = vcombine.low %v914_v9, %v922_v11  ;;  %v978_v4 = vld [vmem:[#allocation2 + $0x380] sm:$0xff] }
 0x2d6   : > { %v1459_v13 = vpop.xlane.xlu0 %1458  ;;  %2387 = vmatprep.subr.bf16.mxu0 %v10250_v43  ;;  %v10297_v63 = vcombine.low %v962_v54, %v970_v27  ;;  %v986_v30 = vld [vmem:[#allocation2 + $0x3c0] sm:$0xff]  ;;  %v10316_v9 = vcombine.high %v979_v5, %v987_v31  ;;  %v16096_v11 = vmov 0  }
 0x2d7   : > { %v1477_v20 = vmul.f32 0.0078125, %v1459_v13  ;;  %v1507_v61 = vmul.f32 %v12969_v8, %v12969_v8  ;;  %v12976_v23 = vsub.f32 %v12899_v42, %v1476_v7  ;;  %2388 = vmatpush1.bf16.msra.mxu0 %v10249_v46  ;;  %v10266_v42 = vcombine.high %v930_v21, %v938_v34  ;;  %2501 = vmatpush1.bf16.msra.mxu1 %v10251_v28  ;;  %v12994_v13 = vld [vmem:[#allocation2 + $0x50] sm:$0xff] }
 0x2d8   : > { %v1461_v25 = vpop.xlane.xlu1 %1460  ;;  %2502 = vmatprep.subr.bf16.mxu1 %v10268_v40  ;;  %v10314_v6 = vcombine.high %v978_v4, %v986_v30  ;;  %v10313_v3 = vcombine.low %v978_v4, %v986_v30  ;;  %v10315_v7 = vcombine.low %v979_v5, %v987_v31  ;;  %2413 = vmatprep.mubr.bf16.mxu0 %v16096_v11 }
 0x2d9   : > { %v1478_v32 = vmul.f32 0.0078125, %v1461_v25  ;;  %1533 = vadd.xlane.f32.xlu1 %v1506_v16  ;;  %1535 = vadd.xlane.f32.xlu0 %v1507_v61  ;;  %v12979_v29 = vsub.f32 %v12903_v51, %v1477_v20  ;;  %v1508_v35 = vmul.f32 %v12976_v23, %v12976_v23  ;;  %v10267_v51 = vcombine.low %v931_v10, %v939_v19  ;;  %v13002_v20 = vld [vmem:[#allocation2 + $0x58] sm:$0xff] }
 0x2da   : > { %2389 = vmatprep.subr.bf16.mxu0 %v10266_v42  ;;  %2526 = vmatprep.mubr.bf16.mxu1 %v16096_v11  ;;  %v10205_v16 = vcombine.low %v12992_v12, %v12994_v13  ;;  %v10206_v43 = vcombine.high %v12992_v12, %v12994_v13  ;;  %v10207_v61 = vcombine.low %v13000_v18, %v13002_v20 }
 0x2db   : > { %v1509_v37 = vmul.f32 %v12979_v29, %v12979_v29  ;;  %v12986_v24 = vsub.f32 %v12907_v45, %v1478_v32  ;;  %2390 = vmatpush1.bf16.msra.mxu0 %v10265_v39  ;;  %2503 = vmatpush1.bf16.msra.mxu1 %v10267_v51  ;;  %v10281_v45 = vcombine.low %v946_v41, %v954_v62 }
 0x2dc   : > { %2391 = vmatprep.subr.bf16.mxu0 %v10282_v33  ;;  %2504 = vmatprep.subr.bf16.mxu1 %v10284_v26  ;;  %v10208_v46 = vcombine.high %v13000_v18, %v13002_v20  ;;  %v13012_v26 = vld [vmem:[%s16082_s7] ss:$0 sm:$0xff] }
 0x2dd   : > { %1537 = vadd.xlane.f32.xlu1 %v1508_v35  ;;  %1539 = vadd.xlane.f32.xlu0 %v1509_v37  ;;  %v1510_v50 = vmul.f32 %v12986_v24, %v12986_v24 }
 0x2df   : > { %2392 = vmatpush1.bf16.msra.mxu0 %v10281_v45  ;;  %2505 = vmatpush1.bf16.msra.mxu1 %v10283_v52 }
 0x2e0   : > { %2393 = vmatprep.subr.bf16.mxu0 %v10298_v57  ;;  %2506 = vmatprep.subr.bf16.mxu1 %v10300_v2 }
 0x2e1   : > { %1541 = vadd.xlane.f32.xlu1 %v1510_v50 }
 0x2e3   : > { %2394 = vmatpush1.bf16.msra.mxu0 %v10297_v63  ;;  %2507 = vmatpush1.bf16.msra.mxu1 %v10299_v1 }
 0x2e4   : > { %2395 = vmatprep.subr.bf16.mxu0 %v10314_v6  ;;  %2508 = vmatprep.subr.bf16.mxu1 %v10316_v9  ;;  %v884_v6 = vld [vmem:[#allocation2 + $0x90] sm:$0xff] }
 0x2e7   : > { %2396 = vmatpush1.bf16.msra.mxu0 %v10313_v3  ;;  %2509 = vmatpush1.bf16.msra.mxu1 %v10315_v7 }
 0x2e8   : > { %2607 = vmatprep.subr.bf16.mxu0 %v10206_v43  ;;  %2720 = vmatprep.subr.bf16.mxu1 %v10208_v46  ;;  %v892_v43 = vld [vmem:[#allocation2 + $0xd0] sm:$0xff]  ;;  %v885_v46 = vld [vmem:[#allocation2 + $0x98] sm:$0xff] }
 0x34e   : > { %v1512_v25 = vpop.xlane.xlu0 %1511 }
 0x34f   : > { %v1543_v28 = vmul.f32 0.0078125, %v1512_v25  ;;  %v893_v25 = vld [vmem:[#allocation2 + $0xd8] sm:$0xff] }
 0x351   : > { %v1559_v17 = vadd.f32 1e-05, %v1543_v28 }
 0x352   : > { %v1514_v32 = vpop.xlane.xlu1 %1513  ;;  %v1516_v21 = vpop.xlane.xlu0 %1515 }
 0x353   : > { %12285 = vrsqrt.f32 %v1559_v17  ;;  %v1544_v34 = vmul.f32 0.0078125, %v1514_v32  ;;  %v1545_v10 = vmul.f32 0.0078125, %v1516_v21  ;;  %v13035_v21 = vld [vmem:[#allocation2 + $0x110] sm:$0xff] }
 0x355   : > { %v1560_v35 = vadd.f32 1e-05, %v1544_v34  ;;  %v1561_v42 = vadd.f32 1e-05, %v1545_v10  ;;  %v13037_v34 = vld [vmem:[#allocation2 + $0x150] sm:$0xff] }
 0x356   : > { %v1518_v19 = vpop.xlane.xlu1 %1517  ;;  %v1520_v37 = vpop.xlane.xlu0 %1519 }
 0x357   : > { %12287 = vrsqrt.f32 %v1560_v35  ;;  %v1546_v39 = vmul.f32 0.0078125, %v1518_v19  ;;  %v1547_v40 = vmul.f32 0.0078125, %v1520_v37  ;;  %v10224_v35 = vcombine.high %v885_v46, %v893_v25  ;;  %v909_v19 = vld [vmem:[#allocation2 + $0x158] sm:$0xff] }
 0x358   : > { %12289 = vrsqrt.f32 %v1561_v42  ;;  %v901_v42 = vld [vmem:[#allocation2 + $0x118] sm:$0xff] }
 0x359   : > { %v1562_v51 = vadd.f32 1e-05, %v1546_v39  ;;  %v1563_v33 = vadd.f32 1e-05, %v1547_v40  ;;  %v10221_v40 = vcombine.low %v884_v6, %v892_v43  ;;  %v10240_v12 = vcombine.high %v901_v42, %v909_v19 }
 0x35a   : > { %v1522_v41 = vpop.xlane.xlu1 %1521  ;;  %v1524_v45 = vpop.xlane.xlu0 %1523 }
 0x35b   : > { %12291 = vrsqrt.f32 %v1562_v51  ;;  %v1548_v62 = vmul.f32 0.0078125, %v1522_v41  ;;  %v1549_v56 = vmul.f32 0.0078125, %v1524_v45  ;;  %v10223_v41 = vcombine.low %v885_v46, %v893_v25  ;;  %v917_v45 = vld [vmem:[#allocation2 + $0x198] sm:$0xff] }
 0x35d   : > { %v12286_v47 = vpop.eup %12285  ;;  %v1564_v49 = vadd.f32 1e-05, %v1548_v62  ;;  %v1565_v5 = vadd.f32 1e-05, %v1549_v56  ;;  %v10238_v62 = vcombine.high %v13035_v21, %v13037_v34 }
 0x35e   : > { %v1591_v50 = vmul.f32 %v12286_v47, %v12911_v14  ;;  %v1526_v52 = vpop.xlane.xlu1 %1525  ;;  %v13019_v14 = vld [vmem:[%s16083_s8] ss:$0 sm:$0xff]  ;;  %v1528_v9 = vpop.xlane.xlu0 %1527 }
 0x35f   : > { %12293 = vrsqrt.f32 %v1564_v49  ;;  %v1550_v54 = vmul.f32 0.0078125, %v1526_v52  ;;  %v925_v52 = vld [vmem:[#allocation2 + $0x1d8] sm:$0xff] }
 0x360   : > { %12295 = vrsqrt.f32 %v1563_v33  ;;  %v1613_v57 = vmul.f32 %v13012_v26, %v1591_v50  ;;  %v924_v50 = vld [vmem:[#allocation2 + $0x1d0] sm:$0xff] }
 0x361   : > { %v12288_v27 = vpop.eup %12287  ;;  %v1566_v1 = vadd.f32 1e-05, %v1550_v54  ;;  %v10237_v54 = vcombine.low %v13035_v21, %v13037_v34 }
 0x362   : > { %v1592_v60 = vmul.f32 %v12288_v27, %v12919_v58  ;;  %v12290_v63 = vpop.eup %12289  ;;  %v1530_v4 = vpop.xlane.xlu1 %1529  ;;  %v13023_v31 = vadd.f32 %v13019_v14, %v1613_v57  ;;  %v10239_v57 = vcombine.low %v901_v42, %v909_v19  ;;  %v956_v42 = vld [vmem:[#allocation2 + $0x2d0] sm:$0xff]  ;;  %v949_v19 = vld [vmem:[#allocation2 + $0x298] sm:$0xff] }
 0x363   : > { %v1593_v58 = vmul.f32 %v12290_v63, %v12916_v22  ;;  %12297 = vrsqrt.f32 %v1566_v1  ;;  %v1552_v28 = vmul.f32 0.0078125, %v1530_v4  ;;  %v1551_v22 = vmul.f32 0.0078125, %v1528_v9 }
 0x364   : > { %v1614_v2 = vmul.f32 %v13012_v26, %v1592_v60  ;;  %12299 = vrsqrt.f32 %v1565_v5  ;;  %v10256_v1 = vcombine.high %v917_v45, %v925_v52  ;;  %v933_v5 = vld [vmem:[#allocation2 + $0x218] sm:$0xff] }
 0x365   : > { %v12292_v30 = vpop.eup %12291  ;;  %v1615_v37 = vmul.f32 %v13012_v26, %v1593_v58  ;;  %v1568_v51 = vadd.f32 1e-05, %v1552_v28  ;;  %v1567_v13 = vadd.f32 1e-05, %v1551_v22  ;;  %v10255_v28 = vcombine.low %v917_v45, %v925_v52 }
 0x366   : > { %v13026_v3 = vadd.f32 %v13019_v14, %v1614_v2  ;;  %v1594_v7 = vmul.f32 %v12292_v30, %v12926_v59  ;;  %v10222_v59 = vcombine.high %v884_v6, %v892_v43  ;;  %v1534_v49 = vpop.xlane.xlu1 %1533  ;;  %v932_v2 = vld [vmem:[#allocation2 + $0x210] sm:$0xff]  ;;  %v941_v6 = vld [vmem:[#allocation2 + $0x258] sm:$0xff] }
 0x367   : > { %v13057_v18 = vadd.f32 %v13019_v14, %v1615_v37  ;;  %12301 = vrsqrt.f32 %v1568_v51  ;;  %v940_v30 = vld [vmem:[#allocation2 + $0x250] sm:$0xff]  ;;  %v10272_v34 = vcombine.high %v933_v5, %v941_v6  ;;  %v957_v37 = vld [vmem:[#allocation2 + $0x2d8] sm:$0xff] }
 0x368   : > { %v13032_v17 = vpack.c.bf16 %v13026_v3, %v13023_v31  ;;  %v1616_v32 = vmul.f32 %v13012_v26, %v1594_v7  ;;  %12303 = vrsqrt.f32 %v1567_v13  ;;  %v10270_v21 = vcombine.high %v932_v2, %v940_v30 }
 0x369   : > { %v12294_v10 = vpop.eup %12293 }
 0x36a   : > { %2414 = vmatmul.mubr.bf16.vlgmr.msra.gmra.mrb[16].mxu0 %v13032_v17  ;;  %2527 = vmatmul.mubr.bf16.vlgmr.msra.gmra.mrb[16].mxu1 %v13032_v17  ;;  %v12296_v39 = vpop.eup %12295  ;;  %v13051_v47 = vadd.f32 %v13019_v14, %v1616_v32  ;;  %v1596_v33 = vmul.f32 %v12294_v10, %v12936_v36  ;;  %v1554_v36 = vmul.f32 0.0078125, %v1534_v49  ;;  %v1538_v25 = vpop.xlane.xlu1 %1537  ;;  %v948_v10 = vld [vmem:[#allocation2 + $0x290] sm:$0xff]  ;;  %v10288_v49 = vcombine.high %v949_v19, %v957_v37 }
 0x36b   : > { %2608 = vmatpush1.bf16.msra.mxu0 %v10205_v16  ;;  %2721 = vmatpush1.bf16.msra.mxu1 %v10207_v61  ;;  %v916_v16 = vld [vmem:[#allocation2 + $0x190] sm:$0xff]  ;;  %v1595_v20 = vmul.f32 %v12296_v39, %v12929_v15  ;;  %v1532_v61 = vpop.xlane.xlu0 %1531  ;;  %v10269_v39 = vcombine.low %v932_v2, %v940_v30  ;;  %v10285_v52 = vcombine.low %v948_v10, %v956_v42 }
 0x36c   : > { %2423 = vmatprep.mubr.bf16.mxu0 %v16096_v11  ;;  %2536 = vmatprep.mubr.bf16.mxu1 %v16096_v11  ;;  %v13064_v27 = vpack.c.bf16 %v13051_v47, %v13057_v18  ;;  %v1618_v56 = vmul.f32 %v13012_v26, %v1596_v33  ;;  %v1553_v60 = vmul.f32 0.0078125, %v1532_v61  ;;  %v10254_v63 = vcombine.high %v916_v16, %v924_v50  ;;  %v973_v61 = vld [vmem:[#allocation2 + $0x358] sm:$0xff] }
 0x36d   : > { %2609 = vmatprep.subr.bf16.mxu0 %v10222_v59  ;;  %2722 = vmatprep.subr.bf16.mxu1 %v10224_v35  ;;  %v12298_v15 = vpop.eup %12297  ;;  %v1617_v4 = vmul.f32 %v13012_v26, %v1595_v20  ;;  %v1570_v7 = vadd.f32 1e-05, %v1554_v36  ;;  %v10253_v9 = vcombine.low %v916_v16, %v924_v50  ;;  %v972_v16 = vld [vmem:[#allocation2 + $0x350] sm:$0xff]  ;;  %v965_v20 = vld [vmem:[#allocation2 + $0x318] sm:$0xff] }
 0x36e   : > { %v12300_v58 = vpop.eup %12299  ;;  %v13073_v43 = vadd.f32 %v13019_v14, %v1618_v56  ;;  %v1598_v46 = vmul.f32 %v12298_v15, %v12946_v44  ;;  %v1569_v32 = vadd.f32 1e-05, %v1553_v60  ;;  %v1556_v44 = vmul.f32 0.0078125, %v1538_v25  ;;  %v1542_v56 = vpop.xlane.xlu1 %1541 }
 0x36f   : > { %2610 = vmatpush1.bf16.msra.mxu0 %v10221_v40  ;;  %2723 = vmatpush1.bf16.msra.mxu1 %v10223_v41  ;;  %v13077_v22 = vadd.f32 %v13019_v14, %v1617_v4  ;;  %v1597_v59 = vmul.f32 %v12300_v58, %v12939_v38  ;;  %v1536_v35 = vpop.xlane.xlu0 %1535  ;;  %12305 = vrsqrt.f32 %v1570_v7  ;;  %v10271_v41 = vcombine.low %v933_v5, %v941_v6  ;;  %v988_v5 = vld [vmem:[#allocation2 + $0x3d0] sm:$0xff]  ;;  %v981_v6 = vld [vmem:[#allocation2 + $0x398] sm:$0xff] }
 0x370   : > { %2611 = vmatprep.subr.bf16.mxu0 %v10238_v62  ;;  %2724 = vmatprep.subr.bf16.mxu1 %v10240_v12  ;;  %v1620_v40 = vmul.f32 %v13012_v26, %v1598_v46  ;;  %12307 = vrsqrt.f32 %v1569_v32  ;;  %v1555_v33 = vmul.f32 0.0078125, %v1536_v35  ;;  %v10286_v38 = vcombine.high %v948_v10, %v956_v42  ;;  %v964_v12 = vld [vmem:[#allocation2 + $0x310] sm:$0xff]  ;;  %v989_v58 = vld [vmem:[#allocation2 + $0x3d8] sm:$0xff]  ;;  %v13110_v35 = vld [vmem:[#allocation2 + $0x28] sm:$0xff] }
 0x371   : > { %v13082_v51 = vpack.c.bf16 %v13073_v43, %v13077_v22  ;;  %v12302_v62 = vpop.eup %12301  ;;  %v1619_v13 = vmul.f32 %v13012_v26, %v1597_v59  ;;  %v1572_v45 = vadd.f32 1e-05, %v1556_v44  ;;  %v10302_v60 = vcombine.high %v964_v12, %v972_v16  ;;  %v13108_v59 = vld [vmem:[#allocation2 + $0x60] sm:$0xff]  ;;  %v13112_v42 = vld [vmem:[#allocation2 + $0x68] sm:$0xff] }
 0x372   : > { %2424 = vmatmul.mubr.bf16.gmra.mrb[20].mxu0 %v13064_v27  ;;  %2537 = vmatmul.mubr.bf16.gmra.mrb[20].mxu1 %v13064_v27  ;;  %v12304_v50 = vpop.eup %12303  ;;  %v13091_v36 = vadd.f32 %v13019_v14, %v1620_v40  ;;  %v1571_v15 = vadd.f32 1e-05, %v1555_v33  ;;  %v10301_v7 = vcombine.low %v964_v12, %v972_v16  ;;  %v10303_v25 = vcombine.low %v965_v20, %v973_v61 }
 0x373   : > { %2433 = vmatprep.mubr.bf16.mxu0 %v16096_v11  ;;  %2546 = vmatprep.mubr.bf16.mxu1 %v16096_v11  ;;  %v13095_v2 = vadd.f32 %v13019_v14, %v1619_v13  ;;  %v1599_v4 = vmul.f32 %v12304_v50, %v12949_v48  ;;  %v1540_v30 = vpop.xlane.xlu0 %1539  ;;  %12309 = vrsqrt.f32 %v1572_v45 }
 0x374   : > { %2612 = vmatpush1.bf16.msra.mxu0 %v10237_v54  ;;  %2725 = vmatpush1.bf16.msra.mxu1 %v10239_v57  ;;  %v1600_v54 = vmul.f32 %v12302_v62, %v12956_v53  ;;  %v10287_v57 = vcombine.low %v949_v19, %v957_v37  ;;  %v1558_v53 = vmul.f32 0.0078125, %v1542_v56  ;;  %12311 = vrsqrt.f32 %v1571_v15 }
 0x375   : > { %2613 = vmatprep.subr.bf16.mxu0 %v10254_v63  ;;  %2726 = vmatprep.subr.bf16.mxu1 %v10256_v1  ;;  %v10304_v63 = vcombine.high %v965_v20, %v973_v61  ;;  %v980_v1 = vld [vmem:[#allocation2 + $0x390] sm:$0xff]  ;;  %v1557_v32 = vmul.f32 0.0078125, %v1540_v30  ;;  %v1621_v10 = vmul.f32 %v13012_v26, %v1599_v4 }
 0x376   : > { %v1622_v46 = vmul.f32 %v13012_v26, %v1600_v54  ;;  %v10318_v48 = vcombine.high %v980_v1, %v988_v5  ;;  %v1574_v37 = vadd.f32 1e-05, %v1558_v53  ;;  %v10317_v44 = vcombine.low %v980_v1, %v988_v5  ;;  %v887_v53 = vld [vmem:[#allocation2 + $0xa8] sm:$0xff] }
 0x377   : > { %v1573_v62 = vadd.f32 1e-05, %v1557_v32 }
 0x378   : > { %2614 = vmatpush1.bf16.msra.mxu0 %v10253_v9  ;;  %2727 = vmatpush1.bf16.msra.mxu1 %v10255_v28  ;;  %v13100_v9 = vpack.c.bf16 %v13091_v36, %v13095_v2  ;;  %12313 = vrsqrt.f32 %v1574_v37 }
 0x379   : > { %2615 = vmatprep.subr.bf16.mxu0 %v10270_v21  ;;  %2728 = vmatprep.subr.bf16.mxu1 %v10272_v34  ;;  %v12306_v28 = vpop.eup %12305  ;;  %v10320_v21 = vcombine.high %v981_v6, %v989_v58  ;;  %v13103_v34 = vld [vmem:[#allocation2 + $0x20] sm:$0xff]  ;;  %12315 = vrsqrt.f32 %v1573_v62 }
 0x37a   : > { %2434 = vmatmul.mubr.bf16.gmra.mrb[24].mxu0 %v13082_v51  ;;  %2547 = vmatmul.mubr.bf16.gmra.mrb[24].mxu1 %v13082_v51  ;;  %v12308_v19 = vpop.eup %12307  ;;  %v1602_v40 = vmul.f32 %v12306_v28, %v12966_v0  ;;  %v10210_v33 = vcombine.high %v13103_v34, %v13108_v59 }
 0x37b   : > { %2443 = vmatprep.mubr.bf16.mxu0 %v16096_v11  ;;  %2556 = vmatprep.mubr.bf16.mxu1 %v16096_v11  ;;  %v1601_v12 = vmul.f32 %v12308_v19, %v12959_v55 }
 0x37c   : > { %2616 = vmatpush1.bf16.msra.mxu0 %v10269_v39  ;;  %2729 = vmatpush1.bf16.msra.mxu1 %v10271_v41  ;;  %v13117_v39 = vadd.f32 %v13019_v14, %v1622_v46  ;;  %v10319_v41 = vcombine.low %v981_v6, %v989_v58  ;;  %v1624_v13 = vmul.f32 %v13012_v26, %v1602_v40  ;;  %v894_v58 = vld [vmem:[#allocation2 + $0xe0] sm:$0xff]  ;;  %v927_v40 = vld [vmem:[#allocation2 + $0x1e8] sm:$0xff] }
 0x37d   : > { %2617 = vmatprep.subr.bf16.mxu0 %v10286_v38  ;;  %2730 = vmatprep.subr.bf16.mxu1 %v10288_v49  ;;  %v10212_v38 = vcombine.high %v13110_v35, %v13112_v42  ;;  %v13125_v49 = vadd.f32 %v13019_v14, %v1621_v10  ;;  %v12310_v16 = vpop.eup %12309  ;;  %v1623_v20 = vmul.f32 %v13012_v26, %v1601_v12  ;;  %v911_v10 = vld [vmem:[#allocation2 + $0x168] sm:$0xff]  ;;  %v934_v12 = vld [vmem:[#allocation2 + $0x220] sm:$0xff] }
 0x37e   : > { %16121 = vst [vmem:[#allocation8_spill] sm:$0xff] %v13117_v39  ;;  %v12312_v55 = vpop.eup %12311  ;;  %v13139_v61 = vadd.f32 %v13019_v14, %v1624_v13  ;;  %v1604_v50 = vmul.f32 %v12310_v16, %v12976_v23  ;;  %v10211_v46 = vcombine.low %v13110_v35, %v13112_v42  ;;  %v918_v35 = vld [vmem:[#allocation2 + $0x1a0] sm:$0xff]  ;;  %v935_v16 = vld [vmem:[#allocation2 + $0x228] sm:$0xff] }
 0x37f   : > { %v13130_v0 = vpack.c.bf16 %v13117_v39, %v13125_v49  ;;  %v13143_v45 = vadd.f32 %v13019_v14, %v1623_v20  ;;  %v926_v42 = vld [vmem:[#allocation2 + $0x1e0] sm:$0xff]  ;;  %v943_v20 = vld [vmem:[#allocation2 + $0x268] sm:$0xff] }
 0x380   : > { %2618 = vmatpush1.bf16.msra.mxu0 %v10285_v52  ;;  %2731 = vmatpush1.bf16.msra.mxu1 %v10287_v57  ;;  %16122 = vst [vmem:[#allocation9_spill] sm:$0xff] %v13139_v61  ;;  %v1603_v52 = vmul.f32 %v12312_v55, %v12969_v8  ;;  %v1626_v56 = vmul.f32 %v13012_v26, %v1604_v50  ;;  %v942_v13 = vld [vmem:[#allocation2 + $0x260] sm:$0xff] }
 0x381   : > { %2619 = vmatprep.subr.bf16.mxu0 %v10302_v60  ;;  %2732 = vmatprep.subr.bf16.mxu1 %v10304_v63  ;;  %16123 = vst [vmem:[#allocation10_spill] sm:$0xff] %v13143_v45  ;;  %v13148_v54 = vpack.c.bf16 %v13139_v61, %v13143_v45  ;;  %v10257_v55 = vcombine.low %v918_v35, %v926_v42 }
 0x382   : > { %2444 = vmatmul.mubr.bf16.gmra.mrb[28].mxu0 %v13100_v9  ;;  %2557 = vmatmul.mubr.bf16.gmra.mrb[28].mxu1 %v13100_v9  ;;  %v12314_v57 = vpop.eup %12313  ;;  %v1625_v15 = vmul.f32 %v13012_v26, %v1603_v52  ;;  %v13157_v8 = vadd.f32 %v13019_v14, %v1626_v56  ;;  %v10274_v52 = vcombine.high %v934_v12, %v942_v13 }
 0x383   : > { %2453 = vmatprep.mubr.bf16.mxu0 %v16096_v11  ;;  %2566 = vmatprep.mubr.bf16.mxu1 %v16096_v11  ;;  %v12316_v60 = vpop.eup %12315  ;;  %v1606_v23 = vmul.f32 %v12314_v57, %v12986_v24  ;;  %v10276_v56 = vcombine.high %v935_v16, %v943_v20  ;;  %v950_v57 = vld [vmem:[#allocation2 + $0x2a0] sm:$0xff] }
 0x384   : > { %2620 = vmatpush1.bf16.msra.mxu0 %v10301_v7  ;;  %2733 = vmatpush1.bf16.msra.mxu1 %v10303_v25  ;;  %16124 = vst [vmem:[#allocation11_spill] sm:$0xff] %v13157_v8  ;;  %v13161_v63 = vadd.f32 %v13019_v14, %v1625_v15  ;;  %v1605_v1 = vmul.f32 %v12316_v60, %v12979_v29  ;;  %v895_v7 = vld [vmem:[#allocation2 + $0xe8] sm:$0xff]  ;;  %v902_v25 = vld [vmem:[#allocation2 + $0x120] sm:$0xff] }
 0x385   : > { %2621 = vmatprep.subr.bf16.mxu0 %v10318_v48  ;;  %2734 = vmatprep.subr.bf16.mxu1 %v10320_v21  ;;  %v1628_v30 = vmul.f32 %v13012_v26, %v1606_v23  ;;  %v10228_v32 = vcombine.high %v887_v53, %v895_v7  ;;  %v910_v48 = vld [vmem:[#allocation2 + $0x160] sm:$0xff]  ;;  %v903_v21 = vld [vmem:[#allocation2 + $0x128] sm:$0xff]  ;;  %v10227_v37 = vcombine.low %v887_v53, %v895_v7 }
 0x386   : > { %16125 = vst [vmem:[#allocation12_spill] sm:$0xff] %v13161_v63  ;;  %v13166_v4 = vpack.c.bf16 %v13157_v8, %v13161_v63  ;;  %v1627_v5 = vmul.f32 %v13012_v26, %v1605_v1  ;;  %v886_v26 = vld [vmem:[#allocation2 + $0xa0] sm:$0xff]  ;;  %v10243_v62 = vcombine.low %v903_v21, %v911_v10  ;;  %v951_v60 = vld [vmem:[#allocation2 + $0x2a8] sm:$0xff]  ;;  %v10273_v1 = vcombine.low %v934_v12, %v942_v13  ;;  %v888_v13 = vld [vmem:[#allocation2 + $0xb0] sm:$0xff] }
 0x387   : > { %v13175_v24 = vadd.f32 %v13019_v14, %v1628_v30  ;;  %v10226_v28 = vcombine.high %v886_v26, %v894_v58  ;;  %v10225_v19 = vcombine.low %v886_v26, %v894_v58  ;;  %v958_v15 = vld [vmem:[#allocation2 + $0x2e0] sm:$0xff]  ;;  %v959_v23 = vld [vmem:[#allocation2 + $0x2e8] sm:$0xff]  ;;  %v10275_v30 = vcombine.low %v935_v16, %v943_v20  ;;  %v896_v16 = vld [vmem:[#allocation2 + $0xf0] sm:$0xff] }
 0x388   : > { %2622 = vmatpush1.bf16.msra.mxu0 %v10317_v44  ;;  %2735 = vmatpush1.bf16.msra.mxu1 %v10319_v41  ;;  %v13178_v29 = vadd.f32 %v13019_v14, %v1627_v5  ;;  %v10209_v14 = vcombine.low %v13103_v34, %v13108_v59  ;;  %v10242_v34 = vcombine.high %v902_v25, %v910_v48  ;;  %v919_v44 = vld [vmem:[#allocation2 + $0x1a8] sm:$0xff]  ;;  %v966_v58 = vld [vmem:[#allocation2 + $0x320] sm:$0xff]  ;;  %v889_v20 = vld [vmem:[#allocation2 + $0xb8] sm:$0xff] }
 0x389   : > { %2833 = vmatprep.subr.bf16.mxu0 %v10210_v33  ;;  %2946 = vmatprep.subr.bf16.mxu1 %v10212_v38  ;;  %16126 = vst [vmem:[#allocation13_spill] sm:$0xff] %v13175_v24  ;;  %v10244_v59 = vcombine.high %v903_v21, %v911_v10  ;;  %v10241_v41 = vcombine.low %v902_v25, %v910_v48  ;;  %v974_v53 = vld [vmem:[#allocation2 + $0x360] sm:$0xff]  ;;  %v967_v7 = vld [vmem:[#allocation2 + $0x328] sm:$0xff] }
 0x38a   : > { %2454 = vmatmul.mubr.bf16.gmra.mrb[32].mxu0 %v13130_v0  ;;  %2567 = vmatmul.mubr.bf16.gmra.mrb[32].mxu1 %v13130_v0  ;;  %16127 = vst [vmem:[#allocation14_spill] sm:$0xff] %v13178_v29  ;;  %v13182_v6 = vpack.c.bf16 %v13175_v24, %v13178_v29  ;;  %v10258_v33 = vcombine.high %v918_v35, %v926_v42  ;;  %v982_v48 = vld [vmem:[#allocation2 + $0x3a0] sm:$0xff]  ;;  %v983_v10 = vld [vmem:[#allocation2 + $0x3a8] sm:$0xff]  ;;  %v872_v42 = vld [vmem:[#allocation2 + $0x30] sm:$0xff] }
 0x38b   : > { %2463 = vmatprep.mubr.bf16.mxu0 %v16096_v11  ;;  %2576 = vmatprep.mubr.bf16.mxu1 %v16096_v11  ;;  %v10260_v38 = vcombine.high %v919_v44, %v927_v40  ;;  %v10259_v50 = vcombine.low %v919_v44, %v927_v40  ;;  %v10290_v5 = vcombine.high %v950_v57, %v958_v15  ;;  %v990_v21 = vld [vmem:[#allocation2 + $0x3e0] sm:$0xff]  ;;  %v880_v44 = vld [vmem:[#allocation2 + $0x70] sm:$0xff]  ;;  %v873_v40 = vld [vmem:[#allocation2 + $0x38] sm:$0xff] }
 0x38c   : > { %v10292_v26 = vcombine.high %v951_v60, %v959_v23  ;;  %v10291_v25 = vcombine.low %v951_v60, %v959_v23  ;;  %v912_v60 = vld [vmem:[#allocation2 + $0x170] sm:$0xff]  ;;  %v905_v23 = vld [vmem:[#allocation2 + $0x138] sm:$0xff] }
 0x392   : > { %2464 = vmatmul.mubr.bf16.gmra.mrb[36].mxu0 %v13148_v54  ;;  %2577 = vmatmul.mubr.bf16.gmra.mrb[36].mxu1 %v13148_v54 }
 0x393   : > { %2473 = vmatprep.mubr.bf16.mxu0 %v16096_v11  ;;  %2586 = vmatprep.mubr.bf16.mxu1 %v16096_v11 }
 0x39a   : > { %2474 = vmatmul.mubr.bf16.gmra.mrb[40].mxu0 %v13166_v4  ;;  %2587 = vmatmul.mubr.bf16.gmra.mrb[40].mxu1 %v13166_v4 }
 0x39b   : > { %2483 = vmatprep.mubr.bf16.mxu0 %v16096_v11  ;;  %2596 = vmatprep.mubr.bf16.mxu1 %v16096_v11 }
 0x3a2   : > { %2484 = vmatmul.mubr.bf16.gmra.mrb[44].mxu0 %v13182_v6  ;;  %2597 = vmatmul.mubr.bf16.gmra.mrb[44].mxu1 %v13182_v6 }
 0x3a3   : > { %2639 = vmatprep.mubr.bf16.mxu0 %v16096_v11  ;;  %2752 = vmatprep.mubr.bf16.mxu1 %v16096_v11 }
 0x3aa   : > { %2640 = vmatmul.mubr.bf16.vlgmr.msra.gmra.mrb[48].mxu0 %v13032_v17  ;;  %2753 = vmatmul.mubr.bf16.vlgmr.msra.gmra.mrb[48].mxu1 %v13032_v17 }
 0x3ab   : > { %2834 = vmatpush1.bf16.msra.mxu0 %v10209_v14  ;;  %2947 = vmatpush1.bf16.msra.mxu1 %v10211_v46  ;;  %v975_v14 = vld [vmem:[#allocation2 + $0x368] sm:$0xff]  ;;  %v10289_v46 = vcombine.low %v950_v57, %v958_v15  ;;  %v10230_v57 = vcombine.high %v888_v13, %v896_v16 }
 0x3ac   : > { %2649 = vmatprep.mubr.bf16.mxu0 %v16096_v11  ;;  %2762 = vmatprep.mubr.bf16.mxu1 %v16096_v11 }
 0x3ad   : > { %2835 = vmatprep.subr.bf16.mxu0 %v10226_v28  ;;  %2948 = vmatprep.subr.bf16.mxu1 %v10228_v32  ;;  %v10306_v28 = vcombine.high %v966_v58, %v974_v53  ;;  %v10308_v32 = vcombine.high %v967_v7, %v975_v14 }
 0x3af   : > { %2836 = vmatpush1.bf16.msra.mxu0 %v10225_v19  ;;  %2949 = vmatpush1.bf16.msra.mxu1 %v10227_v37  ;;  %v991_v19 = vld [vmem:[#allocation2 + $0x3e8] sm:$0xff]  ;;  %v10305_v37 = vcombine.low %v966_v58, %v974_v53  ;;  %v920_v53 = vld [vmem:[#allocation2 + $0x1b0] sm:$0xff] }
 0x3b0   : > { %2837 = vmatprep.subr.bf16.mxu0 %v10242_v34  ;;  %2950 = vmatprep.subr.bf16.mxu1 %v10244_v59  ;;  %v10307_v34 = vcombine.low %v967_v7, %v975_v14  ;;  %v10322_v59 = vcombine.high %v982_v48, %v990_v21  ;;  %v10324_v35 = vcombine.high %v983_v10, %v991_v19  ;;  %v928_v7 = vld [vmem:[#allocation2 + $0x1f0] sm:$0xff]  ;;  %v921_v14 = vld [vmem:[#allocation2 + $0x1b8] sm:$0xff] }
 0x3b2   : > { %2650 = vmatmul.mubr.bf16.gmra.mrb[52].mxu0 %v13064_v27  ;;  %2763 = vmatmul.mubr.bf16.gmra.mrb[52].mxu1 %v13064_v27 }
 0x3b3   : > { %2659 = vmatprep.mubr.bf16.mxu0 %v16096_v11  ;;  %2772 = vmatprep.mubr.bf16.mxu1 %v16096_v11 }
 0x3b4   : > { %2838 = vmatpush1.bf16.msra.mxu0 %v10241_v41  ;;  %2951 = vmatpush1.bf16.msra.mxu1 %v10243_v62  ;;  %v881_v41 = vld [vmem:[#allocation2 + $0x78] sm:$0xff]  ;;  %v10321_v62 = vcombine.low %v982_v48, %v990_v21  ;;  %v936_v21 = vld [vmem:[#allocation2 + $0x230] sm:$0xff] }
 0x3b5   : > { %2839 = vmatprep.subr.bf16.mxu0 %v10258_v33  ;;  %2952 = vmatprep.subr.bf16.mxu1 %v10260_v38  ;;  %v10323_v33 = vcombine.low %v983_v10, %v991_v19  ;;  %v10214_v38 = vcombine.high %v872_v42, %v880_v44  ;;  %v10216_v12 = vcombine.high %v873_v40, %v881_v41  ;;  %v944_v10 = vld [vmem:[#allocation2 + $0x270] sm:$0xff]  ;;  %v937_v19 = vld [vmem:[#allocation2 + $0x238] sm:$0xff] }
 0x3b8   : > { %2840 = vmatpush1.bf16.msra.mxu0 %v10257_v55  ;;  %2953 = vmatpush1.bf16.msra.mxu1 %v10259_v50  ;;  %v897_v55 = vld [vmem:[#allocation2 + $0xf8] sm:$0xff]  ;;  %v10213_v50 = vcombine.low %v872_v42, %v880_v44  ;;  %v952_v44 = vld [vmem:[#allocation2 + $0x2b0] sm:$0xff] }
 0x3b9   : > { %2841 = vmatprep.subr.bf16.mxu0 %v10274_v52  ;;  %2954 = vmatprep.subr.bf16.mxu1 %v10276_v56  ;;  %v10215_v52 = vcombine.low %v873_v40, %v881_v41  ;;  %v904_v56 = vld [vmem:[#allocation2 + $0x130] sm:$0xff]  ;;  %v10232_v15 = vcombine.high %v889_v20, %v897_v55  ;;  %v953_v41 = vld [vmem:[#allocation2 + $0x2b8] sm:$0xff] }
 0x3ba   : > { %2660 = vmatmul.mubr.bf16.gmra.mrb[56].mxu0 %v13082_v51  ;;  %2773 = vmatmul.mubr.bf16.gmra.mrb[56].mxu1 %v13082_v51  ;;  %v960_v40 = vld [vmem:[#allocation2 + $0x2f0] sm:$0xff] }
 0x3bb   : > { %2669 = vmatprep.mubr.bf16.mxu0 %v16096_v11  ;;  %2782 = vmatprep.mubr.bf16.mxu1 %v16096_v11 }
 0x3bc   : > { %2842 = vmatpush1.bf16.msra.mxu0 %v10273_v1  ;;  %2955 = vmatpush1.bf16.msra.mxu1 %v10275_v30  ;;  %v913_v1 = vld [vmem:[#allocation2 + $0x178] sm:$0xff]  ;;  %v10229_v30 = vcombine.low %v888_v13, %v896_v16  ;;  %v968_v16 = vld [vmem:[#allocation2 + $0x330] sm:$0xff] }
 0x3bd   : > { %2843 = vmatprep.subr.bf16.mxu0 %v10290_v5  ;;  %2956 = vmatprep.subr.bf16.mxu1 %v10292_v26  ;;  %v10231_v5 = vcombine.low %v889_v20, %v897_v55  ;;  %v10246_v26 = vcombine.high %v904_v56, %v912_v60  ;;  %v10248_v58 = vcombine.high %v905_v23, %v913_v1  ;;  %v976_v20 = vld [vmem:[#allocation2 + $0x370] sm:$0xff]  ;;  %v969_v55 = vld [vmem:[#allocation2 + $0x338] sm:$0xff] }
 0x3c0   : > { %2844 = vmatpush1.bf16.msra.mxu0 %v10289_v46  ;;  %2957 = vmatpush1.bf16.msra.mxu1 %v10291_v25  ;;  %v929_v46 = vld [vmem:[#allocation2 + $0x1f8] sm:$0xff]  ;;  %v10245_v25 = vcombine.low %v904_v56, %v912_v60  ;;  %v984_v60 = vld [vmem:[#allocation2 + $0x3b0] sm:$0xff] }
 0x3c1   : > { %2845 = vmatprep.subr.bf16.mxu0 %v10306_v28  ;;  %2958 = vmatprep.subr.bf16.mxu1 %v10308_v32  ;;  %v10247_v28 = vcombine.low %v905_v23, %v913_v1  ;;  %v10262_v32 = vcombine.high %v920_v53, %v928_v7  ;;  %v10264_v48 = vcombine.high %v921_v14, %v929_v46  ;;  %v992_v23 = vld [vmem:[#allocation2 + $0x3f0] sm:$0xff]  ;;  %v985_v1 = vld [vmem:[#allocation2 + $0x3b8] sm:$0xff] }
 0x3c2   : > { %2670 = vmatmul.mubr.bf16.gmra.mrb[60].mxu0 %v13100_v9  ;;  %2783 = vmatmul.mubr.bf16.gmra.mrb[60].mxu1 %v13100_v9 }
 0x3c3   : > { %2679 = vmatprep.mubr.bf16.mxu0 %v16096_v11  ;;  %2792 = vmatprep.mubr.bf16.mxu1 %v16096_v11 }
 0x3c4   : > { %2846 = vmatpush1.bf16.msra.mxu0 %v10305_v37  ;;  %2959 = vmatpush1.bf16.msra.mxu1 %v10307_v34  ;;  %v945_v37 = vld [vmem:[#allocation2 + $0x278] sm:$0xff]  ;;  %v10261_v34 = vcombine.low %v920_v53, %v928_v7  ;;  %v10325_v7 = vcombine.low %v984_v60, %v992_v23 }
 0x3c5   : > { %2847 = vmatprep.subr.bf16.mxu0 %v10322_v59  ;;  %2960 = vmatprep.subr.bf16.mxu1 %v10324_v35  ;;  %v10263_v59 = vcombine.low %v921_v14, %v929_v46  ;;  %v10278_v35 = vcombine.high %v936_v21, %v944_v10  ;;  %v10280_v42 = vcombine.high %v937_v19, %v945_v37  ;;  %v11989_v46 = vld [vmem:[#allocation4 + $0x40] sm:$0xff]  }
 0x3c8   : > { %2848 = vmatpush1.bf16.msra.mxu0 %v10321_v62  ;;  %2961 = vmatpush1.bf16.msra.mxu1 %v10323_v33  ;;  %v961_v62 = vld [vmem:[#allocation2 + $0x2f8] sm:$0xff]  ;;  %v10277_v33 = vcombine.low %v936_v21, %v944_v10  ;;  %v11995_v21 = vld [vmem:[#allocation4 + $0xc8] sm:$0xff]  }
 0x3c9   : > { %3059 = vmatprep.subr.bf16.mxu0 %v10214_v38  ;;  %3172 = vmatprep.subr.bf16.mxu1 %v10216_v12  ;;  %v10279_v38 = vcombine.low %v937_v19, %v945_v37  ;;  %v10294_v12 = vcombine.high %v952_v44, %v960_v40  ;;  %v10296_v13 = vcombine.high %v953_v41, %v961_v62  ;;  %v11994_v10 = vld [vmem:[#allocation4 + $0x8] sm:$0xff]   ;;  %v11997_v37 = vld [vmem:[#allocation4 + $0x50] sm:$0xff]  }
 0x3ca   : > { %2680 = vmatmul.mubr.bf16.gmra.mrb[64].mxu0 %v13130_v0  ;;  %2793 = vmatmul.mubr.bf16.gmra.mrb[64].mxu1 %v13130_v0  ;;  %v10295_v56 = vcombine.low %v953_v41, %v961_v62  ;;  %v11996_v19 = vld [vmem:[#allocation4 + $0x88] sm:$0xff]   ;;  %v12002_v41 = vld [vmem:[#allocation4 + $0x18] sm:$0xff]  }
 0x3cb   : > { %2689 = vmatprep.mubr.bf16.mxu0 %v16096_v11  ;;  %2802 = vmatprep.mubr.bf16.mxu1 %v16096_v11  ;;  %v12004_v62 = vld [vmem:[#allocation4 + $0x98] sm:$0xff]  }
 0x3d2   : > { %2690 = vmatmul.mubr.bf16.gmra.mrb[68].mxu0 %v13148_v54  ;;  %2803 = vmatmul.mubr.bf16.gmra.mrb[68].mxu1 %v13148_v54 }
 0x3d3   : > { %2699 = vmatprep.mubr.bf16.mxu0 %v16096_v11  ;;  %2812 = vmatprep.mubr.bf16.mxu1 %v16096_v11 }
 0x3da   : > { %2700 = vmatmul.mubr.bf16.gmra.mrb[72].mxu0 %v13166_v4  ;;  %2813 = vmatmul.mubr.bf16.gmra.mrb[72].mxu1 %v13166_v4 }
 0x3db   : > { %2709 = vmatprep.mubr.bf16.mxu0 %v16096_v11  ;;  %2822 = vmatprep.mubr.bf16.mxu1 %v16096_v11 }
 0x3e2   : > { %2710 = vmatmul.mubr.bf16.gmra.mrb[76].mxu0 %v13182_v6  ;;  %2823 = vmatmul.mubr.bf16.gmra.mrb[76].mxu1 %v13182_v6 }
 0x3e3   : > { %2865 = vmatprep.mubr.bf16.mxu0 %v16096_v11  ;;  %2978 = vmatprep.mubr.bf16.mxu1 %v16096_v11 }
 0x3ea   : > { %2866 = vmatmul.mubr.bf16.vlgmr.msra.gmra.mrb[80].mxu0 %v13032_v17  ;;  %2979 = vmatmul.mubr.bf16.vlgmr.msra.gmra.mrb[80].mxu1 %v13032_v17 }
 0x3eb   : > { %3060 = vmatpush1.bf16.msra.mxu0 %v10213_v50  ;;  %3173 = vmatpush1.bf16.msra.mxu1 %v10215_v52  ;;  %v977_v50 = vld [vmem:[#allocation2 + $0x378] sm:$0xff]  ;;  %v10293_v52 = vcombine.low %v952_v44, %v960_v40 }
 0x3ec   : > { %2875 = vmatprep.mubr.bf16.mxu0 %v16096_v11  ;;  %2988 = vmatprep.mubr.bf16.mxu1 %v16096_v11  ;;  %v12003_v44 = vld [vmem:[#allocation4 + $0xd8] sm:$0xff]  }
 0x3ed   : > { %3061 = vmatprep.subr.bf16.mxu0 %v10230_v57  ;;  %3174 = vmatprep.subr.bf16.mxu1 %v10232_v15  ;;  %v10310_v57 = vcombine.high %v968_v16, %v976_v20  ;;  %v10312_v15 = vcombine.high %v969_v55, %v977_v50 }
 0x3ef   : > { %3062 = vmatpush1.bf16.msra.mxu0 %v10229_v30  ;;  %3175 = vmatpush1.bf16.msra.mxu1 %v10231_v5  ;;  %v993_v30 = vld [vmem:[#allocation2 + $0x3f8] sm:$0xff]  ;;  %v10309_v5 = vcombine.low %v968_v16, %v976_v20 }
 0x3f0   : > { %3063 = vmatprep.subr.bf16.mxu0 %v10246_v26  ;;  %3176 = vmatprep.subr.bf16.mxu1 %v10248_v58  ;;  %v10311_v26 = vcombine.low %v969_v55, %v977_v50  ;;  %v10326_v58 = vcombine.high %v984_v60, %v992_v23  ;;  %v10328_v53 = vcombine.high %v985_v1, %v993_v30  ;;  %v12006_v55 = vld [vmem:[#allocation4 + $0x20] sm:$0xff]  }
 0x3f1   : > { %v10327_v14 = vcombine.low %v985_v1, %v993_v30  ;;  %v12008_v50 = vld [vmem:[#allocation4 + $0xa0] sm:$0xff]   ;;  %v12012_v1 = vld [vmem:[#allocation4 + $0xa8] sm:$0xff]  }
 0x3f2   : > { %2876 = vmatmul.mubr.bf16.gmra.mrb[84].mxu0 %v13064_v27  ;;  %2989 = vmatmul.mubr.bf16.gmra.mrb[84].mxu1 %v13064_v27 }
 0x3f3   : > { %2885 = vmatprep.mubr.bf16.mxu0 %v16096_v11  ;;  %2998 = vmatprep.mubr.bf16.mxu1 %v16096_v11 }
 0x3f4   : > { %3064 = vmatpush1.bf16.msra.mxu0 %v10245_v25  ;;  %3177 = vmatpush1.bf16.msra.mxu1 %v10247_v28  ;;  %v11991_v25 = vld [vmem:[#allocation4 + $0xc0] sm:$0xff]  }
 0x3f5   : > { %3065 = vmatprep.subr.bf16.mxu0 %v10262_v32  ;;  %3178 = vmatprep.subr.bf16.mxu1 %v10264_v48  ;;  %v11990_v28 = vld [vmem:[#allocation4] sm:$0xff]   ;;  %v11993_v48 = vld [vmem:[#allocation4 + $0x48] sm:$0xff]  }
 0x3f6   : > { %v11992_v32 = vld [vmem:[#allocation4 + $0x80] sm:$0xff]  }
 0x3f8   : > { %3066 = vmatpush1.bf16.msra.mxu0 %v10261_v34  ;;  %3179 = vmatpush1.bf16.msra.mxu1 %v10263_v59  ;;  %v11999_v34 = vld [vmem:[#allocation4 + $0xd0] sm:$0xff]   ;;  %v1661_v59 = vlaneseq }
 0x3f9   : > { %3067 = vmatprep.subr.bf16.mxu0 %v10278_v35  ;;  %3180 = vmatprep.subr.bf16.mxu1 %v10280_v42  ;;  %v11998_v35 = vld [vmem:[#allocation4 + $0x10] sm:$0xff]  }
 0x3fa   : > { %2886 = vmatmul.mubr.bf16.gmra.mrb[88].mxu0 %v13082_v51  ;;  %2999 = vmatmul.mubr.bf16.gmra.mrb[88].mxu1 %v13082_v51  ;;  %v12000_v42 = vld [vmem:[#allocation4 + $0x90] sm:$0xff]   ;;  %v13262_v40 = vshrl.u32 %v1661_v59, 7 }
 0x3fb   : > { %2895 = vmatprep.mubr.bf16.mxu0 %v16096_v11  ;;  %3008 = vmatprep.mubr.bf16.mxu1 %v16096_v11  ;;  %v12016_v59 = vld [vmem:[#allocation4 + $0xb0] sm:$0xff]  }
 0x3fc   : > { %3068 = vmatpush1.bf16.msra.mxu0 %v10277_v33  ;;  %3181 = vmatpush1.bf16.msra.mxu1 %v10279_v38  ;;  %v12005_v33 = vld [vmem:[#allocation4 + $0x60] sm:$0xff]   ;;  %v13278_v16 = vsub.s32 1, %v13262_v40  ;;  %v13281_v20 = vsub.s32 3, %v13262_v40  ;;  %v13442_v8 = vsub.s32 5, %v13262_v40 }
 0x3fd   : > { %3069 = vmatprep.subr.bf16.mxu0 %v10294_v12  ;;  %3182 = vmatprep.subr.bf16.mxu1 %v10296_v13  ;;  %v12007_v38 = vld [vmem:[#allocation4 + $0xe0] sm:$0xff]   ;;  %v13267_v12 = vsub.s32 0, %v13262_v40  ;;  %v13270_v13 = vsub.s32 2, %v13262_v40 }
 0x400   : > { %3070 = vmatpush1.bf16.msra.mxu0 %v10293_v52  ;;  %3183 = vmatpush1.bf16.msra.mxu1 %v10295_v56  ;;  %v12009_v52 = vld [vmem:[#allocation4 + $0x68] sm:$0xff]  }
 0x401   : > { %3071 = vmatprep.subr.bf16.mxu0 %v10310_v57  ;;  %3184 = vmatprep.subr.bf16.mxu1 %v10312_v15  ;;  %v12011_v56 = vld [vmem:[#allocation4 + $0xe8] sm:$0xff]  }
 0x402   : > { %2896 = vmatmul.mubr.bf16.gmra.mrb[92].mxu0 %v13100_v9  ;;  %3009 = vmatmul.mubr.bf16.gmra.mrb[92].mxu1 %v13100_v9 }
 0x403   : > { %2905 = vmatprep.mubr.bf16.mxu0 %v16096_v11  ;;  %3018 = vmatprep.mubr.bf16.mxu1 %v16096_v11 }
 0x404   : > { %3072 = vmatpush1.bf16.msra.mxu0 %v10309_v5  ;;  %3185 = vmatpush1.bf16.msra.mxu1 %v10311_v26  ;;  %v12013_v26 = vld [vmem:[#allocation4 + $0x70] sm:$0xff]  }
 0x405   : > { %3073 = vmatprep.subr.bf16.mxu0 %v10326_v58  ;;  %3186 = vmatprep.subr.bf16.mxu1 %v10328_v53  ;;  %v12015_v58 = vld [vmem:[#allocation4 + $0xf0] sm:$0xff]  }
 0x408   : > { %3074 = vmatpush1.bf16.msra.mxu0 %v10325_v7  ;;  %3187 = vmatpush1.bf16.msra.mxu1 %v10327_v14 }
 0x409   : > { %10788 = vmatprep.subr.bf16.mxu0 %v11989_v46  ;;  %10852 = vmatprep.subr.bf16.mxu1 %v11991_v25 }
 0x40a   : > { %2906 = vmatmul.mubr.bf16.gmra.mrb[96].mxu0 %v13130_v0  ;;  %3019 = vmatmul.mubr.bf16.gmra.mrb[96].mxu1 %v13130_v0 }
 0x40b   : > { %2915 = vmatprep.mubr.bf16.mxu0 %v16096_v11  ;;  %3028 = vmatprep.mubr.bf16.mxu1 %v16096_v11 }
 0x412   : > { %2916 = vmatmul.mubr.bf16.gmra.mrb[100].mxu0 %v13148_v54  ;;  %3029 = vmatmul.mubr.bf16.gmra.mrb[100].mxu1 %v13148_v54 }
 0x413   : > { %2925 = vmatprep.mubr.bf16.mxu0 %v16096_v11  ;;  %3038 = vmatprep.mubr.bf16.mxu1 %v16096_v11 }
 0x41a   : > { %2926 = vmatmul.mubr.bf16.gmra.mrb[104].mxu0 %v13166_v4  ;;  %3039 = vmatmul.mubr.bf16.gmra.mrb[104].mxu1 %v13166_v4 }
 0x41b   : > { %2935 = vmatprep.mubr.bf16.mxu0 %v16096_v11  ;;  %3048 = vmatprep.mubr.bf16.mxu1 %v16096_v11 }
 0x422   : > { %2936 = vmatmul.mubr.bf16.gmra.mrb[108].mxu0 %v13182_v6  ;;  %3049 = vmatmul.mubr.bf16.gmra.mrb[108].mxu1 %v13182_v6 }
 0x423   : > { %3091 = vmatprep.mubr.bf16.mxu0 %v16096_v11  ;;  %3204 = vmatprep.mubr.bf16.mxu1 %v16096_v11 }
 0x42a   : > { %3092 = vmatmul.mubr.bf16.vlgmr.msra.gmra.mrb[112].mxu0 %v13032_v17  ;;  %3205 = vmatmul.mubr.bf16.vlgmr.msra.gmra.mrb[112].mxu1 %v13032_v17  ;;  %v12001_v17 = vld [vmem:[#allocation4 + $0x58] sm:$0xff]  }
 0x42b   : > { %10789 = vmatpush3.bf16.msra.mxu0 %v11990_v28  ;;  %10853 = vmatpush3.bf16.msra.mxu1 %v11992_v32 }
 0x42c   : > { %3101 = vmatprep.mubr.bf16.mxu0 %v16096_v11  ;;  %3214 = vmatprep.mubr.bf16.mxu1 %v16096_v11 }
 0x42d   : > { %10790 = vmatprep.subr.bf16.mxu0 %v11993_v48  ;;  %10854 = vmatprep.subr.bf16.mxu1 %v11995_v21 }
 0x42f   : > { %10791 = vmatpush3.bf16.msra.mxu0 %v11994_v10  ;;  %10855 = vmatpush3.bf16.msra.mxu1 %v11996_v19 }
 0x430   : > { %10792 = vmatprep.subr.bf16.mxu0 %v11997_v37  ;;  %10856 = vmatprep.subr.bf16.mxu1 %v11999_v34  ;;  %v12014_v34 = vld [vmem:[#allocation4 + $0x30] sm:$0xff]  }
 0x432   : > { %3102 = vmatmul.mubr.bf16.gmra.mrb[116].mxu0 %v13064_v27  ;;  %3215 = vmatmul.mubr.bf16.gmra.mrb[116].mxu1 %v13064_v27  ;;  %v13275_v27 = vld [vmem:[%s16085_s10] sm:$0xff] }
 0x433   : > { %3111 = vmatprep.mubr.bf16.mxu0 %v16096_v11  ;;  %3224 = vmatprep.mubr.bf16.mxu1 %v16096_v11  ;;  %v13287_v57 = vrot.slane %v13275_v27, %v13267_v12  ;;  %v13291_v15 = vrot.slane %v13275_v27, %v13270_v13  ;;  %v13295_v60 = vrot.slane %v13275_v27, %v13278_v16 }
 0x434   : > { %10793 = vmatpush3.bf16.msra.mxu0 %v11998_v35  ;;  %10857 = vmatpush3.bf16.msra.mxu1 %v12000_v42  ;;  %v13299_v23 = vrot.slane %v13275_v27, %v13281_v20 }
 0x435   : > { %10794 = vmatprep.subr.bf16.mxu0 %v12001_v17  ;;  %10858 = vmatprep.subr.bf16.mxu1 %v12003_v44  ;;  %v12017_v17 = vld [vmem:[#allocation4 + $0x78] sm:$0xff]  }
 0x436   : > { %v12019_v44 = vld [vmem:[#allocation4 + $0xf8] sm:$0xff]  }
 0x438   : > { %10795 = vmatpush3.bf16.msra.mxu0 %v12002_v41  ;;  %10859 = vmatpush3.bf16.msra.mxu1 %v12004_v62 }
 0x439   : > { %10796 = vmatprep.subr.bf16.mxu0 %v12005_v33  ;;  %10860 = vmatprep.subr.bf16.mxu1 %v12007_v38 }
 0x43a   : > { %3112 = vmatmul.mubr.bf16.gmra.mrb[120].mxu0 %v13082_v51  ;;  %3225 = vmatmul.mubr.bf16.gmra.mrb[120].mxu1 %v13082_v51  ;;  %v12010_v51 = vld [vmem:[#allocation4 + $0x28] sm:$0xff]  }
 0x43b   : > { %3121 = vmatprep.mubr.bf16.mxu0 %v16096_v11  ;;  %3234 = vmatprep.mubr.bf16.mxu1 %v16096_v11 }
 0x43c   : > { %10797 = vmatpush3.bf16.msra.mxu0 %v12006_v55  ;;  %10861 = vmatpush3.bf16.msra.mxu1 %v12008_v50 }
 0x43d   : > { %v2415_v30 = vpop.f32.mrb[16].mxu0  ;;  %v2528_v5 = vpop.f32.mrb[16].mxu1  ;;  %10798 = vmatprep.subr.bf16.mxu0 %v12009_v52  ;;  %10862 = vmatprep.subr.bf16.mxu1 %v12011_v56 }
 0x43e   : > { %v2416_v53 = vadd.f32 %v2415_v30, %v13287_v57  ;;  %v2529_v7 = vadd.f32 %v2528_v5, %v13291_v15  ;;  %v2417_v14 = vpop.f32.mrb[17].mxu0  ;;  %v2530_v46 = vpop.f32.mrb[17].mxu1  ;;  %v12018_v30 = vld [vmem:[#allocation4 + $0x38] sm:$0xff]  }
 0x43f   : > { %v2418_v25 = vadd.f32 %v2417_v14, %v13295_v60  ;;  %v2531_v28 = vadd.f32 %v2530_v46, %v13299_v23  ;;  %v2419_v32 = vpop.f32.mrb[18].mxu0  ;;  %v2532_v48 = vpop.f32.mrb[18].mxu1  ;;  %v12020_v5 = vld [vmem:[#allocation4 + $0xb8] sm:$0xff]   ;;  %v12023_v14 = vld [vmem:[#allocation4 + $0x1c0] sm:$0xff]  }
 0x440   : > { %v2420_v21 = vadd.f32 %v2419_v32, %v13287_v57  ;;  %v2533_v10 = vadd.f32 %v2532_v48, %v13291_v15  ;;  %v2421_v19 = vpop.f32.mrb[19].mxu0  ;;  %v2534_v37 = vpop.f32.mrb[19].mxu1  ;;  %10799 = vmatpush3.bf16.msra.mxu0 %v12010_v51  ;;  %10863 = vmatpush3.bf16.msra.mxu1 %v12012_v1  ;;  %v3285_v41 = vmax.f32 %v2416_v53, 0.0  ;;  %v3287_v62 = vmax.f32 %v2529_v7, 0.0  ;;  %v12021_v7 = vld [vmem:[#allocation4 + $0x140] sm:$0xff]  }
 0x441   : > { %v2422_v35 = vadd.f32 %v2421_v19, %v13295_v60  ;;  %v2535_v42 = vadd.f32 %v2534_v37, %v13299_v23  ;;  %10800 = vmatprep.subr.bf16.mxu0 %v12013_v26  ;;  %10864 = vmatprep.subr.bf16.mxu1 %v12015_v58  ;;  %v3286_v55 = vmax.f32 %v2418_v25, 0.0  ;;  %v3288_v50 = vmax.f32 %v2531_v28, 0.0 }
 0x442   : > { %v3301_v33 = vmax.f32 %v2420_v21, 0.0  ;;  %v3303_v38 = vmax.f32 %v2533_v10, 0.0  ;;  %3122 = vmatmul.mubr.bf16.gmra.mrb[124].mxu0 %v13100_v9  ;;  %3235 = vmatmul.mubr.bf16.gmra.mrb[124].mxu1 %v13100_v9 }
 0x443   : > { %v3302_v52 = vmax.f32 %v2422_v35, 0.0  ;;  %v3304_v56 = vmax.f32 %v2535_v42, 0.0  ;;  %3131 = vmatprep.mubr.bf16.mxu0 %v16096_v11  ;;  %3244 = vmatprep.mubr.bf16.mxu1 %v16096_v11 }
 0x444   : > { %v13315_v51 = vpack.c.bf16 %v3301_v33, %v3285_v41  ;;  %v13317_v1 = vpack.c.bf16 %v3303_v38, %v3287_v62  ;;  %10801 = vmatpush3.bf16.msra.mxu0 %v12014_v34  ;;  %10865 = vmatpush3.bf16.msra.mxu1 %v12016_v59 }
 0x445   : > { %v2425_v26 = vpop.f32.mrb[20].mxu0  ;;  %v2538_v58 = vpop.f32.mrb[20].mxu1  ;;  %10802 = vmatprep.subr.bf16.mxu0 %v12017_v17  ;;  %v13319_v9 = vpack.c.bf16 %v3302_v52, %v3286_v55  ;;  %10866 = vmatprep.subr.bf16.mxu1 %v12019_v44  ;;  %v13321_v53 = vpack.c.bf16 %v3304_v56, %v3288_v50 }
 0x446   : > { %v2426_v46 = vadd.f32 %v2425_v26, %v13287_v57  ;;  %v2539_v25 = vadd.f32 %v2538_v58, %v13291_v15  ;;  %v2427_v28 = vpop.f32.mrb[21].mxu0  ;;  %v2540_v32 = vpop.f32.mrb[21].mxu1 }
 0x447   : > { %v2428_v48 = vadd.f32 %v2427_v28, %v13295_v60  ;;  %v2541_v21 = vadd.f32 %v2540_v32, %v13299_v23  ;;  %v2429_v10 = vpop.f32.mrb[22].mxu0  ;;  %v2542_v19 = vpop.f32.mrb[22].mxu1 }
 0x448   : > { %v2430_v37 = vadd.f32 %v2429_v10, %v13287_v57  ;;  %v2543_v34 = vadd.f32 %v2542_v19, %v13291_v15  ;;  %v2431_v59 = vpop.f32.mrb[23].mxu0  ;;  %v2544_v35 = vpop.f32.mrb[23].mxu1  ;;  %10803 = vmatpush3.bf16.msra.mxu0 %v12018_v30  ;;  %10867 = vmatpush3.bf16.msra.mxu1 %v12020_v5  ;;  %v3317_v44 = vmax.f32 %v2426_v46, 0.0  ;;  %v3319_v41 = vmax.f32 %v2539_v25, 0.0 }
 0x449   : > { %v2432_v42 = vadd.f32 %v2431_v59, %v13295_v60  ;;  %v2545_v17 = vadd.f32 %v2544_v35, %v13299_v23  ;;  %10916 = vmatprep.subr.bf16.mxu0 %v12021_v7  ;;  %10980 = vmatprep.subr.bf16.mxu1 %v12023_v14  ;;  %v3318_v38 = vmax.f32 %v2428_v48, 0.0  ;;  %v3320_v55 = vmax.f32 %v2541_v21, 0.0 }
 0x44a   : > { %v3333_v62 = vmax.f32 %v2430_v37, 0.0  ;;  %v3335_v33 = vmax.f32 %v2543_v34, 0.0  ;;  %3132 = vmatmul.mubr.bf16.gmra.mrb[128].mxu0 %v13130_v0  ;;  %3245 = vmatmul.mubr.bf16.gmra.mrb[128].mxu1 %v13130_v0 }
 0x44b   : > { %v3334_v50 = vmax.f32 %v2432_v42, 0.0  ;;  %v3336_v52 = vmax.f32 %v2545_v17, 0.0  ;;  %3141 = vmatprep.mubr.bf16.mxu0 %v16096_v11  ;;  %3254 = vmatprep.mubr.bf16.mxu1 %v16096_v11 }
 0x44c   : > { %v13335_v56 = vpack.c.bf16 %v3333_v62, %v3317_v44  ;;  %v13337_v30 = vpack.c.bf16 %v3335_v33, %v3319_v41 }
 0x44d   : > { %v2435_v5 = vpop.f32.mrb[24].mxu0  ;;  %v2548_v26 = vpop.f32.mrb[24].mxu1  ;;  %v13339_v58 = vpack.c.bf16 %v3334_v50, %v3318_v38  ;;  %v13341_v7 = vpack.c.bf16 %v3336_v52, %v3320_v55 }
 0x44e   : > { %v2436_v0 = vadd.f32 %v2435_v5, %v13287_v57  ;;  %v2549_v14 = vadd.f32 %v2548_v26, %v13291_v15  ;;  %v2437_v46 = vpop.f32.mrb[25].mxu0  ;;  %v2550_v25 = vpop.f32.mrb[25].mxu1 }
 0x44f   : > { %v2438_v28 = vadd.f32 %v2437_v46, %v13295_v60  ;;  %v2551_v32 = vadd.f32 %v2550_v25, %v13299_v23  ;;  %v2439_v48 = vpop.f32.mrb[26].mxu0  ;;  %v2552_v21 = vpop.f32.mrb[26].mxu1 }
 0x450   : > { %v2440_v10 = vadd.f32 %v2439_v48, %v13287_v57  ;;  %v2553_v19 = vadd.f32 %v2552_v21, %v13291_v15  ;;  %v2441_v37 = vpop.f32.mrb[27].mxu0  ;;  %v2554_v34 = vpop.f32.mrb[27].mxu1  ;;  %v3349_v42 = vmax.f32 %v2436_v0, 0.0  ;;  %v3351_v17 = vmax.f32 %v2549_v14, 0.0 }
 0x451   : > { %v2442_v59 = vadd.f32 %v2441_v37, %v13295_v60  ;;  %v2555_v35 = vadd.f32 %v2554_v34, %v13299_v23  ;;  %v3350_v62 = vmax.f32 %v2438_v28, 0.0  ;;  %v3352_v33 = vmax.f32 %v2551_v32, 0.0 }
 0x452   : > { %v3365_v44 = vmax.f32 %v2440_v10, 0.0  ;;  %v3367_v41 = vmax.f32 %v2553_v19, 0.0  ;;  %3142 = vmatmul.mubr.bf16.gmra.mrb[132].mxu0 %v13148_v54  ;;  %3255 = vmatmul.mubr.bf16.gmra.mrb[132].mxu1 %v13148_v54 }
 0x453   : > { %v3366_v38 = vmax.f32 %v2442_v59, 0.0  ;;  %v3368_v55 = vmax.f32 %v2555_v35, 0.0  ;;  %3151 = vmatprep.mubr.bf16.mxu0 %v16096_v11  ;;  %3264 = vmatprep.mubr.bf16.mxu1 %v16096_v11 }
 0x454   : > { %v13355_v50 = vpack.c.bf16 %v3365_v44, %v3349_v42  ;;  %v13357_v52 = vpack.c.bf16 %v3367_v41, %v3351_v17 }
 0x455   : > { %v2445_v5 = vpop.f32.mrb[28].mxu0  ;;  %v2558_v26 = vpop.f32.mrb[28].mxu1  ;;  %v13359_v0 = vpack.c.bf16 %v3366_v38, %v3350_v62  ;;  %v13361_v14 = vpack.c.bf16 %v3368_v55, %v3352_v33 }
 0x456   : > { %v2446_v54 = vadd.f32 %v2445_v5, %v13287_v57  ;;  %v2559_v46 = vadd.f32 %v2558_v26, %v13291_v15  ;;  %v2447_v25 = vpop.f32.mrb[29].mxu0  ;;  %v2560_v28 = vpop.f32.mrb[29].mxu1 }
 0x457   : > { %v2448_v32 = vadd.f32 %v2447_v25, %v13295_v60  ;;  %v2561_v48 = vadd.f32 %v2560_v28, %v13299_v23  ;;  %v2449_v21 = vpop.f32.mrb[30].mxu0  ;;  %v2562_v10 = vpop.f32.mrb[30].mxu1 }
 0x458   : > { %v2450_v19 = vadd.f32 %v2449_v21, %v13287_v57  ;;  %v2563_v37 = vadd.f32 %v2562_v10, %v13291_v15  ;;  %v2451_v34 = vpop.f32.mrb[31].mxu0  ;;  %v2564_v59 = vpop.f32.mrb[31].mxu1  ;;  %v3381_v17 = vmax.f32 %v2446_v54, 0.0  ;;  %v3383_v44 = vmax.f32 %v2559_v46, 0.0 }
 0x459   : > { %v2452_v35 = vadd.f32 %v2451_v34, %v13295_v60  ;;  %v2565_v42 = vadd.f32 %v2564_v59, %v13299_v23  ;;  %v3382_v33 = vmax.f32 %v2448_v32, 0.0  ;;  %v3384_v38 = vmax.f32 %v2561_v48, 0.0 }
 0x45a   : > { %v3397_v41 = vmax.f32 %v2450_v19, 0.0  ;;  %v3399_v62 = vmax.f32 %v2563_v37, 0.0  ;;  %3152 = vmatmul.mubr.bf16.gmra.mrb[136].mxu0 %v13166_v4  ;;  %3265 = vmatmul.mubr.bf16.gmra.mrb[136].mxu1 %v13166_v4 }
 0x45b   : > { %v3398_v55 = vmax.f32 %v2452_v35, 0.0  ;;  %v3400_v5 = vmax.f32 %v2565_v42, 0.0  ;;  %3161 = vmatprep.mubr.bf16.mxu0 %v16096_v11  ;;  %3274 = vmatprep.mubr.bf16.mxu1 %v16096_v11 }
 0x45c   : > { %v13375_v26 = vpack.c.bf16 %v3397_v41, %v3381_v17  ;;  %v13377_v25 = vpack.c.bf16 %v3399_v62, %v3383_v44 }
 0x45d   : > { %v2455_v54 = vpop.f32.mrb[32].mxu0  ;;  %v2568_v46 = vpop.f32.mrb[32].mxu1  ;;  %v13379_v28 = vpack.c.bf16 %v3398_v55, %v3382_v33  ;;  %v13381_v21 = vpack.c.bf16 %v3400_v5, %v3384_v38 }
 0x45e   : > { %v2456_v4 = vadd.f32 %v2455_v54, %v13287_v57  ;;  %v2569_v32 = vadd.f32 %v2568_v46, %v13291_v15  ;;  %v2457_v48 = vpop.f32.mrb[33].mxu0  ;;  %v2570_v10 = vpop.f32.mrb[33].mxu1 }
 0x45f   : > { %v2458_v19 = vadd.f32 %v2457_v48, %v13295_v60  ;;  %v2571_v37 = vadd.f32 %v2570_v10, %v13299_v23  ;;  %v2459_v34 = vpop.f32.mrb[34].mxu0  ;;  %v2572_v59 = vpop.f32.mrb[34].mxu1 }
 0x460   : > { %v2460_v35 = vadd.f32 %v2459_v34, %v13287_v57  ;;  %v2573_v42 = vadd.f32 %v2572_v59, %v13291_v15  ;;  %v2461_v17 = vpop.f32.mrb[35].mxu0  ;;  %v2574_v44 = vpop.f32.mrb[35].mxu1  ;;  %v3413_v33 = vmax.f32 %v2456_v4, 0.0  ;;  %v3415_v38 = vmax.f32 %v2569_v32, 0.0 }
 0x461   : > { %v2462_v41 = vadd.f32 %v2461_v17, %v13295_v60  ;;  %v2575_v62 = vadd.f32 %v2574_v44, %v13299_v23  ;;  %v3414_v54 = vmax.f32 %v2458_v19, 0.0  ;;  %v3416_v46 = vmax.f32 %v2571_v37, 0.0 }
 0x462   : > { %v3429_v55 = vmax.f32 %v2460_v35, 0.0  ;;  %v3431_v5 = vmax.f32 %v2573_v42, 0.0  ;;  %3162 = vmatmul.mubr.bf16.gmra.mrb[140].mxu0 %v13182_v6  ;;  %3275 = vmatmul.mubr.bf16.gmra.mrb[140].mxu1 %v13182_v6 }
 0x463   : > { %v3430_v48 = vmax.f32 %v2462_v41, 0.0  ;;  %v3432_v10 = vmax.f32 %v2575_v62, 0.0  ;;  %4475 = vmatprep.mubr.bf16.mxu0 %v13319_v9  ;;  %4572 = vmatprep.mubr.bf16.mxu1 %v13321_v53  ;;  %v12022_v62 = vld [vmem:[#allocation4 + $0x100] sm:$0xff]  }
 0x464   : > { %v13395_v34 = vpack.c.bf16 %v3429_v55, %v3413_v33  ;;  %v13397_v59 = vpack.c.bf16 %v3431_v5, %v3415_v38 }
 0x465   : > { %v2465_v4 = vpop.f32.mrb[36].mxu0  ;;  %v2578_v32 = vpop.f32.mrb[36].mxu1  ;;  %v13399_v35 = vpack.c.bf16 %v3430_v48, %v3414_v54  ;;  %v13401_v42 = vpack.c.bf16 %v3432_v10, %v3416_v46  ;;  %v12024_v54 = vld [vmem:[#allocation4 + $0x180] sm:$0xff]   ;;  %v12025_v10 = vld [vmem:[#allocation4 + $0x148] sm:$0xff]  }
 0x466   : > { %v2466_v6 = vadd.f32 %v2465_v4, %v13287_v57  ;;  %v2579_v19 = vadd.f32 %v2578_v32, %v13291_v15  ;;  %v2467_v37 = vpop.f32.mrb[37].mxu0  ;;  %v2580_v17 = vpop.f32.mrb[37].mxu1  ;;  %v12027_v4 = vld [vmem:[#allocation4 + $0x1c8] sm:$0xff]  }
 0x467   : > { %v2468_v9 = vadd.f32 %v2467_v37, %v13295_v60  ;;  %v2581_v53 = vadd.f32 %v2580_v17, %v13299_v23  ;;  %v2469_v44 = vpop.f32.mrb[38].mxu0  ;;  %v2582_v41 = vpop.f32.mrb[38].mxu1 }
 0x468   : > { %v2470_v33 = vadd.f32 %v2469_v44, %v13287_v57  ;;  %v2583_v38 = vadd.f32 %v2582_v41, %v13291_v15  ;;  %v2471_v55 = vpop.f32.mrb[39].mxu0  ;;  %v2584_v5 = vpop.f32.mrb[39].mxu1  ;;  %v3445_v32 = vmax.f32 %v2466_v6, 0.0  ;;  %v3447_v37 = vmax.f32 %v2579_v19, 0.0  ;;  %v12029_v6 = vld [vmem:[#allocation4 + $0x150] sm:$0xff]  }
 0x469   : > { %v2472_v46 = vadd.f32 %v2471_v55, %v13295_v60  ;;  %v2585_v48 = vadd.f32 %v2584_v5, %v13299_v23  ;;  %v3446_v44 = vmax.f32 %v2468_v9, 0.0  ;;  %v3448_v24 = vmax.f32 %v2581_v53, 0.0  ;;  %v12026_v55 = vld [vmem:[#allocation4 + $0x108] sm:$0xff]  }
 0x46a   : > { %v3461_v11 = vmax.f32 %v2470_v33, 0.0  ;;  %v3463_v17 = vmax.f32 %v2583_v38, 0.0  ;;  %4476 = vmatmul.mubr.bf16.vlgmr.msra.gmra.mrb[144].mxu0 %v13315_v51  ;;  %4573 = vmatmul.mubr.bf16.vlgmr.msra.gmra.mrb[144].mxu1 %v13317_v1  ;;  %v12028_v5 = vld [vmem:[#allocation4 + $0x188] sm:$0xff]   ;;  %v12031_v1 = vld [vmem:[#allocation4 + $0x1d0] sm:$0xff]  }
 0x46b   : > { %v3462_v41 = vmax.f32 %v2472_v46, 0.0  ;;  %v3464_v29 = vmax.f32 %v2585_v48, 0.0  ;;  %10917 = vmatpush3.bf16.msra.mxu0 %v12022_v62  ;;  %4483 = vmatprep.mubr.bf16.mxu0 %v13339_v58 }
 0x46c   : > { %4580 = vmatprep.mubr.bf16.mxu1 %v13341_v7  ;;  %10981 = vmatpush3.bf16.msra.mxu1 %v12024_v54  ;;  %v13415_v19 = vpack.c.bf16 %v3461_v11, %v3445_v32  ;;  %v13417_v33 = vpack.c.bf16 %v3463_v17, %v3447_v37  ;;  %v12032_v17 = vld [vmem:[#allocation4 + $0x190] sm:$0xff]  }
 0x46d   : > { %v2475_v51 = vpop.f32.mrb[40].mxu0  ;;  %v2588_v38 = vpop.f32.mrb[40].mxu1  ;;  %10918 = vmatprep.subr.bf16.mxu0 %v12025_v10  ;;  %10982 = vmatprep.subr.bf16.mxu1 %v12027_v4  ;;  %v13419_v9 = vpack.c.bf16 %v3462_v41, %v3446_v44  ;;  %v13421_v53 = vpack.c.bf16 %v3464_v29, %v3448_v24  ;;  %v12030_v29 = vld [vmem:[#allocation4 + $0x110] sm:$0xff]  }
 0x46e   : > { %v2476_v58 = vadd.f32 %v2475_v51, %v13287_v57  ;;  %v2589_v7 = vadd.f32 %v2588_v38, %v13291_v15  ;;  %v2477_v62 = vpop.f32.mrb[41].mxu0  ;;  %v2590_v54 = vpop.f32.mrb[41].mxu1  ;;  %v13432_v51 = vsub.s32 4, %v13262_v40  ;;  %v12033_v38 = vld [vmem:[#allocation4 + $0x158] sm:$0xff]  }
 0x46f   : > { %v2478_v11 = vadd.f32 %v2477_v62, %v13295_v60  ;;  %v2591_v46 = vadd.f32 %v2590_v54, %v13299_v23  ;;  %v2479_v48 = vpop.f32.mrb[42].mxu0  ;;  %v2592_v32 = vpop.f32.mrb[42].mxu1  ;;  %10919 = vmatpush3.bf16.msra.mxu0 %v12026_v55  ;;  %v13435_v55 = vsub.s32 6, %v13262_v40  ;;  %v12035_v62 = vld [vmem:[#allocation4 + $0x1d8] sm:$0xff]  }
 0x470   : > { %v2480_v10 = vadd.f32 %v2479_v48, %v13287_v57  ;;  %v2593_v4 = vadd.f32 %v2592_v32, %v13291_v15  ;;  %v2481_v37 = vpop.f32.mrb[43].mxu0  ;;  %v2594_v24 = vpop.f32.mrb[43].mxu1  ;;  %10983 = vmatpush3.bf16.msra.mxu1 %v12028_v5  ;;  %10920 = vmatprep.subr.bf16.mxu0 %v12029_v6  ;;  %v3477_v54 = vmax.f32 %v2476_v58, 0.0  ;;  %v3479_v48 = vmax.f32 %v2589_v7, 0.0  ;;  %v12034_v58 = vld [vmem:[#allocation4 + $0x118] sm:$0xff]  }
 0x471   : > { %v2482_v44 = vadd.f32 %v2481_v37, %v13295_v60  ;;  %v2595_v41 = vadd.f32 %v2594_v24, %v13299_v23  ;;  %10984 = vmatprep.subr.bf16.mxu1 %v12031_v1  ;;  %v3478_v6 = vmax.f32 %v2478_v11, 0.0  ;;  %v3480_v37 = vmax.f32 %v2591_v46, 0.0  ;;  %v12036_v7 = vld [vmem:[#allocation4 + $0x198] sm:$0xff]  }
 0x472   : > { %v3493_v32 = vmax.f32 %v2480_v10, 0.0  ;;  %v3495_v5 = vmax.f32 %v2593_v4, 0.0  ;;  %4484 = vmatmul.mubr.bf16.gmra.mrb[148].mxu0 %v13335_v56  ;;  %4581 = vmatmul.mubr.bf16.gmra.mrb[148].mxu1 %v13337_v30  ;;  %v13449_v46 = vsub.s32 7, %v13262_v40 }
 0x473   : > { %v3494_v24 = vmax.f32 %v2482_v44, 0.0  ;;  %v3496_v1 = vmax.f32 %v2595_v41, 0.0  ;;  %4491 = vmatprep.mubr.bf16.mxu0 %v13359_v0  ;;  %4588 = vmatprep.mubr.bf16.mxu1 %v13361_v14  ;;  %v12037_v0 = vld [vmem:[#allocation4 + $0x160] sm:$0xff]  }
 0x474   : > { %10921 = vmatpush3.bf16.msra.mxu0 %v12030_v29  ;;  %10985 = vmatpush3.bf16.msra.mxu1 %v12032_v17  ;;  %v13444_v10 = vpack.c.bf16 %v3493_v32, %v3477_v54  ;;  %v13446_v56 = vpack.c.bf16 %v3495_v5, %v3479_v48  ;;  %v12039_v14 = vld [vmem:[#allocation4 + $0x1e0] sm:$0xff]   ;;  %v13477_v61 = vrot.slane %v13275_v27, %v13449_v46 }
 0x475   : > { %v2485_v30 = vpop.f32.mrb[44].mxu0  ;;  %v2598_v11 = vpop.f32.mrb[44].mxu1  ;;  %10922 = vmatprep.subr.bf16.mxu0 %v12033_v38  ;;  %10986 = vmatprep.subr.bf16.mxu1 %v12035_v62  ;;  %v13451_v4 = vpack.c.bf16 %v3494_v24, %v3478_v6  ;;  %v13453_v29 = vpack.c.bf16 %v3496_v1, %v3480_v37  ;;  %v13461_v38 = vrot.slane %v13275_v27, %v13432_v51 }
 0x476   : > { %v2486_v17 = vadd.f32 %v2485_v30, %v13287_v57  ;;  %v2599_v44 = vadd.f32 %v2598_v11, %v13291_v15  ;;  %v2487_v41 = vpop.f32.mrb[45].mxu0  ;;  %v2600_v54 = vpop.f32.mrb[45].mxu1  ;;  %v13465_v62 = vrot.slane %v13275_v27, %v13435_v55  ;;  %v13471_v30 = vrot.slane %v13275_v27, %v13442_v8  ;;  %v12038_v11 = vld [vmem:[#allocation4 + $0x120] sm:$0xff]   ;;  %v12042_v27 = vld [vmem:[#allocation4 + $0x128] sm:$0xff]  }
 0x477   : > { %v2488_v48 = vadd.f32 %v2487_v41, %v13295_v60  ;;  %v2601_v32 = vadd.f32 %v2600_v54, %v13299_v23  ;;  %v2489_v40 = vpop.f32.mrb[46].mxu0  ;;  %v2602_v5 = vpop.f32.mrb[46].mxu1  ;;  %v12040_v41 = vld [vmem:[#allocation4 + $0x1a0] sm:$0xff]  }
 0x478   : > { %v2490_v6 = vadd.f32 %v2489_v40, %v13287_v57  ;;  %v2603_v37 = vadd.f32 %v2602_v5, %v13291_v15  ;;  %v2491_v24 = vpop.f32.mrb[47].mxu0  ;;  %v2604_v1 = vpop.f32.mrb[47].mxu1  ;;  %10923 = vmatpush3.bf16.msra.mxu0 %v12034_v58  ;;  %10987 = vmatpush3.bf16.msra.mxu1 %v12036_v7  ;;  %v12041_v57 = vld [vmem:[#allocation4 + $0x168] sm:$0xff]   ;;  %v3509_v40 = vmax.f32 %v2486_v17, 0.0  ;;  %v3511_v5 = vmax.f32 %v2599_v44, 0.0 }
 0x479   : > { %v2492_v54 = vadd.f32 %v2491_v24, %v13295_v60  ;;  %v2605_v63 = vadd.f32 %v2604_v1, %v13299_v23  ;;  %10924 = vmatprep.subr.bf16.mxu0 %v12037_v0  ;;  %10988 = vmatprep.subr.bf16.mxu1 %v12039_v14  ;;  %v12043_v15 = vld [vmem:[#allocation4 + $0x1e8] sm:$0xff]   ;;  %v3510_v58 = vmax.f32 %v2488_v48, 0.0  ;;  %v3512_v60 = vmax.f32 %v2601_v32, 0.0 }
 0x47a   : > { %v3525_v45 = vmax.f32 %v2490_v6, 0.0  ;;  %v3527_v39 = vmax.f32 %v2603_v37, 0.0  ;;  %4492 = vmatmul.mubr.bf16.gmra.mrb[152].mxu0 %v13355_v50  ;;  %4589 = vmatmul.mubr.bf16.gmra.mrb[152].mxu1 %v13357_v52  ;;  %v12044_v0 = vld [vmem:[#allocation4 + $0x1a8] sm:$0xff]   ;;  %v12045_v52 = vld [vmem:[#allocation4 + $0x170] sm:$0xff]  }
 0x47b   : > { %v3526_v7 = vmax.f32 %v2492_v54, 0.0  ;;  %v3528_v23 = vmax.f32 %v2605_v63, 0.0  ;;  %4499 = vmatprep.mubr.bf16.mxu0 %v13379_v28  ;;  %4596 = vmatprep.mubr.bf16.mxu1 %v13381_v21  ;;  %v12047_v28 = vld [vmem:[#allocation4 + $0x1f0] sm:$0xff]  }
 0x47c   : > { %10925 = vmatpush3.bf16.msra.mxu0 %v12038_v11  ;;  %10989 = vmatpush3.bf16.msra.mxu1 %v12040_v41  ;;  %v13483_v14 = vpack.c.bf16 %v3525_v45, %v3509_v40  ;;  %v13485_v17 = vpack.c.bf16 %v3527_v39, %v3511_v5  ;;  %v12048_v40 = vld [vmem:[#allocation4 + $0x1b0] sm:$0xff]  }
 0x47d   : > { %v2641_v44 = vpop.f32.mrb[48].mxu0  ;;  %v2754_v50 = vpop.f32.mrb[48].mxu1  ;;  %10926 = vmatprep.subr.bf16.mxu0 %v12041_v57  ;;  %10990 = vmatprep.subr.bf16.mxu1 %v12043_v15  ;;  %v13487_v48 = vpack.c.bf16 %v3526_v7, %v3510_v58  ;;  %v13489_v63 = vpack.c.bf16 %v3528_v23, %v3512_v60  ;;  %v12046_v15 = vld [vmem:[#allocation4 + $0x130] sm:$0xff]   ;;  %v12049_v60 = vld [vmem:[#allocation4 + $0x178] sm:$0xff]  }
 0x47e   : > { %v2642_v21 = vadd.f32 %v2641_v44, %v13461_v38  ;;  %v2755_v32 = vadd.f32 %v2754_v50, %v13465_v62  ;;  %v2643_v6 = vpop.f32.mrb[49].mxu0  ;;  %v2756_v37 = vpop.f32.mrb[49].mxu1  ;;  %v12051_v7 = vld [vmem:[#allocation4 + $0x1f8] sm:$0xff]  }
 0x47f   : > { %v2644_v45 = vadd.f32 %v2643_v6, %v13471_v30  ;;  %v2757_v39 = vadd.f32 %v2756_v37, %v13477_v61  ;;  %v2645_v24 = vpop.f32.mrb[50].mxu0  ;;  %v2758_v1 = vpop.f32.mrb[50].mxu1 }
 0x480   : > { %v2646_v11 = vadd.f32 %v2645_v24, %v13461_v38  ;;  %v2759_v41 = vadd.f32 %v2758_v1, %v13465_v62  ;;  %v2647_v54 = vpop.f32.mrb[51].mxu0  ;;  %v2760_v57 = vpop.f32.mrb[51].mxu1  ;;  %10927 = vmatpush3.bf16.msra.mxu0 %v12042_v27  ;;  %10991 = vmatpush3.bf16.msra.mxu1 %v12044_v0  ;;  %v3289_v23 = vmax.f32 %v2642_v21, 0.0  ;;  %v3291_v44 = vmax.f32 %v2755_v32, 0.0  ;;  %v12050_v21 = vld [vmem:[#allocation4 + $0x138] sm:$0xff]  }
 0x481   : > { %v2648_v5 = vadd.f32 %v2647_v54, %v13471_v30  ;;  %v2761_v58 = vadd.f32 %v2760_v57, %v13477_v61  ;;  %10928 = vmatprep.subr.bf16.mxu0 %v12045_v52  ;;  %10992 = vmatprep.subr.bf16.mxu1 %v12047_v28  ;;  %v3290_v27 = vmax.f32 %v2644_v45, 0.0  ;;  %v3292_v0 = vmax.f32 %v2757_v39, 0.0  ;;  %v12052_v32 = vld [vmem:[#allocation4 + $0x1b8] sm:$0xff]   ;;  %v12053_v39 = vld [vmem:[#allocation4 + $0x240] sm:$0xff]  }
 0x482   : > { %v3305_v50 = vmax.f32 %v2646_v11, 0.0  ;;  %v3307_v6 = vmax.f32 %v2759_v41, 0.0  ;;  %4500 = vmatmul.mubr.bf16.gmra.mrb[156].mxu0 %v13375_v26  ;;  %4597 = vmatmul.mubr.bf16.gmra.mrb[156].mxu1 %v13377_v25 }
 0x483   : > { %v3306_v37 = vmax.f32 %v2648_v5, 0.0  ;;  %v3308_v24 = vmax.f32 %v2761_v58, 0.0  ;;  %4507 = vmatprep.mubr.bf16.mxu0 %v13399_v35  ;;  %4604 = vmatprep.mubr.bf16.mxu1 %v13401_v42  ;;  %v12055_v35 = vld [vmem:[#allocation4 + $0x2c0] sm:$0xff]  }
 0x484   : > { %v13503_v52 = vpack.c.bf16 %v3305_v50, %v3289_v23  ;;  %v13505_v28 = vpack.c.bf16 %v3307_v6, %v3291_v44  ;;  %10929 = vmatpush3.bf16.msra.mxu0 %v12046_v15  ;;  %10993 = vmatpush3.bf16.msra.mxu1 %v12048_v40 }
 0x485   : > { %v2651_v1 = vpop.f32.mrb[52].mxu0  ;;  %v2764_v26 = vpop.f32.mrb[52].mxu1  ;;  %10930 = vmatprep.subr.bf16.mxu0 %v12049_v60  ;;  %v13507_v25 = vpack.c.bf16 %v3306_v37, %v3290_v27  ;;  %10994 = vmatprep.subr.bf16.mxu1 %v12051_v7  ;;  %v13509_v45 = vpack.c.bf16 %v3308_v24, %v3292_v0 }
 0x486   : > { %v2652_v42 = vadd.f32 %v2651_v1, %v13461_v38  ;;  %v2765_v11 = vadd.f32 %v2764_v26, %v13465_v62  ;;  %v2653_v41 = vpop.f32.mrb[53].mxu0  ;;  %v2766_v54 = vpop.f32.mrb[53].mxu1 }
 0x487   : > { %v2654_v57 = vadd.f32 %v2653_v41, %v13471_v30  ;;  %v2767_v15 = vadd.f32 %v2766_v54, %v13477_v61  ;;  %v2655_v40 = vpop.f32.mrb[54].mxu0  ;;  %v2768_v5 = vpop.f32.mrb[54].mxu1 }
 0x488   : > { %v2656_v58 = vadd.f32 %v2655_v40, %v13461_v38  ;;  %v2769_v60 = vadd.f32 %v2768_v5, %v13465_v62  ;;  %v2657_v7 = vpop.f32.mrb[55].mxu0  ;;  %v2770_v23 = vpop.f32.mrb[55].mxu1  ;;  %10931 = vmatpush3.bf16.msra.mxu0 %v12050_v21  ;;  %10995 = vmatpush3.bf16.msra.mxu1 %v12052_v32  ;;  %v3321_v6 = vmax.f32 %v2652_v42, 0.0  ;;  %v3323_v27 = vmax.f32 %v2765_v11, 0.0 }
 0x489   : > { %v2658_v44 = vadd.f32 %v2657_v7, %v13471_v30  ;;  %v2771_v50 = vadd.f32 %v2770_v23, %v13477_v61  ;;  %11044 = vmatprep.subr.bf16.mxu0 %v12053_v39  ;;  %11108 = vmatprep.subr.bf16.mxu1 %v12055_v35  ;;  %v3322_v24 = vmax.f32 %v2654_v57, 0.0  ;;  %v3324_v1 = vmax.f32 %v2767_v15, 0.0 }
 0x48a   : > { %v3337_v0 = vmax.f32 %v2656_v58, 0.0  ;;  %v3339_v37 = vmax.f32 %v2769_v60, 0.0  ;;  %4508 = vmatmul.mubr.bf16.gmra.mrb[160].mxu0 %v13395_v34  ;;  %4605 = vmatmul.mubr.bf16.gmra.mrb[160].mxu1 %v13397_v59 }
 0x48b   : > { %v3338_v26 = vmax.f32 %v2658_v44, 0.0  ;;  %v3340_v41 = vmax.f32 %v2771_v50, 0.0  ;;  %4515 = vmatprep.mubr.bf16.mxu0 %v13419_v9  ;;  %4612 = vmatprep.mubr.bf16.mxu1 %v13421_v53 }
 0x48c   : > { %v13523_v21 = vpack.c.bf16 %v3337_v0, %v3321_v6  ;;  %v13525_v32 = vpack.c.bf16 %v3339_v37, %v3323_v27 }
 0x48d   : > { %v2661_v39 = vpop.f32.mrb[56].mxu0  ;;  %v2774_v35 = vpop.f32.mrb[56].mxu1  ;;  %v13527_v42 = vpack.c.bf16 %v3338_v26, %v3322_v24  ;;  %v13529_v11 = vpack.c.bf16 %v3340_v41, %v3324_v1 }
 0x48e   : > { %v2662_v34 = vadd.f32 %v2661_v39, %v13461_v38  ;;  %v2775_v59 = vadd.f32 %v2774_v35, %v13465_v62  ;;  %v2663_v54 = vpop.f32.mrb[57].mxu0  ;;  %v2776_v57 = vpop.f32.mrb[57].mxu1 }
 0x48f   : > { %v2664_v9 = vadd.f32 %v2663_v54, %v13471_v30  ;;  %v2777_v53 = vadd.f32 %v2776_v57, %v13477_v61  ;;  %v2665_v15 = vpop.f32.mrb[58].mxu0  ;;  %v2778_v40 = vpop.f32.mrb[58].mxu1 }
 0x490   : > { %v2666_v5 = vadd.f32 %v2665_v15, %v13461_v38  ;;  %v2779_v58 = vadd.f32 %v2778_v40, %v13465_v62  ;;  %v2667_v60 = vpop.f32.mrb[59].mxu0  ;;  %v2780_v7 = vpop.f32.mrb[59].mxu1  ;;  %v3353_v50 = vmax.f32 %v2662_v34, 0.0  ;;  %v3355_v6 = vmax.f32 %v2775_v59, 0.0 }
 0x491   : > { %v2668_v23 = vadd.f32 %v2667_v60, %v13471_v30  ;;  %v2781_v44 = vadd.f32 %v2780_v7, %v13477_v61  ;;  %v3354_v37 = vmax.f32 %v2664_v9, 0.0  ;;  %v3356_v24 = vmax.f32 %v2777_v53, 0.0 }
 0x492   : > { %v3369_v27 = vmax.f32 %v2666_v5, 0.0  ;;  %v3371_v0 = vmax.f32 %v2779_v58, 0.0  ;;  %4516 = vmatmul.mubr.bf16.gmra.mrb[164].mxu0 %v13415_v19  ;;  %4613 = vmatmul.mubr.bf16.gmra.mrb[164].mxu1 %v13417_v33 }
 0x493   : > { %v3370_v1 = vmax.f32 %v2668_v23, 0.0  ;;  %v3372_v26 = vmax.f32 %v2781_v44, 0.0  ;;  %4523 = vmatprep.mubr.bf16.mxu0 %v13451_v4  ;;  %4620 = vmatprep.mubr.bf16.mxu1 %v13453_v29 }
 0x494   : > { %v13543_v41 = vpack.c.bf16 %v3369_v27, %v3353_v50  ;;  %v13545_v39 = vpack.c.bf16 %v3371_v0, %v3355_v6 }
 0x495   : > { %v2671_v35 = vpop.f32.mrb[60].mxu0  ;;  %v2784_v34 = vpop.f32.mrb[60].mxu1  ;;  %v13547_v59 = vpack.c.bf16 %v3370_v1, %v3354_v37  ;;  %v13549_v54 = vpack.c.bf16 %v3372_v26, %v3356_v24 }
 0x496   : > { %v2672_v19 = vadd.f32 %v2671_v35, %v13461_v38  ;;  %v2785_v33 = vadd.f32 %v2784_v34, %v13465_v62  ;;  %v2673_v57 = vpop.f32.mrb[61].mxu0  ;;  %v2786_v9 = vpop.f32.mrb[61].mxu1 }
 0x497   : > { %v2674_v4 = vadd.f32 %v2673_v57, %v13471_v30  ;;  %v2787_v29 = vadd.f32 %v2786_v9, %v13477_v61  ;;  %v2675_v53 = vpop.f32.mrb[62].mxu0  ;;  %v2788_v15 = vpop.f32.mrb[62].mxu1 }
 0x498   : > { %v2676_v40 = vadd.f32 %v2675_v53, %v13461_v38  ;;  %v2789_v5 = vadd.f32 %v2788_v15, %v13465_v62  ;;  %v2677_v58 = vpop.f32.mrb[63].mxu0  ;;  %v2790_v60 = vpop.f32.mrb[63].mxu1  ;;  %v3385_v44 = vmax.f32 %v2672_v19, 0.0  ;;  %v3387_v50 = vmax.f32 %v2785_v33, 0.0 }
 0x499   : > { %v2678_v7 = vadd.f32 %v2677_v58, %v13471_v30  ;;  %v2791_v23 = vadd.f32 %v2790_v60, %v13477_v61  ;;  %v3386_v0 = vmax.f32 %v2674_v4, 0.0  ;;  %v3388_v37 = vmax.f32 %v2787_v29, 0.0 }
 0x49a   : > { %v3401_v6 = vmax.f32 %v2676_v40, 0.0  ;;  %v3403_v27 = vmax.f32 %v2789_v5, 0.0  ;;  %4524 = vmatmul.mubr.bf16.gmra.mrb[168].mxu0 %v13444_v10  ;;  %4621 = vmatmul.mubr.bf16.gmra.mrb[168].mxu1 %v13446_v56 }
 0x49b   : > { %v3402_v24 = vmax.f32 %v2678_v7, 0.0  ;;  %v3404_v1 = vmax.f32 %v2791_v23, 0.0  ;;  %4531 = vmatprep.mubr.bf16.mxu0 %v13487_v48  ;;  %4628 = vmatprep.mubr.bf16.mxu1 %v13489_v63 }
 0x49c   : > { %v13563_v26 = vpack.c.bf16 %v3401_v6, %v3385_v44  ;;  %v13565_v35 = vpack.c.bf16 %v3403_v27, %v3387_v50 }
 0x49d   : > { %v2681_v34 = vpop.f32.mrb[64].mxu0  ;;  %v2794_v19 = vpop.f32.mrb[64].mxu1  ;;  %v13567_v33 = vpack.c.bf16 %v3402_v24, %v3386_v0  ;;  %v13569_v57 = vpack.c.bf16 %v3404_v1, %v3388_v37 }
 0x49e   : > { %v2682_v10 = vadd.f32 %v2681_v34, %v13461_v38  ;;  %v2795_v56 = vadd.f32 %v2794_v19, %v13465_v62  ;;  %v2683_v9 = vpop.f32.mrb[65].mxu0  ;;  %v2796_v4 = vpop.f32.mrb[65].mxu1 }
 0x49f   : > { %v2684_v48 = vadd.f32 %v2683_v9, %v13471_v30  ;;  %v2797_v63 = vadd.f32 %v2796_v4, %v13477_v61  ;;  %v2685_v29 = vpop.f32.mrb[66].mxu0  ;;  %v2798_v53 = vpop.f32.mrb[66].mxu1 }
 0x4a0   : > { %v2686_v15 = vadd.f32 %v2685_v29, %v13461_v38  ;;  %v2799_v40 = vadd.f32 %v2798_v53, %v13465_v62  ;;  %v2687_v5 = vpop.f32.mrb[67].mxu0  ;;  %v2800_v58 = vpop.f32.mrb[67].mxu1  ;;  %v3417_v23 = vmax.f32 %v2682_v10, 0.0  ;;  %v3419_v44 = vmax.f32 %v2795_v56, 0.0  ;;  %v12054_v53 = vld [vmem:[#allocation4 + $0x200] sm:$0xff]  }
 0x4a1   : > { %v2688_v60 = vadd.f32 %v2687_v5, %v13471_v30  ;;  %v2801_v7 = vadd.f32 %v2800_v58, %v13477_v61  ;;  %v3418_v27 = vmax.f32 %v2684_v48, 0.0  ;;  %v3420_v0 = vmax.f32 %v2797_v63, 0.0 }
 0x4a2   : > { %v3433_v50 = vmax.f32 %v2686_v15, 0.0  ;;  %v3435_v6 = vmax.f32 %v2799_v40, 0.0  ;;  %4532 = vmatmul.mubr.bf16.gmra.mrb[172].mxu0 %v13483_v14  ;;  %4629 = vmatmul.mubr.bf16.gmra.mrb[172].mxu1 %v13485_v17 }
 0x4a3   : > { %v3434_v37 = vmax.f32 %v2688_v60, 0.0  ;;  %v3436_v24 = vmax.f32 %v2801_v7, 0.0  ;;  %4669 = vmatprep.mubr.bf16.mxu0 %v13507_v25  ;;  %4766 = vmatprep.mubr.bf16.mxu1 %v13509_v45  ;;  %v12056_v60 = vld [vmem:[#allocation4 + $0x280] sm:$0xff]  }
 0x4a4   : > { %v13583_v1 = vpack.c.bf16 %v3433_v50, %v3417_v23  ;;  %v13585_v34 = vpack.c.bf16 %v3435_v6, %v3419_v44  ;;  %v12057_v44 = vld [vmem:[#allocation4 + $0x248] sm:$0xff]  }
 0x4a5   : > { %v2691_v19 = vpop.f32.mrb[68].mxu0  ;;  %v2804_v10 = vpop.f32.mrb[68].mxu1  ;;  %v13587_v56 = vpack.c.bf16 %v3434_v37, %v3418_v27  ;;  %v13589_v9 = vpack.c.bf16 %v3436_v24, %v3420_v0  ;;  %v12059_v50 = vld [vmem:[#allocation4 + $0x2c8] sm:$0xff]  }
 0x4a6   : > { %v2692_v14 = vadd.f32 %v2691_v19, %v13461_v38  ;;  %v2805_v17 = vadd.f32 %v2804_v10, %v13465_v62  ;;  %v2693_v4 = vpop.f32.mrb[69].mxu0  ;;  %v2806_v48 = vpop.f32.mrb[69].mxu1 }
 0x4a7   : > { %v2694_v25 = vadd.f32 %v2693_v4, %v13471_v30  ;;  %v2807_v45 = vadd.f32 %v2806_v48, %v13477_v61  ;;  %v2695_v63 = vpop.f32.mrb[70].mxu0  ;;  %v2808_v29 = vpop.f32.mrb[70].mxu1  ;;  %v12058_v48 = vld [vmem:[#allocation4 + $0x208] sm:$0xff]  }
 0x4a8   : > { %v2696_v15 = vadd.f32 %v2695_v63, %v13461_v38  ;;  %v2809_v40 = vadd.f32 %v2808_v29, %v13465_v62  ;;  %v2697_v5 = vpop.f32.mrb[71].mxu0  ;;  %v2810_v58 = vpop.f32.mrb[71].mxu1  ;;  %v3449_v6 = vmax.f32 %v2692_v14, 0.0  ;;  %v3451_v27 = vmax.f32 %v2805_v17, 0.0  ;;  %v12060_v63 = vld [vmem:[#allocation4 + $0x288] sm:$0xff]   ;;  %v12061_v14 = vld [vmem:[#allocation4 + $0x250] sm:$0xff]  }
 0x4a9   : > { %v2698_v7 = vadd.f32 %v2697_v5, %v13471_v30  ;;  %v2811_v23 = vadd.f32 %v2810_v58, %v13477_v61  ;;  %v3450_v24 = vmax.f32 %v2694_v25, 0.0  ;;  %v3452_v19 = vmax.f32 %v2807_v45, 0.0 }
 0x4aa   : > { %v3465_v0 = vmax.f32 %v2696_v15, 0.0  ;;  %v3467_v37 = vmax.f32 %v2809_v40, 0.0  ;;  %4670 = vmatmul.mubr.bf16.vlgmr.msra.gmra.mrb[176].mxu0 %v13503_v52  ;;  %4767 = vmatmul.mubr.bf16.vlgmr.msra.gmra.mrb[176].mxu1 %v13505_v28  ;;  %v12063_v28 = vld [vmem:[#allocation4 + $0x2d0] sm:$0xff]  }
 0x4ab   : > { %v3466_v10 = vmax.f32 %v2698_v7, 0.0  ;;  %v3468_v4 = vmax.f32 %v2811_v23, 0.0  ;;  %11045 = vmatpush3.bf16.msra.mxu0 %v12054_v53  ;;  %4677 = vmatprep.mubr.bf16.mxu0 %v13527_v42 }
 0x4ac   : > { %4774 = vmatprep.mubr.bf16.mxu1 %v13529_v11  ;;  %11109 = vmatpush3.bf16.msra.mxu1 %v12056_v60  ;;  %v13603_v17 = vpack.c.bf16 %v3465_v0, %v3449_v6  ;;  %v13605_v29 = vpack.c.bf16 %v3467_v37, %v3451_v27  ;;  %v12062_v27 = vld [vmem:[#allocation4 + $0x210] sm:$0xff]  }
 0x4ad   : > { %v2701_v52 = vpop.f32.mrb[72].mxu0  ;;  %v2814_v15 = vpop.f32.mrb[72].mxu1  ;;  %11046 = vmatprep.subr.bf16.mxu0 %v12057_v44  ;;  %11110 = vmatprep.subr.bf16.mxu1 %v12059_v50  ;;  %v13607_v25 = vpack.c.bf16 %v3466_v10, %v3450_v24  ;;  %v13609_v45 = vpack.c.bf16 %v3468_v4, %v3452_v19  ;;  %v12064_v0 = vld [vmem:[#allocation4 + $0x290] sm:$0xff]   ;;  %v12065_v19 = vld [vmem:[#allocation4 + $0x258] sm:$0xff]  }
 0x4ae   : > { %v2702_v42 = vadd.f32 %v2701_v52, %v13461_v38  ;;  %v2815_v11 = vadd.f32 %v2814_v15, %v13465_v62  ;;  %v2703_v53 = vpop.f32.mrb[73].mxu0  ;;  %v2816_v40 = vpop.f32.mrb[73].mxu1  ;;  %v12067_v10 = vld [vmem:[#allocation4 + $0x2d8] sm:$0xff]  }
 0x4af   : > { %v2704_v5 = vadd.f32 %v2703_v53, %v13471_v30  ;;  %v2817_v58 = vadd.f32 %v2816_v40, %v13477_v61  ;;  %v2705_v60 = vpop.f32.mrb[74].mxu0  ;;  %v2818_v7 = vpop.f32.mrb[74].mxu1  ;;  %11047 = vmatpush3.bf16.msra.mxu0 %v12058_v48 }
 0x4b0   : > { %v2706_v23 = vadd.f32 %v2705_v60, %v13461_v38  ;;  %v2819_v44 = vadd.f32 %v2818_v7, %v13465_v62  ;;  %v2707_v50 = vpop.f32.mrb[75].mxu0  ;;  %v2820_v6 = vpop.f32.mrb[75].mxu1  ;;  %11111 = vmatpush3.bf16.msra.mxu1 %v12060_v63  ;;  %11048 = vmatprep.subr.bf16.mxu0 %v12061_v14  ;;  %v3481_v4 = vmax.f32 %v2702_v42, 0.0  ;;  %v3483_v52 = vmax.f32 %v2815_v11, 0.0  ;;  %v12066_v42 = vld [vmem:[#allocation4 + $0x218] sm:$0xff]   ;;  %v12071_v60 = vld [vmem:[#allocation4 + $0x2e0] sm:$0xff]  }
 0x4b1   : > { %v2708_v37 = vadd.f32 %v2707_v50, %v13471_v30  ;;  %v2821_v24 = vadd.f32 %v2820_v6, %v13477_v61  ;;  %11112 = vmatprep.subr.bf16.mxu1 %v12063_v28  ;;  %v3482_v53 = vmax.f32 %v2704_v5, 0.0  ;;  %v3484_v63 = vmax.f32 %v2817_v58, 0.0  ;;  %v13626_v28 = vld [vmem:[%s16085_s10 + $0x8] sm:$0xff]  ;;  %v12068_v11 = vld [vmem:[#allocation4 + $0x298] sm:$0xff]  }
 0x4b2   : > { %v3497_v48 = vmax.f32 %v2706_v23, 0.0  ;;  %v3499_v15 = vmax.f32 %v2819_v44, 0.0  ;;  %4678 = vmatmul.mubr.bf16.gmra.mrb[180].mxu0 %v13523_v21  ;;  %4775 = vmatmul.mubr.bf16.gmra.mrb[180].mxu1 %v13525_v32 }
 0x4b3   : > { %v3498_v14 = vmax.f32 %v2708_v37, 0.0  ;;  %v3500_v40 = vmax.f32 %v2821_v24, 0.0  ;;  %4685 = vmatprep.mubr.bf16.mxu0 %v13547_v59  ;;  %4782 = vmatprep.mubr.bf16.mxu1 %v13549_v54  ;;  %v12069_v59 = vld [vmem:[#allocation4 + $0x260] sm:$0xff]  }
 0x4b4   : > { %11049 = vmatpush3.bf16.msra.mxu0 %v12062_v27  ;;  %11113 = vmatpush3.bf16.msra.mxu1 %v12064_v0  ;;  %v13628_v21 = vpack.c.bf16 %v3497_v48, %v3481_v4  ;;  %v13630_v32 = vpack.c.bf16 %v3499_v15, %v3483_v52 }
 0x4b5   : > { %v2711_v5 = vpop.f32.mrb[76].mxu0  ;;  %v2824_v58 = vpop.f32.mrb[76].mxu1  ;;  %11050 = vmatprep.subr.bf16.mxu0 %v12065_v19  ;;  %11114 = vmatprep.subr.bf16.mxu1 %v12067_v10  ;;  %v13632_v54 = vpack.c.bf16 %v3498_v14, %v3482_v53  ;;  %v13634_v7 = vpack.c.bf16 %v3500_v40, %v3484_v63  ;;  %v13642_v19 = vrot.slane %v13626_v28, %v13267_v12  ;;  %v12070_v63 = vld [vmem:[#allocation4 + $0x220] sm:$0xff]  }
 0x4b6   : > { %v2712_v23 = vadd.f32 %v2711_v5, %v13461_v38  ;;  %v2825_v44 = vadd.f32 %v2824_v58, %v13465_v62  ;;  %v2713_v50 = vpop.f32.mrb[77].mxu0  ;;  %v2826_v6 = vpop.f32.mrb[77].mxu1  ;;  %v13646_v10 = vrot.slane %v13626_v28, %v13270_v13  ;;  %v13652_v53 = vrot.slane %v13626_v28, %v13278_v16  ;;  %v12072_v14 = vld [vmem:[#allocation4 + $0x2a0] sm:$0xff]  }
 0x4b7   : > { %v2714_v27 = vadd.f32 %v2713_v50, %v13471_v30  ;;  %v2827_v0 = vadd.f32 %v2826_v6, %v13477_v61  ;;  %v2715_v37 = vpop.f32.mrb[78].mxu0  ;;  %v2828_v24 = vpop.f32.mrb[78].mxu1  ;;  %v13658_v58 = vrot.slane %v13626_v28, %v13281_v20 }
 0x4b8   : > { %v2716_v4 = vadd.f32 %v2715_v37, %v13461_v38  ;;  %v2829_v52 = vadd.f32 %v2828_v24, %v13465_v62  ;;  %v2717_v48 = vpop.f32.mrb[79].mxu0  ;;  %v2830_v15 = vpop.f32.mrb[79].mxu1  ;;  %11051 = vmatpush3.bf16.msra.mxu0 %v12066_v42  ;;  %11115 = vmatpush3.bf16.msra.mxu1 %v12068_v11  ;;  %v12073_v38 = vld [vmem:[#allocation4 + $0x268] sm:$0xff]   ;;  %v3513_v50 = vmax.f32 %v2712_v23, 0.0  ;;  %v3515_v6 = vmax.f32 %v2825_v44, 0.0 }
 0x4b9   : > { %v2718_v40 = vadd.f32 %v2717_v48, %v13471_v30  ;;  %v2831_v5 = vadd.f32 %v2830_v15, %v13477_v61  ;;  %11052 = vmatprep.subr.bf16.mxu0 %v12069_v59  ;;  %11116 = vmatprep.subr.bf16.mxu1 %v12071_v60  ;;  %v12075_v62 = vld [vmem:[#allocation4 + $0x2e8] sm:$0xff]   ;;  %v3514_v42 = vmax.f32 %v2714_v27, 0.0  ;;  %v3516_v30 = vmax.f32 %v2827_v0, 0.0 }
 0x4ba   : > { %v3529_v37 = vmax.f32 %v2716_v4, 0.0  ;;  %v3531_v24 = vmax.f32 %v2829_v52, 0.0  ;;  %4686 = vmatmul.mubr.bf16.gmra.mrb[184].mxu0 %v13543_v41  ;;  %4783 = vmatmul.mubr.bf16.gmra.mrb[184].mxu1 %v13545_v39  ;;  %v12074_v59 = vld [vmem:[#allocation4 + $0x228] sm:$0xff]   ;;  %v12077_v39 = vld [vmem:[#allocation4 + $0x270] sm:$0xff]  }
 0x4bb   : > { %v3530_v11 = vmax.f32 %v2718_v40, 0.0  ;;  %v3532_v61 = vmax.f32 %v2831_v5, 0.0  ;;  %4693 = vmatprep.mubr.bf16.mxu0 %v13567_v33  ;;  %4790 = vmatprep.mubr.bf16.mxu1 %v13569_v57  ;;  %v12076_v60 = vld [vmem:[#allocation4 + $0x2a8] sm:$0xff]   ;;  %v12079_v33 = vld [vmem:[#allocation4 + $0x2f0] sm:$0xff]  }
 0x4bc   : > { %11053 = vmatpush3.bf16.msra.mxu0 %v12070_v63  ;;  %11117 = vmatpush3.bf16.msra.mxu1 %v12072_v14  ;;  %v13664_v23 = vpack.c.bf16 %v3529_v37, %v3513_v50  ;;  %v13666_v44 = vpack.c.bf16 %v3531_v24, %v3515_v6  ;;  %v12078_v37 = vld [vmem:[#allocation4 + $0x230] sm:$0xff]  }
 0x4bd   : > { %v2867_v4 = vpop.f32.mrb[80].mxu0  ;;  %v2980_v41 = vpop.f32.mrb[80].mxu1  ;;  %11054 = vmatprep.subr.bf16.mxu0 %v12073_v38  ;;  %11118 = vmatprep.subr.bf16.mxu1 %v12075_v62  ;;  %v13668_v27 = vpack.c.bf16 %v3530_v11, %v3514_v42  ;;  %v13670_v0 = vpack.c.bf16 %v3532_v61, %v3516_v30  ;;  %v12080_v24 = vld [vmem:[#allocation4 + $0x2b0] sm:$0xff]   ;;  %v12081_v11 = vld [vmem:[#allocation4 + $0x278] sm:$0xff]  }
 0x4be   : > { %v2868_v57 = vadd.f32 %v2867_v4, %v13642_v19  ;;  %v2981_v52 = vadd.f32 %v2980_v41, %v13646_v10  ;;  %v2869_v48 = vpop.f32.mrb[81].mxu0  ;;  %v2982_v15 = vpop.f32.mrb[81].mxu1  ;;  %v12083_v61 = vld [vmem:[#allocation4 + $0x2f8] sm:$0xff]  }
 0x4bf   : > { %v2870_v63 = vadd.f32 %v2869_v48, %v13652_v53  ;;  %v2983_v14 = vadd.f32 %v2982_v15, %v13658_v58  ;;  %v2871_v40 = vpop.f32.mrb[82].mxu0  ;;  %v2984_v5 = vpop.f32.mrb[82].mxu1 }
 0x4c0   : > { %v2872_v38 = vadd.f32 %v2871_v40, %v13642_v19  ;;  %v2985_v62 = vadd.f32 %v2984_v5, %v13646_v10  ;;  %v2873_v50 = vpop.f32.mrb[83].mxu0  ;;  %v2986_v6 = vpop.f32.mrb[83].mxu1  ;;  %11055 = vmatpush3.bf16.msra.mxu0 %v12074_v59  ;;  %11119 = vmatpush3.bf16.msra.mxu1 %v12076_v60  ;;  %v3293_v4 = vmax.f32 %v2868_v57, 0.0  ;;  %v3295_v41 = vmax.f32 %v2981_v52, 0.0  ;;  %v12082_v57 = vld [vmem:[#allocation4 + $0x238] sm:$0xff]  }
 0x4c1   : > { %v2874_v42 = vadd.f32 %v2873_v50, %v13652_v53  ;;  %v2987_v30 = vadd.f32 %v2986_v6, %v13658_v58  ;;  %11056 = vmatprep.subr.bf16.mxu0 %v12077_v39  ;;  %11120 = vmatprep.subr.bf16.mxu1 %v12079_v33  ;;  %v3294_v59 = vmax.f32 %v2870_v63, 0.0  ;;  %v3296_v60 = vmax.f32 %v2983_v14, 0.0  ;;  %v12084_v52 = vld [vmem:[#allocation4 + $0x2b8] sm:$0xff]   ;;  %v12085_v14 = vld [vmem:[#allocation4 + $0x340] sm:$0xff]  }
 0x4c2   : > { %v3309_v48 = vmax.f32 %v2872_v38, 0.0  ;;  %v3311_v15 = vmax.f32 %v2985_v62, 0.0  ;;  %4694 = vmatmul.mubr.bf16.gmra.mrb[188].mxu0 %v13563_v26  ;;  %4791 = vmatmul.mubr.bf16.gmra.mrb[188].mxu1 %v13565_v35 }
 0x4c3   : > { %v3310_v40 = vmax.f32 %v2874_v42, 0.0  ;;  %v3312_v5 = vmax.f32 %v2987_v30, 0.0  ;;  %4701 = vmatprep.mubr.bf16.mxu0 %v13587_v56  ;;  %4798 = vmatprep.mubr.bf16.mxu1 %v13589_v9  ;;  %v12087_v56 = vld [vmem:[#allocation4 + $0x3c0] sm:$0xff]  }
 0x4c4   : > { %v13684_v39 = vpack.c.bf16 %v3309_v48, %v3293_v4  ;;  %v13686_v33 = vpack.c.bf16 %v3311_v15, %v3295_v41  ;;  %11057 = vmatpush3.bf16.msra.mxu0 %v12078_v37  ;;  %11121 = vmatpush3.bf16.msra.mxu1 %v12080_v24 }
 0x4c5   : > { %v2877_v38 = vpop.f32.mrb[84].mxu0  ;;  %v2990_v26 = vpop.f32.mrb[84].mxu1  ;;  %11058 = vmatprep.subr.bf16.mxu0 %v12081_v11  ;;  %v13688_v35 = vpack.c.bf16 %v3310_v40, %v3294_v59  ;;  %11122 = vmatprep.subr.bf16.mxu1 %v12083_v61  ;;  %v13690_v63 = vpack.c.bf16 %v3312_v5, %v3296_v60 }
 0x4c6   : > { %v2878_v9 = vadd.f32 %v2877_v38, %v13642_v19  ;;  %v2991_v62 = vadd.f32 %v2990_v26, %v13646_v10  ;;  %v2879_v50 = vpop.f32.mrb[85].mxu0  ;;  %v2992_v6 = vpop.f32.mrb[85].mxu1 }
 0x4c7   : > { %v2880_v37 = vadd.f32 %v2879_v50, %v13652_v53  ;;  %v2993_v24 = vadd.f32 %v2992_v6, %v13658_v58  ;;  %v2881_v42 = vpop.f32.mrb[86].mxu0  ;;  %v2994_v30 = vpop.f32.mrb[86].mxu1 }
 0x4c8   : > { %v2882_v11 = vadd.f32 %v2881_v42, %v13642_v19  ;;  %v2995_v61 = vadd.f32 %v2994_v30, %v13646_v10  ;;  %v2883_v4 = vpop.f32.mrb[87].mxu0  ;;  %v2996_v41 = vpop.f32.mrb[87].mxu1  ;;  %11059 = vmatpush3.bf16.msra.mxu0 %v12082_v57  ;;  %11123 = vmatpush3.bf16.msra.mxu1 %v12084_v52  ;;  %v3325_v59 = vmax.f32 %v2878_v9, 0.0  ;;  %v3327_v60 = vmax.f32 %v2991_v62, 0.0 }
 0x4c9   : > { %v2884_v48 = vadd.f32 %v2883_v4, %v13652_v53  ;;  %v2997_v15 = vadd.f32 %v2996_v41, %v13658_v58  ;;  %11172 = vmatprep.subr.bf16.mxu0 %v12085_v14  ;;  %11236 = vmatprep.subr.bf16.mxu1 %v12087_v56  ;;  %v3326_v38 = vmax.f32 %v2880_v37, 0.0  ;;  %v3328_v26 = vmax.f32 %v2993_v24, 0.0 }
 0x4ca   : > { %v3341_v40 = vmax.f32 %v2882_v11, 0.0  ;;  %v3343_v5 = vmax.f32 %v2995_v61, 0.0  ;;  %4702 = vmatmul.mubr.bf16.gmra.mrb[192].mxu0 %v13583_v1  ;;  %4799 = vmatmul.mubr.bf16.gmra.mrb[192].mxu1 %v13585_v34 }
 0x4cb   : > { %v3342_v50 = vmax.f32 %v2884_v48, 0.0  ;;  %v3344_v6 = vmax.f32 %v2997_v15, 0.0  ;;  %4709 = vmatprep.mubr.bf16.mxu0 %v13607_v25  ;;  %4806 = vmatprep.mubr.bf16.mxu1 %v13609_v45 }
 0x4cc   : > { %v13704_v57 = vpack.c.bf16 %v3341_v40, %v3325_v59  ;;  %v13706_v52 = vpack.c.bf16 %v3343_v5, %v3327_v60 }
 0x4cd   : > { %v2887_v14 = vpop.f32.mrb[88].mxu0  ;;  %v3000_v56 = vpop.f32.mrb[88].mxu1  ;;  %v13708_v9 = vpack.c.bf16 %v3342_v50, %v3326_v38  ;;  %v13710_v62 = vpack.c.bf16 %v3344_v6, %v3328_v26 }
 0x4ce   : > { %v2888_v1 = vadd.f32 %v2887_v14, %v13642_v19  ;;  %v3001_v34 = vadd.f32 %v3000_v56, %v13646_v10  ;;  %v2889_v37 = vpop.f32.mrb[89].mxu0  ;;  %v3002_v24 = vpop.f32.mrb[89].mxu1 }
 0x4cf   : > { %v2890_v25 = vadd.f32 %v2889_v37, %v13652_v53  ;;  %v3003_v45 = vadd.f32 %v3002_v24, %v13658_v58  ;;  %v2891_v42 = vpop.f32.mrb[90].mxu0  ;;  %v3004_v30 = vpop.f32.mrb[90].mxu1 }
 0x4d0   : > { %v2892_v11 = vadd.f32 %v2891_v42, %v13642_v19  ;;  %v3005_v61 = vadd.f32 %v3004_v30, %v13646_v10  ;;  %v2893_v4 = vpop.f32.mrb[91].mxu0  ;;  %v3006_v41 = vpop.f32.mrb[91].mxu1  ;;  %v3357_v59 = vmax.f32 %v2888_v1, 0.0  ;;  %v3359_v60 = vmax.f32 %v3001_v34, 0.0 }
 0x4d1   : > { %v2894_v48 = vadd.f32 %v2893_v4, %v13652_v53  ;;  %v3007_v15 = vadd.f32 %v3006_v41, %v13658_v58  ;;  %v3358_v38 = vmax.f32 %v2890_v25, 0.0  ;;  %v3360_v26 = vmax.f32 %v3003_v45, 0.0 }
 0x4d2   : > { %v3373_v40 = vmax.f32 %v2892_v11, 0.0  ;;  %v3375_v5 = vmax.f32 %v3005_v61, 0.0  ;;  %4710 = vmatmul.mubr.bf16.gmra.mrb[196].mxu0 %v13603_v17  ;;  %4807 = vmatmul.mubr.bf16.gmra.mrb[196].mxu1 %v13605_v29 }
 0x4d3   : > { %v3374_v50 = vmax.f32 %v2894_v48, 0.0  ;;  %v3376_v6 = vmax.f32 %v3007_v15, 0.0  ;;  %4717 = vmatprep.mubr.bf16.mxu0 %v13632_v54  ;;  %4814 = vmatprep.mubr.bf16.mxu1 %v13634_v7 }
 0x4d4   : > { %v13724_v14 = vpack.c.bf16 %v3373_v40, %v3357_v59  ;;  %v13726_v56 = vpack.c.bf16 %v3375_v5, %v3359_v60 }
 0x4d5   : > { %v2897_v1 = vpop.f32.mrb[92].mxu0  ;;  %v3010_v34 = vpop.f32.mrb[92].mxu1  ;;  %v13728_v37 = vpack.c.bf16 %v3374_v50, %v3358_v38  ;;  %v13730_v24 = vpack.c.bf16 %v3376_v6, %v3360_v26 }
 0x4d6   : > { %v2898_v17 = vadd.f32 %v2897_v1, %v13642_v19  ;;  %v3011_v29 = vadd.f32 %v3010_v34, %v13646_v10  ;;  %v2899_v25 = vpop.f32.mrb[93].mxu0  ;;  %v3012_v45 = vpop.f32.mrb[93].mxu1 }
 0x4d7   : > { %v2900_v54 = vadd.f32 %v2899_v25, %v13652_v53  ;;  %v3013_v7 = vadd.f32 %v3012_v45, %v13658_v58  ;;  %v2901_v42 = vpop.f32.mrb[94].mxu0  ;;  %v3014_v30 = vpop.f32.mrb[94].mxu1 }
 0x4d8   : > { %v2902_v11 = vadd.f32 %v2901_v42, %v13642_v19  ;;  %v3015_v61 = vadd.f32 %v3014_v30, %v13646_v10  ;;  %v2903_v4 = vpop.f32.mrb[95].mxu0  ;;  %v3016_v41 = vpop.f32.mrb[95].mxu1  ;;  %v3389_v59 = vmax.f32 %v2898_v17, 0.0  ;;  %v3391_v60 = vmax.f32 %v3011_v29, 0.0 }
 0x4d9   : > { %v2904_v48 = vadd.f32 %v2903_v4, %v13652_v53  ;;  %v3017_v15 = vadd.f32 %v3016_v41, %v13658_v58  ;;  %v3390_v38 = vmax.f32 %v2900_v54, 0.0  ;;  %v3392_v26 = vmax.f32 %v3013_v7, 0.0 }
 0x4da   : > { %v3405_v40 = vmax.f32 %v2902_v11, 0.0  ;;  %v3407_v5 = vmax.f32 %v3015_v61, 0.0  ;;  %4718 = vmatmul.mubr.bf16.gmra.mrb[200].mxu0 %v13628_v21  ;;  %4815 = vmatmul.mubr.bf16.gmra.mrb[200].mxu1 %v13630_v32 }
 0x4db   : > { %v3406_v50 = vmax.f32 %v2904_v48, 0.0  ;;  %v3408_v6 = vmax.f32 %v3017_v15, 0.0  ;;  %4725 = vmatprep.mubr.bf16.mxu0 %v13668_v27  ;;  %4822 = vmatprep.mubr.bf16.mxu1 %v13670_v0 }
 0x4dc   : > { %v13744_v1 = vpack.c.bf16 %v3405_v40, %v3389_v59  ;;  %v13746_v34 = vpack.c.bf16 %v3407_v5, %v3391_v60 }
 0x4dd   : > { %v2907_v17 = vpop.f32.mrb[96].mxu0  ;;  %v3020_v29 = vpop.f32.mrb[96].mxu1  ;;  %v13748_v25 = vpack.c.bf16 %v3406_v50, %v3390_v38  ;;  %v13750_v45 = vpack.c.bf16 %v3408_v6, %v3392_v26 }
 0x4de   : > { %v2908_v21 = vadd.f32 %v2907_v17, %v13642_v19  ;;  %v3021_v32 = vadd.f32 %v3020_v29, %v13646_v10  ;;  %v2909_v54 = vpop.f32.mrb[97].mxu0  ;;  %v3022_v7 = vpop.f32.mrb[97].mxu1 }
 0x4df   : > { %v2910_v27 = vadd.f32 %v2909_v54, %v13652_v53  ;;  %v3023_v0 = vadd.f32 %v3022_v7, %v13658_v58  ;;  %v2911_v42 = vpop.f32.mrb[98].mxu0  ;;  %v3024_v30 = vpop.f32.mrb[98].mxu1 }
 0x4e0   : > { %v2912_v11 = vadd.f32 %v2911_v42, %v13642_v19  ;;  %v3025_v61 = vadd.f32 %v3024_v30, %v13646_v10  ;;  %v2913_v4 = vpop.f32.mrb[99].mxu0  ;;  %v3026_v41 = vpop.f32.mrb[99].mxu1  ;;  %v3421_v59 = vmax.f32 %v2908_v21, 0.0  ;;  %v3423_v60 = vmax.f32 %v3021_v32, 0.0 }
 0x4e1   : > { %v2914_v48 = vadd.f32 %v2913_v4, %v13652_v53  ;;  %v3027_v15 = vadd.f32 %v3026_v41, %v13658_v58  ;;  %v3422_v38 = vmax.f32 %v2910_v27, 0.0  ;;  %v3424_v26 = vmax.f32 %v3023_v0, 0.0 }
 0x4e2   : > { %v3437_v40 = vmax.f32 %v2912_v11, 0.0  ;;  %v3439_v5 = vmax.f32 %v3025_v61, 0.0  ;;  %4726 = vmatmul.mubr.bf16.gmra.mrb[204].mxu0 %v13664_v23  ;;  %4823 = vmatmul.mubr.bf16.gmra.mrb[204].mxu1 %v13666_v44  ;;  %v12086_v11 = vld [vmem:[#allocation4 + $0x300] sm:$0xff]  }
 0x4e3   : > { %v3438_v50 = vmax.f32 %v2914_v48, 0.0  ;;  %v3440_v6 = vmax.f32 %v3027_v15, 0.0  ;;  %4863 = vmatprep.mubr.bf16.mxu0 %v13688_v35  ;;  %4960 = vmatprep.mubr.bf16.mxu1 %v13690_v63  ;;  %v12088_v15 = vld [vmem:[#allocation4 + $0x380] sm:$0xff]  }
 0x4e4   : > { %v13764_v17 = vpack.c.bf16 %v3437_v40, %v3421_v59  ;;  %v13766_v29 = vpack.c.bf16 %v3439_v5, %v3423_v60  ;;  %v12089_v40 = vld [vmem:[#allocation4 + $0x348] sm:$0xff]  }
 0x4e5   : > { %v2917_v21 = vpop.f32.mrb[100].mxu0  ;;  %v3030_v32 = vpop.f32.mrb[100].mxu1  ;;  %v13768_v54 = vpack.c.bf16 %v3438_v50, %v3422_v38  ;;  %v13770_v7 = vpack.c.bf16 %v3440_v6, %v3424_v26  ;;  %v12091_v5 = vld [vmem:[#allocation4 + $0x3c8] sm:$0xff]  }
 0x4e6   : > { %v2918_v23 = vadd.f32 %v2917_v21, %v13642_v19  ;;  %v3031_v44 = vadd.f32 %v3030_v32, %v13646_v10  ;;  %v2919_v27 = vpop.f32.mrb[101].mxu0  ;;  %v3032_v0 = vpop.f32.mrb[101].mxu1 }
 0x4e7   : > { %v2920_v35 = vadd.f32 %v2919_v27, %v13652_v53  ;;  %v3033_v63 = vadd.f32 %v3032_v0, %v13658_v58  ;;  %v2921_v42 = vpop.f32.mrb[102].mxu0  ;;  %v3034_v30 = vpop.f32.mrb[102].mxu1 }
 0x4e8   : > { %v2922_v61 = vadd.f32 %v2921_v42, %v13642_v19  ;;  %v3035_v4 = vadd.f32 %v3034_v30, %v13646_v10  ;;  %v2923_v41 = vpop.f32.mrb[103].mxu0  ;;  %v3036_v48 = vpop.f32.mrb[103].mxu1  ;;  %v3453_v38 = vmax.f32 %v2918_v23, 0.0  ;;  %v3455_v26 = vmax.f32 %v3031_v44, 0.0  ;;  %v12090_v42 = vld [vmem:[#allocation4 + $0x308] sm:$0xff]   ;;  %v12093_v23 = vld [vmem:[#allocation4 + $0x350] sm:$0xff]  }
 0x4e9   : > { %v2924_v59 = vadd.f32 %v2923_v41, %v13652_v53  ;;  %v3037_v60 = vadd.f32 %v3036_v48, %v13658_v58  ;;  %v3454_v21 = vmax.f32 %v2920_v35, 0.0  ;;  %v3456_v32 = vmax.f32 %v3033_v63, 0.0  ;;  %v12092_v30 = vld [vmem:[#allocation4 + $0x388] sm:$0xff]  }
 0x4ea   : > { %v3469_v50 = vmax.f32 %v2922_v61, 0.0  ;;  %v3471_v6 = vmax.f32 %v3035_v4, 0.0  ;;  %4864 = vmatmul.mubr.bf16.vlgmr.msra.gmra.mrb[208].mxu0 %v13684_v39  ;;  %4961 = vmatmul.mubr.bf16.vlgmr.msra.gmra.mrb[208].mxu1 %v13686_v33  ;;  %v12095_v33 = vld [vmem:[#allocation4 + $0x3d0] sm:$0xff]  }
 0x4eb   : > { %v3470_v27 = vmax.f32 %v2924_v59, 0.0  ;;  %v3472_v0 = vmax.f32 %v3037_v60, 0.0  ;;  %11173 = vmatpush3.bf16.msra.mxu0 %v12086_v11  ;;  %4871 = vmatprep.mubr.bf16.mxu0 %v13708_v9 }
 0x4ec   : > { %4968 = vmatprep.mubr.bf16.mxu1 %v13710_v62  ;;  %11237 = vmatpush3.bf16.msra.mxu1 %v12088_v15  ;;  %v13784_v44 = vpack.c.bf16 %v3469_v50, %v3453_v38  ;;  %v13786_v61 = vpack.c.bf16 %v3471_v6, %v3455_v26  ;;  %v12094_v50 = vld [vmem:[#allocation4 + $0x310] sm:$0xff]  }
 0x4ed   : > { %v2927_v39 = vpop.f32.mrb[104].mxu0  ;;  %v3040_v4 = vpop.f32.mrb[104].mxu1  ;;  %11174 = vmatprep.subr.bf16.mxu0 %v12089_v40  ;;  %11238 = vmatprep.subr.bf16.mxu1 %v12091_v5  ;;  %v13788_v35 = vpack.c.bf16 %v3470_v27, %v3454_v21  ;;  %v13790_v63 = vpack.c.bf16 %v3472_v0, %v3456_v32  ;;  %v12096_v6 = vld [vmem:[#allocation4 + $0x390] sm:$0xff]   ;;  %v12097_v27 = vld [vmem:[#allocation4 + $0x358] sm:$0xff]  }
 0x4ee   : > { %v2928_v9 = vadd.f32 %v2927_v39, %v13642_v19  ;;  %v3041_v62 = vadd.f32 %v3040_v4, %v13646_v10  ;;  %v2929_v11 = vpop.f32.mrb[105].mxu0  ;;  %v3042_v41 = vpop.f32.mrb[105].mxu1  ;;  %v12099_v0 = vld [vmem:[#allocation4 + $0x3d8] sm:$0xff]  }
 0x4ef   : > { %v2930_v48 = vadd.f32 %v2929_v11, %v13652_v53  ;;  %v3043_v15 = vadd.f32 %v3042_v41, %v13658_v58  ;;  %v2931_v59 = vpop.f32.mrb[106].mxu0  ;;  %v3044_v60 = vpop.f32.mrb[106].mxu1  ;;  %11175 = vmatpush3.bf16.msra.mxu0 %v12090_v42 }
 0x4f0   : > { %v2932_v40 = vadd.f32 %v2931_v59, %v13642_v19  ;;  %v3045_v5 = vadd.f32 %v3044_v60, %v13646_v10  ;;  %v2933_v38 = vpop.f32.mrb[107].mxu0  ;;  %v3046_v26 = vpop.f32.mrb[107].mxu1  ;;  %11239 = vmatpush3.bf16.msra.mxu1 %v12092_v30  ;;  %11176 = vmatprep.subr.bf16.mxu0 %v12093_v23  ;;  %v3485_v39 = vmax.f32 %v2928_v9, 0.0  ;;  %v3487_v4 = vmax.f32 %v3041_v62, 0.0  ;;  %v12100_v60 = vld [vmem:[#allocation4 + $0x398] sm:$0xff]  }
 0x4f1   : > { %v2934_v21 = vadd.f32 %v2933_v38, %v13652_v53  ;;  %v3047_v32 = vadd.f32 %v3046_v26, %v13658_v58  ;;  %11240 = vmatprep.subr.bf16.mxu1 %v12095_v33  ;;  %v3486_v41 = vmax.f32 %v2930_v48, 0.0  ;;  %v3488_v30 = vmax.f32 %v3043_v15, 0.0  ;;  %v12098_v33 = vld [vmem:[#allocation4 + $0x318] sm:$0xff]   ;;  %v12103_v48 = vld [vmem:[#allocation4 + $0x3e0] sm:$0xff]  }
 0x4f2   : > { %v3501_v42 = vmax.f32 %v2932_v40, 0.0  ;;  %v3503_v11 = vmax.f32 %v3045_v5, 0.0  ;;  %4872 = vmatmul.mubr.bf16.gmra.mrb[212].mxu0 %v13704_v57  ;;  %4969 = vmatmul.mubr.bf16.gmra.mrb[212].mxu1 %v13706_v52  ;;  %v12101_v52 = vld [vmem:[#allocation4 + $0x360] sm:$0xff]  }
 0x4f3   : > { %v3502_v23 = vmax.f32 %v2934_v21, 0.0  ;;  %v3504_v59 = vmax.f32 %v3047_v32, 0.0  ;;  %4879 = vmatprep.mubr.bf16.mxu0 %v13728_v37  ;;  %4976 = vmatprep.mubr.bf16.mxu1 %v13730_v24 }
 0x4f4   : > { %11177 = vmatpush3.bf16.msra.mxu0 %v12094_v50  ;;  %11241 = vmatpush3.bf16.msra.mxu1 %v12096_v6  ;;  %v13804_v9 = vpack.c.bf16 %v3501_v42, %v3485_v39  ;;  %v13806_v62 = vpack.c.bf16 %v3503_v11, %v3487_v4 }
 0x4f5   : > { %v2937_v40 = vpop.f32.mrb[108].mxu0  ;;  %v3050_v57 = vpop.f32.mrb[108].mxu1  ;;  %11178 = vmatprep.subr.bf16.mxu0 %v12097_v27  ;;  %11242 = vmatprep.subr.bf16.mxu1 %v12099_v0  ;;  %v13808_v15 = vpack.c.bf16 %v3502_v23, %v3486_v41  ;;  %v13810_v5 = vpack.c.bf16 %v3504_v59, %v3488_v30  ;;  %v13818_v27 = vrot.slane %v13626_v28, %v13432_v51  ;;  %v12102_v30 = vld [vmem:[#allocation4 + $0x320] sm:$0xff]  }
 0x4f6   : > { %v2938_v37 = vadd.f32 %v2937_v40, %v13642_v19  ;;  %v3051_v24 = vadd.f32 %v3050_v57, %v13646_v10  ;;  %v2939_v38 = vpop.f32.mrb[109].mxu0  ;;  %v3052_v26 = vpop.f32.mrb[109].mxu1  ;;  %v13822_v0 = vrot.slane %v13626_v28, %v13435_v55  ;;  %v13828_v41 = vrot.slane %v13626_v28, %v13442_v8  ;;  %v12104_v23 = vld [vmem:[#allocation4 + $0x3a0] sm:$0xff]  }
 0x4f7   : > { %v2940_v50 = vadd.f32 %v2939_v38, %v13652_v53  ;;  %v3053_v6 = vadd.f32 %v3052_v26, %v13658_v58  ;;  %v2941_v21 = vpop.f32.mrb[110].mxu0  ;;  %v3054_v32 = vpop.f32.mrb[110].mxu1  ;;  %v13834_v57 = vrot.slane %v13626_v28, %v13449_v46  ;;  %v12106_v28 = vld [vmem:[#allocation4 + $0x328] sm:$0xff]  }
 0x4f8   : > { %v2942_v39 = vadd.f32 %v2941_v21, %v13642_v19  ;;  %v3055_v4 = vadd.f32 %v3054_v32, %v13646_v10  ;;  %v2943_v42 = vpop.f32.mrb[111].mxu0  ;;  %v3056_v11 = vpop.f32.mrb[111].mxu1  ;;  %11179 = vmatpush3.bf16.msra.mxu0 %v12098_v33  ;;  %11243 = vmatpush3.bf16.msra.mxu1 %v12100_v60  ;;  %v12105_v19 = vld [vmem:[#allocation4 + $0x368] sm:$0xff]   ;;  %v3517_v38 = vmax.f32 %v2938_v37, 0.0  ;;  %v3519_v26 = vmax.f32 %v3051_v24, 0.0 }
 0x4f9   : > { %v2944_v59 = vadd.f32 %v2943_v42, %v13652_v53  ;;  %v3057_v40 = vadd.f32 %v3056_v11, %v13658_v58  ;;  %11180 = vmatprep.subr.bf16.mxu0 %v12101_v52  ;;  %11244 = vmatprep.subr.bf16.mxu1 %v12103_v48  ;;  %v12107_v10 = vld [vmem:[#allocation4 + $0x3e8] sm:$0xff]   ;;  %v3518_v33 = vmax.f32 %v2940_v50, 0.0  ;;  %v3520_v53 = vmax.f32 %v3053_v6, 0.0 }
 0x4fa   : > { %v3533_v21 = vmax.f32 %v2942_v39, 0.0  ;;  %v3535_v32 = vmax.f32 %v3055_v4, 0.0  ;;  %4880 = vmatmul.mubr.bf16.gmra.mrb[216].mxu0 %v13724_v14  ;;  %4977 = vmatmul.mubr.bf16.gmra.mrb[216].mxu1 %v13726_v56  ;;  %v12108_v52 = vld [vmem:[#allocation4 + $0x3a8] sm:$0xff]   ;;  %v12109_v56 = vld [vmem:[#allocation4 + $0x370] sm:$0xff]  }
 0x4fb   : > { %v3534_v60 = vmax.f32 %v2944_v59, 0.0  ;;  %v3536_v58 = vmax.f32 %v3057_v40, 0.0  ;;  %4887 = vmatprep.mubr.bf16.mxu0 %v13748_v25  ;;  %4984 = vmatprep.mubr.bf16.mxu1 %v13750_v45  ;;  %v12111_v25 = vld [vmem:[#allocation4 + $0x3f0] sm:$0xff]  }
 0x4fc   : > { %11181 = vmatpush3.bf16.msra.mxu0 %v12102_v30  ;;  %11245 = vmatpush3.bf16.msra.mxu1 %v12104_v23  ;;  %v13840_v48 = vpack.c.bf16 %v3533_v21, %v3517_v38  ;;  %v13842_v37 = vpack.c.bf16 %v3535_v32, %v3519_v26  ;;  %v12110_v26 = vld [vmem:[#allocation4 + $0x330] sm:$0xff]  }
 0x4fd   : > { %v3093_v24 = vpop.f32.mrb[112].mxu0  ;;  %v3206_v14 = vpop.f32.mrb[112].mxu1  ;;  %11182 = vmatprep.subr.bf16.mxu0 %v12105_v19  ;;  %11246 = vmatprep.subr.bf16.mxu1 %v12107_v10  ;;  %v13844_v50 = vpack.c.bf16 %v3534_v60, %v3518_v33  ;;  %v13846_v6 = vpack.c.bf16 %v3536_v58, %v3520_v53  ;;  %v12112_v21 = vld [vmem:[#allocation4 + $0x3b0] sm:$0xff]   ;;  %v12113_v53 = vld [vmem:[#allocation4 + $0x378] sm:$0xff]  }
 0x4fe   : > { %v3094_v45 = vadd.f32 %v3093_v24, %v13818_v27  ;;  %v3207_v39 = vadd.f32 %v3206_v14, %v13822_v0  ;;  %v3095_v4 = vpop.f32.mrb[113].mxu0  ;;  %v3208_v42 = vpop.f32.mrb[113].mxu1  ;;  %v12115_v60 = vld [vmem:[#allocation4 + $0x3f8] sm:$0xff]  }
 0x4ff   : > { %v3096_v11 = vadd.f32 %v3095_v4, %v13828_v41  ;;  %v3209_v30 = vadd.f32 %v3208_v42, %v13834_v57  ;;  %v3097_v23 = vpop.f32.mrb[114].mxu0  ;;  %v3210_v59 = vpop.f32.mrb[114].mxu1 }
 0x500   : > { %v3098_v40 = vadd.f32 %v3097_v23, %v13818_v27  ;;  %v3211_v19 = vadd.f32 %v3210_v59, %v13822_v0  ;;  %v3099_v10 = vpop.f32.mrb[115].mxu0  ;;  %v3212_v38 = vpop.f32.mrb[115].mxu1  ;;  %11183 = vmatpush3.bf16.msra.mxu0 %v12106_v28  ;;  %11247 = vmatpush3.bf16.msra.mxu1 %v12108_v52  ;;  %v3297_v58 = vmax.f32 %v3094_v45, 0.0  ;;  %v3299_v24 = vmax.f32 %v3207_v39, 0.0  ;;  %v12114_v45 = vld [vmem:[#allocation4 + $0x338] sm:$0xff]  }
 0x501   : > { %v3100_v32 = vadd.f32 %v3099_v10, %v13828_v41  ;;  %v3213_v33 = vadd.f32 %v3212_v38, %v13834_v57  ;;  %11184 = vmatprep.subr.bf16.mxu0 %v12109_v56  ;;  %11248 = vmatprep.subr.bf16.mxu1 %v12111_v25  ;;  %v3298_v28 = vmax.f32 %v3096_v11, 0.0  ;;  %v3300_v52 = vmax.f32 %v3209_v30, 0.0  ;;  %v12116_v39 = vld [vmem:[#allocation4 + $0x3b8] sm:$0xff]  }
 0x502   : > { %v3313_v14 = vmax.f32 %v3098_v40, 0.0  ;;  %v3315_v4 = vmax.f32 %v3211_v19, 0.0  ;;  %4888 = vmatmul.mubr.bf16.gmra.mrb[220].mxu0 %v13744_v1  ;;  %4985 = vmatmul.mubr.bf16.gmra.mrb[220].mxu1 %v13746_v34 }
 0x503   : > { %v3314_v42 = vmax.f32 %v3100_v32, 0.0  ;;  %v3316_v23 = vmax.f32 %v3213_v33, 0.0  ;;  %4895 = vmatprep.mubr.bf16.mxu0 %v13768_v54  ;;  %4992 = vmatprep.mubr.bf16.mxu1 %v13770_v7 }
 0x504   : > { %v13860_v56 = vpack.c.bf16 %v3313_v14, %v3297_v58  ;;  %v13862_v25 = vpack.c.bf16 %v3315_v4, %v3299_v24  ;;  %11185 = vmatpush3.bf16.msra.mxu0 %v12110_v26  ;;  %11249 = vmatpush3.bf16.msra.mxu1 %v12112_v21 }
 0x505   : > { %v3103_v59 = vpop.f32.mrb[116].mxu0  ;;  %v3216_v1 = vpop.f32.mrb[116].mxu1  ;;  %11186 = vmatprep.subr.bf16.mxu0 %v12113_v53  ;;  %v13864_v34 = vpack.c.bf16 %v3314_v42, %v3298_v28  ;;  %11250 = vmatprep.subr.bf16.mxu1 %v12115_v60  ;;  %v13866_v11 = vpack.c.bf16 %v3316_v23, %v3300_v52 }
 0x506   : > { %v3104_v54 = vadd.f32 %v3103_v59, %v13818_v27  ;;  %v3217_v7 = vadd.f32 %v3216_v1, %v13822_v0  ;;  %v3105_v30 = vpop.f32.mrb[117].mxu0  ;;  %v3218_v40 = vpop.f32.mrb[117].mxu1 }
 0x507   : > { %v3106_v19 = vadd.f32 %v3105_v30, %v13828_v41  ;;  %v3219_v10 = vadd.f32 %v3218_v40, %v13834_v57  ;;  %v3107_v38 = vpop.f32.mrb[118].mxu0  ;;  %v3220_v26 = vpop.f32.mrb[118].mxu1 }
 0x508   : > { %v3108_v21 = vadd.f32 %v3107_v38, %v13818_v27  ;;  %v3221_v32 = vadd.f32 %v3220_v26, %v13822_v0  ;;  %v3109_v33 = vpop.f32.mrb[119].mxu0  ;;  %v3222_v53 = vpop.f32.mrb[119].mxu1  ;;  %11187 = vmatpush3.bf16.msra.mxu0 %v12114_v45  ;;  %11251 = vmatpush3.bf16.msra.mxu1 %v12116_v39  ;;  %v3329_v24 = vmax.f32 %v3104_v54, 0.0  ;;  %v3331_v14 = vmax.f32 %v3217_v7, 0.0 }
 0x509   : > { %v3110_v60 = vadd.f32 %v3109_v33, %v13828_v41  ;;  %v3223_v58 = vadd.f32 %v3222_v53, %v13834_v57  ;;  %v3330_v52 = vmax.f32 %v3106_v19, 0.0  ;;  %v3332_v42 = vmax.f32 %v3219_v10, 0.0 }
 0x50a   : > { %v3345_v4 = vmax.f32 %v3108_v21, 0.0  ;;  %v3347_v28 = vmax.f32 %v3221_v32, 0.0  ;;  %4896 = vmatmul.mubr.bf16.gmra.mrb[224].mxu0 %v13764_v17  ;;  %4993 = vmatmul.mubr.bf16.gmra.mrb[224].mxu1 %v13766_v29 }
 0x50b   : > { %v3346_v23 = vmax.f32 %v3110_v60, 0.0  ;;  %v3348_v59 = vmax.f32 %v3223_v58, 0.0  ;;  %4903 = vmatprep.mubr.bf16.mxu0 %v13788_v35  ;;  %5000 = vmatprep.mubr.bf16.mxu1 %v13790_v63 }
 0x50c   : > { %v13880_v45 = vpack.c.bf16 %v3345_v4, %v3329_v24  ;;  %v13882_v39 = vpack.c.bf16 %v3347_v28, %v3331_v14 }
 0x50d   : > { %v3113_v1 = vpop.f32.mrb[120].mxu0  ;;  %v3226_v54 = vpop.f32.mrb[120].mxu1  ;;  %v13884_v7 = vpack.c.bf16 %v3346_v23, %v3330_v52  ;;  %v13886_v30 = vpack.c.bf16 %v3348_v59, %v3332_v42 }
 0x50e   : > { %v3114_v17 = vadd.f32 %v3113_v1, %v13818_v27  ;;  %v3227_v29 = vadd.f32 %v3226_v54, %v13822_v0  ;;  %v3115_v40 = vpop.f32.mrb[121].mxu0  ;;  %v3228_v19 = vpop.f32.mrb[121].mxu1 }
 0x50f   : > { %v3116_v35 = vadd.f32 %v3115_v40, %v13828_v41  ;;  %v3229_v63 = vadd.f32 %v3228_v19, %v13834_v57  ;;  %v3117_v10 = vpop.f32.mrb[122].mxu0  ;;  %v3230_v38 = vpop.f32.mrb[122].mxu1 }
 0x510   : > { %v3118_v26 = vadd.f32 %v3117_v10, %v13818_v27  ;;  %v3231_v21 = vadd.f32 %v3230_v38, %v13822_v0  ;;  %v3119_v32 = vpop.f32.mrb[123].mxu0  ;;  %v3232_v33 = vpop.f32.mrb[123].mxu1  ;;  %v3361_v58 = vmax.f32 %v3114_v17, 0.0  ;;  %v3363_v24 = vmax.f32 %v3227_v29, 0.0 }
 0x511   : > { %v3120_v53 = vadd.f32 %v3119_v32, %v13828_v41  ;;  %v3233_v60 = vadd.f32 %v3232_v33, %v13834_v57  ;;  %v3362_v28 = vmax.f32 %v3116_v35, 0.0  ;;  %v3364_v52 = vmax.f32 %v3229_v63, 0.0 }
 0x512   : > { %v3377_v14 = vmax.f32 %v3118_v26, 0.0  ;;  %v3379_v4 = vmax.f32 %v3231_v21, 0.0  ;;  %4904 = vmatmul.mubr.bf16.gmra.mrb[228].mxu0 %v13784_v44  ;;  %5001 = vmatmul.mubr.bf16.gmra.mrb[228].mxu1 %v13786_v61 }
 0x513   : > { %v3378_v42 = vmax.f32 %v3120_v53, 0.0  ;;  %v3380_v23 = vmax.f32 %v3233_v60, 0.0  ;;  %4911 = vmatprep.mubr.bf16.mxu0 %v13808_v15  ;;  %5008 = vmatprep.mubr.bf16.mxu1 %v13810_v5 }
 0x514   : > { %v13900_v59 = vpack.c.bf16 %v3377_v14, %v3361_v58  ;;  %v13902_v1 = vpack.c.bf16 %v3379_v4, %v3363_v24 }
 0x515   : > { %v3123_v54 = vpop.f32.mrb[124].mxu0  ;;  %v3236_v17 = vpop.f32.mrb[124].mxu1  ;;  %v13904_v29 = vpack.c.bf16 %v3378_v42, %v3362_v28  ;;  %v13906_v40 = vpack.c.bf16 %v3380_v23, %v3364_v52 }
 0x516   : > { %v3124_v44 = vadd.f32 %v3123_v54, %v13818_v27  ;;  %v3237_v61 = vadd.f32 %v3236_v17, %v13822_v0  ;;  %v3125_v19 = vpop.f32.mrb[125].mxu0  ;;  %v3238_v35 = vpop.f32.mrb[125].mxu1 }
 0x517   : > { %v3126_v15 = vadd.f32 %v3125_v19, %v13828_v41  ;;  %v3239_v5 = vadd.f32 %v3238_v35, %v13834_v57  ;;  %v3127_v63 = vpop.f32.mrb[126].mxu0  ;;  %v3240_v10 = vpop.f32.mrb[126].mxu1 }
 0x518   : > { %v3128_v38 = vadd.f32 %v3127_v63, %v13818_v27  ;;  %v3241_v26 = vadd.f32 %v3240_v10, %v13822_v0  ;;  %v3129_v21 = vpop.f32.mrb[127].mxu0  ;;  %v3242_v32 = vpop.f32.mrb[127].mxu1  ;;  %v3393_v60 = vmax.f32 %v3124_v44, 0.0  ;;  %v3395_v58 = vmax.f32 %v3237_v61, 0.0 }
 0x519   : > { %v3130_v33 = vadd.f32 %v3129_v21, %v13828_v41  ;;  %v3243_v53 = vadd.f32 %v3242_v32, %v13834_v57  ;;  %v3394_v4 = vmax.f32 %v3126_v15, 0.0  ;;  %v3396_v28 = vmax.f32 %v3239_v5, 0.0 }
 0x51a   : > { %v3409_v24 = vmax.f32 %v3128_v38, 0.0  ;;  %v3411_v14 = vmax.f32 %v3241_v26, 0.0  ;;  %4912 = vmatmul.mubr.bf16.gmra.mrb[232].mxu0 %v13804_v9  ;;  %5009 = vmatmul.mubr.bf16.gmra.mrb[232].mxu1 %v13806_v62 }
 0x51b   : > { %v3410_v52 = vmax.f32 %v3130_v33, 0.0  ;;  %v3412_v42 = vmax.f32 %v3243_v53, 0.0  ;;  %4919 = vmatprep.mubr.bf16.mxu0 %v13844_v50  ;;  %5016 = vmatprep.mubr.bf16.mxu1 %v13846_v6 }
 0x51c   : > { %v13920_v23 = vpack.c.bf16 %v3409_v24, %v3393_v60  ;;  %v13922_v54 = vpack.c.bf16 %v3411_v14, %v3395_v58 }
 0x51d   : > { %v3133_v17 = vpop.f32.mrb[128].mxu0  ;;  %v3246_v44 = vpop.f32.mrb[128].mxu1  ;;  %v13924_v61 = vpack.c.bf16 %v3410_v52, %v3394_v4  ;;  %v13926_v19 = vpack.c.bf16 %v3412_v42, %v3396_v28 }
 0x51e   : > { %v3134_v9 = vadd.f32 %v3133_v17, %v13818_v27  ;;  %v3247_v62 = vadd.f32 %v3246_v44, %v13822_v0  ;;  %v3135_v35 = vpop.f32.mrb[129].mxu0  ;;  %v3248_v15 = vpop.f32.mrb[129].mxu1 }
 0x51f   : > { %v3136_v50 = vadd.f32 %v3135_v35, %v13828_v41  ;;  %v3249_v6 = vadd.f32 %v3248_v15, %v13834_v57  ;;  %v3137_v5 = vpop.f32.mrb[130].mxu0  ;;  %v3250_v63 = vpop.f32.mrb[130].mxu1 }
 0x520   : > { %v3138_v10 = vadd.f32 %v3137_v5, %v13818_v27  ;;  %v3251_v38 = vadd.f32 %v3250_v63, %v13822_v0  ;;  %v3139_v26 = vpop.f32.mrb[131].mxu0  ;;  %v3252_v21 = vpop.f32.mrb[131].mxu1  ;;  %v3425_v53 = vmax.f32 %v3134_v9, 0.0  ;;  %v3427_v60 = vmax.f32 %v3247_v62, 0.0 }
 0x521   : > { %v3140_v32 = vadd.f32 %v3139_v26, %v13828_v41  ;;  %v3253_v33 = vadd.f32 %v3252_v21, %v13834_v57  ;;  %v3426_v14 = vmax.f32 %v3136_v50, 0.0  ;;  %v3428_v4 = vmax.f32 %v3249_v6, 0.0 }
 0x522   : > { %v3441_v58 = vmax.f32 %v3138_v10, 0.0  ;;  %v3443_v24 = vmax.f32 %v3251_v38, 0.0  ;;  %4920 = vmatmul.mubr.bf16.gmra.mrb[236].mxu0 %v13840_v48  ;;  %5017 = vmatmul.mubr.bf16.gmra.mrb[236].mxu1 %v13842_v37 }
 0x523   : > { %v3442_v28 = vmax.f32 %v3140_v32, 0.0  ;;  %v3444_v52 = vmax.f32 %v3253_v33, 0.0  ;;  %5057 = vmatprep.mubr.bf16.mxu0 %v13864_v34  ;;  %5154 = vmatprep.mubr.bf16.mxu1 %v13866_v11 }
 0x524   : > { %v13940_v42 = vpack.c.bf16 %v3441_v58, %v3425_v53  ;;  %v13942_v17 = vpack.c.bf16 %v3443_v24, %v3427_v60 }
 0x525   : > { %v3143_v44 = vpop.f32.mrb[132].mxu0  ;;  %v3256_v9 = vpop.f32.mrb[132].mxu1  ;;  %v13944_v62 = vpack.c.bf16 %v3442_v28, %v3426_v14  ;;  %v13946_v35 = vpack.c.bf16 %v3444_v52, %v3428_v4 }
 0x526   : > { %v3144_v48 = vadd.f32 %v3143_v44, %v13818_v27  ;;  %v3257_v37 = vadd.f32 %v3256_v9, %v13822_v0  ;;  %v3145_v15 = vpop.f32.mrb[133].mxu0  ;;  %v3258_v50 = vpop.f32.mrb[133].mxu1 }
 0x527   : > { %v3146_v34 = vadd.f32 %v3145_v15, %v13828_v41  ;;  %v3259_v11 = vadd.f32 %v3258_v50, %v13834_v57  ;;  %v3147_v6 = vpop.f32.mrb[134].mxu0  ;;  %v3260_v5 = vpop.f32.mrb[134].mxu1 }
 0x528   : > { %v3148_v63 = vadd.f32 %v3147_v6, %v13818_v27  ;;  %v3261_v10 = vadd.f32 %v3260_v5, %v13822_v0  ;;  %v3149_v38 = vpop.f32.mrb[135].mxu0  ;;  %v3262_v26 = vpop.f32.mrb[135].mxu1  ;;  %v3457_v33 = vmax.f32 %v3144_v48, 0.0  ;;  %v3459_v53 = vmax.f32 %v3257_v37, 0.0 }
 0x529   : > { %v3150_v21 = vadd.f32 %v3149_v38, %v13828_v41  ;;  %v3263_v32 = vadd.f32 %v3262_v26, %v13834_v57  ;;  %v3458_v24 = vmax.f32 %v3146_v34, 0.0  ;;  %v3460_v14 = vmax.f32 %v3259_v11, 0.0 }
 0x52a   : > { %v3473_v60 = vmax.f32 %v3148_v63, 0.0  ;;  %v3475_v58 = vmax.f32 %v3261_v10, 0.0  ;;  %5058 = vmatmul.mubr.bf16.vlgmr.msra.gmra.mrb[240].mxu0 %v13860_v56  ;;  %5155 = vmatmul.mubr.bf16.vlgmr.msra.gmra.mrb[240].mxu1 %v13862_v25 }
 0x52b   : > { %v3474_v4 = vmax.f32 %v3150_v21, 0.0  ;;  %v3476_v28 = vmax.f32 %v3263_v32, 0.0  ;;  %5065 = vmatprep.mubr.bf16.mxu0 %v13884_v7  ;;  %5162 = vmatprep.mubr.bf16.mxu1 %v13886_v30 }
 0x52c   : > { %v13960_v52 = vpack.c.bf16 %v3473_v60, %v3457_v33  ;;  %v13962_v44 = vpack.c.bf16 %v3475_v58, %v3459_v53 }
 0x52d   : > { %v3153_v9 = vpop.f32.mrb[136].mxu0  ;;  %v3266_v48 = vpop.f32.mrb[136].mxu1  ;;  %v13964_v37 = vpack.c.bf16 %v3474_v4, %v3458_v24  ;;  %v13966_v15 = vpack.c.bf16 %v3476_v28, %v3460_v14 }
 0x52e   : > { %v3154_v56 = vadd.f32 %v3153_v9, %v13818_v27  ;;  %v3267_v25 = vadd.f32 %v3266_v48, %v13822_v0  ;;  %v3155_v50 = vpop.f32.mrb[137].mxu0  ;;  %v3268_v34 = vpop.f32.mrb[137].mxu1 }
 0x52f   : > { %v3156_v7 = vadd.f32 %v3155_v50, %v13828_v41  ;;  %v3269_v30 = vadd.f32 %v3268_v34, %v13834_v57  ;;  %v3157_v11 = vpop.f32.mrb[138].mxu0  ;;  %v3270_v6 = vpop.f32.mrb[138].mxu1 }
 0x530   : > { %v3158_v5 = vadd.f32 %v3157_v11, %v13818_v27  ;;  %v3271_v63 = vadd.f32 %v3270_v6, %v13822_v0  ;;  %v3159_v10 = vpop.f32.mrb[139].mxu0  ;;  %v3272_v38 = vpop.f32.mrb[139].mxu1  ;;  %v3489_v32 = vmax.f32 %v3154_v56, 0.0  ;;  %v3491_v33 = vmax.f32 %v3267_v25, 0.0 }
 0x531   : > { %v3160_v26 = vadd.f32 %v3159_v10, %v13828_v41  ;;  %v3273_v21 = vadd.f32 %v3272_v38, %v13834_v57  ;;  %v3490_v58 = vmax.f32 %v3156_v7, 0.0  ;;  %v3492_v24 = vmax.f32 %v3269_v30, 0.0 }
 0x532   : > { %v3505_v53 = vmax.f32 %v3158_v5, 0.0  ;;  %v3507_v60 = vmax.f32 %v3271_v63, 0.0  ;;  %5066 = vmatmul.mubr.bf16.gmra.mrb[244].mxu0 %v13880_v45  ;;  %5163 = vmatmul.mubr.bf16.gmra.mrb[244].mxu1 %v13882_v39 }
 0x533   : > { %v3506_v14 = vmax.f32 %v3160_v26, 0.0  ;;  %v3508_v4 = vmax.f32 %v3273_v21, 0.0  ;;  %5073 = vmatprep.mubr.bf16.mxu0 %v13904_v29  ;;  %5170 = vmatprep.mubr.bf16.mxu1 %v13906_v40 }
 0x534   : > { %v13980_v28 = vpack.c.bf16 %v3505_v53, %v3489_v32  ;;  %v13982_v9 = vpack.c.bf16 %v3507_v60, %v3491_v33 }
 0x535   : > { %v3163_v48 = vpop.f32.mrb[140].mxu0  ;;  %v3276_v56 = vpop.f32.mrb[140].mxu1  ;;  %v13984_v25 = vpack.c.bf16 %v3506_v14, %v3490_v58  ;;  %v13986_v50 = vpack.c.bf16 %v3508_v4, %v3492_v24 }
 0x536   : > { %v3164_v45 = vadd.f32 %v3163_v48, %v13818_v27  ;;  %v3277_v39 = vadd.f32 %v3276_v56, %v13822_v0  ;;  %v3165_v34 = vpop.f32.mrb[141].mxu0  ;;  %v3278_v7 = vpop.f32.mrb[141].mxu1 }
 0x537   : > { %v3166_v29 = vadd.f32 %v3165_v34, %v13828_v41  ;;  %v3279_v40 = vadd.f32 %v3278_v7, %v13834_v57  ;;  %v3167_v30 = vpop.f32.mrb[142].mxu0  ;;  %v3280_v11 = vpop.f32.mrb[142].mxu1 }
 0x538   : > { %v3168_v6 = vadd.f32 %v3167_v30, %v13818_v27  ;;  %v3281_v5 = vadd.f32 %v3280_v11, %v13822_v0  ;;  %v3169_v63 = vpop.f32.mrb[143].mxu0  ;;  %v3282_v10 = vpop.f32.mrb[143].mxu1  ;;  %v3521_v21 = vmax.f32 %v3164_v45, 0.0  ;;  %v3523_v32 = vmax.f32 %v3277_v39, 0.0 }
 0x539   : > { %v3170_v38 = vadd.f32 %v3169_v63, %v13828_v41  ;;  %v3283_v26 = vadd.f32 %v3282_v10, %v13834_v57  ;;  %v3522_v60 = vmax.f32 %v3166_v29, 0.0  ;;  %v3524_v58 = vmax.f32 %v3279_v40, 0.0 }
 0x53a   : > { %v3537_v33 = vmax.f32 %v3168_v6, 0.0  ;;  %v3539_v53 = vmax.f32 %v3281_v5, 0.0  ;;  %5074 = vmatmul.mubr.bf16.gmra.mrb[248].mxu0 %v13900_v59  ;;  %5171 = vmatmul.mubr.bf16.gmra.mrb[248].mxu1 %v13902_v1  ;;  %v14011_v59 = vld [vmem:[%s16087_s12] ss:$0 sm:$0xff] }
 0x53b   : > { %v3538_v24 = vmax.f32 %v3170_v38, 0.0  ;;  %v3540_v27 = vmax.f32 %v3283_v26, 0.0  ;;  %5081 = vmatprep.mubr.bf16.mxu0 %v13924_v61  ;;  %5178 = vmatprep.mubr.bf16.mxu1 %v13926_v19 }
 0x53c   : > { %v14000_v0 = vpack.c.bf16 %v3537_v33, %v3521_v21  ;;  %v14002_v41 = vpack.c.bf16 %v3539_v53, %v3523_v32 }
 0x53d   : > { %v10804_v57 = vpop.f32.mrb[144].mxu0  ;;  %v10868_v14 = vpop.f32.mrb[144].mxu1  ;;  %v14004_v4 = vpack.c.bf16 %v3538_v24, %v3522_v60  ;;  %v14006_v48 = vpack.c.bf16 %v3540_v27, %v3524_v58 }
 0x53e   : > { %v10805_v1 = vpop.f32.mrb[145].mxu0  ;;  %v10869_v56 = vpop.f32.mrb[145].mxu1 }
 0x53f   : > { %v10806_v61 = vadd.f32 %v10805_v1, %v10804_v57  ;;  %v10870_v45 = vadd.f32 %v10869_v56, %v10868_v14  ;;  %v10807_v19 = vpop.f32.mrb[146].mxu0  ;;  %v10871_v39 = vpop.f32.mrb[146].mxu1 }
 0x540   : > { %v10808_v34 = vpop.f32.mrb[147].mxu0  ;;  %v10872_v7 = vpop.f32.mrb[147].mxu1 }
 0x541   : > { %v4478_v29 = vadd.f32 %v10806_v61, %v14011_v59  ;;  %v10809_v40 = vadd.f32 %v10808_v34, %v10807_v19  ;;  %v10873_v30 = vadd.f32 %v10872_v7, %v10871_v39 }
 0x542   : > { %5082 = vmatmul.mubr.bf16.gmra.mrb[252].mxu0 %v13920_v23  ;;  %5179 = vmatmul.mubr.bf16.gmra.mrb[252].mxu1 %v13922_v54 }
 0x543   : > { %v14016_v11 = vadd.f32 %v10870_v45, %v4478_v29  ;;  %v4481_v6 = vadd.f32 %v10809_v40, %v14011_v59  ;;  %5089 = vmatprep.mubr.bf16.mxu0 %v13944_v62  ;;  %5186 = vmatprep.mubr.bf16.mxu1 %v13946_v35 }
 0x545   : > { %v14021_v5 = vadd.f32 %v10873_v30, %v4481_v6  ;;  %v10810_v63 = vpop.f32.mrb[148].mxu0  ;;  %v10874_v10 = vpop.f32.mrb[148].mxu1 }
 0x546   : > { %v10811_v38 = vpop.f32.mrb[149].mxu0  ;;  %v10875_v26 = vpop.f32.mrb[149].mxu1 }
 0x547   : > { %v10812_v21 = vadd.f32 %v10811_v38, %v10810_v63  ;;  %v10876_v32 = vadd.f32 %v10875_v26, %v10874_v10  ;;  %v10813_v33 = vpop.f32.mrb[150].mxu0  ;;  %v10877_v23 = vpop.f32.mrb[150].mxu1 }
 0x548   : > { %v10814_v53 = vpop.f32.mrb[151].mxu0  ;;  %v10878_v54 = vpop.f32.mrb[151].mxu1 }
 0x549   : > { %v4486_v60 = vadd.f32 %v10812_v21, %v14011_v59  ;;  %v10815_v58 = vadd.f32 %v10814_v53, %v10813_v33  ;;  %v10879_v24 = vadd.f32 %v10878_v54, %v10877_v23 }
 0x54a   : > { %5090 = vmatmul.mubr.bf16.gmra.mrb[0].mxu0 %v13940_v42  ;;  %5187 = vmatmul.mubr.bf16.gmra.mrb[0].mxu1 %v13942_v17 }
 0x54b   : > { %v14026_v62 = vadd.f32 %v10876_v32, %v4486_v60  ;;  %v4489_v35 = vadd.f32 %v10815_v58, %v14011_v59  ;;  %5097 = vmatprep.mubr.bf16.mxu0 %v13964_v37  ;;  %5194 = vmatprep.mubr.bf16.mxu1 %v13966_v15 }
 0x54d   : > { %v14031_v27 = vadd.f32 %v10879_v24, %v4489_v35  ;;  %v10816_v57 = vpop.f32.mrb[152].mxu0  ;;  %v10880_v14 = vpop.f32.mrb[152].mxu1 }
 0x54e   : > { %v10817_v1 = vpop.f32.mrb[153].mxu0  ;;  %v10881_v56 = vpop.f32.mrb[153].mxu1 }
 0x54f   : > { %v10818_v61 = vadd.f32 %v10817_v1, %v10816_v57  ;;  %v10882_v45 = vadd.f32 %v10881_v56, %v10880_v14  ;;  %v10819_v19 = vpop.f32.mrb[154].mxu0  ;;  %v10883_v42 = vpop.f32.mrb[154].mxu1 }
 0x550   : > { %v10820_v39 = vpop.f32.mrb[155].mxu0  ;;  %v10884_v17 = vpop.f32.mrb[155].mxu1 }
 0x551   : > { %v4494_v34 = vadd.f32 %v10818_v61, %v14011_v59  ;;  %v10821_v7 = vadd.f32 %v10820_v39, %v10819_v19  ;;  %v10885_v29 = vadd.f32 %v10884_v17, %v10883_v42  ;;  %v16128_v42 = vmov 0  }
 0x552   : > { %5098 = vmatmul.mubr.bf16.gmra.mrb[4].mxu0 %v13960_v52  ;;  %5195 = vmatmul.mubr.bf16.gmra.mrb[4].mxu1 %v13962_v44 }
 0x553   : > { %v14036_v37 = vadd.f32 %v10882_v45, %v4494_v34  ;;  %v4497_v15 = vadd.f32 %v10821_v7, %v14011_v59  ;;  %5105 = vmatprep.mubr.bf16.mxu0 %v13984_v25  ;;  %5202 = vmatprep.mubr.bf16.mxu1 %v13986_v50 }
 0x555   : > { %v14041_v40 = vadd.f32 %v10885_v29, %v4497_v15  ;;  %v10822_v30 = vpop.f32.mrb[156].mxu0  ;;  %v10886_v6 = vpop.f32.mrb[156].mxu1 }
 0x556   : > { %v10823_v63 = vpop.f32.mrb[157].mxu0  ;;  %v10887_v10 = vpop.f32.mrb[157].mxu1 }
 0x557   : > { %v10824_v38 = vadd.f32 %v10823_v63, %v10822_v30  ;;  %v10888_v26 = vadd.f32 %v10887_v10, %v10886_v6  ;;  %v10825_v21 = vpop.f32.mrb[158].mxu0  ;;  %v10889_v52 = vpop.f32.mrb[158].mxu1 }
 0x558   : > { %v10826_v32 = vpop.f32.mrb[159].mxu0  ;;  %v10890_v44 = vpop.f32.mrb[159].mxu1 }
 0x559   : > { %v4502_v33 = vadd.f32 %v10824_v38, %v14011_v59  ;;  %v10827_v23 = vadd.f32 %v10826_v32, %v10825_v21  ;;  %v10891_v53 = vadd.f32 %v10890_v44, %v10889_v52 }
 0x55a   : > { %5106 = vmatmul.mubr.bf16.gmra.mrb[8].mxu0 %v13980_v28  ;;  %5203 = vmatmul.mubr.bf16.gmra.mrb[8].mxu1 %v13982_v9 }
 0x55b   : > { %v14046_v25 = vadd.f32 %v10888_v26, %v4502_v33  ;;  %v4505_v50 = vadd.f32 %v10827_v23, %v14011_v59  ;;  %5113 = vmatprep.mubr.bf16.mxu0 %v14004_v4  ;;  %5210 = vmatprep.mubr.bf16.mxu1 %v14006_v48 }
 0x55d   : > { %v14051_v54 = vadd.f32 %v10891_v53, %v4505_v50  ;;  %v10828_v60 = vpop.f32.mrb[160].mxu0  ;;  %v10892_v58 = vpop.f32.mrb[160].mxu1 }
 0x55e   : > { %v10829_v24 = vpop.f32.mrb[161].mxu0  ;;  %v10893_v35 = vpop.f32.mrb[161].mxu1 }
 0x55f   : > { %v10830_v57 = vadd.f32 %v10829_v24, %v10828_v60  ;;  %v10894_v14 = vadd.f32 %v10893_v35, %v10892_v58  ;;  %v10831_v1 = vpop.f32.mrb[162].mxu0  ;;  %v10895_v28 = vpop.f32.mrb[162].mxu1 }
 0x560   : > { %v10832_v56 = vpop.f32.mrb[163].mxu0  ;;  %v10896_v9 = vpop.f32.mrb[163].mxu1 }
 0x561   : > { %v4510_v61 = vadd.f32 %v10830_v57, %v14011_v59  ;;  %v10833_v45 = vadd.f32 %v10832_v56, %v10831_v1  ;;  %v10897_v19 = vadd.f32 %v10896_v9, %v10895_v28 }
 0x562   : > { %5114 = vmatmul.mubr.bf16.gmra.mrb[12].mxu0 %v14000_v0  ;;  %5211 = vmatmul.mubr.bf16.gmra.mrb[12].mxu1 %v14002_v41 }
 0x563   : > { %v14056_v4 = vadd.f32 %v10894_v14, %v4510_v61  ;;  %v4513_v48 = vadd.f32 %v10833_v45, %v14011_v59  ;;  %7030 = vmatprep.mubr.bf16.mxu1 %v16128_v42 }
 0x565   : > { %v14060_v39 = vadd.f32 %v10897_v19, %v4513_v48  ;;  %v10834_v17 = vpop.f32.mrb[164].mxu0  ;;  %v10898_v34 = vpop.f32.mrb[164].mxu1 }
 0x566   : > { %v10835_v7 = vpop.f32.mrb[165].mxu0  ;;  %v10899_v29 = vpop.f32.mrb[165].mxu1 }
 0x567   : > { %v10836_v15 = vadd.f32 %v10835_v7, %v10834_v17  ;;  %v10900_v30 = vadd.f32 %v10899_v29, %v10898_v34  ;;  %v10837_v6 = vpop.f32.mrb[166].mxu0  ;;  %v10901_v63 = vpop.f32.mrb[166].mxu1 }
 0x568   : > { %v10838_v10 = vpop.f32.mrb[167].mxu0  ;;  %v10902_v0 = vpop.f32.mrb[167].mxu1 }
 0x569   : > { %v4518_v41 = vadd.f32 %v10836_v15, %v14011_v59  ;;  %v10839_v38 = vadd.f32 %v10838_v10, %v10837_v6  ;;  %v10903_v26 = vadd.f32 %v10902_v0, %v10901_v63 }
 0x56b   : > { %v14063_v21 = vadd.f32 %v10900_v30, %v4518_v41  ;;  %v4521_v52 = vadd.f32 %v10839_v38, %v14011_v59 }
 0x56d   : > { %v14066_v32 = vadd.f32 %v10903_v26, %v4521_v52  ;;  %v10840_v44 = vpop.f32.mrb[168].mxu0  ;;  %v10904_v33 = vpop.f32.mrb[168].mxu1 }
 0x56e   : > { %v10841_v23 = vpop.f32.mrb[169].mxu0  ;;  %v10905_v53 = vpop.f32.mrb[169].mxu1 }
 0x56f   : > { %v10842_v50 = vadd.f32 %v10841_v23, %v10840_v44  ;;  %v10906_v60 = vadd.f32 %v10905_v53, %v10904_v33  ;;  %v10843_v58 = vpop.f32.mrb[170].mxu0  ;;  %v10907_v24 = vpop.f32.mrb[170].mxu1 }
 0x570   : > { %v10844_v35 = vpop.f32.mrb[171].mxu0  ;;  %v10908_v57 = vpop.f32.mrb[171].mxu1 }
 0x571   : > { %v4526_v14 = vadd.f32 %v10842_v50, %v14011_v59  ;;  %v10845_v1 = vadd.f32 %v10844_v35, %v10843_v58  ;;  %v10909_v28 = vadd.f32 %v10908_v57, %v10907_v24 }
 0x573   : > { %v14069_v56 = vadd.f32 %v10906_v60, %v4526_v14  ;;  %v4529_v9 = vadd.f32 %v10845_v1, %v14011_v59 }
 0x575   : > { %v14072_v61 = vadd.f32 %v10909_v28, %v4529_v9  ;;  %v10846_v45 = vpop.f32.mrb[172].mxu0  ;;  %v10910_v19 = vpop.f32.mrb[172].mxu1 }
 0x576   : > { %v10847_v48 = vpop.f32.mrb[173].mxu0  ;;  %v10911_v17 = vpop.f32.mrb[173].mxu1 }
 0x577   : > { %v10848_v34 = vadd.f32 %v10847_v48, %v10846_v45  ;;  %v10912_v7 = vadd.f32 %v10911_v17, %v10910_v19  ;;  %v10849_v29 = vpop.f32.mrb[174].mxu0  ;;  %v10913_v15 = vpop.f32.mrb[174].mxu1 }
 0x578   : > { %v10850_v30 = vpop.f32.mrb[175].mxu0  ;;  %v10914_v6 = vpop.f32.mrb[175].mxu1 }
 0x579   : > { %v4534_v63 = vadd.f32 %v10848_v34, %v14011_v59  ;;  %v10851_v10 = vadd.f32 %v10850_v30, %v10849_v29  ;;  %v10915_v0 = vadd.f32 %v10914_v6, %v10913_v15 }
 0x57b   : > { %v14075_v41 = vadd.f32 %v10912_v7, %v4534_v63  ;;  %v4537_v38 = vadd.f32 %v10851_v10, %v14011_v59 }
 0x57d   : > { %v14078_v26 = vadd.f32 %v10915_v0, %v4537_v38  ;;  %v10932_v52 = vpop.f32.mrb[176].mxu0  ;;  %v10996_v44 = vpop.f32.mrb[176].mxu1 }
 0x57e   : > { %v10933_v33 = vpop.f32.mrb[177].mxu0  ;;  %v10997_v23 = vpop.f32.mrb[177].mxu1 }
 0x57f   : > { %v10934_v53 = vadd.f32 %v10933_v33, %v10932_v52  ;;  %v10998_v50 = vadd.f32 %v10997_v23, %v10996_v44  ;;  %v10935_v60 = vpop.f32.mrb[178].mxu0  ;;  %v10999_v58 = vpop.f32.mrb[178].mxu1 }
 0x580   : > { %v10936_v24 = vpop.f32.mrb[179].mxu0  ;;  %v11000_v35 = vpop.f32.mrb[179].mxu1 }
 0x581   : > { %v4672_v57 = vadd.f32 %v10934_v53, %v14016_v11  ;;  %v10937_v14 = vadd.f32 %v10936_v24, %v10935_v60  ;;  %v11001_v1 = vadd.f32 %v11000_v35, %v10999_v58 }
 0x583   : > { %v14081_v28 = vadd.f32 %v10998_v50, %v4672_v57  ;;  %v4675_v59 = vadd.f32 %v10937_v14, %v14021_v5 }
 0x585   : > { %v14084_v9 = vadd.f32 %v11001_v1, %v4675_v59  ;;  %v10938_v45 = vpop.f32.mrb[180].mxu0  ;;  %v11002_v19 = vpop.f32.mrb[180].mxu1 }
 0x586   : > { %v10939_v48 = vpop.f32.mrb[181].mxu0  ;;  %v11003_v17 = vpop.f32.mrb[181].mxu1 }
 0x587   : > { %v10940_v34 = vadd.f32 %v10939_v48, %v10938_v45  ;;  %v11004_v7 = vadd.f32 %v11003_v17, %v11002_v19  ;;  %v10941_v29 = vpop.f32.mrb[182].mxu0  ;;  %v11005_v15 = vpop.f32.mrb[182].mxu1 }
 0x588   : > { %v10942_v30 = vpop.f32.mrb[183].mxu0  ;;  %v11006_v6 = vpop.f32.mrb[183].mxu1 }
 0x589   : > { %v4680_v11 = vadd.f32 %v10940_v34, %v14026_v62  ;;  %v10943_v63 = vadd.f32 %v10942_v30, %v10941_v29  ;;  %v11007_v10 = vadd.f32 %v11006_v6, %v11005_v15 }
 0x58b   : > { %v14087_v0 = vadd.f32 %v11004_v7, %v4680_v11  ;;  %v4683_v5 = vadd.f32 %v10943_v63, %v14031_v27 }
 0x58d   : > { %v14090_v38 = vadd.f32 %v11007_v10, %v4683_v5  ;;  %v10944_v52 = vpop.f32.mrb[184].mxu0  ;;  %v11008_v44 = vpop.f32.mrb[184].mxu1 }
 0x58e   : > { %v10945_v33 = vpop.f32.mrb[185].mxu0  ;;  %v11009_v23 = vpop.f32.mrb[185].mxu1 }
 0x58f   : > { %v10946_v53 = vadd.f32 %v10945_v33, %v10944_v52  ;;  %v11010_v50 = vadd.f32 %v11009_v23, %v11008_v44  ;;  %v10947_v60 = vpop.f32.mrb[186].mxu0  ;;  %v11011_v58 = vpop.f32.mrb[186].mxu1 }
 0x590   : > { %v10948_v24 = vpop.f32.mrb[187].mxu0  ;;  %v11012_v35 = vpop.f32.mrb[187].mxu1 }
 0x591   : > { %v4688_v62 = vadd.f32 %v10946_v53, %v14036_v37  ;;  %v10949_v57 = vadd.f32 %v10948_v24, %v10947_v60  ;;  %v11013_v14 = vadd.f32 %v11012_v35, %v11011_v58 }
 0x593   : > { %v14093_v1 = vadd.f32 %v11010_v50, %v4688_v62  ;;  %v4691_v27 = vadd.f32 %v10949_v57, %v14041_v40 }
 0x595   : > { %v14096_v59 = vadd.f32 %v11013_v14, %v4691_v27  ;;  %v10950_v45 = vpop.f32.mrb[188].mxu0  ;;  %v11014_v19 = vpop.f32.mrb[188].mxu1 }
 0x596   : > { %v10951_v48 = vpop.f32.mrb[189].mxu0  ;;  %v11015_v17 = vpop.f32.mrb[189].mxu1 }
 0x597   : > { %v10952_v34 = vadd.f32 %v10951_v48, %v10950_v45  ;;  %v11016_v7 = vadd.f32 %v11015_v17, %v11014_v19  ;;  %v10953_v29 = vpop.f32.mrb[190].mxu0  ;;  %v11017_v15 = vpop.f32.mrb[190].mxu1 }
 0x598   : > { %v10954_v30 = vpop.f32.mrb[191].mxu0  ;;  %v11018_v6 = vpop.f32.mrb[191].mxu1 }
 0x599   : > { %v4696_v37 = vadd.f32 %v10952_v34, %v14046_v25  ;;  %v10955_v11 = vadd.f32 %v10954_v30, %v10953_v29  ;;  %v11019_v63 = vadd.f32 %v11018_v6, %v11017_v15 }
 0x59b   : > { %v14099_v10 = vadd.f32 %v11016_v7, %v4696_v37  ;;  %v4699_v40 = vadd.f32 %v10955_v11, %v14051_v54 }
 0x59d   : > { %v14102_v5 = vadd.f32 %v11019_v63, %v4699_v40  ;;  %v10956_v52 = vpop.f32.mrb[192].mxu0  ;;  %v11020_v44 = vpop.f32.mrb[192].mxu1 }
 0x59e   : > { %v10957_v33 = vpop.f32.mrb[193].mxu0  ;;  %v11021_v23 = vpop.f32.mrb[193].mxu1 }
 0x59f   : > { %v10958_v53 = vadd.f32 %v10957_v33, %v10956_v52  ;;  %v11022_v50 = vadd.f32 %v11021_v23, %v11020_v44  ;;  %v10959_v60 = vpop.f32.mrb[194].mxu0  ;;  %v11023_v58 = vpop.f32.mrb[194].mxu1 }
 0x5a0   : > { %v10960_v24 = vpop.f32.mrb[195].mxu0  ;;  %v11024_v35 = vpop.f32.mrb[195].mxu1 }
 0x5a1   : > { %v4704_v25 = vadd.f32 %v10958_v53, %v14056_v4  ;;  %v10961_v62 = vadd.f32 %v10960_v24, %v10959_v60  ;;  %v11025_v57 = vadd.f32 %v11024_v35, %v11023_v58 }
 0x5a3   : > { %v14105_v14 = vadd.f32 %v11022_v50, %v4704_v25  ;;  %v4707_v54 = vadd.f32 %v10961_v62, %v14060_v39 }
 0x5a5   : > { %v14108_v27 = vadd.f32 %v11025_v57, %v4707_v54  ;;  %v10962_v45 = vpop.f32.mrb[196].mxu0  ;;  %v11026_v19 = vpop.f32.mrb[196].mxu1 }
 0x5a6   : > { %v10963_v48 = vpop.f32.mrb[197].mxu0  ;;  %v11027_v17 = vpop.f32.mrb[197].mxu1 }
 0x5a7   : > { %v10964_v34 = vadd.f32 %v10963_v48, %v10962_v45  ;;  %v11028_v7 = vadd.f32 %v11027_v17, %v11026_v19  ;;  %v10965_v29 = vpop.f32.mrb[198].mxu0  ;;  %v11029_v15 = vpop.f32.mrb[198].mxu1 }
 0x5a8   : > { %v10966_v30 = vpop.f32.mrb[199].mxu0  ;;  %v11030_v6 = vpop.f32.mrb[199].mxu1 }
 0x5a9   : > { %v4712_v4 = vadd.f32 %v10964_v34, %v14063_v21  ;;  %v10967_v37 = vadd.f32 %v10966_v30, %v10965_v29  ;;  %v11031_v11 = vadd.f32 %v11030_v6, %v11029_v15 }
 0x5ab   : > { %v14111_v63 = vadd.f32 %v11028_v7, %v4712_v4  ;;  %v4715_v39 = vadd.f32 %v10967_v37, %v14066_v32 }
 0x5ad   : > { %v14114_v40 = vadd.f32 %v11031_v11, %v4715_v39  ;;  %v10968_v52 = vpop.f32.mrb[200].mxu0  ;;  %v11032_v44 = vpop.f32.mrb[200].mxu1 }
 0x5ae   : > { %v10969_v33 = vpop.f32.mrb[201].mxu0  ;;  %v11033_v23 = vpop.f32.mrb[201].mxu1 }
 0x5af   : > { %v10970_v53 = vadd.f32 %v10969_v33, %v10968_v52  ;;  %v11034_v50 = vadd.f32 %v11033_v23, %v11032_v44  ;;  %v10971_v60 = vpop.f32.mrb[202].mxu0  ;;  %v11035_v58 = vpop.f32.mrb[202].mxu1 }
 0x5b0   : > { %v10972_v24 = vpop.f32.mrb[203].mxu0  ;;  %v11036_v35 = vpop.f32.mrb[203].mxu1 }
 0x5b1   : > { %v4720_v21 = vadd.f32 %v10970_v53, %v14069_v56  ;;  %v10973_v25 = vadd.f32 %v10972_v24, %v10971_v60  ;;  %v11037_v62 = vadd.f32 %v11036_v35, %v11035_v58 }
 0x5b3   : > { %v14117_v57 = vadd.f32 %v11034_v50, %v4720_v21  ;;  %v4723_v32 = vadd.f32 %v10973_v25, %v14072_v61 }
 0x5b5   : > { %v14120_v54 = vadd.f32 %v11037_v62, %v4723_v32  ;;  %v10974_v45 = vpop.f32.mrb[204].mxu0  ;;  %v11038_v19 = vpop.f32.mrb[204].mxu1 }
 0x5b6   : > { %v10975_v48 = vpop.f32.mrb[205].mxu0  ;;  %v11039_v17 = vpop.f32.mrb[205].mxu1 }
 0x5b7   : > { %v10976_v34 = vadd.f32 %v10975_v48, %v10974_v45  ;;  %v11040_v7 = vadd.f32 %v11039_v17, %v11038_v19  ;;  %v10977_v29 = vpop.f32.mrb[206].mxu0  ;;  %v11041_v15 = vpop.f32.mrb[206].mxu1 }
 0x5b8   : > { %v10978_v30 = vpop.f32.mrb[207].mxu0  ;;  %v11042_v6 = vpop.f32.mrb[207].mxu1 }
 0x5b9   : > { %v4728_v56 = vadd.f32 %v10976_v34, %v14075_v41  ;;  %v10979_v4 = vadd.f32 %v10978_v30, %v10977_v29  ;;  %v11043_v37 = vadd.f32 %v11042_v6, %v11041_v15 }
 0x5bb   : > { %v14123_v11 = vadd.f32 %v11040_v7, %v4728_v56  ;;  %v4731_v61 = vadd.f32 %v10979_v4, %v14078_v26 }
 0x5bd   : > { %v14126_v39 = vadd.f32 %v11043_v37, %v4731_v61  ;;  %v11060_v52 = vpop.f32.mrb[208].mxu0  ;;  %v11124_v44 = vpop.f32.mrb[208].mxu1 }
 0x5be   : > { %v11061_v33 = vpop.f32.mrb[209].mxu0  ;;  %v11125_v23 = vpop.f32.mrb[209].mxu1 }
 0x5bf   : > { %v11062_v53 = vadd.f32 %v11061_v33, %v11060_v52  ;;  %v11126_v50 = vadd.f32 %v11125_v23, %v11124_v44  ;;  %v11063_v60 = vpop.f32.mrb[210].mxu0  ;;  %v11127_v58 = vpop.f32.mrb[210].mxu1 }
 0x5c0   : > { %v11064_v24 = vpop.f32.mrb[211].mxu0  ;;  %v11128_v35 = vpop.f32.mrb[211].mxu1 }
 0x5c1   : > { %v4866_v41 = vadd.f32 %v11062_v53, %v14081_v28  ;;  %v11065_v21 = vadd.f32 %v11064_v24, %v11063_v60  ;;  %v11129_v25 = vadd.f32 %v11128_v35, %v11127_v58 }
 0x5c3   : > { %v14129_v62 = vadd.f32 %v11126_v50, %v4866_v41  ;;  %v4869_v26 = vadd.f32 %v11065_v21, %v14084_v9 }
 0x5c5   : > { %v14132_v32 = vadd.f32 %v11129_v25, %v4869_v26  ;;  %v11066_v45 = vpop.f32.mrb[212].mxu0  ;;  %v11130_v19 = vpop.f32.mrb[212].mxu1 }
 0x5c6   : > { %v11067_v48 = vpop.f32.mrb[213].mxu0  ;;  %v11131_v17 = vpop.f32.mrb[213].mxu1 }
 0x5c7   : > { %v11068_v34 = vadd.f32 %v11067_v48, %v11066_v45  ;;  %v11132_v7 = vadd.f32 %v11131_v17, %v11130_v19  ;;  %v11069_v29 = vpop.f32.mrb[214].mxu0  ;;  %v11133_v15 = vpop.f32.mrb[214].mxu1 }
 0x5c8   : > { %v11070_v30 = vpop.f32.mrb[215].mxu0  ;;  %v11134_v6 = vpop.f32.mrb[215].mxu1 }
 0x5c9   : > { %v4874_v28 = vadd.f32 %v11068_v34, %v14087_v0  ;;  %v11071_v56 = vadd.f32 %v11070_v30, %v11069_v29  ;;  %v11135_v4 = vadd.f32 %v11134_v6, %v11133_v15 }
 0x5cb   : > { %v14135_v37 = vadd.f32 %v11132_v7, %v4874_v28  ;;  %v4877_v9 = vadd.f32 %v11071_v56, %v14090_v38 }
 0x5cd   : > { %v14138_v61 = vadd.f32 %v11135_v4, %v4877_v9  ;;  %v11072_v52 = vpop.f32.mrb[216].mxu0  ;;  %v11136_v44 = vpop.f32.mrb[216].mxu1 }
 0x5ce   : > { %v11073_v33 = vpop.f32.mrb[217].mxu0  ;;  %v11137_v23 = vpop.f32.mrb[217].mxu1 }
 0x5cf   : > { %v11074_v53 = vadd.f32 %v11073_v33, %v11072_v52  ;;  %v11138_v50 = vadd.f32 %v11137_v23, %v11136_v44  ;;  %v11075_v60 = vpop.f32.mrb[218].mxu0  ;;  %v11139_v58 = vpop.f32.mrb[218].mxu1 }
 0x5d0   : > { %v11076_v24 = vpop.f32.mrb[219].mxu0  ;;  %v11140_v35 = vpop.f32.mrb[219].mxu1 }
 0x5d1   : > { %v4882_v0 = vadd.f32 %v11074_v53, %v14093_v1  ;;  %v11077_v41 = vadd.f32 %v11076_v24, %v11075_v60  ;;  %v11141_v21 = vadd.f32 %v11140_v35, %v11139_v58 }
 0x5d3   : > { %v14141_v25 = vadd.f32 %v11138_v50, %v4882_v0  ;;  %v4885_v38 = vadd.f32 %v11077_v41, %v14096_v59 }
 0x5d5   : > { %v14144_v26 = vadd.f32 %v11141_v21, %v4885_v38  ;;  %v11078_v45 = vpop.f32.mrb[220].mxu0  ;;  %v11142_v19 = vpop.f32.mrb[220].mxu1 }
 0x5d6   : > { %v11079_v48 = vpop.f32.mrb[221].mxu0  ;;  %v11143_v17 = vpop.f32.mrb[221].mxu1 }
 0x5d7   : > { %v11080_v34 = vadd.f32 %v11079_v48, %v11078_v45  ;;  %v11144_v7 = vadd.f32 %v11143_v17, %v11142_v19  ;;  %v11081_v29 = vpop.f32.mrb[222].mxu0  ;;  %v11145_v15 = vpop.f32.mrb[222].mxu1 }
 0x5d8   : > { %v11082_v30 = vpop.f32.mrb[223].mxu0  ;;  %v11146_v6 = vpop.f32.mrb[223].mxu1 }
 0x5d9   : > { %v4890_v1 = vadd.f32 %v11080_v34, %v14099_v10  ;;  %v11083_v28 = vadd.f32 %v11082_v30, %v11081_v29  ;;  %v11147_v56 = vadd.f32 %v11146_v6, %v11145_v15 }
 0x5db   : > { %v14147_v4 = vadd.f32 %v11144_v7, %v4890_v1  ;;  %v4893_v59 = vadd.f32 %v11083_v28, %v14102_v5 }
 0x5dd   : > { %v14150_v9 = vadd.f32 %v11147_v56, %v4893_v59  ;;  %v11084_v52 = vpop.f32.mrb[224].mxu0  ;;  %v11148_v44 = vpop.f32.mrb[224].mxu1 }
 0x5de   : > { %v11085_v33 = vpop.f32.mrb[225].mxu0  ;;  %v11149_v23 = vpop.f32.mrb[225].mxu1 }
 0x5df   : > { %v11086_v53 = vadd.f32 %v11085_v33, %v11084_v52  ;;  %v11150_v50 = vadd.f32 %v11149_v23, %v11148_v44  ;;  %v11087_v60 = vpop.f32.mrb[226].mxu0  ;;  %v11151_v58 = vpop.f32.mrb[226].mxu1 }
 0x5e0   : > { %v11088_v24 = vpop.f32.mrb[227].mxu0  ;;  %v11152_v35 = vpop.f32.mrb[227].mxu1 }
 0x5e1   : > { %v4898_v10 = vadd.f32 %v11086_v53, %v14105_v14  ;;  %v11089_v0 = vadd.f32 %v11088_v24, %v11087_v60  ;;  %v11153_v41 = vadd.f32 %v11152_v35, %v11151_v58 }
 0x5e3   : > { %v14153_v21 = vadd.f32 %v11150_v50, %v4898_v10  ;;  %v4901_v5 = vadd.f32 %v11089_v0, %v14108_v27 }
 0x5e5   : > { %v14156_v38 = vadd.f32 %v11153_v41, %v4901_v5  ;;  %v11090_v45 = vpop.f32.mrb[228].mxu0  ;;  %v11154_v19 = vpop.f32.mrb[228].mxu1 }
 0x5e6   : > { %v11091_v48 = vpop.f32.mrb[229].mxu0  ;;  %v11155_v17 = vpop.f32.mrb[229].mxu1 }
 0x5e7   : > { %v11092_v34 = vadd.f32 %v11091_v48, %v11090_v45  ;;  %v11156_v7 = vadd.f32 %v11155_v17, %v11154_v19  ;;  %v11093_v29 = vpop.f32.mrb[230].mxu0  ;;  %v11157_v15 = vpop.f32.mrb[230].mxu1 }
 0x5e8   : > { %v11094_v30 = vpop.f32.mrb[231].mxu0  ;;  %v11158_v6 = vpop.f32.mrb[231].mxu1 }
 0x5e9   : > { %v4906_v14 = vadd.f32 %v11092_v34, %v14111_v63  ;;  %v11095_v1 = vadd.f32 %v11094_v30, %v11093_v29  ;;  %v11159_v28 = vadd.f32 %v11158_v6, %v11157_v15 }
 0x5eb   : > { %v14159_v56 = vadd.f32 %v11156_v7, %v4906_v14  ;;  %v4909_v27 = vadd.f32 %v11095_v1, %v14114_v40 }
 0x5ed   : > { %v14162_v59 = vadd.f32 %v11159_v28, %v4909_v27  ;;  %v11096_v52 = vpop.f32.mrb[232].mxu0  ;;  %v11160_v44 = vpop.f32.mrb[232].mxu1 }
 0x5ee   : > { %v11097_v33 = vpop.f32.mrb[233].mxu0  ;;  %v11161_v23 = vpop.f32.mrb[233].mxu1 }
 0x5ef   : > { %v11098_v53 = vadd.f32 %v11097_v33, %v11096_v52  ;;  %v11162_v50 = vadd.f32 %v11161_v23, %v11160_v44  ;;  %v11099_v60 = vpop.f32.mrb[234].mxu0  ;;  %v11163_v58 = vpop.f32.mrb[234].mxu1 }
 0x5f0   : > { %v11100_v24 = vpop.f32.mrb[235].mxu0  ;;  %v11164_v35 = vpop.f32.mrb[235].mxu1 }
 0x5f1   : > { %v4914_v63 = vadd.f32 %v11098_v53, %v14117_v57  ;;  %v11101_v10 = vadd.f32 %v11100_v24, %v11099_v60  ;;  %v11165_v0 = vadd.f32 %v11164_v35, %v11163_v58 }
 0x5f3   : > { %v14165_v41 = vadd.f32 %v11162_v50, %v4914_v63  ;;  %v4917_v40 = vadd.f32 %v11101_v10, %v14120_v54 }
 0x5f5   : > { %v14168_v5 = vadd.f32 %v11165_v0, %v4917_v40  ;;  %v11102_v45 = vpop.f32.mrb[236].mxu0  ;;  %v11166_v19 = vpop.f32.mrb[236].mxu1 }
 0x5f6   : > { %v11103_v48 = vpop.f32.mrb[237].mxu0  ;;  %v11167_v17 = vpop.f32.mrb[237].mxu1 }
 0x5f7   : > { %v11104_v34 = vadd.f32 %v11103_v48, %v11102_v45  ;;  %v11168_v7 = vadd.f32 %v11167_v17, %v11166_v19  ;;  %v11105_v29 = vpop.f32.mrb[238].mxu0  ;;  %v11169_v15 = vpop.f32.mrb[238].mxu1 }
 0x5f8   : > { %v11106_v30 = vpop.f32.mrb[239].mxu0  ;;  %v11170_v6 = vpop.f32.mrb[239].mxu1 }
 0x5f9   : > { %v4922_v57 = vadd.f32 %v11104_v34, %v14123_v11  ;;  %v11107_v14 = vadd.f32 %v11106_v30, %v11105_v29  ;;  %v11171_v1 = vadd.f32 %v11170_v6, %v11169_v15 }
 0x5fb   : > { %v14171_v28 = vadd.f32 %v11168_v7, %v4922_v57  ;;  %v4925_v54 = vadd.f32 %v11107_v14, %v14126_v39 }
 0x5fd   : > { %v14174_v27 = vadd.f32 %v11171_v1, %v4925_v54  ;;  %v11188_v52 = vpop.f32.mrb[240].mxu0  ;;  %v11252_v44 = vpop.f32.mrb[240].mxu1 }
 0x5fe   : > { %v11189_v33 = vpop.f32.mrb[241].mxu0  ;;  %v11253_v23 = vpop.f32.mrb[241].mxu1 }
 0x5ff   : > { %v11190_v53 = vadd.f32 %v11189_v33, %v11188_v52  ;;  %v11254_v50 = vadd.f32 %v11253_v23, %v11252_v44  ;;  %v11191_v60 = vpop.f32.mrb[242].mxu0  ;;  %v11255_v58 = vpop.f32.mrb[242].mxu1 }
 0x600   : > { %v11192_v24 = vpop.f32.mrb[243].mxu0  ;;  %v11256_v35 = vpop.f32.mrb[243].mxu1 }
 0x601   : > { %v11193_v63 = vadd.f32 %v11192_v24, %v11191_v60  ;;  %v11257_v11 = vadd.f32 %v11256_v35, %v11255_v58  ;;  %v5060_v10 = vadd.f32 %v11190_v53, %v14129_v62 }
 0x603   : > { %v5157_v0 = vadd.f32 %v11254_v50, %v5060_v10  ;;  %v5063_v40 = vadd.f32 %v11193_v63, %v14132_v32 }
 0x605   : > { %v11194_v39 = vpop.f32.mrb[244].mxu0  ;;  %v11258_v45 = vpop.f32.mrb[244].mxu1  ;;  %v14179_v19 = vadd.f32 %v5157_v0, %v13023_v31  ;;  %v5160_v48 = vadd.f32 %v11257_v11, %v5063_v40 }
 0x606   : > { %v11195_v17 = vpop.f32.mrb[245].mxu0  ;;  %v11259_v34 = vpop.f32.mrb[245].mxu1 }
 0x607   : > { %v11196_v7 = vadd.f32 %v11195_v17, %v11194_v39  ;;  %v11260_v29 = vadd.f32 %v11259_v34, %v11258_v45  ;;  %v11197_v15 = vpop.f32.mrb[246].mxu0  ;;  %v11261_v30 = vpop.f32.mrb[246].mxu1  ;;  %5235 = vadd.xlane.f32.xlu0 %v14179_v19  ;;  %v14183_v6 = vadd.f32 %v5160_v48, %v13026_v3 }
 0x608   : > { %v11198_v62 = vpop.f32.mrb[247].mxu0  ;;  %v11262_v57 = vpop.f32.mrb[247].mxu1 }
 0x609   : > { %v11199_v32 = vadd.f32 %v11198_v62, %v11197_v15  ;;  %v11263_v14 = vadd.f32 %v11262_v57, %v11261_v30  ;;  %5237 = vadd.xlane.f32.xlu1 %v14183_v6  ;;  %v5068_v31 = vadd.f32 %v11196_v7, %v14135_v37 }
 0x60b   : > { %v5165_v1 = vadd.f32 %v11260_v29, %v5068_v31  ;;  %v5071_v54 = vadd.f32 %v11199_v32, %v14138_v61 }
 0x60d   : > { %v11200_v52 = vpop.f32.mrb[248].mxu0  ;;  %v11264_v44 = vpop.f32.mrb[248].mxu1  ;;  %v14189_v33 = vadd.f32 %v5165_v1, %v13057_v18  ;;  %v5168_v23 = vadd.f32 %v11263_v14, %v5071_v54 }
 0x60e   : > { %v11201_v53 = vpop.f32.mrb[249].mxu0  ;;  %v11265_v3 = vpop.f32.mrb[249].mxu1 }
 0x60f   : > { %v11202_v50 = vadd.f32 %v11201_v53, %v11200_v52  ;;  %v11266_v60 = vadd.f32 %v11265_v3, %v11264_v44  ;;  %v11203_v58 = vpop.f32.mrb[250].mxu0  ;;  %v11267_v24 = vpop.f32.mrb[250].mxu1  ;;  %5239 = vadd.xlane.f32.xlu0 %v14189_v33  ;;  %v14193_v35 = vadd.f32 %v5168_v23, %v13051_v47 }
 0x610   : > { %v11204_v37 = vpop.f32.mrb[251].mxu0  ;;  %v11268_v63 = vpop.f32.mrb[251].mxu1 }
 0x611   : > { %v11205_v61 = vadd.f32 %v11204_v37, %v11203_v58  ;;  %v11269_v11 = vadd.f32 %v11268_v63, %v11267_v24  ;;  %5241 = vadd.xlane.f32.xlu1 %v14193_v35  ;;  %v5076_v18 = vadd.f32 %v11202_v50, %v14141_v25 }
 0x613   : > { %v5173_v10 = vadd.f32 %v11266_v60, %v5076_v18  ;;  %v5079_v0 = vadd.f32 %v11205_v61, %v14144_v26 }
 0x615   : > { %v11206_v40 = vpop.f32.mrb[252].mxu0  ;;  %v11270_v39 = vpop.f32.mrb[252].mxu1  ;;  %v14199_v45 = vadd.f32 %v5173_v10, %v13077_v22  ;;  %v5176_v48 = vadd.f32 %v11269_v11, %v5079_v0 }
 0x616   : > { %v11207_v17 = vpop.f32.mrb[253].mxu0  ;;  %v11271_v47 = vpop.f32.mrb[253].mxu1 }
 0x617   : > { %v11208_v34 = vadd.f32 %v11207_v17, %v11206_v40  ;;  %v11272_v7 = vadd.f32 %v11271_v47, %v11270_v39  ;;  %v11209_v29 = vpop.f32.mrb[254].mxu0  ;;  %v11273_v15 = vpop.f32.mrb[254].mxu1  ;;  %5243 = vadd.xlane.f32.xlu0 %v14199_v45  ;;  %v14203_v30 = vadd.f32 %v5176_v48, %v13073_v43  ;;  %v16129_v47 = vld [vmem:[#allocation8_spill] sm:$0xff] }
 0x618   : > { %v11210_v25 = vpop.f32.mrb[255].mxu0  ;;  %v11274_v62 = vpop.f32.mrb[255].mxu1 }
 0x619   : > { %v11211_v26 = vadd.f32 %v11210_v25, %v11209_v29  ;;  %v11275_v57 = vadd.f32 %v11274_v62, %v11273_v15  ;;  %5245 = vadd.xlane.f32.xlu1 %v14203_v30  ;;  %v5084_v22 = vadd.f32 %v11208_v34, %v14147_v4 }
 0x61b   : > { %v5181_v32 = vadd.f32 %v11272_v7, %v5084_v22  ;;  %v5087_v14 = vadd.f32 %v11211_v26, %v14150_v9 }
 0x61d   : > { %v11212_v31 = vpop.f32.mrb[0].mxu0  ;;  %v11276_v1 = vpop.f32.mrb[0].mxu1  ;;  %v14209_v54 = vadd.f32 %v5181_v32, %v13095_v2  ;;  %v5184_v52 = vadd.f32 %v11275_v57, %v5087_v14  ;;  %v16130_v57 = vld [vmem:[#allocation10_spill] sm:$0xff] }
 0x61e   : > { %v11213_v44 = vpop.f32.mrb[1].mxu0  ;;  %v11277_v43 = vpop.f32.mrb[1].mxu1 }
 0x61f   : > { %v11214_v23 = vadd.f32 %v11213_v44, %v11212_v31  ;;  %v11278_v53 = vadd.f32 %v11277_v43, %v11276_v1  ;;  %v11215_v3 = vpop.f32.mrb[2].mxu0  ;;  %v11279_v50 = vpop.f32.mrb[2].mxu1  ;;  %5247 = vadd.xlane.f32.xlu0 %v14209_v54  ;;  %v14213_v60 = vadd.f32 %v5184_v52, %v13091_v36 }
 0x620   : > { %v11216_v4 = vpop.f32.mrb[3].mxu0  ;;  %v11280_v58 = vpop.f32.mrb[3].mxu1 }
 0x621   : > { %v11217_v9 = vadd.f32 %v11216_v4, %v11215_v3  ;;  %v11281_v24 = vadd.f32 %v11280_v58, %v11279_v50  ;;  %5249 = vadd.xlane.f32.xlu1 %v14213_v60  ;;  %v5092_v2 = vadd.f32 %v11214_v23, %v14153_v21  ;;  %v16131_v23 = vld [vmem:[#allocation9_spill] sm:$0xff] }
 0x623   : > { %v5189_v37 = vadd.f32 %v11278_v53, %v5092_v2  ;;  %v5095_v63 = vadd.f32 %v11217_v9, %v14156_v38 }
 0x625   : > { %v11218_v61 = vpop.f32.mrb[4].mxu0  ;;  %v11282_v11 = vpop.f32.mrb[4].mxu1  ;;  %v14219_v18 = vadd.f32 %v5189_v37, %v13125_v49  ;;  %v5192_v10 = vadd.f32 %v11281_v24, %v5095_v63  ;;  %v16132_v37 = vld [vmem:[#allocation12_spill] sm:$0xff] }
 0x626   : > { %v11219_v0 = vpop.f32.mrb[5].mxu0  ;;  %v11283_v36 = vpop.f32.mrb[5].mxu1 }
 0x627   : > { %v11220_v40 = vadd.f32 %v11219_v0, %v11218_v61  ;;  %v11284_v39 = vadd.f32 %v11283_v36, %v11282_v11  ;;  %v11221_v48 = vpop.f32.mrb[6].mxu0  ;;  %v11285_v17 = vpop.f32.mrb[6].mxu1  ;;  %5251 = vadd.xlane.f32.xlu0 %v14219_v18  ;;  %v14223_v34 = vadd.f32 %v5192_v10, %v16129_v47 }
 0x628   : > { %v11222_v21 = vpop.f32.mrb[7].mxu0  ;;  %v11286_v7 = vpop.f32.mrb[7].mxu1 }
 0x629   : > { %v11223_v38 = vadd.f32 %v11222_v21, %v11221_v48  ;;  %v11287_v29 = vadd.f32 %v11286_v7, %v11285_v17  ;;  %5253 = vadd.xlane.f32.xlu1 %v14223_v34  ;;  %v5100_v49 = vadd.f32 %v11220_v40, %v14159_v56  ;;  %v16133_v48 = vld [vmem:[#allocation11_spill] sm:$0xff] }
 0x62b   : > { %v5197_v15 = vadd.f32 %v11284_v39, %v5100_v49  ;;  %v5103_v25 = vadd.f32 %v11223_v38, %v14162_v59  ;;  %v16134_v49 = vld [vmem:[#allocation14_spill] sm:$0xff] }
 0x62d   : > { %v11224_v62 = vpop.f32.mrb[8].mxu0  ;;  %v11288_v26 = vpop.f32.mrb[8].mxu1  ;;  %v14229_v22 = vadd.f32 %v5197_v15, %v16130_v57  ;;  %v5200_v32 = vadd.f32 %v11287_v29, %v5103_v25  ;;  %v12117_v57 = vld [vmem:[%s16080_s5 + $0x40] sm:$0xff]  }
 0x62e   : > { %v11225_v14 = vpop.f32.mrb[9].mxu0  ;;  %v11289_v31 = vpop.f32.mrb[9].mxu1  ;;  %11892 = vmatprep.subr.bf16.mxu0 %v12117_v57 }
 0x62f   : > { %v11226_v1 = vadd.f32 %v11225_v14, %v11224_v62  ;;  %v11290_v52 = vadd.f32 %v11289_v31, %v11288_v26  ;;  %v11227_v44 = vpop.f32.mrb[10].mxu0  ;;  %v11291_v43 = vpop.f32.mrb[10].mxu1  ;;  %5255 = vadd.xlane.f32.xlu0 %v14229_v22  ;;  %v14233_v53 = vadd.f32 %v5200_v32, %v16131_v23  ;;  %v16135_v62 = vld [vmem:[#allocation13_spill] sm:$0xff]  ;;  %11893 = vmatpush3.bf16.msra.mxu0 %v12117_v57  ;;  %v12120_v32 = vld [vmem:[%s16080_s5 + $0x58] sm:$0xff]  }
 0x630   : > { %v11228_v56 = vpop.f32.mrb[11].mxu0  ;;  %v11292_v3 = vpop.f32.mrb[11].mxu1 }
 0x631   : > { %v11229_v59 = vadd.f32 %v11228_v56, %v11227_v44  ;;  %v11293_v50 = vadd.f32 %v11292_v3, %v11291_v43  ;;  %5257 = vadd.xlane.f32.xlu1 %v14233_v53  ;;  %v5108_v4 = vadd.f32 %v11226_v1, %v14165_v41 }
 0x633   : > { %v5205_v58 = vadd.f32 %v11290_v52, %v5108_v4  ;;  %v5111_v9 = vadd.f32 %v11229_v59, %v14168_v5 }
 0x635   : > { %v11230_v24 = vpop.f32.mrb[12].mxu0  ;;  %v11294_v2 = vpop.f32.mrb[12].mxu1  ;;  %v14239_v63 = vadd.f32 %v5205_v58, %v16132_v37  ;;  %v5208_v61 = vadd.f32 %v11293_v50, %v5111_v9 }
 0x636   : > { %v11231_v11 = vpop.f32.mrb[13].mxu0  ;;  %v11295_v10 = vpop.f32.mrb[13].mxu1 }
 0x637   : > { %v11232_v0 = vadd.f32 %v11231_v11, %v11230_v24  ;;  %v11296_v36 = vadd.f32 %v11295_v10, %v11294_v2  ;;  %v11233_v40 = vpop.f32.mrb[14].mxu0  ;;  %v11297_v39 = vpop.f32.mrb[14].mxu1  ;;  %5259 = vadd.xlane.f32.xlu0 %v14239_v63  ;;  %v14243_v17 = vadd.f32 %v5208_v61, %v16133_v48 }
 0x638   : > { %v11234_v41 = vpop.f32.mrb[15].mxu0  ;;  %v11298_v47 = vpop.f32.mrb[15].mxu1 }
 0x639   : > { %v11235_v5 = vadd.f32 %v11234_v41, %v11233_v40  ;;  %v11299_v21 = vadd.f32 %v11298_v47, %v11297_v39  ;;  %5261 = vadd.xlane.f32.xlu1 %v14243_v17  ;;  %v5116_v7 = vadd.f32 %v11232_v0, %v14171_v28  ;;  %v12118_v28 = vld [vmem:[%s16080_s5 + $0x48] sm:$0xff]   ;;  %v12121_v40 = vld [vmem:[%s16080_s5 + $0x60] sm:$0xff]  }
 0x63a   : > { %11894 = vmatprep.subr.bf16.mxu0 %v12118_v28 }
 0x63b   : > { %v5213_v38 = vadd.f32 %v11296_v36, %v5116_v7  ;;  %v5119_v29 = vadd.f32 %v11235_v5, %v14174_v27  ;;  %v12119_v27 = vld [vmem:[%s16080_s5 + $0x50] sm:$0xff]   ;;  %11895 = vmatpush3.bf16.msra.mxu0 %v12118_v28 }
 0x63c   : > { %11896 = vmatprep.subr.bf16.mxu0 %v12119_v27 }
 0x63d   : > { %v14249_v15 = vadd.f32 %v5213_v38, %v16134_v49  ;;  %v5216_v25 = vadd.f32 %v11299_v21, %v5119_v29 }
 0x63f   : > { %5263 = vadd.xlane.f32.xlu0 %v14249_v15  ;;  %v14253_v26 = vadd.f32 %v5216_v25, %v16135_v62  ;;  %11897 = vmatpush3.bf16.msra.mxu0 %v12119_v27 }
 0x640   : > { %11898 = vmatprep.subr.bf16.mxu0 %v12120_v32 }
 0x641   : > { %5265 = vadd.xlane.f32.xlu1 %v14253_v26 }
 0x643   : > { %11899 = vmatpush3.bf16.msra.mxu0 %v12120_v32 }
 0x644   : > { %11900 = vmatprep.subr.bf16.mxu0 %v12121_v40 }
 0x647   : > { %11901 = vmatpush3.bf16.msra.mxu0 %v12121_v40 }
 0x694   : > { %v5236_v14 = vpop.xlane.xlu0 %5235 }
 0x695   : > { %v5267_v31 = vmul.f32 0.0078125, %v5236_v14  ;;  %v12123_v14 = vld [vmem:[%s16080_s5 + $0x70] sm:$0xff]  }
 0x696   : > { %v5238_v1 = vpop.xlane.xlu1 %5237 }
 0x697   : > { %v14269_v52 = vsub.f32 %v14179_v19, %v5267_v31  ;;  %v5268_v44 = vmul.f32 0.0078125, %v5238_v1 }
 0x699   : > { %v14272_v43 = vsub.f32 %v14183_v6, %v5268_v44  ;;  %v5299_v23 = vmul.f32 %v14269_v52, %v14269_v52 }
 0x69b   : > { %5315 = vadd.xlane.f32.xlu0 %v5299_v23  ;;  %v5300_v56 = vmul.f32 %v14272_v43, %v14272_v43 }
 0x69c   : > { %v5240_v3 = vpop.xlane.xlu0 %5239 }
 0x69d   : > { %v5269_v59 = vmul.f32 0.0078125, %v5240_v3  ;;  %5317 = vadd.xlane.f32.xlu1 %v5300_v56 }
 0x69e   : > { %v5242_v50 = vpop.xlane.xlu1 %5241 }
 0x69f   : > { %v14279_v4 = vsub.f32 %v14189_v33, %v5269_v59  ;;  %v5270_v19 = vmul.f32 0.0078125, %v5242_v50 }
 0x6a1   : > { %v14282_v58 = vsub.f32 %v14193_v35, %v5270_v19  ;;  %v5301_v6 = vmul.f32 %v14279_v4, %v14279_v4 }
 0x6a3   : > { %5319 = vadd.xlane.f32.xlu0 %v5301_v6  ;;  %v5302_v9 = vmul.f32 %v14282_v58, %v14282_v58 }
 0x6a4   : > { %v5244_v24 = vpop.xlane.xlu0 %5243 }
 0x6a5   : > { %v5271_v2 = vmul.f32 0.0078125, %v5244_v24  ;;  %5321 = vadd.xlane.f32.xlu1 %v5302_v9 }
 0x6a6   : > { %v5246_v37 = vpop.xlane.xlu1 %5245 }
 0x6a7   : > { %v14289_v61 = vsub.f32 %v14199_v45, %v5271_v2  ;;  %v5272_v33 = vmul.f32 0.0078125, %v5246_v37 }
 0x6a9   : > { %v14292_v11 = vsub.f32 %v14203_v30, %v5272_v33  ;;  %v5303_v35 = vmul.f32 %v14289_v61, %v14289_v61 }
 0x6ab   : > { %5323 = vadd.xlane.f32.xlu0 %v5303_v35  ;;  %v5304_v10 = vmul.f32 %v14292_v11, %v14292_v11 }
 0x6ac   : > { %v5248_v0 = vpop.xlane.xlu0 %5247 }
 0x6ad   : > { %v5273_v36 = vmul.f32 0.0078125, %v5248_v0  ;;  %5325 = vadd.xlane.f32.xlu1 %v5304_v10 }
 0x6ae   : > { %v5250_v45 = vpop.xlane.xlu1 %5249 }
 0x6af   : > { %v14302_v39 = vsub.f32 %v14209_v54, %v5273_v36  ;;  %v5274_v30 = vmul.f32 0.0078125, %v5250_v45 }
 0x6b1   : > { %v14305_v48 = vsub.f32 %v14213_v60, %v5274_v30  ;;  %v5305_v41 = vmul.f32 %v14302_v39, %v14302_v39 }
 0x6b3   : > { %5327 = vadd.xlane.f32.xlu0 %v5305_v41  ;;  %v5306_v47 = vmul.f32 %v14305_v48, %v14305_v48 }
 0x6b4   : > { %v5252_v5 = vpop.xlane.xlu0 %5251 }
 0x6b5   : > { %v5275_v21 = vmul.f32 0.0078125, %v5252_v5  ;;  %5329 = vadd.xlane.f32.xlu1 %v5306_v47 }
 0x6b6   : > { %v5254_v7 = vpop.xlane.xlu1 %5253 }
 0x6b7   : > { %v14312_v54 = vsub.f32 %v14219_v18, %v5275_v21  ;;  %v5276_v38 = vmul.f32 0.0078125, %v5254_v7  ;;  %v12122_v18 = vld [vmem:[%s16080_s5 + $0x68] sm:$0xff]   ;;  %v14363_v21 = vld [vmem:[%s16088_s13] ss:$0 sm:$0xff] }
 0x6b8   : > { %11902 = vmatprep.subr.bf16.mxu0 %v12122_v18 }
 0x6b9   : > { %v14315_v29 = vsub.f32 %v14223_v34, %v5276_v38  ;;  %v5307_v60 = vmul.f32 %v14312_v54, %v14312_v54  ;;  %11903 = vmatpush3.bf16.msra.mxu0 %v12122_v18  ;;  %v14371_v18 = vld [vmem:[%s16136_s29] ss:$0 sm:$0xff] }
 0x6ba   : > { %11904 = vmatprep.subr.bf16.mxu0 %v12123_v14 }
 0x6bb   : > { %5331 = vadd.xlane.f32.xlu0 %v5307_v60  ;;  %v5308_v49 = vmul.f32 %v14315_v29, %v14315_v29 }
 0x6bc   : > { %v5256_v25 = vpop.xlane.xlu0 %5255 }
 0x6bd   : > { %v5277_v62 = vmul.f32 0.0078125, %v5256_v25  ;;  %5333 = vadd.xlane.f32.xlu1 %v5308_v49  ;;  %11905 = vmatpush3.bf16.msra.mxu0 %v12123_v14 }
 0x6be   : > { %v5258_v57 = vpop.xlane.xlu1 %5257 }
 0x6bf   : > { %v14325_v28 = vsub.f32 %v14229_v22, %v5277_v62  ;;  %v5278_v34 = vmul.f32 0.0078125, %v5258_v57 }
 0x6c1   : > { %v14328_v27 = vsub.f32 %v14233_v53, %v5278_v34  ;;  %v5309_v32 = vmul.f32 %v14325_v28, %v14325_v28  ;;  %v12124_v53 = vld [vmem:[%s16080_s5 + $0x78] sm:$0xff]  }
 0x6c2   : > { %11906 = vmatprep.subr.bf16.mxu0 %v12124_v53 }
 0x6c3   : > { %5335 = vadd.xlane.f32.xlu0 %v5309_v32  ;;  %v5310_v31 = vmul.f32 %v14328_v27, %v14328_v27  ;;  %11907 = vmatpush3.bf16.msra.mxu0 %v12124_v53 }
 0x6c4   : > { %v5260_v1 = vpop.xlane.xlu0 %5259 }
 0x6c5   : > { %v5279_v22 = vmul.f32 0.0078125, %v5260_v1  ;;  %5337 = vadd.xlane.f32.xlu1 %v5310_v31 }
 0x6c6   : > { %v5262_v44 = vpop.xlane.xlu1 %5261 }
 0x6c7   : > { %v14341_v23 = vsub.f32 %v14239_v63, %v5279_v22  ;;  %v5280_v56 = vmul.f32 0.0078125, %v5262_v44 }
 0x6c9   : > { %v14344_v3 = vsub.f32 %v14243_v17, %v5280_v56  ;;  %v5311_v59 = vmul.f32 %v14341_v23, %v14341_v23 }
 0x6cb   : > { %5339 = vadd.xlane.f32.xlu0 %v5311_v59  ;;  %v5312_v50 = vmul.f32 %v14344_v3, %v14344_v3 }
 0x6cc   : > { %v5264_v19 = vpop.xlane.xlu0 %5263 }
 0x6cd   : > { %v5281_v6 = vmul.f32 0.0078125, %v5264_v19  ;;  %5341 = vadd.xlane.f32.xlu1 %v5312_v50 }
 0x6ce   : > { %v5266_v9 = vpop.xlane.xlu1 %5265 }
 0x6cf   : > { %v14351_v63 = vsub.f32 %v14249_v15, %v5281_v6  ;;  %v5282_v24 = vmul.f32 0.0078125, %v5266_v9 }
 0x6d1   : > { %v14354_v2 = vsub.f32 %v14253_v26, %v5282_v24  ;;  %v5313_v17 = vmul.f32 %v14351_v63, %v14351_v63 }
 0x6d3   : > { %5343 = vadd.xlane.f32.xlu0 %v5313_v17  ;;  %v5314_v37 = vmul.f32 %v14354_v2, %v14354_v2 }
 0x6d5   : > { %5345 = vadd.xlane.f32.xlu1 %v5314_v37 }
 0x728   : > { %v5316_v33 = vpop.xlane.xlu0 %5315 }
 0x729   : > { %v5347_v35 = vmul.f32 0.0078125, %v5316_v33 }
 0x72a   : > { %v5318_v10 = vpop.xlane.xlu1 %5317 }
 0x72b   : > { %v5363_v0 = vadd.f32 1e-05, %v5347_v35  ;;  %v5348_v36 = vmul.f32 0.0078125, %v5318_v10 }
 0x72d   : > { %12317 = vrsqrt.f32 %v5363_v0  ;;  %v5364_v15 = vadd.f32 1e-05, %v5348_v36 }
 0x72f   : > { %12319 = vrsqrt.f32 %v5364_v15 }
 0x730   : > { %v5320_v40 = vpop.xlane.xlu0 %5319 }
 0x731   : > { %v5349_v45 = vmul.f32 0.0078125, %v5320_v40 }
 0x732   : > { %v5322_v26 = vpop.xlane.xlu1 %5321 }
 0x733   : > { %v5365_v30 = vadd.f32 1e-05, %v5349_v45  ;;  %v5350_v41 = vmul.f32 0.0078125, %v5322_v26 }
 0x735   : > { %12321 = vrsqrt.f32 %v5365_v30  ;;  %v5366_v47 = vadd.f32 1e-05, %v5350_v41 }
 0x737   : > { %v12318_v5 = vpop.eup %12317  ;;  %12323 = vrsqrt.f32 %v5366_v47 }
 0x738   : > { %v5324_v7 = vpop.xlane.xlu0 %5323  ;;  %v5395_v38 = vmul.f32 %v12318_v5, %v14269_v52 }
 0x739   : > { %v12320_v60 = vpop.eup %12319  ;;  %v5351_v49 = vmul.f32 0.0078125, %v5324_v7 }
 0x73a   : > { %v5326_v25 = vpop.xlane.xlu1 %5325  ;;  %v5396_v62 = vmul.f32 %v12320_v60, %v14272_v43  ;;  %v5417_v57 = vmul.f32 %v14363_v21, %v5395_v38 }
 0x73b   : > { %v5367_v34 = vadd.f32 1e-05, %v5351_v49  ;;  %v5352_v32 = vmul.f32 0.0078125, %v5326_v25 }
 0x73c   : > { %v5418_v14 = vmul.f32 %v14363_v21, %v5396_v62  ;;  %v14375_v52 = vadd.f32 %v14371_v18, %v5417_v57 }
 0x73d   : > { %12325 = vrsqrt.f32 %v5367_v34  ;;  %v5368_v31 = vadd.f32 1e-05, %v5352_v32 }
 0x73e   : > { %v14378_v1 = vadd.f32 %v14371_v18, %v5418_v14 }
 0x73f   : > { %v12322_v43 = vpop.eup %12321  ;;  %12327 = vrsqrt.f32 %v5368_v31 }
 0x740   : > { %v5397_v22 = vmul.f32 %v12322_v43, %v14279_v4  ;;  %v5328_v44 = vpop.xlane.xlu0 %5327  ;;  %v5873_v53 = vpack.c.bf16 %v14378_v1, %v14375_v52 }
 0x741   : > { %v12324_v56 = vpop.eup %12323  ;;  %v5353_v59 = vmul.f32 0.0078125, %v5328_v44 }
 0x742   : > { %v5419_v50 = vmul.f32 %v14363_v21, %v5397_v22  ;;  %v5398_v19 = vmul.f32 %v12324_v56, %v14282_v58  ;;  %v5330_v6 = vpop.xlane.xlu1 %5329  ;;  %11908 = vmatprep.mubr.bf16.mxu0 %v5873_v53 }
 0x743   : > { %v5369_v9 = vadd.f32 1e-05, %v5353_v59  ;;  %v5354_v24 = vmul.f32 0.0078125, %v5330_v6 }
 0x744   : > { %v5420_v17 = vmul.f32 %v14363_v21, %v5398_v19  ;;  %v14387_v4 = vadd.f32 %v14371_v18, %v5419_v50 }
 0x745   : > { %12329 = vrsqrt.f32 %v5369_v9  ;;  %v5370_v37 = vadd.f32 1e-05, %v5354_v24 }
 0x746   : > { %v14390_v33 = vadd.f32 %v14371_v18, %v5420_v17 }
 0x747   : > { %v12326_v35 = vpop.eup %12325  ;;  %12331 = vrsqrt.f32 %v5370_v37 }
 0x748   : > { %v5874_v10 = vpack.c.bf16 %v14390_v33, %v14387_v4  ;;  %v5332_v58 = vpop.xlane.xlu0 %5331  ;;  %v5399_v0 = vmul.f32 %v12326_v35, %v14289_v61 }
 0x749   : > { %v12328_v36 = vpop.eup %12327  ;;  %v5355_v15 = vmul.f32 0.0078125, %v5332_v58 }
 0x74a   : > { %v5334_v40 = vpop.xlane.xlu1 %5333  ;;  %11909 = vmatmul.mubr.bf16.vlgmr.msra.gmra.mrb[16].mxu0 %v5874_v10  ;;  %v5400_v45 = vmul.f32 %v12328_v36, %v14292_v11  ;;  %v5421_v26 = vmul.f32 %v14363_v21, %v5399_v0 }
 0x74b   : > { %v5371_v30 = vadd.f32 1e-05, %v5355_v15  ;;  %v5356_v41 = vmul.f32 0.0078125, %v5334_v40 }
 0x74c   : > { %v5422_v47 = vmul.f32 %v14363_v21, %v5400_v45  ;;  %v14399_v7 = vadd.f32 %v14371_v18, %v5421_v26 }
 0x74d   : > { %12333 = vrsqrt.f32 %v5371_v30  ;;  %v5372_v5 = vadd.f32 1e-05, %v5356_v41 }
 0x74e   : > { %v14402_v38 = vadd.f32 %v14371_v18, %v5422_v47 }
 0x74f   : > { %v12330_v61 = vpop.eup %12329  ;;  %12335 = vrsqrt.f32 %v5372_v5 }
 0x750   : > { %v5401_v60 = vmul.f32 %v12330_v61, %v14302_v39  ;;  %v5336_v49 = vpop.xlane.xlu0 %5335  ;;  %v5875_v11 = vpack.c.bf16 %v14402_v38, %v14399_v7 }
 0x751   : > { %v12332_v25 = vpop.eup %12331  ;;  %v5357_v62 = vmul.f32 0.0078125, %v5336_v49 }
 0x752   : > { %v5423_v57 = vmul.f32 %v14363_v21, %v5401_v60  ;;  %v5402_v34 = vmul.f32 %v12332_v25, %v14305_v48  ;;  %v5338_v32 = vpop.xlane.xlu1 %5337  ;;  %11912 = vmatprep.mubr.bf16.mxu0 %v5875_v11 }
 0x753   : > { %v5373_v14 = vadd.f32 1e-05, %v5357_v62  ;;  %v5358_v31 = vmul.f32 0.0078125, %v5338_v32 }
 0x754   : > { %v5424_v43 = vmul.f32 %v14363_v21, %v5402_v34  ;;  %v14411_v39 = vadd.f32 %v14371_v18, %v5423_v57 }
 0x755   : > { %12337 = vrsqrt.f32 %v5373_v14  ;;  %v5374_v22 = vadd.f32 1e-05, %v5358_v31 }
 0x756   : > { %v14414_v44 = vadd.f32 %v14371_v18, %v5424_v43 }
 0x757   : > { %v12334_v53 = vpop.eup %12333  ;;  %12339 = vrsqrt.f32 %v5374_v22 }
 0x758   : > { %v5876_v56 = vpack.c.bf16 %v14414_v44, %v14411_v39  ;;  %v5340_v48 = vpop.xlane.xlu0 %5339  ;;  %v5403_v59 = vmul.f32 %v12334_v53, %v14312_v54 }
 0x759   : > { %v12336_v50 = vpop.eup %12335  ;;  %v5359_v19 = vmul.f32 0.0078125, %v5340_v48 }
 0x75a   : > { %v5342_v6 = vpop.xlane.xlu1 %5341  ;;  %11913 = vmatmul.mubr.bf16.gmra.mrb[20].mxu0 %v5876_v56  ;;  %v5404_v9 = vmul.f32 %v12336_v50, %v14315_v29  ;;  %v5425_v24 = vmul.f32 %v14363_v21, %v5403_v59 }
 0x75b   : > { %v5375_v17 = vadd.f32 1e-05, %v5359_v19  ;;  %v5360_v37 = vmul.f32 0.0078125, %v5342_v6  ;;  %v10484_v19 = vld [vmem:[%s16081_s6 + $0x1] ss:$0 sm:$0xff] }
 0x75c   : > { %v5426_v35 = vmul.f32 %v14363_v21, %v5404_v9  ;;  %v14423_v58 = vadd.f32 %v14371_v18, %v5425_v24 }
 0x75d   : > { %12341 = vrsqrt.f32 %v5375_v17  ;;  %v5376_v10 = vadd.f32 1e-05, %v5360_v37 }
 0x75e   : > { %v14426_v0 = vadd.f32 %v14371_v18, %v5426_v35 }
 0x75f   : > { %v12338_v54 = vpop.eup %12337  ;;  %12343 = vrsqrt.f32 %v5376_v10 }
 0x760   : > { %v5405_v36 = vmul.f32 %v12338_v54, %v14325_v28  ;;  %v5344_v15 = vpop.xlane.xlu0 %5343  ;;  %v5877_v29 = vpack.c.bf16 %v14426_v0, %v14423_v58 }
 0x761   : > { %v12340_v40 = vpop.eup %12339  ;;  %v5361_v45 = vmul.f32 0.0078125, %v5344_v15 }
 0x762   : > { %v5427_v26 = vmul.f32 %v14363_v21, %v5405_v36  ;;  %v5406_v30 = vmul.f32 %v12340_v40, %v14328_v27  ;;  %v5346_v41 = vpop.xlane.xlu1 %5345  ;;  %11916 = vmatprep.mubr.bf16.mxu0 %v5877_v29 }
 0x763   : > { %v5377_v47 = vadd.f32 1e-05, %v5361_v45  ;;  %v5362_v5 = vmul.f32 0.0078125, %v5346_v41 }
 0x764   : > { %v5428_v61 = vmul.f32 %v14363_v21, %v5406_v30  ;;  %v14435_v28 = vadd.f32 %v14371_v18, %v5427_v26 }
 0x765   : > { %12345 = vrsqrt.f32 %v5377_v47  ;;  %v5378_v60 = vadd.f32 1e-05, %v5362_v5 }
 0x766   : > { %v14438_v49 = vadd.f32 %v14371_v18, %v5428_v61 }
 0x767   : > { %v12342_v11 = vpop.eup %12341  ;;  %12347 = vrsqrt.f32 %v5378_v60 }
 0x768   : > { %v5878_v25 = vpack.c.bf16 %v14438_v49, %v14435_v28  ;;  %v5407_v27 = vmul.f32 %v12342_v11, %v14341_v23 }
 0x769   : > { %v12344_v62 = vpop.eup %12343 }
 0x76a   : > { %11917 = vmatmul.mubr.bf16.gmra.mrb[24].mxu0 %v5878_v25  ;;  %v5408_v57 = vmul.f32 %v12344_v62, %v14344_v3  ;;  %v5429_v34 = vmul.f32 %v14363_v21, %v5407_v27 }
 0x76c   : > { %v5430_v32 = vmul.f32 %v14363_v21, %v5408_v57  ;;  %v14447_v14 = vadd.f32 %v14371_v18, %v5429_v34 }
 0x76e   : > { %v14450_v31 = vadd.f32 %v14371_v18, %v5430_v32 }
 0x76f   : > { %v12346_v43 = vpop.eup %12345 }
 0x770   : > { %v5409_v22 = vmul.f32 %v12346_v43, %v14351_v63  ;;  %v5879_v23 = vpack.c.bf16 %v14450_v31, %v14447_v14 }
 0x771   : > { %v12348_v53 = vpop.eup %12347 }
 0x772   : > { %v5431_v56 = vmul.f32 %v14363_v21, %v5409_v22  ;;  %v5410_v3 = vmul.f32 %v12348_v53, %v14354_v2  ;;  %11920 = vmatprep.mubr.bf16.mxu0 %v5879_v23 }
 0x774   : > { %v5432_v48 = vmul.f32 %v14363_v21, %v5410_v3  ;;  %v14459_v59 = vadd.f32 %v14371_v18, %v5431_v56 }
 0x776   : > { %v14462_v50 = vadd.f32 %v14371_v18, %v5432_v48  ;;  %v5487_v48 = vld [vmem:[#allocation2 + $0x440] sm:$0xff] }
 0x778   : > { %v5880_v63 = vpack.c.bf16 %v14462_v50, %v14459_v59 }
 0x77a   : > { %11921 = vmatmul.mubr.bf16.gmra.mrb[28].mxu0 %v5880_v63  ;;  %v5495_v63 = vld [vmem:[#allocation2 + $0x480] sm:$0xff] }
 0x77b   : > { %7143 = vmatprep.mubr.bf16.mxu0 %v16128_v42 }
 0x81d   : > { %v11910_v2 = vpop.f32.mrb[16].mxu0 }
 0x81e   : > { %v5969_v6 = vpop.f32.mrb[17].mxu0  ;;  %v5978_v37 = vadd.f32 %v11910_v2, %v10484_v19 }
 0x81f   : > { %v11911_v9 = vpop.f32.mrb[18].mxu0  ;;  %v5970_v21 = vadd.f32 %v10484_v19, %v5969_v6  ;;  %v5503_v6 = vld [vmem:[#allocation2 + $0x4c0] sm:$0xff] }
 0x820   : > { %v5972_v24 = vpop.f32.mrb[19].mxu0  ;;  %v5981_v10 = vadd.f32 %v11911_v9, %v10484_v19  ;;  %v14479_v54 = vadd.f32 %v5978_v37, %v14387_v4  ;;  %v5511_v9 = vld [vmem:[#allocation2 + $0x500] sm:$0xff] }
 0x821   : > { %v14471_v17 = vadd.f32 %v5970_v21, %v14375_v52  ;;  %v5973_v18 = vadd.f32 %v10484_v19, %v5972_v24  ;;  %v5519_v21 = vld [vmem:[#allocation2 + $0x540] sm:$0xff]  ;;  %v5480_v24 = vld [vmem:[#allocation2 + $0x408] sm:$0xff] }
 0x822   : > { %v14483_v36 = vadd.f32 %v5981_v10, %v14390_v33 }
 0x823   : > { %6048 = vadd.xlane.f32.xlu0 %v14471_v17  ;;  %v14475_v35 = vadd.f32 %v5973_v18, %v14378_v1  ;;  %v10511_v18 = vcombine.low %v5495_v63, %v5503_v6 }
 0x825   : > { %6050 = vadd.xlane.f32.xlu1 %v14475_v35 }
 0x827   : > { %6052 = vadd.xlane.f32.xlu0 %v14479_v54 }
 0x829   : > { %6054 = vadd.xlane.f32.xlu1 %v14483_v36 }
 0x82d   : > { %v11914_v52 = vpop.f32.mrb[20].mxu0 }
 0x82e   : > { %v5985_v15 = vpop.f32.mrb[21].mxu0  ;;  %v5994_v30 = vadd.f32 %v11914_v52, %v10484_v19  ;;  %v5504_v52 = vld [vmem:[#allocation2 + $0x4c8] sm:$0xff] }
 0x82f   : > { %v11915_v29 = vpop.f32.mrb[22].mxu0  ;;  %v5986_v40 = vadd.f32 %v10484_v19, %v5985_v15  ;;  %v10528_v15 = vcombine.high %v5511_v9, %v5519_v21 }
 0x830   : > { %v5988_v45 = vpop.f32.mrb[23].mxu0  ;;  %v5997_v41 = vadd.f32 %v11915_v29, %v10484_v19  ;;  %v14495_v33 = vadd.f32 %v5994_v30, %v14411_v39  ;;  %v10527_v30 = vcombine.low %v5511_v9, %v5519_v21 }
 0x831   : > { %v14487_v1 = vadd.f32 %v5986_v40, %v14399_v7  ;;  %v5989_v26 = vadd.f32 %v10484_v19, %v5988_v45  ;;  %v5527_v40 = vld [vmem:[#allocation2 + $0x580] sm:$0xff] }
 0x832   : > { %v14499_v47 = vadd.f32 %v5997_v41, %v14414_v44  ;;  %v5535_v45 = vld [vmem:[#allocation2 + $0x5c0] sm:$0xff] }
 0x833   : > { %6056 = vadd.xlane.f32.xlu0 %v14487_v1  ;;  %v14491_v4 = vadd.f32 %v5989_v26, %v14402_v38  ;;  %v10544_v41 = vcombine.high %v5527_v40, %v5535_v45 }
 0x835   : > { %6058 = vadd.xlane.f32.xlu1 %v14491_v4 }
 0x837   : > { %6060 = vadd.xlane.f32.xlu0 %v14495_v33 }
 0x839   : > { %6062 = vadd.xlane.f32.xlu1 %v14499_v47 }
 0x83d   : > { %v11918_v7 = vpop.f32.mrb[24].mxu0 }
 0x83e   : > { %v6001_v5 = vpop.f32.mrb[25].mxu0  ;;  %v6010_v38 = vadd.f32 %v11918_v7, %v10484_v19  ;;  %v5543_v7 = vld [vmem:[#allocation2 + $0x600] sm:$0xff] }
 0x83f   : > { %v6002_v61 = vadd.f32 %v10484_v19, %v6001_v5  ;;  %v11919_v60 = vpop.f32.mrb[26].mxu0  ;;  %v5551_v5 = vld [vmem:[#allocation2 + $0x640] sm:$0xff] }
 0x840   : > { %v6004_v11 = vpop.f32.mrb[27].mxu0  ;;  %v6013_v62 = vadd.f32 %v11919_v60, %v10484_v19  ;;  %v14511_v44 = vadd.f32 %v6010_v38, %v14435_v28  ;;  %v10560_v60 = vcombine.high %v5543_v7, %v5551_v5 }
 0x841   : > { %v6005_v25 = vadd.f32 %v10484_v19, %v6004_v11  ;;  %v14503_v27 = vadd.f32 %v6002_v61, %v14423_v58  ;;  %v10543_v61 = vcombine.low %v5527_v40, %v5535_v45  ;;  %v10559_v11 = vcombine.low %v5543_v7, %v5551_v5  ;;  %v5528_v40 = vld [vmem:[#allocation2 + $0x588] sm:$0xff] }
 0x842   : > { %v14515_v57 = vadd.f32 %v6013_v62, %v14438_v49  ;;  %v5536_v45 = vld [vmem:[#allocation2 + $0x5c8] sm:$0xff] }
 0x843   : > { %6064 = vadd.xlane.f32.xlu0 %v14503_v27  ;;  %v14507_v39 = vadd.f32 %v6005_v25, %v14426_v0  ;;  %v5552_v7 = vld [vmem:[#allocation2 + $0x648] sm:$0xff] }
 0x845   : > { %6066 = vadd.xlane.f32.xlu1 %v14507_v39 }
 0x847   : > { %6068 = vadd.xlane.f32.xlu0 %v14511_v44 }
 0x849   : > { %6070 = vadd.xlane.f32.xlu1 %v14515_v57 }
 0x84d   : > { %v11922_v58 = vpop.f32.mrb[28].mxu0 }
 0x84e   : > { %v6017_v34 = vpop.f32.mrb[29].mxu0  ;;  %v6026_v23 = vadd.f32 %v11922_v58, %v10484_v19 }
 0x84f   : > { %v6018_v32 = vadd.f32 %v10484_v19, %v6017_v34  ;;  %v11923_v43 = vpop.f32.mrb[30].mxu0 }
 0x850   : > { %v6020_v22 = vpop.f32.mrb[31].mxu0  ;;  %v6029_v56 = vadd.f32 %v11923_v43, %v10484_v19  ;;  %v14527_v49 = vadd.f32 %v6026_v23, %v14459_v59  ;;  %v5488_v59 = vld [vmem:[#allocation2 + $0x448] sm:$0xff] }
 0x851   : > { %v6021_v0 = vadd.f32 %v10484_v19, %v6020_v22  ;;  %v14519_v53 = vadd.f32 %v6018_v32, %v14447_v14  ;;  %v5479_v14 = vld [vmem:[#allocation2 + $0x400] sm:$0xff]  ;;  %v10497_v37 = vcombine.low %v5480_v24, %v5488_v59  ;;  %v10498_v10 = vcombine.high %v5480_v24, %v5488_v59  ;;  %v5512_v59 = vld [vmem:[#allocation2 + $0x508] sm:$0xff] }
 0x852   : > { %v14531_v3 = vadd.f32 %v6029_v56, %v14462_v50  ;;  %v10495_v19 = vcombine.low %v5479_v14, %v5487_v48  ;;  %v10496_v2 = vcombine.high %v5479_v14, %v5487_v48  ;;  %v5496_v50 = vld [vmem:[#allocation2 + $0x488] sm:$0xff] }
 0x853   : > { %6072 = vadd.xlane.f32.xlu0 %v14519_v53  ;;  %v14523_v28 = vadd.f32 %v6021_v0, %v14450_v31  ;;  %v10512_v31 = vcombine.high %v5495_v63, %v5503_v6  ;;  %v10514_v29 = vcombine.high %v5496_v50, %v5504_v52  ;;  %7111 = vmatprep.subr.bf16.mxu0 %v10498_v10 }
 0x854   : > { %6998 = vmatprep.subr.bf16.mxu1 %v10496_v2  ;;  %7112 = vmatpush1.bf16.msra.mxu0 %v10497_v37  ;;  %v10513_v26 = vcombine.low %v5496_v50, %v5504_v52 }
 0x855   : > { %6074 = vadd.xlane.f32.xlu1 %v14523_v28  ;;  %6999 = vmatpush1.bf16.msra.mxu1 %v10495_v19 }
 0x856   : > { %7000 = vmatprep.subr.bf16.mxu1 %v10512_v31  ;;  %7113 = vmatprep.subr.bf16.mxu0 %v10514_v29 }
 0x857   : > { %6076 = vadd.xlane.f32.xlu0 %v14527_v49 }
 0x858   : > { %7114 = vmatpush1.bf16.msra.mxu0 %v10513_v26  ;;  %v10546_v26 = vcombine.high %v5528_v40, %v5536_v45 }
 0x859   : > { %6078 = vadd.xlane.f32.xlu1 %v14531_v3  ;;  %7001 = vmatpush1.bf16.msra.mxu1 %v10511_v18  ;;  %v5520_v18 = vld [vmem:[#allocation2 + $0x548] sm:$0xff] }
 0x85a   : > { %7002 = vmatprep.subr.bf16.mxu1 %v10528_v15  ;;  %v10530_v10 = vcombine.high %v5512_v59, %v5520_v18  ;;  %v10529_v15 = vcombine.low %v5512_v59, %v5520_v18 }
 0x85c   : > { %7115 = vmatprep.subr.bf16.mxu0 %v10530_v10 }
 0x85d   : > { %7003 = vmatpush1.bf16.msra.mxu1 %v10527_v30  ;;  %7116 = vmatpush1.bf16.msra.mxu0 %v10529_v15  ;;  %v10545_v30 = vcombine.low %v5528_v40, %v5536_v45  ;;  %v5592_v40 = vld [vmem:[#allocation2 + $0x788] sm:$0xff] }
 0x85e   : > { %7004 = vmatprep.subr.bf16.mxu1 %v10544_v41  ;;  %7117 = vmatprep.subr.bf16.mxu0 %v10546_v26  ;;  %v5544_v41 = vld [vmem:[#allocation2 + $0x608] sm:$0xff] }
 0x85f   : > { %v10561_v5 = vcombine.low %v5544_v41, %v5552_v7  ;;  %v5600_v26 = vld [vmem:[#allocation2 + $0x7c8] sm:$0xff] }
 0x861   : > { %7005 = vmatpush1.bf16.msra.mxu1 %v10543_v61  ;;  %7118 = vmatpush1.bf16.msra.mxu0 %v10545_v30 }
 0x862   : > { %7006 = vmatprep.subr.bf16.mxu1 %v10560_v60 }
 0x865   : > { %7007 = vmatpush1.bf16.msra.mxu1 %v10559_v11  ;;  %v5559_v11 = vld [vmem:[#allocation2 + $0x680] sm:$0xff] }
 0x8b0   : > { %v6049_v38 = vpop.xlane.xlu0 %6048 }
 0x8b1   : > { %v6080_v25 = vmul.f32 0.0078125, %v6049_v38  ;;  %v5567_v38 = vld [vmem:[#allocation2 + $0x6c0] sm:$0xff] }
 0x8b2   : > { %v6051_v62 = vpop.xlane.xlu1 %6050 }
 0x8b3   : > { %v14535_v58 = vsub.f32 %v14471_v17, %v6080_v25  ;;  %v6081_v34 = vmul.f32 0.0078125, %v6051_v62  ;;  %v5560_v25 = vld [vmem:[#allocation2 + $0x688] sm:$0xff] }
 0x8b4   : > { %v6053_v32 = vpop.xlane.xlu0 %6052 }
 0x8b5   : > { %v14538_v43 = vsub.f32 %v14475_v35, %v6081_v34  ;;  %v6082_v22 = vmul.f32 0.0078125, %v6053_v32  ;;  %v6112_v23 = vmul.f32 %v14535_v58, %v14535_v58  ;;  %v10576_v34 = vcombine.high %v5559_v11, %v5567_v38  ;;  %v5568_v32 = vld [vmem:[#allocation2 + $0x6c8] sm:$0xff] }
 0x8b6   : > { %v6055_v0 = vpop.xlane.xlu1 %6054 }
 0x8b7   : > { %v14543_v56 = vsub.f32 %v14479_v54, %v6082_v22  ;;  %v6083_v14 = vmul.f32 0.0078125, %v6055_v0  ;;  %6128 = vadd.xlane.f32.xlu0 %v6112_v23  ;;  %v6113_v48 = vmul.f32 %v14538_v43, %v14538_v43  ;;  %v10575_v0 = vcombine.low %v5559_v11, %v5567_v38  ;;  %7008 = vmatprep.subr.bf16.mxu1 %v10576_v34 }
 0x8b9   : > { %v14548_v17 = vsub.f32 %v14483_v36, %v6083_v14  ;;  %6130 = vadd.xlane.f32.xlu1 %v6113_v48  ;;  %v6114_v35 = vmul.f32 %v14543_v56, %v14543_v56  ;;  %v10577_v14 = vcombine.low %v5560_v25, %v5568_v32  ;;  %7009 = vmatpush1.bf16.msra.mxu1 %v10575_v0 }
 0x8bb   : > { %6132 = vadd.xlane.f32.xlu0 %v6114_v35  ;;  %v6115_v63 = vmul.f32 %v14548_v17, %v14548_v17  ;;  %v10578_v35 = vcombine.high %v5560_v25, %v5568_v32 }
 0x8bd   : > { %6134 = vadd.xlane.f32.xlu1 %v6115_v63 }
 0x8c0   : > { %v6057_v19 = vpop.xlane.xlu0 %6056 }
 0x8c1   : > { %v6084_v54 = vmul.f32 0.0078125, %v6057_v19 }
 0x8c2   : > { %v6059_v2 = vpop.xlane.xlu1 %6058 }
 0x8c3   : > { %v14555_v6 = vsub.f32 %v14487_v1, %v6084_v54  ;;  %v6085_v31 = vmul.f32 0.0078125, %v6059_v2  ;;  %v5575_v2 = vld [vmem:[#allocation2 + $0x700] sm:$0xff] }
 0x8c4   : > { %v6061_v9 = vpop.xlane.xlu0 %6060 }
 0x8c5   : > { %v14558_v36 = vsub.f32 %v14491_v4, %v6085_v31  ;;  %v6086_v21 = vmul.f32 0.0078125, %v6061_v9  ;;  %v6116_v24 = vmul.f32 %v14555_v6, %v14555_v6  ;;  %v5583_v31 = vld [vmem:[#allocation2 + $0x740] sm:$0xff]  ;;  %v5576_v9 = vld [vmem:[#allocation2 + $0x708] sm:$0xff] }
 0x8c6   : > { %v6063_v37 = vpop.xlane.xlu1 %6062 }
 0x8c7   : > { %v14563_v50 = vsub.f32 %v14495_v33, %v6086_v21  ;;  %v6087_v52 = vmul.f32 0.0078125, %v6063_v37  ;;  %6136 = vadd.xlane.f32.xlu0 %v6116_v24  ;;  %v6117_v1 = vmul.f32 %v14558_v36, %v14558_v36  ;;  %v5584_v24 = vld [vmem:[#allocation2 + $0x748] sm:$0xff]  ;;  %v10591_v37 = vcombine.low %v5575_v2, %v5583_v31 }
 0x8c8   : > { %v10593_v10 = vcombine.low %v5576_v9, %v5584_v24 }
 0x8c9   : > { %v14568_v4 = vsub.f32 %v14499_v47, %v6087_v52  ;;  %6138 = vadd.xlane.f32.xlu1 %v6117_v1  ;;  %v6118_v29 = vmul.f32 %v14563_v50, %v14563_v50  ;;  %v10562_v47 = vcombine.high %v5544_v41, %v5552_v7  ;;  %v10594_v52 = vcombine.high %v5576_v9, %v5584_v24 }
 0x8ca   : > { %v10609_v41 = vcombine.low %v5592_v40, %v5600_v26 }
 0x8cb   : > { %6140 = vadd.xlane.f32.xlu0 %v6118_v29  ;;  %v6119_v33 = vmul.f32 %v14568_v4, %v14568_v4  ;;  %7119 = vmatprep.subr.bf16.mxu0 %v10562_v47  ;;  %v5599_v29 = vld [vmem:[#allocation2 + $0x7c0] sm:$0xff] }
 0x8cc   : > { %7120 = vmatpush1.bf16.msra.mxu0 %v10561_v5 }
 0x8cd   : > { %6142 = vadd.xlane.f32.xlu1 %v6119_v33  ;;  %7121 = vmatprep.subr.bf16.mxu0 %v10578_v35 }
 0x8d0   : > { %v6065_v61 = vpop.xlane.xlu0 %6064  ;;  %7122 = vmatpush1.bf16.msra.mxu0 %v10577_v14 }
 0x8d1   : > { %v6088_v60 = vmul.f32 0.0078125, %v6065_v61  ;;  %7123 = vmatprep.subr.bf16.mxu0 %v10594_v52 }
 0x8d2   : > { %v6067_v62 = vpop.xlane.xlu1 %6066 }
 0x8d3   : > { %v14575_v22 = vsub.f32 %v14503_v27, %v6088_v60  ;;  %v6089_v23 = vmul.f32 0.0078125, %v6067_v62  ;;  %v10592_v27 = vcombine.high %v5575_v2, %v5583_v31 }
 0x8d4   : > { %v6069_v48 = vpop.xlane.xlu0 %6068  ;;  %7124 = vmatpush1.bf16.msra.mxu0 %v10593_v10 }
 0x8d5   : > { %v14578_v63 = vsub.f32 %v14507_v39, %v6089_v23  ;;  %v6090_v19 = vmul.f32 0.0078125, %v6069_v48  ;;  %v6120_v54 = vmul.f32 %v14575_v22, %v14575_v22  ;;  %7010 = vmatprep.subr.bf16.mxu1 %v10592_v27  ;;  %v14614_v48 = vld [vmem:[#allocation2 + $0x410] sm:$0xff] }
 0x8d6   : > { %v6071_v21 = vpop.xlane.xlu1 %6070  ;;  %7011 = vmatpush1.bf16.msra.mxu1 %v10591_v37 }
 0x8d7   : > { %v14583_v59 = vsub.f32 %v14511_v44, %v6090_v19  ;;  %v6091_v18 = vmul.f32 0.0078125, %v6071_v21  ;;  %6144 = vadd.xlane.f32.xlu0 %v6120_v54  ;;  %v6121_v39 = vmul.f32 %v14578_v63, %v14578_v63  ;;  %v5591_v44 = vld [vmem:[#allocation2 + $0x780] sm:$0xff]  ;;  %v14622_v19 = vld [vmem:[#allocation2 + $0x418] sm:$0xff] }
 0x8d8   : > { %v10608_v45 = vcombine.high %v5591_v44, %v5599_v29  ;;  %v10607_v30 = vcombine.low %v5591_v44, %v5599_v29  ;;  %v14624_v54 = vld [vmem:[#allocation2 + $0x458] sm:$0xff] }
 0x8d9   : > { %v14588_v1 = vsub.f32 %v14515_v57, %v6091_v18  ;;  %6146 = vadd.xlane.f32.xlu1 %v6121_v39  ;;  %v6122_v15 = vmul.f32 %v14583_v59, %v14583_v59  ;;  %v10610_v57 = vcombine.high %v5592_v40, %v5600_v26  ;;  %v10502_v2 = vcombine.high %v14622_v19, %v14624_v54 }
 0x8da   : > { %7012 = vmatprep.subr.bf16.mxu1 %v10608_v45  ;;  %v10501_v31 = vcombine.low %v14622_v19, %v14624_v54  ;;  %v14633_v45 = vld [vmem:[%s16082_s7 + $0x1] ss:$0 sm:$0xff] }
 0x8db   : > { %6148 = vadd.xlane.f32.xlu0 %v6122_v15  ;;  %v6123_v33 = vmul.f32 %v14588_v1, %v14588_v1  ;;  %7013 = vmatpush1.bf16.msra.mxu1 %v10607_v30 }
 0x8dc   : > { %7125 = vmatprep.subr.bf16.mxu0 %v10610_v57 }
 0x8dd   : > { %6150 = vadd.xlane.f32.xlu1 %v6123_v33  ;;  %7126 = vmatpush1.bf16.msra.mxu0 %v10609_v41 }
 0x8de   : > { %7337 = vmatprep.subr.bf16.mxu0 %v10502_v2 }
 0x8e0   : > { %v6073_v7 = vpop.xlane.xlu0 %6072 }
 0x8e1   : > { %v6092_v47 = vmul.f32 0.0078125, %v6073_v7 }
 0x8e2   : > { %v6075_v5 = vpop.xlane.xlu1 %6074 }
 0x8e3   : > { %v14595_v61 = vsub.f32 %v14519_v53, %v6092_v47  ;;  %v6093_v60 = vmul.f32 0.0078125, %v6075_v5 }
 0x8e4   : > { %v6077_v11 = vpop.xlane.xlu0 %6076 }
 0x8e5   : > { %v14598_v38 = vsub.f32 %v14523_v28, %v6093_v60  ;;  %v6094_v25 = vmul.f32 0.0078125, %v6077_v11  ;;  %v6124_v62 = vmul.f32 %v14595_v61, %v14595_v61  ;;  %v14641_v60 = vld [vmem:[%s16083_s8 + $0x1] ss:$0 sm:$0xff] }
 0x8e6   : > { %v6079_v34 = vpop.xlane.xlu1 %6078 }
 0x8e7   : > { %v14603_v32 = vsub.f32 %v14527_v49, %v6094_v25  ;;  %v6095_v23 = vmul.f32 0.0078125, %v6079_v34  ;;  %6152 = vadd.xlane.f32.xlu0 %v6124_v62  ;;  %v6125_v0 = vmul.f32 %v14598_v38, %v14598_v38  ;;  %v14616_v49 = vld [vmem:[#allocation2 + $0x450] sm:$0xff] }
 0x8e8   : > { %v10499_v35 = vcombine.low %v14614_v48, %v14616_v49 }
 0x8e9   : > { %v14608_v53 = vsub.f32 %v14531_v3, %v6095_v23  ;;  %6154 = vadd.xlane.f32.xlu1 %v6125_v0  ;;  %v6126_v28 = vmul.f32 %v14603_v32, %v14603_v32  ;;  %v10500_v3 = vcombine.high %v14614_v48, %v14616_v49  ;;  %v5529_v49 = vld [vmem:[#allocation2 + $0x590] sm:$0xff] }
 0x8eb   : > { %6156 = vadd.xlane.f32.xlu0 %v6126_v28  ;;  %v6127_v14 = vmul.f32 %v14608_v53, %v14608_v53  ;;  %7224 = vmatprep.subr.bf16.mxu1 %v10500_v3  ;;  %v5497_v28 = vld [vmem:[#allocation2 + $0x490] sm:$0xff] }
 0x8ed   : > { %6158 = vadd.xlane.f32.xlu1 %v6127_v14  ;;  %v5505_v14 = vld [vmem:[#allocation2 + $0x4d0] sm:$0xff] }
 0x944   : > { %v6129_v9 = vpop.xlane.xlu0 %6128 }
 0x945   : > { %v6160_v21 = vmul.f32 0.0078125, %v6129_v9 }
 0x946   : > { %v6131_v27 = vpop.xlane.xlu1 %6130 }
 0x947   : > { %v6176_v24 = vadd.f32 1e-05, %v6160_v21  ;;  %v6161_v18 = vmul.f32 0.0078125, %v6131_v27 }
 0x948   : > { %v6133_v39 = vpop.xlane.xlu0 %6132 }
 0x949   : > { %12349 = vrsqrt.f32 %v6176_v24  ;;  %v6177_v37 = vadd.f32 1e-05, %v6161_v18  ;;  %v6162_v10 = vmul.f32 0.0078125, %v6133_v39  ;;  %v5498_v18 = vld [vmem:[#allocation2 + $0x498] sm:$0xff] }
 0x94a   : > { %v6135_v52 = vpop.xlane.xlu1 %6134  ;;  %v5506_v39 = vld [vmem:[#allocation2 + $0x4d8] sm:$0xff] }
 0x94b   : > { %12351 = vrsqrt.f32 %v6177_v37  ;;  %v6178_v15 = vadd.f32 1e-05, %v6162_v10  ;;  %v6163_v44 = vmul.f32 0.0078125, %v6135_v52  ;;  %v10516_v52 = vcombine.high %v5497_v28, %v5505_v14 }
 0x94d   : > { %12353 = vrsqrt.f32 %v6178_v15  ;;  %v6179_v29 = vadd.f32 1e-05, %v6163_v44  ;;  %v5513_v44 = vld [vmem:[#allocation2 + $0x510] sm:$0xff] }
 0x94f   : > { %12355 = vrsqrt.f32 %v6179_v29  ;;  %v5521_v29 = vld [vmem:[#allocation2 + $0x550] sm:$0xff] }
 0x953   : > { %v12350_v40 = vpop.eup %12349 }
 0x954   : > { %v6208_v26 = vmul.f32 %v12350_v40, %v14535_v58  ;;  %v6137_v33 = vpop.xlane.xlu0 %6136  ;;  %v10515_v40 = vcombine.low %v5497_v28, %v5505_v14 }
 0x955   : > { %v12352_v30 = vpop.eup %12351  ;;  %v6164_v41 = vmul.f32 0.0078125, %v6137_v33  ;;  %v10532_v33 = vcombine.high %v5513_v44, %v5521_v29 }
 0x956   : > { %v6230_v57 = vmul.f32 %v14633_v45, %v6208_v26  ;;  %v6209_v7 = vmul.f32 %v12352_v30, %v14538_v43  ;;  %v6139_v47 = vpop.xlane.xlu1 %6138  ;;  %v10517_v30 = vcombine.low %v5498_v18, %v5506_v39 }
 0x957   : > { %v12354_v5 = vpop.eup %12353  ;;  %v6180_v11 = vadd.f32 1e-05, %v6164_v41  ;;  %v6165_v25 = vmul.f32 0.0078125, %v6139_v47  ;;  %v5514_v41 = vld [vmem:[#allocation2 + $0x518] sm:$0xff] }
 0x958   : > { %v6231_v62 = vmul.f32 %v14633_v45, %v6209_v7  ;;  %v6141_v34 = vpop.xlane.xlu0 %6140  ;;  %v14645_v43 = vadd.f32 %v14641_v60, %v6230_v57  ;;  %v6210_v2 = vmul.f32 %v12354_v5, %v14543_v56  ;;  %v5522_v57 = vld [vmem:[#allocation2 + $0x558] sm:$0xff] }
 0x959   : > { %v12356_v58 = vpop.eup %12355  ;;  %12357 = vrsqrt.f32 %v6180_v11  ;;  %v6181_v23 = vadd.f32 1e-05, %v6165_v25  ;;  %v6166_v0 = vmul.f32 0.0078125, %v6141_v34  ;;  %v14674_v47 = vld [vmem:[#allocation2 + $0x598] sm:$0xff]  ;;  %v10534_v25 = vcombine.high %v5514_v41, %v5522_v57 }
 0x95a   : > { %v14648_v3 = vadd.f32 %v14641_v60, %v6231_v62  ;;  %v6211_v9 = vmul.f32 %v12356_v58, %v14548_v17  ;;  %v6143_v21 = vpop.xlane.xlu1 %6142  ;;  %v6232_v56 = vmul.f32 %v14633_v45, %v6210_v2  ;;  %v10518_v17 = vcombine.high %v5498_v18, %v5506_v39  ;;  %v5538_v5 = vld [vmem:[#allocation2 + $0x5d8] sm:$0xff]  ;;  %v5545_v2 = vld [vmem:[#allocation2 + $0x610] sm:$0xff] }
 0x95b   : > { %12359 = vrsqrt.f32 %v6181_v23  ;;  %v6182_v27 = vadd.f32 1e-05, %v6166_v0  ;;  %v6167_v24 = vmul.f32 0.0078125, %v6143_v21  ;;  %v10533_v23 = vcombine.low %v5514_v41, %v5522_v57 }
 0x95c   : > { %v14654_v37 = vpack.c.bf16 %v14648_v3, %v14645_v43  ;;  %v6233_v10 = vmul.f32 %v14633_v45, %v6211_v9  ;;  %v14672_v48 = vadd.f32 %v14641_v60, %v6232_v56  ;;  %v10550_v9 = vcombine.high %v14674_v47, %v5538_v5  ;;  %v5546_v56 = vld [vmem:[#allocation2 + $0x618] sm:$0xff] }
 0x95d   : > { %12361 = vrsqrt.f32 %v6182_v27  ;;  %v6183_v15 = vadd.f32 1e-05, %v6167_v24 }
 0x95e   : > { %7031 = vmatmul.mubr.bf16.vlgmr.msra.gmra.mrb[16].mxu1 %v14654_v37  ;;  %7144 = vmatmul.mubr.bf16.vlgmr.msra.gmra.mrb[32].mxu0 %v14654_v37  ;;  %v14665_v26 = vadd.f32 %v14641_v60, %v6233_v10  ;;  %v10549_v10 = vcombine.low %v14674_v47, %v5538_v5  ;;  %v5562_v5 = vld [vmem:[#allocation2 + $0x698] sm:$0xff] }
 0x95f   : > { %12363 = vrsqrt.f32 %v6183_v15  ;;  %7225 = vmatpush1.bf16.msra.mxu1 %v10499_v35  ;;  %7040 = vmatprep.mubr.bf16.mxu1 %v16128_v42  ;;  %v5537_v35 = vld [vmem:[#allocation2 + $0x5d0] sm:$0xff] }
 0x960   : > { %7153 = vmatprep.mubr.bf16.mxu0 %v16128_v42  ;;  %7226 = vmatprep.subr.bf16.mxu1 %v10516_v52  ;;  %v14678_v11 = vpack.c.bf16 %v14665_v26, %v14672_v48  ;;  %v10548_v58 = vcombine.high %v5529_v49, %v5537_v35 }
 0x961   : > { %7338 = vmatpush1.bf16.msra.mxu0 %v10501_v31  ;;  %v10531_v31 = vcombine.low %v5513_v44, %v5521_v29 }
 0x962   : > { %7339 = vmatprep.subr.bf16.mxu0 %v10518_v17  ;;  %v5554_v17 = vld [vmem:[#allocation2 + $0x658] sm:$0xff] }
 0x963   : > { %v12358_v7 = vpop.eup %12357  ;;  %7227 = vmatpush1.bf16.msra.mxu1 %v10515_v40 }
 0x964   : > { %v6212_v19 = vmul.f32 %v12358_v7, %v14555_v6  ;;  %v6145_v54 = vpop.xlane.xlu0 %6144  ;;  %7228 = vmatprep.subr.bf16.mxu1 %v10532_v33  ;;  %v5553_v6 = vld [vmem:[#allocation2 + $0x650] sm:$0xff] }
 0x965   : > { %v12360_v62 = vpop.eup %12359  ;;  %v6168_v34 = vmul.f32 0.0078125, %v6145_v54  ;;  %7340 = vmatpush1.bf16.msra.mxu0 %v10517_v30  ;;  %v10564_v29 = vcombine.high %v5545_v2, %v5553_v6 }
 0x966   : > { %v6234_v0 = vmul.f32 %v14633_v45, %v6212_v19  ;;  %v6213_v28 = vmul.f32 %v12360_v62, %v14558_v36  ;;  %v6147_v14 = vpop.xlane.xlu1 %6146  ;;  %7041 = vmatmul.mubr.bf16.gmra.mrb[20].mxu1 %v14678_v11  ;;  %7154 = vmatmul.mubr.bf16.gmra.mrb[36].mxu0 %v14678_v11  ;;  %v10547_v36 = vcombine.low %v5529_v49, %v5537_v35  ;;  %v5561_v49 = vld [vmem:[#allocation2 + $0x690] sm:$0xff]  ;;  %v5570_v19 = vld [vmem:[#allocation2 + $0x6d8] sm:$0xff] }
 0x967   : > { %v12362_v21 = vpop.eup %12361  ;;  %v6184_v27 = vadd.f32 1e-05, %v6168_v34  ;;  %v6169_v24 = vmul.f32 0.0078125, %v6147_v14  ;;  %7050 = vmatprep.mubr.bf16.mxu1 %v16128_v42  ;;  %7163 = vmatprep.mubr.bf16.mxu0 %v16128_v42  ;;  %v5569_v35 = vld [vmem:[#allocation2 + $0x6d0] sm:$0xff]  ;;  %v10565_v34 = vcombine.low %v5546_v56, %v5554_v17 }
 0x968   : > { %v6235_v18 = vmul.f32 %v14633_v45, %v6213_v28  ;;  %v6149_v39 = vpop.xlane.xlu0 %6148  ;;  %7229 = vmatpush1.bf16.msra.mxu1 %v10531_v31  ;;  %7341 = vmatprep.subr.bf16.mxu0 %v10534_v25  ;;  %v14691_v40 = vadd.f32 %v14641_v60, %v6234_v0  ;;  %v6214_v30 = vmul.f32 %v12362_v21, %v14563_v50  ;;  %v5585_v0 = vld [vmem:[#allocation2 + $0x750] sm:$0xff]  ;;  %v5578_v21 = vld [vmem:[#allocation2 + $0x718] sm:$0xff] }
 0x969   : > { %v12364_v52 = vpop.eup %12363  ;;  %12365 = vrsqrt.f32 %v6184_v27  ;;  %v6185_v15 = vadd.f32 1e-05, %v6169_v24  ;;  %v6170_v44 = vmul.f32 0.0078125, %v6149_v39  ;;  %7230 = vmatprep.subr.bf16.mxu1 %v10548_v58  ;;  %7342 = vmatpush1.bf16.msra.mxu0 %v10533_v23  ;;  %v10563_v25 = vcombine.low %v5545_v2, %v5553_v6  ;;  %v5577_v23 = vld [vmem:[#allocation2 + $0x710] sm:$0xff]  ;;  %v5586_v27 = vld [vmem:[#allocation2 + $0x758] sm:$0xff] }
 0x96a   : > { %v14694_v33 = vadd.f32 %v14641_v60, %v6235_v18  ;;  %v6215_v41 = vmul.f32 %v12364_v52, %v14568_v4  ;;  %v6151_v57 = vpop.xlane.xlu1 %6150  ;;  %7343 = vmatprep.subr.bf16.mxu0 %v10550_v9  ;;  %v10566_v50 = vcombine.high %v5546_v56, %v5554_v17  ;;  %v10580_v62 = vcombine.high %v5561_v49, %v5569_v35  ;;  %v5593_v18 = vld [vmem:[#allocation2 + $0x790] sm:$0xff]  ;;  %v5602_v52 = vld [vmem:[#allocation2 + $0x7d8] sm:$0xff] }
 0x96b   : > { %12367 = vrsqrt.f32 %v6185_v15  ;;  %v6186_v7 = vadd.f32 1e-05, %v6170_v44  ;;  %v6171_v47 = vmul.f32 0.0078125, %v6151_v57  ;;  %v6236_v58 = vmul.f32 %v14633_v45, %v6214_v30  ;;  %v5601_v39 = vld [vmem:[#allocation2 + $0x7d0] sm:$0xff] }
 0x96c   : > { %v14700_v54 = vpack.c.bf16 %v14694_v33, %v14691_v40  ;;  %v6237_v31 = vmul.f32 %v14633_v45, %v6215_v41  ;;  %7231 = vmatpush1.bf16.msra.mxu1 %v10547_v36  ;;  %v10582_v28 = vcombine.high %v5562_v5, %v5570_v19  ;;  %v10579_v2 = vcombine.low %v5561_v49, %v5569_v35 }
 0x96d   : > { %12369 = vrsqrt.f32 %v6186_v7  ;;  %v6187_v4 = vadd.f32 1e-05, %v6171_v47  ;;  %7232 = vmatprep.subr.bf16.mxu1 %v10564_v29  ;;  %7344 = vmatpush1.bf16.msra.mxu0 %v10549_v10  ;;  %v10596_v6 = vcombine.high %v5577_v23, %v5585_v0  ;;  %v10581_v9 = vcombine.low %v5562_v5, %v5570_v19  ;;  %v5594_v10 = vld [vmem:[#allocation2 + $0x798] sm:$0xff]  ;;  %v14723_v5 = vld [vmem:[#allocation2 + $0x420] sm:$0xff] }
 0x96e   : > { %7051 = vmatmul.mubr.bf16.gmra.mrb[24].mxu1 %v14700_v54  ;;  %7164 = vmatmul.mubr.bf16.gmra.mrb[40].mxu0 %v14700_v54  ;;  %v14709_v14 = vadd.f32 %v14641_v60, %v6237_v31  ;;  %v14712_v24 = vadd.f32 %v14641_v60, %v6236_v58  ;;  %v10595_v56 = vcombine.low %v5577_v23, %v5585_v0  ;;  %v14725_v19 = vld [vmem:[#allocation2 + $0x460] sm:$0xff] }
 0x96f   : > { %12371 = vrsqrt.f32 %v6187_v4  ;;  %7060 = vmatprep.mubr.bf16.mxu1 %v16128_v42  ;;  %7173 = vmatprep.mubr.bf16.mxu0 %v16128_v42  ;;  %v10598_v17 = vcombine.high %v5578_v21, %v5586_v27  ;;  %v10612_v57 = vcombine.high %v5593_v18, %v5601_v39  ;;  %v10597_v49 = vcombine.low %v5578_v21, %v5586_v27 }
 0x970   : > { %7233 = vmatpush1.bf16.msra.mxu1 %v10563_v25  ;;  %7345 = vmatprep.subr.bf16.mxu0 %v10566_v50  ;;  %v14716_v15 = vpack.c.bf16 %v14709_v14, %v14712_v24 }
 0x971   : > { %7234 = vmatprep.subr.bf16.mxu1 %v10580_v62  ;;  %7346 = vmatpush1.bf16.msra.mxu0 %v10565_v34  ;;  %v10611_v62 = vcombine.low %v5593_v18, %v5601_v39  ;;  %v10613_v34 = vcombine.low %v5594_v10, %v5602_v52 }
 0x972   : > { %7347 = vmatprep.subr.bf16.mxu0 %v10582_v28  ;;  %v10504_v28 = vcombine.high %v14723_v5, %v14725_v19 }
 0x973   : > { %v12366_v36 = vpop.eup %12365 }
 0x974   : > { %v6216_v44 = vmul.f32 %v12366_v36, %v14575_v22  ;;  %v6153_v29 = vpop.xlane.xlu0 %6152  ;;  %7235 = vmatpush1.bf16.msra.mxu1 %v10579_v2  ;;  %v10614_v22 = vcombine.high %v5594_v10, %v5602_v52  ;;  %v14732_v2 = vld [vmem:[#allocation2 + $0x428] sm:$0xff] }
 0x975   : > { %v12368_v30 = vpop.eup %12367  ;;  %v6172_v41 = vmul.f32 0.0078125, %v6153_v29  ;;  %7236 = vmatprep.subr.bf16.mxu1 %v10596_v6  ;;  %7348 = vmatpush1.bf16.msra.mxu0 %v10581_v9  ;;  %v14734_v6 = vld [vmem:[#allocation2 + $0x468] sm:$0xff] }
 0x976   : > { %v6238_v35 = vmul.f32 %v14633_v45, %v6216_v44  ;;  %v6217_v7 = vmul.f32 %v12368_v30, %v14578_v63  ;;  %v6155_v47 = vpop.xlane.xlu1 %6154  ;;  %7061 = vmatmul.mubr.bf16.gmra.mrb[28].mxu1 %v14716_v15  ;;  %7174 = vmatmul.mubr.bf16.gmra.mrb[44].mxu0 %v14716_v15  ;;  %v10506_v29 = vcombine.high %v14732_v2, %v14734_v6 }
 0x977   : > { %v12370_v31 = vpop.eup %12369  ;;  %v6188_v25 = vadd.f32 1e-05, %v6172_v41  ;;  %v6173_v50 = vmul.f32 0.0078125, %v6155_v47  ;;  %7070 = vmatprep.mubr.bf16.mxu1 %v16128_v42  ;;  %7183 = vmatprep.mubr.bf16.mxu0 %v16128_v42 }
 0x978   : > { %v6239_v4 = vmul.f32 %v14633_v45, %v6217_v7  ;;  %v6157_v63 = vpop.xlane.xlu0 %6156  ;;  %7237 = vmatpush1.bf16.msra.mxu1 %v10595_v56  ;;  %7349 = vmatprep.subr.bf16.mxu0 %v10598_v17  ;;  %v14737_v9 = vadd.f32 %v14641_v60, %v6238_v35  ;;  %v6218_v27 = vmul.f32 %v12370_v31, %v14583_v59 }
 0x979   : > { %v12372_v58 = vpop.eup %12371  ;;  %12373 = vrsqrt.f32 %v6188_v25  ;;  %v6189_v23 = vadd.f32 1e-05, %v6173_v50  ;;  %v6174_v0 = vmul.f32 0.0078125, %v6157_v63  ;;  %7238 = vmatprep.subr.bf16.mxu1 %v10612_v57  ;;  %7350 = vmatpush1.bf16.msra.mxu0 %v10597_v49 }
 0x97a   : > { %16137 = vst [vmem:[#allocation8_spill] sm:$0xff] %v14737_v9  ;;  %v14740_v21 = vadd.f32 %v14641_v60, %v6239_v4  ;;  %v6219_v18 = vmul.f32 %v12372_v58, %v14588_v1  ;;  %v6159_v39 = vpop.xlane.xlu1 %6158  ;;  %7351 = vmatprep.subr.bf16.mxu0 %v10614_v22  ;;  %v6240_v59 = vmul.f32 %v14633_v45, %v6218_v27  ;;  %v5507_v58 = vld [vmem:[#allocation2 + $0x4e0] sm:$0xff] }
 0x97b   : > { %12375 = vrsqrt.f32 %v6189_v23  ;;  %v6190_v36 = vadd.f32 1e-05, %v6174_v0  ;;  %v6175_v10 = vmul.f32 0.0078125, %v6159_v39  ;;  %v10503_v23 = vcombine.low %v14723_v5, %v14725_v19  ;;  %v5500_v0 = vld [vmem:[#allocation2 + $0x4a8] sm:$0xff]  ;;  %v5515_v27 = vld [vmem:[#allocation2 + $0x520] sm:$0xff] }
 0x97c   : > { %16138 = vst [vmem:[#allocation10_spill] sm:$0xff] %v14740_v21  ;;  %v14746_v52 = vpack.c.bf16 %v14740_v21, %v14737_v9  ;;  %v6241_v44 = vmul.f32 %v14633_v45, %v6219_v18  ;;  %7239 = vmatpush1.bf16.msra.mxu1 %v10611_v62  ;;  %v14760_v17 = vadd.f32 %v14641_v60, %v6240_v59  ;;  %v5523_v18 = vld [vmem:[#allocation2 + $0x560] sm:$0xff] }
 0x97d   : > { %12377 = vrsqrt.f32 %v6190_v36  ;;  %v6191_v56 = vadd.f32 1e-05, %v6175_v10  ;;  %7352 = vmatpush1.bf16.msra.mxu0 %v10613_v34  ;;  %7450 = vmatprep.subr.bf16.mxu1 %v10504_v28  ;;  %v10505_v39 = vcombine.low %v14732_v2, %v14734_v6  ;;  %v10536_v5 = vcombine.high %v5515_v27, %v5523_v18  ;;  %v5539_v59 = vld [vmem:[#allocation2 + $0x5e0] sm:$0xff]  ;;  %v5532_v2 = vld [vmem:[#allocation2 + $0x5a8] sm:$0xff] }
 0x97e   : > { %7071 = vmatmul.mubr.bf16.gmra.mrb[32].mxu1 %v14746_v52  ;;  %7184 = vmatmul.mubr.bf16.gmra.mrb[48].mxu0 %v14746_v52  ;;  %v14757_v1 = vadd.f32 %v14641_v60, %v6241_v44  ;;  %16140 = vst [vmem:[#allocation12_spill] sm:$0xff] %v14760_v17  ;;  %v5516_v44 = vld [vmem:[#allocation2 + $0x528] sm:$0xff] }
 0x97f   : > { %12379 = vrsqrt.f32 %v6191_v56  ;;  %7080 = vmatprep.mubr.bf16.mxu1 %v16128_v42  ;;  %7193 = vmatprep.mubr.bf16.mxu0 %v16128_v42  ;;  %v5531_v56 = vld [vmem:[#allocation2 + $0x5a0] sm:$0xff]  ;;  %v5540_v6 = vld [vmem:[#allocation2 + $0x5e8] sm:$0xff] }
 0x980   : > { %16139 = vst [vmem:[#allocation9_spill] sm:$0xff] %v14757_v1  ;;  %7563 = vmatprep.subr.bf16.mxu0 %v10506_v29  ;;  %v14764_v41 = vpack.c.bf16 %v14757_v1, %v14760_v17  ;;  %v5524_v29 = vld [vmem:[#allocation2 + $0x568] sm:$0xff] }
 0x983   : > { %v12374_v30 = vpop.eup %12373 }
 0x984   : > { %v6220_v57 = vmul.f32 %v12374_v30, %v14595_v61  ;;  %v10535_v30 = vcombine.low %v5515_v27, %v5523_v18 }
 0x985   : > { %v12376_v49 = vpop.eup %12375 }
 0x986   : > { %v6242_v35 = vmul.f32 %v14633_v45, %v6220_v57  ;;  %v6221_v7 = vmul.f32 %v12376_v49, %v14598_v38  ;;  %7081 = vmatmul.mubr.bf16.gmra.mrb[36].mxu1 %v14764_v41  ;;  %7194 = vmatmul.mubr.bf16.gmra.mrb[52].mxu0 %v14764_v41  ;;  %v10538_v57 = vcombine.high %v5516_v44, %v5524_v29 }
 0x987   : > { %v12378_v47 = vpop.eup %12377  ;;  %7090 = vmatprep.mubr.bf16.mxu1 %v16128_v42  ;;  %7203 = vmatprep.mubr.bf16.mxu0 %v16128_v42  ;;  %v10552_v49 = vcombine.high %v5531_v56, %v5539_v59 }
 0x988   : > { %v6243_v22 = vmul.f32 %v14633_v45, %v6221_v7  ;;  %v14775_v25 = vadd.f32 %v14641_v60, %v6242_v35  ;;  %v6222_v38 = vmul.f32 %v12378_v47, %v14603_v32  ;;  %v10537_v35 = vcombine.low %v5516_v44, %v5524_v29  ;;  %v5547_v7 = vld [vmem:[#allocation2 + $0x620] sm:$0xff]  ;;  %v5580_v29 = vld [vmem:[#allocation2 + $0x728] sm:$0xff] }
 0x989   : > { %v12380_v31 = vpop.eup %12379  ;;  %v5555_v47 = vld [vmem:[#allocation2 + $0x660] sm:$0xff] }
 0x98a   : > { %16141 = vst [vmem:[#allocation11_spill] sm:$0xff] %v14775_v25  ;;  %v14778_v61 = vadd.f32 %v14641_v60, %v6243_v22  ;;  %v6223_v50 = vmul.f32 %v12380_v31, %v14608_v53  ;;  %v6244_v62 = vmul.f32 %v14633_v45, %v6222_v38  ;;  %v10554_v22 = vcombine.high %v5532_v2, %v5540_v6 }
 0x98b   : > { %v10551_v31 = vcombine.low %v5531_v56, %v5539_v59  ;;  %v10568_v38 = vcombine.high %v5547_v7, %v5555_v47  ;;  %v5588_v56 = vld [vmem:[#allocation2 + $0x768] sm:$0xff]  ;;  %v5595_v59 = vld [vmem:[#allocation2 + $0x7a0] sm:$0xff] }
 0x98c   : > { %16142 = vst [vmem:[#allocation14_spill] sm:$0xff] %v14778_v61  ;;  %v14784_v4 = vpack.c.bf16 %v14778_v61, %v14775_v25  ;;  %v6245_v63 = vmul.f32 %v14633_v45, %v6223_v50  ;;  %v14796_v53 = vadd.f32 %v14641_v60, %v6244_v62  ;;  %v5499_v45 = vld [vmem:[#allocation2 + $0x4a0] sm:$0xff]  ;;  %v10553_v50 = vcombine.low %v5532_v2, %v5540_v6  ;;  %v5556_v62 = vld [vmem:[#allocation2 + $0x668] sm:$0xff] }
 0x98d   : > { %v10520_v28 = vcombine.high %v5499_v45, %v5507_v58  ;;  %v10519_v10 = vcombine.low %v5499_v45, %v5507_v58  ;;  %v5563_v45 = vld [vmem:[#allocation2 + $0x6a0] sm:$0xff]  ;;  %v5596_v6 = vld [vmem:[#allocation2 + $0x7a8] sm:$0xff] }
 0x98e   : > { %7091 = vmatmul.mubr.bf16.gmra.mrb[40].mxu1 %v14784_v4  ;;  %7204 = vmatmul.mubr.bf16.gmra.mrb[56].mxu0 %v14784_v4  ;;  %v14793_v32 = vadd.f32 %v14641_v60, %v6245_v63  ;;  %16144 = vst [vmem:[#allocation15_spill] sm:$0xff] %v14796_v53  ;;  %v5508_v60 = vld [vmem:[#allocation2 + $0x4e8] sm:$0xff]  ;;  %v5571_v58 = vld [vmem:[#allocation2 + $0x6e0] sm:$0xff] }
 0x98f   : > { %7100 = vmatprep.mubr.bf16.mxu1 %v16128_v42  ;;  %7213 = vmatprep.mubr.bf16.mxu0 %v16128_v42  ;;  %v10522_v36 = vcombine.high %v5500_v0, %v5508_v60  ;;  %v10521_v19 = vcombine.low %v5500_v0, %v5508_v60  ;;  %v5548_v63 = vld [vmem:[#allocation2 + $0x628] sm:$0xff]  ;;  %v10567_v60 = vcombine.low %v5547_v7, %v5555_v47  ;;  %v5603_v2 = vld [vmem:[#allocation2 + $0x7e0] sm:$0xff] }
 0x990   : > { %16143 = vst [vmem:[#allocation13_spill] sm:$0xff] %v14793_v32  ;;  %v14800_v34 = vpack.c.bf16 %v14793_v32, %v14796_v53  ;;  %v5572_v0 = vld [vmem:[#allocation2 + $0x6e8] sm:$0xff]  ;;  %v10584_v27 = vcombine.high %v5563_v45, %v5571_v58  ;;  %v10569_v18 = vcombine.low %v5548_v63, %v5556_v62  ;;  %v10601_v7 = vcombine.low %v5580_v29, %v5588_v56 }
 0x996   : > { %7101 = vmatmul.mubr.bf16.gmra.mrb[44].mxu1 %v14800_v34  ;;  %7214 = vmatmul.mubr.bf16.gmra.mrb[60].mxu0 %v14800_v34 }
 0x997   : > { %7256 = vmatprep.mubr.bf16.mxu1 %v16128_v42  ;;  %7369 = vmatprep.mubr.bf16.mxu0 %v16128_v42 }
 0x99e   : > { %7257 = vmatmul.mubr.bf16.vlgmr.msra.gmra.mrb[48].mxu1 %v14654_v37  ;;  %7370 = vmatmul.mubr.bf16.vlgmr.msra.gmra.mrb[64].mxu0 %v14654_v37 }
 0x99f   : > { %7451 = vmatpush1.bf16.msra.mxu1 %v10503_v23  ;;  %7266 = vmatprep.mubr.bf16.mxu1 %v16128_v42  ;;  %v5564_v23 = vld [vmem:[#allocation2 + $0x6a8] sm:$0xff] }
 0x9a0   : > { %7379 = vmatprep.mubr.bf16.mxu0 %v16128_v42  ;;  %7452 = vmatprep.subr.bf16.mxu1 %v10520_v28  ;;  %v10570_v28 = vcombine.high %v5548_v63, %v5556_v62  ;;  %v10585_v44 = vcombine.low %v5564_v23, %v5572_v0  ;;  %v5486_v62 = vld [vmem:[#allocation2 + $0x438] sm:$0xff] }
 0x9a1   : > { %7564 = vmatpush1.bf16.msra.mxu0 %v10505_v39  ;;  %v5579_v39 = vld [vmem:[#allocation2 + $0x720] sm:$0xff] }
 0x9a2   : > { %7565 = vmatprep.subr.bf16.mxu0 %v10522_v36  ;;  %v5587_v36 = vld [vmem:[#allocation2 + $0x760] sm:$0xff] }
 0x9a3   : > { %7453 = vmatpush1.bf16.msra.mxu1 %v10519_v10  ;;  %v10586_v10 = vcombine.high %v5564_v23, %v5572_v0  ;;  %v5501_v23 = vld [vmem:[#allocation2 + $0x4b0] sm:$0xff] }
 0x9a4   : > { %7454 = vmatprep.subr.bf16.mxu1 %v10536_v5  ;;  %v10583_v5 = vcombine.low %v5563_v45, %v5571_v58  ;;  %v5494_v45 = vld [vmem:[#allocation2 + $0x478] sm:$0xff]  ;;  %v5509_v0 = vld [vmem:[#allocation2 + $0x4f0] sm:$0xff] }
 0x9a5   : > { %7566 = vmatpush1.bf16.msra.mxu0 %v10521_v19  ;;  %v10600_v19 = vcombine.high %v5579_v39, %v5587_v36  ;;  %v10510_v58 = vcombine.high %v5486_v62, %v5494_v45 }
 0x9a6   : > { %7267 = vmatmul.mubr.bf16.gmra.mrb[52].mxu1 %v14678_v11  ;;  %7380 = vmatmul.mubr.bf16.gmra.mrb[68].mxu0 %v14678_v11 }
 0x9a7   : > { %7276 = vmatprep.mubr.bf16.mxu1 %v16128_v42  ;;  %7389 = vmatprep.mubr.bf16.mxu0 %v16128_v42 }
 0x9a8   : > { %7455 = vmatpush1.bf16.msra.mxu1 %v10535_v30  ;;  %7567 = vmatprep.subr.bf16.mxu0 %v10538_v57  ;;  %v5604_v30 = vld [vmem:[#allocation2 + $0x7e8] sm:$0xff]  ;;  %v10599_v57 = vcombine.low %v5579_v39, %v5587_v36  ;;  %v5517_v39 = vld [vmem:[#allocation2 + $0x530] sm:$0xff] }
 0x9a9   : > { %7456 = vmatprep.subr.bf16.mxu1 %v10552_v49  ;;  %7568 = vmatpush1.bf16.msra.mxu0 %v10537_v35  ;;  %v10602_v49 = vcombine.high %v5580_v29, %v5588_v56  ;;  %v10616_v35 = vcombine.high %v5595_v59, %v5603_v2  ;;  %v10618_v47 = vcombine.high %v5596_v6, %v5604_v30  ;;  %v5525_v36 = vld [vmem:[#allocation2 + $0x570] sm:$0xff]  ;;  %v5518_v56 = vld [vmem:[#allocation2 + $0x538] sm:$0xff] }
 0x9aa   : > { %7569 = vmatprep.subr.bf16.mxu0 %v10554_v22  ;;  %v5485_v22 = vld [vmem:[#allocation2 + $0x430] sm:$0xff] }
 0x9ac   : > { %7457 = vmatpush1.bf16.msra.mxu1 %v10551_v31  ;;  %v5493_v31 = vld [vmem:[#allocation2 + $0x470] sm:$0xff] }
 0x9ad   : > { %7458 = vmatprep.subr.bf16.mxu1 %v10568_v38  ;;  %7570 = vmatpush1.bf16.msra.mxu0 %v10553_v50  ;;  %v10615_v38 = vcombine.low %v5595_v59, %v5603_v2  ;;  %v10617_v50 = vcombine.low %v5596_v6, %v5604_v30  ;;  %v10508_v63 = vcombine.high %v5485_v22, %v5493_v31  ;;  %v5526_v59 = vld [vmem:[#allocation2 + $0x578] sm:$0xff]  ;;  %v5533_v2 = vld [vmem:[#allocation2 + $0x5b0] sm:$0xff] }
 0x9ae   : > { %7277 = vmatmul.mubr.bf16.gmra.mrb[56].mxu1 %v14700_v54  ;;  %7390 = vmatmul.mubr.bf16.gmra.mrb[72].mxu0 %v14700_v54  ;;  %v5541_v6 = vld [vmem:[#allocation2 + $0x5f0] sm:$0xff]  ;;  %v5534_v30 = vld [vmem:[#allocation2 + $0x5b8] sm:$0xff] }
 0x9af   : > { %7286 = vmatprep.mubr.bf16.mxu1 %v16128_v42  ;;  %7399 = vmatprep.mubr.bf16.mxu0 %v16128_v42 }
 0x9b0   : > { %7459 = vmatpush1.bf16.msra.mxu1 %v10567_v60  ;;  %7571 = vmatprep.subr.bf16.mxu0 %v10570_v28  ;;  %v10507_v60 = vcombine.low %v5485_v22, %v5493_v31  ;;  %v5502_v28 = vld [vmem:[#allocation2 + $0x4b8] sm:$0xff]  ;;  %v5549_v22 = vld [vmem:[#allocation2 + $0x630] sm:$0xff] }
 0x9b1   : > { %7460 = vmatprep.subr.bf16.mxu1 %v10584_v27  ;;  %7572 = vmatpush1.bf16.msra.mxu0 %v10569_v18  ;;  %v5510_v27 = vld [vmem:[#allocation2 + $0x4f8] sm:$0xff]  ;;  %v10524_v18 = vcombine.high %v5501_v23, %v5509_v0  ;;  %v5557_v31 = vld [vmem:[#allocation2 + $0x670] sm:$0xff] }
 0x9b2   : > { %7573 = vmatprep.subr.bf16.mxu0 %v10586_v10  ;;  %v10509_v10 = vcombine.low %v5486_v62, %v5494_v45  ;;  %v10525_v29 = vcombine.low %v5502_v28, %v5510_v27  ;;  %v5550_v45 = vld [vmem:[#allocation2 + $0x638] sm:$0xff] }
 0x9b4   : > { %7461 = vmatpush1.bf16.msra.mxu1 %v10583_v5  ;;  %v10526_v5 = vcombine.high %v5502_v28, %v5510_v27  ;;  %v5574_v28 = vld [vmem:[#allocation2 + $0x6f8] sm:$0xff]  ;;  %v10571_v27 = vcombine.low %v5549_v22, %v5557_v31 }
 0x9b5   : > { %7462 = vmatprep.subr.bf16.mxu1 %v10600_v19  ;;  %7574 = vmatpush1.bf16.msra.mxu0 %v10585_v44  ;;  %v10523_v19 = vcombine.low %v5501_v23, %v5509_v0  ;;  %v10540_v44 = vcombine.high %v5517_v39, %v5525_v36  ;;  %v5565_v23 = vld [vmem:[#allocation2 + $0x6b0] sm:$0xff] }
 0x9b6   : > { %7287 = vmatmul.mubr.bf16.gmra.mrb[60].mxu1 %v14716_v15  ;;  %7400 = vmatmul.mubr.bf16.gmra.mrb[76].mxu0 %v14716_v15  ;;  %v5573_v0 = vld [vmem:[#allocation2 + $0x6f0] sm:$0xff] }
 0x9b7   : > { %7296 = vmatprep.mubr.bf16.mxu1 %v16128_v42  ;;  %7409 = vmatprep.mubr.bf16.mxu0 %v16128_v42 }
 0x9b8   : > { %7463 = vmatpush1.bf16.msra.mxu1 %v10599_v57  ;;  %7575 = vmatprep.subr.bf16.mxu0 %v10602_v49  ;;  %v5542_v57 = vld [vmem:[#allocation2 + $0x5f8] sm:$0xff]  ;;  %v10539_v49 = vcombine.low %v5517_v39, %v5525_v36  ;;  %v10588_v39 = vcombine.high %v5565_v23, %v5573_v0 }
 0x9b9   : > { %7464 = vmatprep.subr.bf16.mxu1 %v10616_v35  ;;  %7576 = vmatpush1.bf16.msra.mxu0 %v10601_v7  ;;  %v10542_v35 = vcombine.high %v5518_v56, %v5526_v59  ;;  %v10556_v7 = vcombine.high %v5533_v2, %v5541_v6  ;;  %v10557_v62 = vcombine.low %v5534_v30, %v5542_v57 }
 0x9ba   : > { %7577 = vmatprep.subr.bf16.mxu0 %v10618_v47  ;;  %v10541_v47 = vcombine.low %v5518_v56, %v5526_v59  ;;  %v5582_v59 = vld [vmem:[#allocation2 + $0x738] sm:$0xff] }
 0x9bc   : > { %7465 = vmatpush1.bf16.msra.mxu1 %v10615_v38  ;;  %v10558_v38 = vcombine.high %v5534_v30, %v5542_v57  ;;  %v5605_v30 = vld [vmem:[#allocation2 + $0x7f0] sm:$0xff]  ;;  %v5598_v57 = vld [vmem:[#allocation2 + $0x7b8] sm:$0xff] }
 0x9bd   : > { %7578 = vmatpush1.bf16.msra.mxu0 %v10617_v50  ;;  %7676 = vmatprep.subr.bf16.mxu1 %v10508_v63  ;;  %v10555_v50 = vcombine.low %v5533_v2, %v5541_v6  ;;  %v10572_v63 = vcombine.high %v5549_v22, %v5557_v31  ;;  %v5590_v2 = vld [vmem:[#allocation2 + $0x778] sm:$0xff]  ;;  %v5597_v6 = vld [vmem:[#allocation2 + $0x7b0] sm:$0xff] }
 0x9be   : > { %7297 = vmatmul.mubr.bf16.gmra.mrb[64].mxu1 %v14746_v52  ;;  %7410 = vmatmul.mubr.bf16.gmra.mrb[80].mxu0 %v14746_v52  ;;  %v10605_v22 = vcombine.low %v5582_v59, %v5590_v2 }
 0x9bf   : > { %7306 = vmatprep.mubr.bf16.mxu1 %v16128_v42  ;;  %7419 = vmatprep.mubr.bf16.mxu0 %v16128_v42 }
 0x9c0   : > { %7789 = vmatprep.subr.bf16.mxu0 %v10510_v58  ;;  %v5558_v58 = vld [vmem:[#allocation2 + $0x678] sm:$0xff] }
 0x9c1   : > { %v10573_v36 = vcombine.low %v5550_v45, %v5558_v58 }
 0x9c6   : > { %7307 = vmatmul.mubr.bf16.gmra.mrb[68].mxu1 %v14764_v41  ;;  %7420 = vmatmul.mubr.bf16.gmra.mrb[84].mxu0 %v14764_v41 }
 0x9c7   : > { %7316 = vmatprep.mubr.bf16.mxu1 %v16128_v42  ;;  %7429 = vmatprep.mubr.bf16.mxu0 %v16128_v42 }
 0x9ce   : > { %7317 = vmatmul.mubr.bf16.gmra.mrb[72].mxu1 %v14784_v4  ;;  %7430 = vmatmul.mubr.bf16.gmra.mrb[88].mxu0 %v14784_v4 }
 0x9cf   : > { %7326 = vmatprep.mubr.bf16.mxu1 %v16128_v42  ;;  %7439 = vmatprep.mubr.bf16.mxu0 %v16128_v42 }
 0x9d6   : > { %7327 = vmatmul.mubr.bf16.gmra.mrb[76].mxu1 %v14800_v34  ;;  %7440 = vmatmul.mubr.bf16.gmra.mrb[92].mxu0 %v14800_v34 }
 0x9d7   : > { %7482 = vmatprep.mubr.bf16.mxu1 %v16128_v42  ;;  %7595 = vmatprep.mubr.bf16.mxu0 %v16128_v42 }
 0x9de   : > { %7483 = vmatmul.mubr.bf16.vlgmr.msra.gmra.mrb[80].mxu1 %v14654_v37  ;;  %7596 = vmatmul.mubr.bf16.vlgmr.msra.gmra.mrb[96].mxu0 %v14654_v37 }
 0x9df   : > { %7677 = vmatpush1.bf16.msra.mxu1 %v10507_v60  ;;  %7492 = vmatprep.mubr.bf16.mxu1 %v16128_v42  ;;  %v5566_v60 = vld [vmem:[#allocation2 + $0x6b8] sm:$0xff] }
 0x9e0   : > { %7605 = vmatprep.mubr.bf16.mxu0 %v16128_v42  ;;  %7678 = vmatprep.subr.bf16.mxu1 %v10524_v18  ;;  %v10574_v18 = vcombine.high %v5550_v45, %v5558_v58  ;;  %v10589_v56 = vcombine.low %v5566_v60, %v5574_v28  ;;  %v12126_v45 = vld [vmem:[#allocation4 + $0x400] sm:$0xff]   ;;  %v12127_v58 = vld [vmem:[#allocation4 + $0x448] sm:$0xff]  }
 0x9e1   : > { %7790 = vmatpush1.bf16.msra.mxu0 %v10509_v10  ;;  %v5581_v10 = vld [vmem:[#allocation2 + $0x730] sm:$0xff] }
 0x9e2   : > { %7791 = vmatprep.subr.bf16.mxu0 %v10526_v5  ;;  %v5589_v5 = vld [vmem:[#allocation2 + $0x770] sm:$0xff] }
 0x9e3   : > { %7679 = vmatpush1.bf16.msra.mxu1 %v10523_v19  ;;  %v10590_v19 = vcombine.high %v5566_v60, %v5574_v28  ;;  %v12128_v60 = vld [vmem:[#allocation4 + $0x408] sm:$0xff]   ;;  %v12129_v28 = vld [vmem:[#allocation4 + $0x450] sm:$0xff]  }
 0x9e4   : > { %7680 = vmatprep.subr.bf16.mxu1 %v10540_v44  ;;  %v10587_v44 = vcombine.low %v5565_v23, %v5573_v0  ;;  %v12134_v23 = vld [vmem:[#allocation4 + $0x480] sm:$0xff]   ;;  %v12136_v0 = vld [vmem:[#allocation4 + $0x4c8] sm:$0xff]  }
 0x9e5   : > { %7792 = vmatpush1.bf16.msra.mxu0 %v10525_v29  ;;  %v10604_v29 = vcombine.high %v5581_v10, %v5589_v5 }
 0x9e6   : > { %7493 = vmatmul.mubr.bf16.gmra.mrb[84].mxu1 %v14678_v11  ;;  %7606 = vmatmul.mubr.bf16.gmra.mrb[100].mxu0 %v14678_v11 }
 0x9e7   : > { %7502 = vmatprep.mubr.bf16.mxu1 %v16128_v42  ;;  %7615 = vmatprep.mubr.bf16.mxu0 %v16128_v42 }
 0x9e8   : > { %7681 = vmatpush1.bf16.msra.mxu1 %v10539_v49  ;;  %7793 = vmatprep.subr.bf16.mxu0 %v10542_v35  ;;  %v5606_v49 = vld [vmem:[#allocation2 + $0x7f8] sm:$0xff]  ;;  %v10603_v35 = vcombine.low %v5581_v10, %v5589_v5  ;;  %v12142_v10 = vld [vmem:[#allocation4 + $0x490] sm:$0xff]  }
 0x9e9   : > { %7682 = vmatprep.subr.bf16.mxu1 %v10556_v7  ;;  %7794 = vmatpush1.bf16.msra.mxu0 %v10541_v47  ;;  %v10606_v7 = vcombine.high %v5582_v59, %v5590_v2  ;;  %v10620_v47 = vcombine.high %v5597_v6, %v5605_v30  ;;  %v10622_v31 = vcombine.high %v5598_v57, %v5606_v49  ;;  %v12133_v5 = vld [vmem:[#allocation4 + $0x418] sm:$0xff]   ;;  %v12139_v59 = vld [vmem:[#allocation4 + $0x468] sm:$0xff]   ;;  %v12148_v2 = vld [vmem:[#allocation4 + $0x4a0] sm:$0xff]  }
 0x9ea   : > { %7795 = vmatprep.subr.bf16.mxu0 %v10558_v38  ;;  %v10619_v38 = vcombine.low %v5597_v6, %v5605_v30 }
 0x9ec   : > { %7683 = vmatpush1.bf16.msra.mxu1 %v10555_v50  ;;  %v10621_v50 = vcombine.low %v5598_v57, %v5606_v49  ;;  %v12149_v57 = vld [vmem:[#allocation4 + $0x4e8] sm:$0xff]  }
 0x9ed   : > { %7684 = vmatprep.subr.bf16.mxu1 %v10572_v63  ;;  %7796 = vmatpush1.bf16.msra.mxu0 %v10557_v62  ;;  %v12125_v63 = vld [vmem:[#allocation4 + $0x440] sm:$0xff]  }
 0x9ee   : > { %7503 = vmatmul.mubr.bf16.gmra.mrb[88].mxu1 %v14700_v54  ;;  %7616 = vmatmul.mubr.bf16.gmra.mrb[104].mxu0 %v14700_v54  ;;  %v12132_v62 = vld [vmem:[#allocation4 + $0x4c0] sm:$0xff]  }
 0x9ef   : > { %7512 = vmatprep.mubr.bf16.mxu1 %v16128_v42  ;;  %7625 = vmatprep.mubr.bf16.mxu0 %v16128_v42 }
 0x9f0   : > { %7685 = vmatpush1.bf16.msra.mxu1 %v10571_v27  ;;  %7797 = vmatprep.subr.bf16.mxu0 %v10574_v18  ;;  %v12138_v27 = vld [vmem:[#allocation4 + $0x488] sm:$0xff]   ;;  %v12130_v18 = vld [vmem:[#allocation4 + $0x410] sm:$0xff]  }
 0x9f1   : > { %7686 = vmatprep.subr.bf16.mxu1 %v10588_v39  ;;  %7798 = vmatpush1.bf16.msra.mxu0 %v10573_v36  ;;  %v12140_v39 = vld [vmem:[#allocation4 + $0x4d0] sm:$0xff]   ;;  %v12131_v36 = vld [vmem:[#allocation4 + $0x458] sm:$0xff]  }
 0x9f2   : > { %7799 = vmatprep.subr.bf16.mxu0 %v10590_v19  ;;  %v12135_v19 = vld [vmem:[#allocation4 + $0x460] sm:$0xff]  }
 0x9f4   : > { %7687 = vmatpush1.bf16.msra.mxu1 %v10587_v44  ;;  %v12144_v44 = vld [vmem:[#allocation4 + $0x498] sm:$0xff]  }
 0x9f5   : > { %7688 = vmatprep.subr.bf16.mxu1 %v10604_v29  ;;  %7800 = vmatpush1.bf16.msra.mxu0 %v10589_v56  ;;  %v14885_v29 = vld [vmem:[%s16085_s10 + $0x10] sm:$0xff]  ;;  %v12147_v56 = vld [vmem:[#allocation4 + $0x4e0] sm:$0xff]  }
 0x9f6   : > { %7513 = vmatmul.mubr.bf16.gmra.mrb[92].mxu1 %v14716_v15  ;;  %7626 = vmatmul.mubr.bf16.gmra.mrb[108].mxu0 %v14716_v15  ;;  %v14891_v6 = vrot.slane %v14885_v29, %v13267_v12  ;;  %v14895_v30 = vrot.slane %v14885_v29, %v13270_v13  ;;  %v14899_v49 = vrot.slane %v14885_v29, %v13278_v16 }
 0x9f7   : > { %7522 = vmatprep.mubr.bf16.mxu1 %v16128_v42  ;;  %7635 = vmatprep.mubr.bf16.mxu0 %v16128_v42 }
 0x9f8   : > { %7689 = vmatpush1.bf16.msra.mxu1 %v10603_v35  ;;  %7801 = vmatprep.subr.bf16.mxu0 %v10606_v7  ;;  %v14903_v35 = vrot.slane %v14885_v29, %v13281_v20 }
 0x9f9   : > { %7690 = vmatprep.subr.bf16.mxu1 %v10620_v47  ;;  %7802 = vmatpush1.bf16.msra.mxu0 %v10605_v22  ;;  %v12145_v22 = vld [vmem:[#allocation4 + $0x470] sm:$0xff]  }
 0x9fa   : > { %7803 = vmatprep.subr.bf16.mxu0 %v10622_v31  ;;  %v12150_v31 = vld [vmem:[#allocation4 + $0x4a8] sm:$0xff]  }
 0x9fc   : > { %7691 = vmatpush1.bf16.msra.mxu1 %v10619_v38 }
 0x9fd   : > { %7804 = vmatpush1.bf16.msra.mxu0 %v10621_v50  ;;  %11316 = vmatprep.subr.bf16.mxu1 %v12125_v63 }
 0x9fe   : > { %7523 = vmatmul.mubr.bf16.gmra.mrb[96].mxu1 %v14746_v52  ;;  %7636 = vmatmul.mubr.bf16.gmra.mrb[112].mxu0 %v14746_v52 }
 0x9ff   : > { %7532 = vmatprep.mubr.bf16.mxu1 %v16128_v42  ;;  %7645 = vmatprep.mubr.bf16.mxu0 %v16128_v42 }
 0xa00   : > { %11380 = vmatprep.subr.bf16.mxu0 %v12132_v62 }
 0xa06   : > { %7533 = vmatmul.mubr.bf16.gmra.mrb[100].mxu1 %v14764_v41  ;;  %7646 = vmatmul.mubr.bf16.gmra.mrb[116].mxu0 %v14764_v41 }
 0xa07   : > { %7542 = vmatprep.mubr.bf16.mxu1 %v16128_v42  ;;  %7655 = vmatprep.mubr.bf16.mxu0 %v16128_v42 }
 0xa0e   : > { %7543 = vmatmul.mubr.bf16.gmra.mrb[104].mxu1 %v14784_v4  ;;  %7656 = vmatmul.mubr.bf16.gmra.mrb[120].mxu0 %v14784_v4 }
 0xa0f   : > { %7552 = vmatprep.mubr.bf16.mxu1 %v16128_v42  ;;  %7665 = vmatprep.mubr.bf16.mxu0 %v16128_v42 }
 0xa16   : > { %7553 = vmatmul.mubr.bf16.gmra.mrb[108].mxu1 %v14800_v34  ;;  %7666 = vmatmul.mubr.bf16.gmra.mrb[124].mxu0 %v14800_v34 }
 0xa17   : > { %7708 = vmatprep.mubr.bf16.mxu1 %v16128_v42  ;;  %7821 = vmatprep.mubr.bf16.mxu0 %v16128_v42 }
 0xa1e   : > { %7709 = vmatmul.mubr.bf16.vlgmr.msra.gmra.mrb[112].mxu1 %v14654_v37  ;;  %7822 = vmatmul.mubr.bf16.vlgmr.msra.gmra.mrb[128].mxu0 %v14654_v37  ;;  %v12143_v37 = vld [vmem:[#allocation4 + $0x4d8] sm:$0xff]  }
 0xa1f   : > { %11317 = vmatpush3.bf16.msra.mxu1 %v12126_v45  ;;  %7718 = vmatprep.mubr.bf16.mxu1 %v16128_v42 }
 0xa20   : > { %7831 = vmatprep.mubr.bf16.mxu0 %v16128_v42  ;;  %11318 = vmatprep.subr.bf16.mxu1 %v12127_v58 }
 0xa21   : > { %11381 = vmatpush3.bf16.msra.mxu0 %v12134_v23 }
 0xa22   : > { %11382 = vmatprep.subr.bf16.mxu0 %v12136_v0 }
 0xa23   : > { %11319 = vmatpush3.bf16.msra.mxu1 %v12128_v60 }
 0xa24   : > { %11320 = vmatprep.subr.bf16.mxu1 %v12129_v28 }
 0xa25   : > { %11383 = vmatpush3.bf16.msra.mxu0 %v12138_v27 }
 0xa26   : > { %7719 = vmatmul.mubr.bf16.gmra.mrb[116].mxu1 %v14678_v11  ;;  %7832 = vmatmul.mubr.bf16.gmra.mrb[132].mxu0 %v14678_v11  ;;  %v12137_v11 = vld [vmem:[#allocation4 + $0x420] sm:$0xff]  }
 0xa27   : > { %7728 = vmatprep.mubr.bf16.mxu1 %v16128_v42  ;;  %7841 = vmatprep.mubr.bf16.mxu0 %v16128_v42 }
 0xa28   : > { %11321 = vmatpush3.bf16.msra.mxu1 %v12130_v18  ;;  %11384 = vmatprep.subr.bf16.mxu0 %v12140_v39  ;;  %v12146_v39 = vld [vmem:[#allocation4 + $0x430] sm:$0xff]  }
 0xa29   : > { %11322 = vmatprep.subr.bf16.mxu1 %v12131_v36  ;;  %11385 = vmatpush3.bf16.msra.mxu0 %v12142_v10  ;;  %v12153_v36 = vld [vmem:[#allocation4 + $0x4f0] sm:$0xff]  }
 0xa2a   : > { %11386 = vmatprep.subr.bf16.mxu0 %v12143_v37 }
 0xa2c   : > { %11323 = vmatpush3.bf16.msra.mxu1 %v12133_v5  ;;  %v12151_v5 = vld [vmem:[#allocation4 + $0x478] sm:$0xff]  }
 0xa2d   : > { %11324 = vmatprep.subr.bf16.mxu1 %v12135_v19  ;;  %11387 = vmatpush3.bf16.msra.mxu0 %v12144_v44  ;;  %v12154_v19 = vld [vmem:[#allocation4 + $0x4b0] sm:$0xff]  }
 0xa2e   : > { %7729 = vmatmul.mubr.bf16.gmra.mrb[120].mxu1 %v14700_v54  ;;  %7842 = vmatmul.mubr.bf16.gmra.mrb[136].mxu0 %v14700_v54  ;;  %v12141_v54 = vld [vmem:[#allocation4 + $0x428] sm:$0xff]  }
 0xa2f   : > { %7738 = vmatprep.mubr.bf16.mxu1 %v16128_v42  ;;  %7851 = vmatprep.mubr.bf16.mxu0 %v16128_v42 }
 0xa30   : > { %11325 = vmatpush3.bf16.msra.mxu1 %v12137_v11  ;;  %11388 = vmatprep.subr.bf16.mxu0 %v12147_v56 }
 0xa31   : > { %v7032_v7 = vpop.f32.mrb[16].mxu1  ;;  %v7145_v47 = vpop.f32.mrb[32].mxu0  ;;  %11326 = vmatprep.subr.bf16.mxu1 %v12139_v59  ;;  %11389 = vmatpush3.bf16.msra.mxu0 %v12148_v2  ;;  %v12155_v2 = vld [vmem:[#allocation4 + $0x4f8] sm:$0xff]  }
 0xa32   : > { %v7033_v38 = vadd.f32 %v7032_v7, %v14891_v6  ;;  %v7146_v50 = vadd.f32 %v7145_v47, %v14895_v30  ;;  %v7034_v63 = vpop.f32.mrb[17].mxu1  ;;  %v7147_v62 = vpop.f32.mrb[33].mxu0  ;;  %11390 = vmatprep.subr.bf16.mxu0 %v12149_v57 }
 0xa33   : > { %v7035_v45 = vadd.f32 %v7034_v63, %v14899_v49  ;;  %v7148_v58 = vadd.f32 %v7147_v62, %v14903_v35  ;;  %v7036_v23 = vpop.f32.mrb[18].mxu1  ;;  %v7149_v0 = vpop.f32.mrb[34].mxu0 }
 0xa34   : > { %v7037_v60 = vadd.f32 %v7036_v23, %v14891_v6  ;;  %v7150_v28 = vadd.f32 %v7149_v0, %v14895_v30  ;;  %v7038_v27 = vpop.f32.mrb[19].mxu1  ;;  %v7151_v18 = vpop.f32.mrb[35].mxu0  ;;  %11327 = vmatpush3.bf16.msra.mxu1 %v12141_v54  ;;  %v7902_v44 = vmax.f32 %v7033_v38, 0.0  ;;  %v7904_v11 = vmax.f32 %v7146_v50, 0.0  ;;  %v12152_v38 = vld [vmem:[#allocation4 + $0x438] sm:$0xff]  }
 0xa35   : > { %v7039_v10 = vadd.f32 %v7038_v27, %v14899_v49  ;;  %v7152_v37 = vadd.f32 %v7151_v18, %v14903_v35  ;;  %11328 = vmatprep.subr.bf16.mxu1 %v12145_v22  ;;  %11391 = vmatpush3.bf16.msra.mxu0 %v12150_v31  ;;  %v7903_v57 = vmax.f32 %v7035_v45, 0.0  ;;  %v7905_v54 = vmax.f32 %v7148_v58, 0.0  ;;  %v12156_v45 = vld [vmem:[#allocation4 + $0x4b8] sm:$0xff]   ;;  %v12157_v58 = vld [vmem:[#allocation4 + $0x540] sm:$0xff]  }
 0xa36   : > { %v7918_v56 = vmax.f32 %v7037_v60, 0.0  ;;  %v7920_v59 = vmax.f32 %v7150_v28, 0.0  ;;  %7739 = vmatmul.mubr.bf16.gmra.mrb[124].mxu1 %v14716_v15  ;;  %7852 = vmatmul.mubr.bf16.gmra.mrb[140].mxu0 %v14716_v15 }
 0xa37   : > { %v7919_v7 = vmax.f32 %v7039_v10, 0.0  ;;  %v7921_v47 = vmax.f32 %v7152_v37, 0.0  ;;  %7748 = vmatprep.mubr.bf16.mxu1 %v16128_v42  ;;  %7861 = vmatprep.mubr.bf16.mxu0 %v16128_v42 }
 0xa38   : > { %v14919_v22 = vpack.c.bf16 %v7918_v56, %v7902_v44  ;;  %v14921_v31 = vpack.c.bf16 %v7920_v59, %v7904_v11  ;;  %11329 = vmatpush3.bf16.msra.mxu1 %v12146_v39  ;;  %11392 = vmatprep.subr.bf16.mxu0 %v12153_v36  ;;  %v12164_v44 = vld [vmem:[#allocation4 + $0x5c0] sm:$0xff]  }
 0xa39   : > { %v14923_v50 = vpack.c.bf16 %v7921_v47, %v7905_v54  ;;  %v7042_v63 = vpop.f32.mrb[20].mxu1  ;;  %v7155_v15 = vpop.f32.mrb[36].mxu0  ;;  %11330 = vmatprep.subr.bf16.mxu1 %v12151_v5  ;;  %v14925_v62 = vpack.c.bf16 %v7919_v7, %v7903_v57  ;;  %11393 = vmatpush3.bf16.msra.mxu0 %v12154_v19 }
 0xa3a   : > { %v7043_v23 = vadd.f32 %v7042_v63, %v14891_v6  ;;  %v7156_v0 = vadd.f32 %v7155_v15, %v14895_v30  ;;  %v7044_v60 = vpop.f32.mrb[21].mxu1  ;;  %v7157_v28 = vpop.f32.mrb[37].mxu0  ;;  %11394 = vmatprep.subr.bf16.mxu0 %v12155_v2 }
 0xa3b   : > { %v7045_v27 = vadd.f32 %v7044_v60, %v14899_v49  ;;  %v7158_v18 = vadd.f32 %v7157_v28, %v14903_v35  ;;  %v7046_v39 = vpop.f32.mrb[22].mxu1  ;;  %v7159_v36 = vpop.f32.mrb[38].mxu0 }
 0xa3c   : > { %v7047_v10 = vadd.f32 %v7046_v39, %v14891_v6  ;;  %v7160_v37 = vadd.f32 %v7159_v36, %v14895_v30  ;;  %v7048_v5 = vpop.f32.mrb[23].mxu1  ;;  %v7161_v19 = vpop.f32.mrb[39].mxu0  ;;  %11331 = vmatpush3.bf16.msra.mxu1 %v12152_v38  ;;  %v7934_v59 = vmax.f32 %v7043_v23, 0.0  ;;  %v7936_v2 = vmax.f32 %v7156_v0, 0.0 }
 0xa3d   : > { %v7049_v11 = vadd.f32 %v7048_v5, %v14899_v49  ;;  %v7162_v56 = vadd.f32 %v7161_v19, %v14903_v35  ;;  %11395 = vmatpush3.bf16.msra.mxu0 %v12156_v45  ;;  %11444 = vmatprep.subr.bf16.mxu1 %v12157_v58  ;;  %v7935_v7 = vmax.f32 %v7045_v27, 0.0  ;;  %v7937_v47 = vmax.f32 %v7158_v18, 0.0 }
 0xa3e   : > { %v7950_v57 = vmax.f32 %v7047_v10, 0.0  ;;  %v7952_v54 = vmax.f32 %v7160_v37, 0.0  ;;  %7749 = vmatmul.mubr.bf16.gmra.mrb[128].mxu1 %v14746_v52  ;;  %7862 = vmatmul.mubr.bf16.gmra.mrb[144].mxu0 %v14746_v52 }
 0xa3f   : > { %v7951_v63 = vmax.f32 %v7049_v11, 0.0  ;;  %v7953_v15 = vmax.f32 %v7162_v56, 0.0  ;;  %7758 = vmatprep.mubr.bf16.mxu1 %v16128_v42  ;;  %7871 = vmatprep.mubr.bf16.mxu0 %v16128_v42 }
 0xa40   : > { %v14939_v38 = vpack.c.bf16 %v7950_v57, %v7934_v59  ;;  %v14941_v45 = vpack.c.bf16 %v7952_v54, %v7936_v2  ;;  %11508 = vmatprep.subr.bf16.mxu0 %v12164_v44 }
 0xa41   : > { %v14943_v58 = vpack.c.bf16 %v7953_v15, %v7937_v47  ;;  %v7052_v23 = vpop.f32.mrb[24].mxu1  ;;  %v7165_v0 = vpop.f32.mrb[40].mxu0  ;;  %v14945_v60 = vpack.c.bf16 %v7951_v63, %v7935_v7 }
 0xa42   : > { %v7053_v52 = vadd.f32 %v7052_v23, %v14891_v6  ;;  %v7166_v28 = vadd.f32 %v7165_v0, %v14895_v30  ;;  %v7054_v27 = vpop.f32.mrb[25].mxu1  ;;  %v7167_v18 = vpop.f32.mrb[41].mxu0 }
 0xa43   : > { %v7055_v39 = vadd.f32 %v7054_v27, %v14899_v49  ;;  %v7168_v36 = vadd.f32 %v7167_v18, %v14903_v35  ;;  %v7056_v10 = vpop.f32.mrb[26].mxu1  ;;  %v7169_v37 = vpop.f32.mrb[42].mxu0 }
 0xa44   : > { %v7057_v5 = vadd.f32 %v7056_v10, %v14891_v6  ;;  %v7170_v19 = vadd.f32 %v7169_v37, %v14895_v30  ;;  %v7058_v44 = vpop.f32.mrb[27].mxu1  ;;  %v7171_v11 = vpop.f32.mrb[43].mxu0  ;;  %v7966_v2 = vmax.f32 %v7053_v52, 0.0  ;;  %v7968_v57 = vmax.f32 %v7166_v28, 0.0 }
 0xa45   : > { %v7059_v56 = vadd.f32 %v7058_v44, %v14899_v49  ;;  %v7172_v59 = vadd.f32 %v7171_v11, %v14903_v35  ;;  %v7967_v47 = vmax.f32 %v7055_v39, 0.0  ;;  %v7969_v63 = vmax.f32 %v7168_v36, 0.0 }
 0xa46   : > { %v7982_v54 = vmax.f32 %v7057_v5, 0.0  ;;  %v7984_v7 = vmax.f32 %v7170_v19, 0.0  ;;  %7759 = vmatmul.mubr.bf16.gmra.mrb[132].mxu1 %v14764_v41  ;;  %7872 = vmatmul.mubr.bf16.gmra.mrb[148].mxu0 %v14764_v41 }
 0xa47   : > { %v7983_v15 = vmax.f32 %v7059_v56, 0.0  ;;  %v7985_v23 = vmax.f32 %v7172_v59, 0.0  ;;  %7768 = vmatprep.mubr.bf16.mxu1 %v16128_v42  ;;  %7881 = vmatprep.mubr.bf16.mxu0 %v16128_v42 }
 0xa48   : > { %v14959_v0 = vpack.c.bf16 %v7982_v54, %v7966_v2  ;;  %v14961_v27 = vpack.c.bf16 %v7984_v7, %v7968_v57 }
 0xa49   : > { %v14963_v52 = vpack.c.bf16 %v7983_v15, %v7967_v47  ;;  %v14965_v28 = vpack.c.bf16 %v7985_v23, %v7969_v63  ;;  %v7062_v18 = vpop.f32.mrb[28].mxu1  ;;  %v7175_v10 = vpop.f32.mrb[44].mxu0 }
 0xa4a   : > { %v7063_v41 = vadd.f32 %v7062_v18, %v14891_v6  ;;  %v7176_v39 = vadd.f32 %v7175_v10, %v14895_v30  ;;  %v7064_v36 = vpop.f32.mrb[29].mxu1  ;;  %v7177_v37 = vpop.f32.mrb[45].mxu0 }
 0xa4b   : > { %v7065_v5 = vadd.f32 %v7064_v36, %v14899_v49  ;;  %v7178_v19 = vadd.f32 %v7177_v37, %v14903_v35  ;;  %v7066_v44 = vpop.f32.mrb[30].mxu1  ;;  %v7179_v11 = vpop.f32.mrb[46].mxu0 }
 0xa4c   : > { %v7067_v56 = vadd.f32 %v7066_v44, %v14891_v6  ;;  %v7180_v59 = vadd.f32 %v7179_v11, %v14895_v30  ;;  %v7068_v2 = vpop.f32.mrb[31].mxu1  ;;  %v7181_v57 = vpop.f32.mrb[47].mxu0  ;;  %v7998_v47 = vmax.f32 %v7063_v41, 0.0  ;;  %v8000_v63 = vmax.f32 %v7176_v39, 0.0 }
 0xa4d   : > { %v7069_v54 = vadd.f32 %v7068_v2, %v14899_v49  ;;  %v7182_v7 = vadd.f32 %v7181_v57, %v14903_v35  ;;  %v7999_v18 = vmax.f32 %v7065_v5, 0.0  ;;  %v8001_v10 = vmax.f32 %v7178_v19, 0.0 }
 0xa4e   : > { %v8014_v15 = vmax.f32 %v7067_v56, 0.0  ;;  %v8016_v23 = vmax.f32 %v7180_v59, 0.0  ;;  %7769 = vmatmul.mubr.bf16.gmra.mrb[136].mxu1 %v14784_v4  ;;  %7882 = vmatmul.mubr.bf16.gmra.mrb[152].mxu0 %v14784_v4 }
 0xa4f   : > { %v8015_v36 = vmax.f32 %v7069_v54, 0.0  ;;  %v8017_v37 = vmax.f32 %v7182_v7, 0.0  ;;  %7778 = vmatprep.mubr.bf16.mxu1 %v16128_v42  ;;  %7891 = vmatprep.mubr.bf16.mxu0 %v16128_v42 }
 0xa50   : > { %v14979_v44 = vpack.c.bf16 %v8014_v15, %v7998_v47  ;;  %v14981_v11 = vpack.c.bf16 %v8016_v23, %v8000_v63 }
 0xa51   : > { %v14983_v41 = vpack.c.bf16 %v8015_v36, %v7999_v18  ;;  %v14985_v39 = vpack.c.bf16 %v8017_v37, %v8001_v10  ;;  %v7072_v56 = vpop.f32.mrb[32].mxu1  ;;  %v7185_v59 = vpop.f32.mrb[48].mxu0 }
 0xa52   : > { %v7073_v4 = vadd.f32 %v7072_v56, %v14891_v6  ;;  %v7186_v5 = vadd.f32 %v7185_v59, %v14895_v30  ;;  %v7074_v19 = vpop.f32.mrb[33].mxu1  ;;  %v7187_v2 = vpop.f32.mrb[49].mxu0 }
 0xa53   : > { %v7075_v57 = vadd.f32 %v7074_v19, %v14899_v49  ;;  %v7188_v42 = vadd.f32 %v7187_v2, %v14903_v35  ;;  %v7076_v54 = vpop.f32.mrb[34].mxu1  ;;  %v7189_v7 = vpop.f32.mrb[50].mxu0 }
 0xa54   : > { %v7077_v47 = vadd.f32 %v7076_v54, %v14891_v6  ;;  %v7190_v63 = vadd.f32 %v7189_v7, %v14895_v30  ;;  %v7078_v15 = vpop.f32.mrb[35].mxu1  ;;  %v7191_v23 = vpop.f32.mrb[51].mxu0  ;;  %v8030_v36 = vmax.f32 %v7073_v4, 0.0  ;;  %v8032_v37 = vmax.f32 %v7186_v5, 0.0 }
 0xa55   : > { %v7079_v18 = vadd.f32 %v7078_v15, %v14899_v49  ;;  %v7192_v10 = vadd.f32 %v7191_v23, %v14903_v35  ;;  %v8031_v19 = vmax.f32 %v7075_v57, 0.0  ;;  %v8033_v2 = vmax.f32 %v7188_v42, 0.0 }
 0xa56   : > { %v8046_v56 = vmax.f32 %v7077_v47, 0.0  ;;  %v8048_v59 = vmax.f32 %v7190_v63, 0.0  ;;  %7779 = vmatmul.mubr.bf16.gmra.mrb[140].mxu1 %v14800_v34  ;;  %7892 = vmatmul.mubr.bf16.gmra.mrb[156].mxu0 %v14800_v34 }
 0xa57   : > { %v8047_v32 = vmax.f32 %v7079_v18, 0.0  ;;  %v8049_v54 = vmax.f32 %v7192_v10, 0.0  ;;  %9092 = vmatprep.mubr.bf16.mxu1 %v14925_v62  ;;  %9189 = vmatprep.mubr.bf16.mxu0 %v14923_v50 }
 0xa58   : > { %v14999_v7 = vpack.c.bf16 %v8046_v56, %v8030_v36  ;;  %v15001_v15 = vpack.c.bf16 %v8048_v59, %v8032_v37  ;;  %v12158_v36 = vld [vmem:[#allocation4 + $0x500] sm:$0xff]  }
 0xa59   : > { %v15003_v4 = vpack.c.bf16 %v8047_v32, %v8031_v19  ;;  %v15005_v5 = vpack.c.bf16 %v8049_v54, %v8033_v2  ;;  %v7082_v47 = vpop.f32.mrb[36].mxu1  ;;  %v7195_v63 = vpop.f32.mrb[52].mxu0  ;;  %v12159_v19 = vld [vmem:[#allocation4 + $0x548] sm:$0xff]  }
 0xa5a   : > { %v7083_v34 = vadd.f32 %v7082_v47, %v14891_v6  ;;  %v7196_v57 = vadd.f32 %v7195_v63, %v14895_v30  ;;  %v7084_v42 = vpop.f32.mrb[37].mxu1  ;;  %v7197_v23 = vpop.f32.mrb[53].mxu0  ;;  %v12166_v47 = vld [vmem:[#allocation4 + $0x580] sm:$0xff]  }
 0xa5b   : > { %v7085_v62 = vadd.f32 %v7084_v42, %v14899_v49  ;;  %v7198_v50 = vadd.f32 %v7197_v23, %v14903_v35  ;;  %v7086_v18 = vpop.f32.mrb[38].mxu1  ;;  %v7199_v10 = vpop.f32.mrb[54].mxu0  ;;  %v12168_v23 = vld [vmem:[#allocation4 + $0x5c8] sm:$0xff]  }
 0xa5c   : > { %v7087_v32 = vadd.f32 %v7086_v18, %v14891_v6  ;;  %v7200_v37 = vadd.f32 %v7199_v10, %v14895_v30  ;;  %v7088_v56 = vpop.f32.mrb[39].mxu1  ;;  %v7201_v59 = vpop.f32.mrb[55].mxu0  ;;  %v8062_v63 = vmax.f32 %v7083_v34, 0.0  ;;  %v8064_v53 = vmax.f32 %v7196_v57, 0.0  ;;  %v12161_v34 = vld [vmem:[#allocation4 + $0x550] sm:$0xff]  }
 0xa5d   : > { %v7089_v2 = vadd.f32 %v7088_v56, %v14899_v49  ;;  %v7202_v54 = vadd.f32 %v7201_v59, %v14903_v35  ;;  %v8063_v18 = vmax.f32 %v7085_v62, 0.0  ;;  %v8065_v25 = vmax.f32 %v7198_v50, 0.0  ;;  %v12160_v56 = vld [vmem:[#allocation4 + $0x508] sm:$0xff]  }
 0xa5e   : > { %v8078_v42 = vmax.f32 %v7087_v32, 0.0  ;;  %v8080_v61 = vmax.f32 %v7200_v37, 0.0  ;;  %9093 = vmatmul.mubr.bf16.vlgmr.msra.gmra.mrb[144].mxu1 %v14919_v22  ;;  %9190 = vmatmul.mubr.bf16.vlgmr.msra.gmra.mrb[160].mxu0 %v14921_v31  ;;  %v12170_v50 = vld [vmem:[#allocation4 + $0x588] sm:$0xff]  }
 0xa5f   : > { %v8079_v10 = vmax.f32 %v7089_v2, 0.0  ;;  %v8081_v1 = vmax.f32 %v7202_v54, 0.0  ;;  %11445 = vmatpush3.bf16.msra.mxu1 %v12158_v36  ;;  %9100 = vmatprep.mubr.bf16.mxu1 %v14945_v60 }
 0xa60   : > { %v15018_v17 = vpack.c.bf16 %v8078_v42, %v8062_v63  ;;  %v15020_v59 = vpack.c.bf16 %v8080_v61, %v8064_v53  ;;  %9197 = vmatprep.mubr.bf16.mxu0 %v14943_v58  ;;  %11446 = vmatprep.subr.bf16.mxu1 %v12159_v19  ;;  %v12172_v63 = vld [vmem:[#allocation4 + $0x5d0] sm:$0xff]  }
 0xa61   : > { %v15023_v22 = vpack.c.bf16 %v8079_v10, %v8063_v18  ;;  %v15025_v31 = vpack.c.bf16 %v8081_v1, %v8065_v25  ;;  %v7092_v57 = vpop.f32.mrb[40].mxu1  ;;  %v7205_v62 = vpop.f32.mrb[56].mxu0  ;;  %11509 = vmatpush3.bf16.msra.mxu0 %v12166_v47  ;;  %v12162_v47 = vld [vmem:[#allocation4 + $0x510] sm:$0xff]   ;;  %v12163_v18 = vld [vmem:[#allocation4 + $0x558] sm:$0xff]  }
 0xa62   : > { %v7093_v36 = vadd.f32 %v7092_v57, %v14891_v6  ;;  %v7206_v60 = vadd.f32 %v7205_v62, %v14895_v30  ;;  %v7094_v32 = vpop.f32.mrb[41].mxu1  ;;  %v7207_v37 = vpop.f32.mrb[57].mxu0  ;;  %11510 = vmatprep.subr.bf16.mxu0 %v12168_v23  ;;  %v12174_v10 = vld [vmem:[#allocation4 + $0x590] sm:$0xff]  }
 0xa63   : > { %v7095_v61 = vadd.f32 %v7094_v32, %v14899_v49  ;;  %v7208_v53 = vadd.f32 %v7207_v37, %v14903_v35  ;;  %v7096_v58 = vpop.f32.mrb[42].mxu1  ;;  %v7209_v19 = vpop.f32.mrb[58].mxu0  ;;  %11447 = vmatpush3.bf16.msra.mxu1 %v12160_v56  ;;  %v12175_v37 = vld [vmem:[#allocation4 + $0x5d8] sm:$0xff]  }
 0xa64   : > { %v7097_v1 = vadd.f32 %v7096_v58, %v14891_v6  ;;  %v7210_v25 = vadd.f32 %v7209_v19, %v14895_v30  ;;  %v7098_v2 = vpop.f32.mrb[43].mxu1  ;;  %v7211_v54 = vpop.f32.mrb[59].mxu0  ;;  %11448 = vmatprep.subr.bf16.mxu1 %v12161_v34  ;;  %v8094_v57 = vmax.f32 %v7093_v36, 0.0  ;;  %v8096_v62 = vmax.f32 %v7206_v60, 0.0  ;;  %v12165_v36 = vld [vmem:[#allocation4 + $0x518] sm:$0xff]  }
 0xa65   : > { %v7099_v42 = vadd.f32 %v7098_v2, %v14899_v49  ;;  %v7212_v23 = vadd.f32 %v7211_v54, %v14903_v35  ;;  %11511 = vmatpush3.bf16.msra.mxu0 %v12170_v50  ;;  %v8095_v58 = vmax.f32 %v7095_v61, 0.0  ;;  %v8097_v34 = vmax.f32 %v7208_v53, 0.0  ;;  %v12167_v53 = vld [vmem:[#allocation4 + $0x560] sm:$0xff]  }
 0xa66   : > { %v8110_v32 = vmax.f32 %v7097_v1, 0.0  ;;  %v8112_v56 = vmax.f32 %v7210_v25, 0.0  ;;  %9101 = vmatmul.mubr.bf16.gmra.mrb[148].mxu1 %v14939_v38  ;;  %9198 = vmatmul.mubr.bf16.gmra.mrb[164].mxu0 %v14941_v45  ;;  %v12176_v1 = vld [vmem:[#allocation4 + $0x598] sm:$0xff]  }
 0xa67   : > { %v8111_v19 = vmax.f32 %v7099_v42, 0.0  ;;  %v8113_v21 = vmax.f32 %v7212_v23, 0.0  ;;  %9108 = vmatprep.mubr.bf16.mxu1 %v14963_v52  ;;  %9205 = vmatprep.mubr.bf16.mxu0 %v14965_v28  ;;  %v15053_v23 = vrot.slane %v14885_v29, %v13432_v51 }
 0xa68   : > { %v15039_v2 = vpack.c.bf16 %v8110_v32, %v8094_v57  ;;  %v15041_v50 = vpack.c.bf16 %v8112_v56, %v8096_v62  ;;  %11449 = vmatpush3.bf16.msra.mxu1 %v12162_v47  ;;  %11512 = vmatprep.subr.bf16.mxu0 %v12172_v63  ;;  %v15059_v32 = vrot.slane %v14885_v29, %v13435_v55 }
 0xa69   : > { %v15043_v60 = vpack.c.bf16 %v8111_v19, %v8095_v58  ;;  %v15045_v38 = vpack.c.bf16 %v8113_v21, %v8097_v34  ;;  %v7102_v45 = vpop.f32.mrb[44].mxu1  ;;  %v7215_v61 = vpop.f32.mrb[60].mxu0  ;;  %11450 = vmatprep.subr.bf16.mxu1 %v12163_v18  ;;  %11513 = vmatpush3.bf16.msra.mxu0 %v12174_v10  ;;  %v15063_v56 = vrot.slane %v14885_v29, %v13442_v8  ;;  %v12179_v58 = vld [vmem:[#allocation4 + $0x5e0] sm:$0xff]  }
 0xa6a   : > { %v7103_v52 = vadd.f32 %v7102_v45, %v14891_v6  ;;  %v7216_v28 = vadd.f32 %v7215_v61, %v14895_v30  ;;  %v7104_v25 = vpop.f32.mrb[45].mxu1  ;;  %v7217_v54 = vpop.f32.mrb[61].mxu0  ;;  %11514 = vmatprep.subr.bf16.mxu0 %v12175_v37  ;;  %v12169_v37 = vld [vmem:[#allocation4 + $0x520] sm:$0xff]  }
 0xa6b   : > { %v7105_v47 = vadd.f32 %v7104_v25, %v14899_v49  ;;  %v7218_v63 = vadd.f32 %v7217_v54, %v14903_v35  ;;  %v7106_v42 = vpop.f32.mrb[46].mxu1  ;;  %v7219_v21 = vpop.f32.mrb[62].mxu0  ;;  %v12180_v45 = vld [vmem:[#allocation4 + $0x5a0] sm:$0xff]  }
 0xa6c   : > { %v7107_v18 = vadd.f32 %v7106_v42, %v14891_v6  ;;  %v7220_v10 = vadd.f32 %v7219_v21, %v14895_v30  ;;  %v7108_v57 = vpop.f32.mrb[47].mxu1  ;;  %v7221_v62 = vpop.f32.mrb[63].mxu0  ;;  %11451 = vmatpush3.bf16.msra.mxu1 %v12165_v36  ;;  %v15069_v6 = vrot.slane %v14885_v29, %v13449_v46  ;;  %v12171_v30 = vld [vmem:[#allocation4 + $0x568] sm:$0xff]   ;;  %v8126_v61 = vmax.f32 %v7103_v52, 0.0 }
 0xa6d   : > { %v7109_v34 = vadd.f32 %v7108_v57, %v14899_v49  ;;  %v7222_v19 = vadd.f32 %v7221_v62, %v14903_v35  ;;  %11452 = vmatprep.subr.bf16.mxu1 %v12167_v53  ;;  %11515 = vmatpush3.bf16.msra.mxu0 %v12176_v1  ;;  %v8128_v25 = vmax.f32 %v7216_v28, 0.0  ;;  %v12181_v36 = vld [vmem:[#allocation4 + $0x5e8] sm:$0xff]   ;;  %v8127_v49 = vmax.f32 %v7105_v47, 0.0  ;;  %v12177_v47 = vld [vmem:[#allocation4 + $0x570] sm:$0xff]  }
 0xa6e   : > { %v8142_v54 = vmax.f32 %v7107_v18, 0.0  ;;  %v8144_v42 = vmax.f32 %v7220_v10, 0.0  ;;  %9109 = vmatmul.mubr.bf16.gmra.mrb[152].mxu1 %v14959_v0  ;;  %9206 = vmatmul.mubr.bf16.gmra.mrb[168].mxu0 %v14961_v27  ;;  %v8129_v21 = vmax.f32 %v7218_v63, 0.0  ;;  %v12173_v1 = vld [vmem:[#allocation4 + $0x528] sm:$0xff]  }
 0xa6f   : > { %v8143_v35 = vmax.f32 %v7109_v34, 0.0  ;;  %v8145_v57 = vmax.f32 %v7222_v19, 0.0  ;;  %9116 = vmatprep.mubr.bf16.mxu1 %v14983_v41  ;;  %9213 = vmatprep.mubr.bf16.mxu0 %v14985_v39  ;;  %v12182_v63 = vld [vmem:[#allocation4 + $0x5a8] sm:$0xff]  }
 0xa70   : > { %v15075_v29 = vpack.c.bf16 %v8142_v54, %v8126_v61  ;;  %v15077_v53 = vpack.c.bf16 %v8144_v42, %v8128_v25  ;;  %11453 = vmatpush3.bf16.msra.mxu1 %v12169_v37  ;;  %11516 = vmatprep.subr.bf16.mxu0 %v12179_v58  ;;  %v12178_v25 = vld [vmem:[#allocation4 + $0x530] sm:$0xff]  }
 0xa71   : > { %v15079_v52 = vpack.c.bf16 %v8143_v35, %v8127_v49  ;;  %v15081_v0 = vpack.c.bf16 %v8145_v57, %v8129_v21  ;;  %v7258_v27 = vpop.f32.mrb[48].mxu1  ;;  %v7371_v28 = vpop.f32.mrb[64].mxu0  ;;  %11454 = vmatprep.subr.bf16.mxu1 %v12171_v30  ;;  %11517 = vmatpush3.bf16.msra.mxu0 %v12180_v45  ;;  %v12185_v54 = vld [vmem:[#allocation4 + $0x5f0] sm:$0xff]  }
 0xa72   : > { %v7259_v41 = vadd.f32 %v7258_v27, %v15053_v23  ;;  %v7372_v39 = vadd.f32 %v7371_v28, %v15059_v32  ;;  %v7260_v18 = vpop.f32.mrb[49].mxu1  ;;  %v7373_v10 = vpop.f32.mrb[65].mxu0  ;;  %11518 = vmatprep.subr.bf16.mxu0 %v12181_v36  ;;  %v12183_v36 = vld [vmem:[#allocation4 + $0x578] sm:$0xff]   ;;  %v12186_v21 = vld [vmem:[#allocation4 + $0x5b0] sm:$0xff]  }
 0xa73   : > { %v7261_v62 = vadd.f32 %v7260_v18, %v15063_v56  ;;  %v7374_v37 = vadd.f32 %v7373_v10, %v15069_v6  ;;  %v7262_v58 = vpop.f32.mrb[50].mxu1  ;;  %v7375_v34 = vpop.f32.mrb[66].mxu0  ;;  %v12187_v18 = vld [vmem:[#allocation4 + $0x5f8] sm:$0xff]  }
 0xa74   : > { %v7263_v19 = vadd.f32 %v7262_v58, %v15053_v23  ;;  %v7376_v30 = vadd.f32 %v7375_v34, %v15059_v32  ;;  %v7264_v61 = vpop.f32.mrb[51].mxu1  ;;  %v7377_v45 = vpop.f32.mrb[67].mxu0  ;;  %11455 = vmatpush3.bf16.msra.mxu1 %v12173_v1  ;;  %v7906_v35 = vmax.f32 %v7259_v41, 0.0  ;;  %v7908_v57 = vmax.f32 %v7372_v39, 0.0  ;;  %v12184_v41 = vld [vmem:[#allocation4 + $0x538] sm:$0xff]  }
 0xa75   : > { %v7265_v42 = vadd.f32 %v7264_v61, %v15063_v56  ;;  %v7378_v49 = vadd.f32 %v7377_v45, %v15069_v6  ;;  %11456 = vmatprep.subr.bf16.mxu1 %v12177_v47  ;;  %11519 = vmatpush3.bf16.msra.mxu0 %v12182_v63  ;;  %v7907_v1 = vmax.f32 %v7261_v62, 0.0  ;;  %v7909_v10 = vmax.f32 %v7374_v37, 0.0  ;;  %v12188_v37 = vld [vmem:[#allocation4 + $0x5b8] sm:$0xff]  }
 0xa76   : > { %v7922_v27 = vmax.f32 %v7263_v19, 0.0  ;;  %v7924_v28 = vmax.f32 %v7376_v30, 0.0  ;;  %9117 = vmatmul.mubr.bf16.gmra.mrb[156].mxu1 %v14979_v44  ;;  %9214 = vmatmul.mubr.bf16.gmra.mrb[172].mxu0 %v14981_v11  ;;  %v12189_v19 = vld [vmem:[#allocation4 + $0x640] sm:$0xff]  }
 0xa77   : > { %v7923_v58 = vmax.f32 %v7265_v42, 0.0  ;;  %v7925_v34 = vmax.f32 %v7378_v49, 0.0  ;;  %9124 = vmatprep.mubr.bf16.mxu1 %v15003_v4  ;;  %9221 = vmatprep.mubr.bf16.mxu0 %v15005_v5 }
 0xa78   : > { %v15095_v47 = vpack.c.bf16 %v7922_v27, %v7906_v35  ;;  %v15097_v63 = vpack.c.bf16 %v7924_v28, %v7908_v57  ;;  %11457 = vmatpush3.bf16.msra.mxu1 %v12178_v25  ;;  %11520 = vmatprep.subr.bf16.mxu0 %v12185_v54  ;;  %v12196_v57 = vld [vmem:[#allocation4 + $0x6c0] sm:$0xff]  }
 0xa79   : > { %v15099_v39 = vpack.c.bf16 %v7923_v58, %v7907_v1  ;;  %v15101_v44 = vpack.c.bf16 %v7925_v34, %v7909_v10  ;;  %v7268_v11 = vpop.f32.mrb[52].mxu1  ;;  %v7381_v62 = vpop.f32.mrb[68].mxu0  ;;  %11458 = vmatprep.subr.bf16.mxu1 %v12183_v36  ;;  %11521 = vmatpush3.bf16.msra.mxu0 %v12186_v21 }
 0xa7a   : > { %v7269_v4 = vadd.f32 %v7268_v11, %v15053_v23  ;;  %v7382_v5 = vadd.f32 %v7381_v62, %v15059_v32  ;;  %v7270_v30 = vpop.f32.mrb[53].mxu1  ;;  %v7383_v61 = vpop.f32.mrb[69].mxu0  ;;  %11522 = vmatprep.subr.bf16.mxu0 %v12187_v18 }
 0xa7b   : > { %v7271_v45 = vadd.f32 %v7270_v30, %v15063_v56  ;;  %v7384_v25 = vadd.f32 %v7383_v61, %v15069_v6  ;;  %v7272_v54 = vpop.f32.mrb[54].mxu1  ;;  %v7385_v42 = vpop.f32.mrb[70].mxu0 }
 0xa7c   : > { %v7273_v49 = vadd.f32 %v7272_v54, %v15053_v23  ;;  %v7386_v36 = vadd.f32 %v7385_v42, %v15059_v32  ;;  %v7274_v21 = vpop.f32.mrb[55].mxu1  ;;  %v7387_v35 = vpop.f32.mrb[71].mxu0  ;;  %11459 = vmatpush3.bf16.msra.mxu1 %v12184_v41  ;;  %v7938_v18 = vmax.f32 %v7269_v4, 0.0  ;;  %v7940_v1 = vmax.f32 %v7382_v5, 0.0 }
 0xa7d   : > { %v7275_v27 = vadd.f32 %v7274_v21, %v15063_v56  ;;  %v7388_v28 = vadd.f32 %v7387_v35, %v15069_v6  ;;  %11523 = vmatpush3.bf16.msra.mxu0 %v12188_v37  ;;  %11572 = vmatprep.subr.bf16.mxu1 %v12189_v19  ;;  %v7939_v34 = vmax.f32 %v7271_v45, 0.0  ;;  %v7941_v11 = vmax.f32 %v7384_v25, 0.0 }
 0xa7e   : > { %v7954_v10 = vmax.f32 %v7273_v49, 0.0  ;;  %v7956_v58 = vmax.f32 %v7386_v36, 0.0  ;;  %9125 = vmatmul.mubr.bf16.gmra.mrb[160].mxu1 %v14999_v7  ;;  %9222 = vmatmul.mubr.bf16.gmra.mrb[176].mxu0 %v15001_v15 }
 0xa7f   : > { %v7955_v62 = vmax.f32 %v7275_v27, 0.0  ;;  %v7957_v30 = vmax.f32 %v7388_v28, 0.0  ;;  %9132 = vmatprep.mubr.bf16.mxu1 %v15023_v22  ;;  %9229 = vmatprep.mubr.bf16.mxu0 %v15025_v31 }
 0xa80   : > { %v15115_v41 = vpack.c.bf16 %v7954_v10, %v7938_v18  ;;  %v15117_v37 = vpack.c.bf16 %v7956_v58, %v7940_v1  ;;  %11636 = vmatprep.subr.bf16.mxu0 %v12196_v57 }
 0xa81   : > { %v15119_v19 = vpack.c.bf16 %v7955_v62, %v7939_v34  ;;  %v15121_v4 = vpack.c.bf16 %v7957_v30, %v7941_v11  ;;  %v7278_v7 = vpop.f32.mrb[56].mxu1  ;;  %v7391_v5 = vpop.f32.mrb[72].mxu0 }
 0xa82   : > { %v7279_v15 = vadd.f32 %v7278_v7, %v15053_v23  ;;  %v7392_v61 = vadd.f32 %v7391_v5, %v15059_v32  ;;  %v7280_v45 = vpop.f32.mrb[57].mxu1  ;;  %v7393_v25 = vpop.f32.mrb[73].mxu0 }
 0xa83   : > { %v7281_v22 = vadd.f32 %v7280_v45, %v15063_v56  ;;  %v7394_v31 = vadd.f32 %v7393_v25, %v15069_v6  ;;  %v7282_v54 = vpop.f32.mrb[58].mxu1  ;;  %v7395_v42 = vpop.f32.mrb[74].mxu0 }
 0xa84   : > { %v7283_v49 = vadd.f32 %v7282_v54, %v15053_v23  ;;  %v7396_v36 = vadd.f32 %v7395_v42, %v15059_v32  ;;  %v7284_v21 = vpop.f32.mrb[59].mxu1  ;;  %v7397_v35 = vpop.f32.mrb[75].mxu0  ;;  %v7970_v28 = vmax.f32 %v7279_v15, 0.0  ;;  %v7972_v18 = vmax.f32 %v7392_v61, 0.0 }
 0xa85   : > { %v7285_v57 = vadd.f32 %v7284_v21, %v15063_v56  ;;  %v7398_v27 = vadd.f32 %v7397_v35, %v15069_v6  ;;  %v7971_v58 = vmax.f32 %v7281_v22, 0.0  ;;  %v7973_v34 = vmax.f32 %v7394_v31, 0.0 }
 0xa86   : > { %v7986_v1 = vmax.f32 %v7283_v49, 0.0  ;;  %v7988_v10 = vmax.f32 %v7396_v36, 0.0  ;;  %9133 = vmatmul.mubr.bf16.gmra.mrb[164].mxu1 %v15018_v17  ;;  %9230 = vmatmul.mubr.bf16.gmra.mrb[180].mxu0 %v15020_v59 }
 0xa87   : > { %v7987_v11 = vmax.f32 %v7285_v57, 0.0  ;;  %v7989_v62 = vmax.f32 %v7398_v27, 0.0  ;;  %9140 = vmatprep.mubr.bf16.mxu1 %v15043_v60  ;;  %9237 = vmatprep.mubr.bf16.mxu0 %v15045_v38 }
 0xa88   : > { %v15135_v30 = vpack.c.bf16 %v7986_v1, %v7970_v28  ;;  %v15137_v7 = vpack.c.bf16 %v7988_v10, %v7972_v18 }
 0xa89   : > { %v15139_v5 = vpack.c.bf16 %v7987_v11, %v7971_v58  ;;  %v15141_v15 = vpack.c.bf16 %v7989_v62, %v7973_v34  ;;  %v7288_v61 = vpop.f32.mrb[60].mxu1  ;;  %v7401_v17 = vpop.f32.mrb[76].mxu0 }
 0xa8a   : > { %v7289_v59 = vadd.f32 %v7288_v61, %v15053_v23  ;;  %v7402_v45 = vadd.f32 %v7401_v17, %v15059_v32  ;;  %v7290_v25 = vpop.f32.mrb[61].mxu1  ;;  %v7403_v22 = vpop.f32.mrb[77].mxu0 }
 0xa8b   : > { %v7291_v60 = vadd.f32 %v7290_v25, %v15063_v56  ;;  %v7404_v38 = vadd.f32 %v7403_v22, %v15069_v6  ;;  %v7292_v31 = vpop.f32.mrb[62].mxu1  ;;  %v7405_v54 = vpop.f32.mrb[78].mxu0 }
 0xa8c   : > { %v7293_v42 = vadd.f32 %v7292_v31, %v15053_v23  ;;  %v7406_v49 = vadd.f32 %v7405_v54, %v15059_v32  ;;  %v7294_v36 = vpop.f32.mrb[63].mxu1  ;;  %v7407_v21 = vpop.f32.mrb[79].mxu0  ;;  %v8002_v27 = vmax.f32 %v7289_v59, 0.0  ;;  %v8004_v28 = vmax.f32 %v7402_v45, 0.0 }
 0xa8d   : > { %v7295_v35 = vadd.f32 %v7294_v36, %v15063_v56  ;;  %v7408_v57 = vadd.f32 %v7407_v21, %v15069_v6  ;;  %v8003_v10 = vmax.f32 %v7291_v60, 0.0  ;;  %v8005_v58 = vmax.f32 %v7404_v38, 0.0 }
 0xa8e   : > { %v8018_v18 = vmax.f32 %v7293_v42, 0.0  ;;  %v8020_v1 = vmax.f32 %v7406_v49, 0.0  ;;  %9141 = vmatmul.mubr.bf16.gmra.mrb[168].mxu1 %v15039_v2  ;;  %9238 = vmatmul.mubr.bf16.gmra.mrb[184].mxu0 %v15041_v50 }
 0xa8f   : > { %v8019_v34 = vmax.f32 %v7295_v35, 0.0  ;;  %v8021_v11 = vmax.f32 %v7408_v57, 0.0  ;;  %9148 = vmatprep.mubr.bf16.mxu1 %v15079_v52  ;;  %9245 = vmatprep.mubr.bf16.mxu0 %v15081_v0 }
 0xa90   : > { %v15155_v62 = vpack.c.bf16 %v8018_v18, %v8002_v27  ;;  %v15157_v61 = vpack.c.bf16 %v8020_v1, %v8004_v28 }
 0xa91   : > { %v15159_v17 = vpack.c.bf16 %v8019_v34, %v8003_v10  ;;  %v15161_v59 = vpack.c.bf16 %v8021_v11, %v8005_v58  ;;  %v7298_v45 = vpop.f32.mrb[64].mxu1  ;;  %v7411_v2 = vpop.f32.mrb[80].mxu0 }
 0xa92   : > { %v7299_v50 = vadd.f32 %v7298_v45, %v15053_v23  ;;  %v7412_v25 = vadd.f32 %v7411_v2, %v15059_v32  ;;  %v7300_v22 = vpop.f32.mrb[65].mxu1  ;;  %v7413_v60 = vpop.f32.mrb[81].mxu0 }
 0xa93   : > { %v7301_v52 = vadd.f32 %v7300_v22, %v15063_v56  ;;  %v7414_v0 = vadd.f32 %v7413_v60, %v15069_v6  ;;  %v7302_v38 = vpop.f32.mrb[66].mxu1  ;;  %v7415_v31 = vpop.f32.mrb[82].mxu0 }
 0xa94   : > { %v7303_v54 = vadd.f32 %v7302_v38, %v15053_v23  ;;  %v7416_v42 = vadd.f32 %v7415_v31, %v15059_v32  ;;  %v7304_v49 = vpop.f32.mrb[67].mxu1  ;;  %v7417_v36 = vpop.f32.mrb[83].mxu0  ;;  %v8034_v57 = vmax.f32 %v7299_v50, 0.0  ;;  %v8036_v27 = vmax.f32 %v7412_v25, 0.0  ;;  %v12190_v31 = vld [vmem:[#allocation4 + $0x600] sm:$0xff]  }
 0xa95   : > { %v7305_v21 = vadd.f32 %v7304_v49, %v15063_v56  ;;  %v7418_v35 = vadd.f32 %v7417_v36, %v15069_v6  ;;  %v8035_v1 = vmax.f32 %v7301_v52, 0.0  ;;  %v8037_v10 = vmax.f32 %v7414_v0, 0.0 }
 0xa96   : > { %v8050_v28 = vmax.f32 %v7303_v54, 0.0  ;;  %v8052_v18 = vmax.f32 %v7416_v42, 0.0  ;;  %9149 = vmatmul.mubr.bf16.gmra.mrb[172].mxu1 %v15075_v29  ;;  %9246 = vmatmul.mubr.bf16.gmra.mrb[188].mxu0 %v15077_v53 }
 0xa97   : > { %v8051_v58 = vmax.f32 %v7305_v21, 0.0  ;;  %v8053_v34 = vmax.f32 %v7418_v35, 0.0  ;;  %9286 = vmatprep.mubr.bf16.mxu1 %v15099_v39  ;;  %9383 = vmatprep.mubr.bf16.mxu0 %v15101_v44  ;;  %v12191_v21 = vld [vmem:[#allocation4 + $0x648] sm:$0xff]  }
 0xa98   : > { %v15175_v11 = vpack.c.bf16 %v8050_v28, %v8034_v57  ;;  %v15177_v45 = vpack.c.bf16 %v8052_v18, %v8036_v27  ;;  %v12198_v27 = vld [vmem:[#allocation4 + $0x680] sm:$0xff]  }
 0xa99   : > { %v15179_v2 = vpack.c.bf16 %v8051_v58, %v8035_v1  ;;  %v15181_v50 = vpack.c.bf16 %v8053_v34, %v8037_v10  ;;  %v7308_v25 = vpop.f32.mrb[68].mxu1  ;;  %v7421_v29 = vpop.f32.mrb[84].mxu0  ;;  %v12200_v58 = vld [vmem:[#allocation4 + $0x6c8] sm:$0xff]  }
 0xa9a   : > { %v7309_v53 = vadd.f32 %v7308_v25, %v15053_v23  ;;  %v7422_v22 = vadd.f32 %v7421_v29, %v15059_v32  ;;  %v7310_v60 = vpop.f32.mrb[69].mxu1  ;;  %v7423_v52 = vpop.f32.mrb[85].mxu0 }
 0xa9b   : > { %v7311_v39 = vadd.f32 %v7310_v60, %v15063_v56  ;;  %v7424_v44 = vadd.f32 %v7423_v52, %v15069_v6  ;;  %v7312_v0 = vpop.f32.mrb[70].mxu1  ;;  %v7425_v38 = vpop.f32.mrb[86].mxu0  ;;  %v12192_v52 = vld [vmem:[#allocation4 + $0x608] sm:$0xff]  }
 0xa9c   : > { %v7313_v54 = vadd.f32 %v7312_v0, %v15053_v23  ;;  %v7426_v42 = vadd.f32 %v7425_v38, %v15059_v32  ;;  %v7314_v49 = vpop.f32.mrb[71].mxu1  ;;  %v7427_v36 = vpop.f32.mrb[87].mxu0  ;;  %v8066_v28 = vmax.f32 %v7309_v53, 0.0  ;;  %v8068_v18 = vmax.f32 %v7422_v22, 0.0  ;;  %v12193_v53 = vld [vmem:[#allocation4 + $0x650] sm:$0xff]  }
 0xa9d   : > { %v7315_v35 = vadd.f32 %v7314_v49, %v15063_v56  ;;  %v7428_v57 = vadd.f32 %v7427_v36, %v15069_v6  ;;  %v8067_v34 = vmax.f32 %v7311_v39, 0.0  ;;  %v8069_v25 = vmax.f32 %v7424_v44, 0.0  ;;  %v12202_v44 = vld [vmem:[#allocation4 + $0x688] sm:$0xff]  }
 0xa9e   : > { %v8082_v1 = vmax.f32 %v7313_v54, 0.0  ;;  %v8084_v10 = vmax.f32 %v7426_v42, 0.0  ;;  %9287 = vmatmul.mubr.bf16.vlgmr.msra.gmra.mrb[176].mxu1 %v15095_v47  ;;  %9384 = vmatmul.mubr.bf16.vlgmr.msra.gmra.mrb[192].mxu0 %v15097_v63 }
 0xa9f   : > { %v8083_v29 = vmax.f32 %v7315_v35, 0.0  ;;  %v8085_v60 = vmax.f32 %v7428_v57, 0.0  ;;  %11573 = vmatpush3.bf16.msra.mxu1 %v12190_v31  ;;  %9294 = vmatprep.mubr.bf16.mxu1 %v15119_v19 }
 0xaa0   : > { %v15194_v0 = vpack.c.bf16 %v8082_v1, %v8066_v28  ;;  %v15196_v38 = vpack.c.bf16 %v8084_v10, %v8068_v18  ;;  %9391 = vmatprep.mubr.bf16.mxu0 %v15121_v4  ;;  %11574 = vmatprep.subr.bf16.mxu1 %v12191_v21  ;;  %v12194_v18 = vld [vmem:[#allocation4 + $0x610] sm:$0xff]  }
 0xaa1   : > { %v15199_v47 = vpack.c.bf16 %v8083_v29, %v8067_v34  ;;  %v15201_v63 = vpack.c.bf16 %v8085_v60, %v8069_v25  ;;  %v7318_v22 = vpop.f32.mrb[72].mxu1  ;;  %v7431_v39 = vpop.f32.mrb[88].mxu0  ;;  %11637 = vmatpush3.bf16.msra.mxu0 %v12198_v27  ;;  %v12204_v1 = vld [vmem:[#allocation4 + $0x6d0] sm:$0xff]   ;;  %v12195_v34 = vld [vmem:[#allocation4 + $0x658] sm:$0xff]  }
 0xaa2   : > { %v7319_v31 = vadd.f32 %v7318_v22, %v15053_v23  ;;  %v7432_v19 = vadd.f32 %v7431_v39, %v15059_v32  ;;  %v7320_v54 = vpop.f32.mrb[73].mxu1  ;;  %v7433_v42 = vpop.f32.mrb[89].mxu0  ;;  %11638 = vmatprep.subr.bf16.mxu0 %v12200_v58  ;;  %v12206_v25 = vld [vmem:[#allocation4 + $0x690] sm:$0xff]   ;;  %v12207_v39 = vld [vmem:[#allocation4 + $0x6d8] sm:$0xff]  }
 0xaa3   : > { %v7321_v49 = vadd.f32 %v7320_v54, %v15063_v56  ;;  %v7434_v4 = vadd.f32 %v7433_v42, %v15069_v6  ;;  %v7322_v36 = vpop.f32.mrb[74].mxu1  ;;  %v7435_v21 = vpop.f32.mrb[90].mxu0  ;;  %11575 = vmatpush3.bf16.msra.mxu1 %v12192_v52 }
 0xaa4   : > { %v7323_v35 = vadd.f32 %v7322_v36, %v15053_v23  ;;  %v7436_v57 = vadd.f32 %v7435_v21, %v15059_v32  ;;  %v7324_v27 = vpop.f32.mrb[75].mxu1  ;;  %v7437_v28 = vpop.f32.mrb[91].mxu0  ;;  %11576 = vmatprep.subr.bf16.mxu1 %v12193_v53  ;;  %v8098_v29 = vmax.f32 %v7319_v31, 0.0  ;;  %v8100_v60 = vmax.f32 %v7432_v19, 0.0 }
 0xaa5   : > { %v7325_v10 = vadd.f32 %v7324_v27, %v15063_v56  ;;  %v7438_v58 = vadd.f32 %v7437_v28, %v15069_v6  ;;  %11639 = vmatpush3.bf16.msra.mxu0 %v12202_v44  ;;  %v8099_v54 = vmax.f32 %v7321_v49, 0.0  ;;  %v8101_v53 = vmax.f32 %v7434_v4, 0.0  ;;  %v12208_v4 = vld [vmem:[#allocation4 + $0x698] sm:$0xff]  }
 0xaa6   : > { %v8114_v22 = vmax.f32 %v7323_v35, 0.0  ;;  %v8116_v52 = vmax.f32 %v7436_v57, 0.0  ;;  %9295 = vmatmul.mubr.bf16.gmra.mrb[180].mxu1 %v15115_v41  ;;  %9392 = vmatmul.mubr.bf16.gmra.mrb[196].mxu0 %v15117_v37  ;;  %v15222_v41 = vld [vmem:[%s16085_s10 + $0x18] sm:$0xff] }
 0xaa7   : > { %v8115_v42 = vmax.f32 %v7325_v10, 0.0  ;;  %v8117_v36 = vmax.f32 %v7438_v58, 0.0  ;;  %9302 = vmatprep.mubr.bf16.mxu1 %v15139_v5  ;;  %9399 = vmatprep.mubr.bf16.mxu0 %v15141_v15  ;;  %v12197_v37 = vld [vmem:[#allocation4 + $0x618] sm:$0xff]   ;;  %v12199_v15 = vld [vmem:[#allocation4 + $0x660] sm:$0xff]  }
 0xaa8   : > { %v15215_v21 = vpack.c.bf16 %v8114_v22, %v8098_v29  ;;  %v15217_v44 = vpack.c.bf16 %v8116_v52, %v8100_v60  ;;  %11577 = vmatpush3.bf16.msra.mxu1 %v12194_v18  ;;  %11640 = vmatprep.subr.bf16.mxu0 %v12204_v1  ;;  %v15234_v29 = vrot.slane %v15222_v41, %v13267_v12 }
 0xaa9   : > { %v15224_v31 = vpack.c.bf16 %v8115_v42, %v8099_v54  ;;  %v15226_v19 = vpack.c.bf16 %v8117_v36, %v8101_v53  ;;  %v7328_v49 = vpop.f32.mrb[76].mxu1  ;;  %v7441_v5 = vpop.f32.mrb[92].mxu0  ;;  %11578 = vmatprep.subr.bf16.mxu1 %v12195_v34  ;;  %11641 = vmatpush3.bf16.msra.mxu0 %v12206_v25  ;;  %v15240_v52 = vrot.slane %v15222_v41, %v13270_v13  ;;  %v12201_v54 = vld [vmem:[#allocation4 + $0x620] sm:$0xff]  }
 0xaaa   : > { %v7329_v35 = vadd.f32 %v7328_v49, %v15053_v23  ;;  %v7442_v57 = vadd.f32 %v7441_v5, %v15059_v32  ;;  %v7330_v27 = vpop.f32.mrb[77].mxu1  ;;  %v7443_v28 = vpop.f32.mrb[93].mxu0  ;;  %11642 = vmatprep.subr.bf16.mxu0 %v12207_v39  ;;  %v15244_v39 = vrot.slane %v15222_v41, %v13278_v16  ;;  %v12211_v53 = vld [vmem:[#allocation4 + $0x6e0] sm:$0xff]  }
 0xaab   : > { %v7331_v18 = vadd.f32 %v7330_v27, %v15063_v56  ;;  %v7444_v1 = vadd.f32 %v7443_v28, %v15069_v6  ;;  %v7332_v10 = vpop.f32.mrb[78].mxu1  ;;  %v7445_v58 = vpop.f32.mrb[94].mxu0  ;;  %v12212_v13 = vld [vmem:[#allocation4 + $0x6a0] sm:$0xff]  }
 0xaac   : > { %v7333_v34 = vadd.f32 %v7332_v10, %v15053_v23  ;;  %v7446_v25 = vadd.f32 %v7445_v58, %v15059_v32  ;;  %v7334_v60 = vpop.f32.mrb[79].mxu1  ;;  %v7447_v22 = vpop.f32.mrb[95].mxu0  ;;  %11579 = vmatpush3.bf16.msra.mxu1 %v12197_v37  ;;  %v15250_v23 = vrot.slane %v15222_v41, %v13281_v20  ;;  %v12203_v32 = vld [vmem:[#allocation4 + $0x668] sm:$0xff]   ;;  %v8130_v36 = vmax.f32 %v7329_v35, 0.0 }
 0xaad   : > { %v7335_v12 = vadd.f32 %v7334_v60, %v15063_v56  ;;  %v7448_v42 = vadd.f32 %v7447_v22, %v15069_v6  ;;  %11580 = vmatprep.subr.bf16.mxu1 %v12199_v15  ;;  %11643 = vmatpush3.bf16.msra.mxu0 %v12208_v4  ;;  %v8132_v49 = vmax.f32 %v7442_v57, 0.0  ;;  %v12213_v37 = vld [vmem:[#allocation4 + $0x6e8] sm:$0xff]   ;;  %v8131_v56 = vmax.f32 %v7331_v18, 0.0  ;;  %v12209_v18 = vld [vmem:[#allocation4 + $0x670] sm:$0xff]  }
 0xaae   : > { %v8146_v5 = vmax.f32 %v7333_v34, 0.0  ;;  %v8148_v16 = vmax.f32 %v7446_v25, 0.0  ;;  %9303 = vmatmul.mubr.bf16.gmra.mrb[184].mxu1 %v15135_v30  ;;  %9400 = vmatmul.mubr.bf16.gmra.mrb[200].mxu0 %v15137_v7  ;;  %v8133_v27 = vmax.f32 %v7444_v1, 0.0  ;;  %v12205_v4 = vld [vmem:[#allocation4 + $0x628] sm:$0xff]  }
 0xaaf   : > { %v8147_v6 = vmax.f32 %v7335_v12, 0.0  ;;  %v8149_v28 = vmax.f32 %v7448_v42, 0.0  ;;  %9310 = vmatprep.mubr.bf16.mxu1 %v15159_v17  ;;  %9407 = vmatprep.mubr.bf16.mxu0 %v15161_v59  ;;  %v12214_v1 = vld [vmem:[#allocation4 + $0x6a8] sm:$0xff]  }
 0xab0   : > { %v15256_v20 = vpack.c.bf16 %v8146_v5, %v8130_v36  ;;  %v15258_v15 = vpack.c.bf16 %v8148_v16, %v8132_v49  ;;  %11581 = vmatpush3.bf16.msra.mxu1 %v12201_v54  ;;  %11644 = vmatprep.subr.bf16.mxu0 %v12211_v53  ;;  %v12215_v5 = vld [vmem:[#allocation4 + $0x678] sm:$0xff]   ;;  %v12218_v16 = vld [vmem:[#allocation4 + $0x6b0] sm:$0xff]  }
 0xab1   : > { %v15260_v35 = vpack.c.bf16 %v8147_v6, %v8131_v56  ;;  %v15262_v30 = vpack.c.bf16 %v8149_v28, %v8133_v27  ;;  %v7484_v7 = vpop.f32.mrb[80].mxu1  ;;  %v7597_v57 = vpop.f32.mrb[96].mxu0  ;;  %11582 = vmatprep.subr.bf16.mxu1 %v12203_v32  ;;  %11645 = vmatpush3.bf16.msra.mxu0 %v12212_v13  ;;  %v12210_v32 = vld [vmem:[#allocation4 + $0x630] sm:$0xff]   ;;  %v12219_v28 = vld [vmem:[#allocation4 + $0x6f8] sm:$0xff]  }
 0xab2   : > { %v7485_v17 = vadd.f32 %v7484_v7, %v15234_v29  ;;  %v7598_v59 = vadd.f32 %v7597_v57, %v15240_v52  ;;  %v7486_v10 = vpop.f32.mrb[81].mxu1  ;;  %v7599_v58 = vpop.f32.mrb[97].mxu0  ;;  %11646 = vmatprep.subr.bf16.mxu0 %v12213_v37  ;;  %v12217_v13 = vld [vmem:[#allocation4 + $0x6f0] sm:$0xff]  }
 0xab3   : > { %v7487_v34 = vadd.f32 %v7486_v10, %v15244_v39  ;;  %v7600_v25 = vadd.f32 %v7599_v58, %v15250_v23  ;;  %v7488_v60 = vpop.f32.mrb[82].mxu1  ;;  %v7601_v22 = vpop.f32.mrb[98].mxu0 }
 0xab4   : > { %v7489_v54 = vadd.f32 %v7488_v60, %v15234_v29  ;;  %v7602_v53 = vadd.f32 %v7601_v22, %v15240_v52  ;;  %v7490_v12 = vpop.f32.mrb[83].mxu1  ;;  %v7603_v42 = vpop.f32.mrb[99].mxu0  ;;  %11583 = vmatpush3.bf16.msra.mxu1 %v12205_v4  ;;  %v7910_v37 = vmax.f32 %v7485_v17, 0.0  ;;  %v7912_v56 = vmax.f32 %v7598_v59, 0.0  ;;  %v12216_v17 = vld [vmem:[#allocation4 + $0x638] sm:$0xff]  }
 0xab5   : > { %v7491_v36 = vadd.f32 %v7490_v12, %v15244_v39  ;;  %v7604_v49 = vadd.f32 %v7603_v42, %v15250_v23  ;;  %11584 = vmatprep.subr.bf16.mxu1 %v12209_v18  ;;  %11647 = vmatpush3.bf16.msra.mxu0 %v12214_v1  ;;  %v7911_v4 = vmax.f32 %v7487_v34, 0.0  ;;  %v7913_v7 = vmax.f32 %v7600_v25, 0.0  ;;  %v12220_v34 = vld [vmem:[#allocation4 + $0x6b8] sm:$0xff]   ;;  %v12221_v25 = vld [vmem:[#allocation4 + $0x740] sm:$0xff]  }
 0xab6   : > { %v7926_v27 = vmax.f32 %v7489_v54, 0.0  ;;  %v7928_v6 = vmax.f32 %v7602_v53, 0.0  ;;  %9311 = vmatmul.mubr.bf16.gmra.mrb[188].mxu1 %v15155_v62  ;;  %9408 = vmatmul.mubr.bf16.gmra.mrb[204].mxu0 %v15157_v61 }
 0xab7   : > { %v7927_v57 = vmax.f32 %v7491_v36, 0.0  ;;  %v7929_v10 = vmax.f32 %v7604_v49, 0.0  ;;  %9318 = vmatprep.mubr.bf16.mxu1 %v15179_v2  ;;  %9415 = vmatprep.mubr.bf16.mxu0 %v15181_v50 }
 0xab8   : > { %v15276_v18 = vpack.c.bf16 %v7926_v27, %v7910_v37  ;;  %v15278_v1 = vpack.c.bf16 %v7928_v6, %v7912_v56  ;;  %11585 = vmatpush3.bf16.msra.mxu1 %v12210_v32  ;;  %11648 = vmatprep.subr.bf16.mxu0 %v12217_v13 }
 0xab9   : > { %v15280_v59 = vpack.c.bf16 %v7927_v57, %v7911_v4  ;;  %v15282_v62 = vpack.c.bf16 %v7929_v10, %v7913_v7  ;;  %v7494_v61 = vpop.f32.mrb[84].mxu1  ;;  %v7607_v58 = vpop.f32.mrb[100].mxu0  ;;  %11586 = vmatprep.subr.bf16.mxu1 %v12215_v5  ;;  %11649 = vmatpush3.bf16.msra.mxu0 %v12218_v16  ;;  %v15290_v5 = vld [vmem:[#allocation4 + $0x7c0] sm:$0xff]  }
 0xaba   : > { %v7495_v2 = vadd.f32 %v7494_v61, %v15234_v29  ;;  %v7608_v50 = vadd.f32 %v7607_v58, %v15240_v52  ;;  %v7496_v60 = vpop.f32.mrb[85].mxu1  ;;  %v7609_v22 = vpop.f32.mrb[101].mxu0  ;;  %11650 = vmatprep.subr.bf16.mxu0 %v12219_v28 }
 0xabb   : > { %v7497_v54 = vadd.f32 %v7496_v60, %v15244_v39  ;;  %v7610_v53 = vadd.f32 %v7609_v22, %v15250_v23  ;;  %v7498_v12 = vpop.f32.mrb[86].mxu1  ;;  %v7611_v42 = vpop.f32.mrb[102].mxu0 }
 0xabc   : > { %v7499_v32 = vadd.f32 %v7498_v12, %v15234_v29  ;;  %v7612_v13 = vadd.f32 %v7611_v42, %v15240_v52  ;;  %v7500_v36 = vpop.f32.mrb[87].mxu1  ;;  %v7613_v49 = vpop.f32.mrb[103].mxu0  ;;  %11587 = vmatpush3.bf16.msra.mxu1 %v12216_v17  ;;  %v7942_v56 = vmax.f32 %v7495_v2, 0.0  ;;  %v7944_v27 = vmax.f32 %v7608_v50, 0.0 }
 0xabd   : > { %v7501_v16 = vadd.f32 %v7500_v36, %v15244_v39  ;;  %v7614_v37 = vadd.f32 %v7613_v49, %v15250_v23  ;;  %11651 = vmatpush3.bf16.msra.mxu0 %v12220_v34  ;;  %11700 = vmatprep.subr.bf16.mxu1 %v12221_v25  ;;  %v7943_v4 = vmax.f32 %v7497_v54, 0.0  ;;  %v7945_v7 = vmax.f32 %v7610_v53, 0.0 }
 0xabe   : > { %v7958_v6 = vmax.f32 %v7499_v32, 0.0  ;;  %v7960_v28 = vmax.f32 %v7612_v13, 0.0  ;;  %9319 = vmatmul.mubr.bf16.gmra.mrb[192].mxu1 %v15175_v11  ;;  %9416 = vmatmul.mubr.bf16.gmra.mrb[208].mxu0 %v15177_v45 }
 0xabf   : > { %v7959_v57 = vmax.f32 %v7501_v16, 0.0  ;;  %v7961_v10 = vmax.f32 %v7614_v37, 0.0  ;;  %9326 = vmatprep.mubr.bf16.mxu1 %v15199_v47  ;;  %9423 = vmatprep.mubr.bf16.mxu0 %v15201_v63 }
 0xac0   : > { %v15298_v17 = vpack.c.bf16 %v7958_v6, %v7942_v56  ;;  %v15300_v61 = vpack.c.bf16 %v7960_v28, %v7944_v27  ;;  %11764 = vmatprep.subr.bf16.mxu0 %v15290_v5 }
 0xac1   : > { %v15303_v58 = vpack.c.bf16 %v7959_v57, %v7943_v4  ;;  %v15305_v34 = vpack.c.bf16 %v7961_v10, %v7945_v7  ;;  %v7504_v11 = vpop.f32.mrb[88].mxu1  ;;  %v7617_v45 = vpop.f32.mrb[104].mxu0 }
 0xac2   : > { %v7505_v25 = vadd.f32 %v7504_v11, %v15234_v29  ;;  %v7618_v2 = vadd.f32 %v7617_v45, %v15240_v52  ;;  %v7506_v50 = vpop.f32.mrb[89].mxu1  ;;  %v7619_v47 = vpop.f32.mrb[105].mxu0 }
 0xac3   : > { %v7507_v63 = vadd.f32 %v7506_v50, %v15244_v39  ;;  %v7620_v60 = vadd.f32 %v7619_v47, %v15250_v23  ;;  %v7508_v22 = vpop.f32.mrb[90].mxu1  ;;  %v7621_v54 = vpop.f32.mrb[106].mxu0 }
 0xac4   : > { %v7509_v53 = vadd.f32 %v7508_v22, %v15234_v29  ;;  %v7622_v12 = vadd.f32 %v7621_v54, %v15240_v52  ;;  %v7510_v42 = vpop.f32.mrb[91].mxu1  ;;  %v7623_v32 = vpop.f32.mrb[107].mxu0  ;;  %v7974_v49 = vmax.f32 %v7505_v25, 0.0  ;;  %v7976_v16 = vmax.f32 %v7618_v2, 0.0 }
 0xac5   : > { %v7511_v13 = vadd.f32 %v7510_v42, %v15244_v39  ;;  %v7624_v36 = vadd.f32 %v7623_v32, %v15250_v23  ;;  %v7975_v27 = vmax.f32 %v7507_v63, 0.0  ;;  %v7977_v6 = vmax.f32 %v7620_v60, 0.0 }
 0xac6   : > { %v7990_v37 = vmax.f32 %v7509_v53, 0.0  ;;  %v7992_v56 = vmax.f32 %v7622_v12, 0.0  ;;  %9327 = vmatmul.mubr.bf16.gmra.mrb[196].mxu1 %v15194_v0  ;;  %9424 = vmatmul.mubr.bf16.gmra.mrb[212].mxu0 %v15196_v38 }
 0xac7   : > { %v7991_v28 = vmax.f32 %v7511_v13, 0.0  ;;  %v7993_v4 = vmax.f32 %v7624_v36, 0.0  ;;  %9334 = vmatprep.mubr.bf16.mxu1 %v15224_v31  ;;  %9431 = vmatprep.mubr.bf16.mxu0 %v15226_v19 }
 0xac8   : > { %v15319_v7 = vpack.c.bf16 %v7990_v37, %v7974_v49  ;;  %v15321_v57 = vpack.c.bf16 %v7992_v56, %v7976_v16 }
 0xac9   : > { %v15323_v10 = vpack.c.bf16 %v7991_v28, %v7975_v27  ;;  %v15325_v11 = vpack.c.bf16 %v7993_v4, %v7977_v6  ;;  %v7514_v45 = vpop.f32.mrb[92].mxu1  ;;  %v7627_v0 = vpop.f32.mrb[108].mxu0 }
 0xaca   : > { %v7515_v38 = vadd.f32 %v7514_v45, %v15234_v29  ;;  %v7628_v25 = vadd.f32 %v7627_v0, %v15240_v52  ;;  %v7516_v2 = vpop.f32.mrb[93].mxu1  ;;  %v7629_v50 = vpop.f32.mrb[109].mxu0 }
 0xacb   : > { %v7517_v31 = vadd.f32 %v7516_v2, %v15244_v39  ;;  %v7630_v19 = vadd.f32 %v7629_v50, %v15250_v23  ;;  %v7518_v47 = vpop.f32.mrb[94].mxu1  ;;  %v7631_v63 = vpop.f32.mrb[110].mxu0 }
 0xacc   : > { %v7519_v60 = vadd.f32 %v7518_v47, %v15234_v29  ;;  %v7632_v22 = vadd.f32 %v7631_v63, %v15240_v52  ;;  %v7520_v54 = vpop.f32.mrb[95].mxu1  ;;  %v7633_v53 = vpop.f32.mrb[111].mxu0  ;;  %v8006_v32 = vmax.f32 %v7515_v38, 0.0  ;;  %v8008_v13 = vmax.f32 %v7628_v25, 0.0 }
 0xacd   : > { %v7521_v12 = vadd.f32 %v7520_v54, %v15244_v39  ;;  %v7634_v42 = vadd.f32 %v7633_v53, %v15250_v23  ;;  %v8007_v16 = vmax.f32 %v7517_v31, 0.0  ;;  %v8009_v37 = vmax.f32 %v7630_v19, 0.0 }
 0xace   : > { %v8022_v36 = vmax.f32 %v7519_v60, 0.0  ;;  %v8024_v49 = vmax.f32 %v7632_v22, 0.0  ;;  %9335 = vmatmul.mubr.bf16.gmra.mrb[200].mxu1 %v15215_v21  ;;  %9432 = vmatmul.mubr.bf16.gmra.mrb[216].mxu0 %v15217_v44 }
 0xacf   : > { %v8023_v56 = vmax.f32 %v7521_v12, 0.0  ;;  %v8025_v27 = vmax.f32 %v7634_v42, 0.0  ;;  %9342 = vmatprep.mubr.bf16.mxu1 %v15260_v35  ;;  %9439 = vmatprep.mubr.bf16.mxu0 %v15262_v30 }
 0xad0   : > { %v15339_v6 = vpack.c.bf16 %v8022_v36, %v8006_v32  ;;  %v15341_v28 = vpack.c.bf16 %v8024_v49, %v8008_v13 }
 0xad1   : > { %v15343_v4 = vpack.c.bf16 %v8023_v56, %v8007_v16  ;;  %v15345_v45 = vpack.c.bf16 %v8025_v27, %v8009_v37  ;;  %v7524_v0 = vpop.f32.mrb[96].mxu1  ;;  %v7637_v21 = vpop.f32.mrb[112].mxu0 }
 0xad2   : > { %v7525_v44 = vadd.f32 %v7524_v0, %v15234_v29  ;;  %v7638_v38 = vadd.f32 %v7637_v21, %v15240_v52  ;;  %v7526_v25 = vpop.f32.mrb[97].mxu1  ;;  %v7639_v2 = vpop.f32.mrb[113].mxu0 }
 0xad3   : > { %v7527_v35 = vadd.f32 %v7526_v25, %v15244_v39  ;;  %v7640_v30 = vadd.f32 %v7639_v2, %v15250_v23  ;;  %v7528_v50 = vpop.f32.mrb[98].mxu1  ;;  %v7641_v31 = vpop.f32.mrb[114].mxu0 }
 0xad4   : > { %v7529_v19 = vadd.f32 %v7528_v50, %v15234_v29  ;;  %v7642_v47 = vadd.f32 %v7641_v31, %v15240_v52  ;;  %v7530_v63 = vpop.f32.mrb[99].mxu1  ;;  %v7643_v60 = vpop.f32.mrb[115].mxu0  ;;  %v8038_v53 = vmax.f32 %v7525_v44, 0.0  ;;  %v8040_v12 = vmax.f32 %v7638_v38, 0.0 }
 0xad5   : > { %v7531_v22 = vadd.f32 %v7530_v63, %v15244_v39  ;;  %v7644_v54 = vadd.f32 %v7643_v60, %v15250_v23  ;;  %v8039_v13 = vmax.f32 %v7527_v35, 0.0  ;;  %v8041_v36 = vmax.f32 %v7640_v30, 0.0  ;;  %v12222_v30 = vld [vmem:[#allocation4 + $0x700] sm:$0xff]   ;;  %v12223_v63 = vld [vmem:[#allocation4 + $0x748] sm:$0xff]  }
 0xad6   : > { %v8054_v42 = vmax.f32 %v7529_v19, 0.0  ;;  %v8056_v32 = vmax.f32 %v7642_v47, 0.0  ;;  %9343 = vmatmul.mubr.bf16.gmra.mrb[204].mxu1 %v15256_v20  ;;  %9440 = vmatmul.mubr.bf16.gmra.mrb[220].mxu0 %v15258_v15 }
 0xad7   : > { %v8055_v49 = vmax.f32 %v7531_v22, 0.0  ;;  %v8057_v16 = vmax.f32 %v7644_v54, 0.0  ;;  %9480 = vmatprep.mubr.bf16.mxu1 %v15280_v59  ;;  %9577 = vmatprep.mubr.bf16.mxu0 %v15282_v62  ;;  %v15375_v54 = vld [vmem:[#allocation4 + $0x780] sm:$0xff]  }
 0xad8   : > { %v15359_v37 = vpack.c.bf16 %v8054_v42, %v8038_v53  ;;  %v15361_v56 = vpack.c.bf16 %v8056_v32, %v8040_v12 }
 0xad9   : > { %v15363_v27 = vpack.c.bf16 %v8055_v49, %v8039_v13  ;;  %v15365_v0 = vpack.c.bf16 %v8057_v16, %v8041_v36  ;;  %v7534_v21 = vpop.f32.mrb[100].mxu1  ;;  %v7647_v20 = vpop.f32.mrb[116].mxu0  ;;  %v15379_v13 = vld [vmem:[#allocation4 + $0x7c8] sm:$0xff]  }
 0xada   : > { %v7535_v15 = vadd.f32 %v7534_v21, %v15234_v29  ;;  %v7648_v44 = vadd.f32 %v7647_v20, %v15240_v52  ;;  %v7536_v38 = vpop.f32.mrb[101].mxu1  ;;  %v7649_v25 = vpop.f32.mrb[117].mxu0  ;;  %v12224_v20 = vld [vmem:[#allocation4 + $0x708] sm:$0xff]  }
 0xadb   : > { %v7537_v59 = vadd.f32 %v7536_v38, %v15244_v39  ;;  %v7650_v62 = vadd.f32 %v7649_v25, %v15250_v23  ;;  %v7538_v2 = vpop.f32.mrb[102].mxu1  ;;  %v7651_v35 = vpop.f32.mrb[118].mxu0 }
 0xadc   : > { %v7539_v50 = vadd.f32 %v7538_v2, %v15234_v29  ;;  %v7652_v31 = vadd.f32 %v7651_v35, %v15240_v52  ;;  %v7540_v19 = vpop.f32.mrb[103].mxu1  ;;  %v7653_v47 = vpop.f32.mrb[119].mxu0  ;;  %v8070_v53 = vmax.f32 %v7535_v15, 0.0  ;;  %v8072_v12 = vmax.f32 %v7648_v44, 0.0 }
 0xadd   : > { %v7541_v60 = vadd.f32 %v7540_v19, %v15244_v39  ;;  %v7654_v22 = vadd.f32 %v7653_v47, %v15250_v23  ;;  %v8071_v36 = vmax.f32 %v7537_v59, 0.0  ;;  %v8073_v49 = vmax.f32 %v7650_v62, 0.0  ;;  %v15392_v62 = vld [vmem:[#allocation4 + $0x788] sm:$0xff]  }
 0xade   : > { %v8086_v42 = vmax.f32 %v7539_v50, 0.0  ;;  %v8088_v32 = vmax.f32 %v7652_v31, 0.0  ;;  %9481 = vmatmul.mubr.bf16.vlgmr.msra.gmra.mrb[208].mxu1 %v15276_v18  ;;  %9578 = vmatmul.mubr.bf16.vlgmr.msra.gmra.mrb[224].mxu0 %v15278_v1  ;;  %v12225_v18 = vld [vmem:[#allocation4 + $0x750] sm:$0xff]  }
 0xadf   : > { %v8087_v16 = vmax.f32 %v7541_v60, 0.0  ;;  %v8089_v21 = vmax.f32 %v7654_v22, 0.0  ;;  %11701 = vmatpush3.bf16.msra.mxu1 %v12222_v30  ;;  %9488 = vmatprep.mubr.bf16.mxu1 %v15303_v58 }
 0xae0   : > { %v15382_v38 = vpack.c.bf16 %v8086_v42, %v8070_v53  ;;  %v15384_v15 = vpack.c.bf16 %v8088_v32, %v8072_v12  ;;  %9585 = vmatprep.mubr.bf16.mxu0 %v15305_v34  ;;  %11702 = vmatprep.subr.bf16.mxu1 %v12223_v63  ;;  %v12226_v53 = vld [vmem:[#allocation4 + $0x710] sm:$0xff]  }
 0xae1   : > { %v15387_v44 = vpack.c.bf16 %v8087_v16, %v8071_v36  ;;  %v15389_v1 = vpack.c.bf16 %v8089_v21, %v8073_v49  ;;  %v7544_v25 = vpop.f32.mrb[104].mxu1  ;;  %v7657_v59 = vpop.f32.mrb[120].mxu0  ;;  %11765 = vmatpush3.bf16.msra.mxu0 %v15375_v54  ;;  %v15401_v12 = vld [vmem:[#allocation4 + $0x7d0] sm:$0xff]   ;;  %v12227_v36 = vld [vmem:[#allocation4 + $0x758] sm:$0xff]  }
 0xae2   : > { %v7545_v58 = vadd.f32 %v7544_v25, %v15234_v29  ;;  %v7658_v2 = vadd.f32 %v7657_v59, %v15240_v52  ;;  %v7546_v35 = vpop.f32.mrb[105].mxu1  ;;  %v7659_v30 = vpop.f32.mrb[121].mxu0  ;;  %11766 = vmatprep.subr.bf16.mxu0 %v15379_v13  ;;  %v15406_v49 = vld [vmem:[#allocation4 + $0x790] sm:$0xff]  }
 0xae3   : > { %v7547_v34 = vadd.f32 %v7546_v35, %v15244_v39  ;;  %v7660_v50 = vadd.f32 %v7659_v30, %v15250_v23  ;;  %v7548_v31 = vpop.f32.mrb[106].mxu1  ;;  %v7661_v19 = vpop.f32.mrb[122].mxu0  ;;  %11703 = vmatpush3.bf16.msra.mxu1 %v12224_v20 }
 0xae4   : > { %v7549_v47 = vadd.f32 %v7548_v31, %v15234_v29  ;;  %v7662_v63 = vadd.f32 %v7661_v19, %v15240_v52  ;;  %v7550_v60 = vpop.f32.mrb[107].mxu1  ;;  %v7663_v22 = vpop.f32.mrb[123].mxu0  ;;  %11704 = vmatprep.subr.bf16.mxu1 %v12225_v18  ;;  %v8102_v16 = vmax.f32 %v7545_v58, 0.0  ;;  %v8104_v21 = vmax.f32 %v7658_v2, 0.0  ;;  %v15410_v18 = vld [vmem:[#allocation4 + $0x7d8] sm:$0xff]  }
 0xae5   : > { %v7551_v42 = vadd.f32 %v7550_v60, %v15244_v39  ;;  %v7664_v32 = vadd.f32 %v7663_v22, %v15250_v23  ;;  %11767 = vmatpush3.bf16.msra.mxu0 %v15392_v62  ;;  %v8103_v59 = vmax.f32 %v7547_v34, 0.0  ;;  %v8105_v35 = vmax.f32 %v7660_v50, 0.0  ;;  %v12229_v2 = vld [vmem:[#allocation4 + $0x718] sm:$0xff]  }
 0xae6   : > { %v8118_v20 = vmax.f32 %v7549_v47, 0.0  ;;  %v8120_v25 = vmax.f32 %v7662_v63, 0.0  ;;  %9489 = vmatmul.mubr.bf16.gmra.mrb[212].mxu1 %v15298_v17  ;;  %9586 = vmatmul.mubr.bf16.gmra.mrb[228].mxu0 %v15300_v61  ;;  %v12231_v47 = vld [vmem:[#allocation4 + $0x760] sm:$0xff]  }
 0xae7   : > { %v8119_v30 = vmax.f32 %v7551_v42, 0.0  ;;  %v8121_v31 = vmax.f32 %v7664_v32, 0.0  ;;  %9496 = vmatprep.mubr.bf16.mxu1 %v15323_v10  ;;  %9593 = vmatprep.mubr.bf16.mxu0 %v15325_v11  ;;  %v15424_v10 = vld [vmem:[#allocation4 + $0x798] sm:$0xff]  }
 0xae8   : > { %v15414_v19 = vpack.c.bf16 %v8118_v20, %v8102_v16  ;;  %v15416_v58 = vpack.c.bf16 %v8120_v25, %v8104_v21  ;;  %11705 = vmatpush3.bf16.msra.mxu1 %v12226_v53  ;;  %11768 = vmatprep.subr.bf16.mxu0 %v15401_v12 }
 0xae9   : > { %v15419_v17 = vpack.c.bf16 %v8119_v30, %v8103_v59  ;;  %v15421_v61 = vpack.c.bf16 %v8121_v31, %v8105_v35  ;;  %v7554_v34 = vpop.f32.mrb[108].mxu1  ;;  %v7667_v50 = vpop.f32.mrb[124].mxu0  ;;  %11706 = vmatprep.subr.bf16.mxu1 %v12227_v36  ;;  %11769 = vmatpush3.bf16.msra.mxu0 %v15406_v49  ;;  %v15433_v36 = vrot.slane %v15222_v41, %v13432_v51  ;;  %v12233_v31 = vld [vmem:[#allocation4 + $0x720] sm:$0xff]  }
 0xaea   : > { %v7555_v11 = vadd.f32 %v7554_v34, %v15234_v29  ;;  %v7668_v63 = vadd.f32 %v7667_v50, %v15240_v52  ;;  %v7556_v60 = vpop.f32.mrb[109].mxu1  ;;  %v7669_v22 = vpop.f32.mrb[125].mxu0  ;;  %11770 = vmatprep.subr.bf16.mxu0 %v15410_v18  ;;  %v15439_v35 = vrot.slane %v15222_v41, %v13435_v55  ;;  %v15443_v30 = vrot.slane %v15222_v41, %v13442_v8  ;;  %v15445_v34 = vld [vmem:[#allocation4 + $0x7e0] sm:$0xff]   ;;  %v12235_v50 = vld [vmem:[#allocation4 + $0x768] sm:$0xff]  }
 0xaeb   : > { %v7557_v53 = vadd.f32 %v7556_v60, %v15244_v39  ;;  %v7670_v42 = vadd.f32 %v7669_v22, %v15250_v23  ;;  %v7558_v32 = vpop.f32.mrb[110].mxu1  ;;  %v7671_v16 = vpop.f32.mrb[126].mxu0  ;;  %v15454_v55 = vld [vmem:[#allocation4 + $0x7a0] sm:$0xff]  }
 0xaec   : > { %v7559_v21 = vadd.f32 %v7558_v32, %v15234_v29  ;;  %v7672_v20 = vadd.f32 %v7671_v16, %v15240_v52  ;;  %v7560_v25 = vpop.f32.mrb[111].mxu1  ;;  %v7673_v59 = vpop.f32.mrb[127].mxu0  ;;  %11707 = vmatpush3.bf16.msra.mxu1 %v12229_v2  ;;  %v15451_v52 = vrot.slane %v15222_v41, %v13449_v46  ;;  %v8134_v8 = vmax.f32 %v7555_v11, 0.0  ;;  %v12241_v16 = vld [vmem:[#allocation4 + $0x770] sm:$0xff]  }
 0xaed   : > { %v7561_v51 = vadd.f32 %v7560_v25, %v15244_v39  ;;  %v7674_v29 = vadd.f32 %v7673_v59, %v15250_v23  ;;  %11708 = vmatprep.subr.bf16.mxu1 %v12231_v47  ;;  %11771 = vmatpush3.bf16.msra.mxu0 %v15424_v10  ;;  %v8136_v60 = vmax.f32 %v7668_v63, 0.0  ;;  %v15458_v39 = vld [vmem:[#allocation4 + $0x7e8] sm:$0xff]   ;;  %v8135_v23 = vmax.f32 %v7557_v53, 0.0 }
 0xaee   : > { %v8150_v2 = vmax.f32 %v7559_v21, 0.0  ;;  %v8152_v22 = vmax.f32 %v7672_v20, 0.0  ;;  %9497 = vmatmul.mubr.bf16.gmra.mrb[216].mxu1 %v15319_v7  ;;  %9594 = vmatmul.mubr.bf16.gmra.mrb[232].mxu0 %v15321_v57  ;;  %v8137_v32 = vmax.f32 %v7670_v42, 0.0  ;;  %v12237_v63 = vld [vmem:[#allocation4 + $0x728] sm:$0xff]  }
 0xaef   : > { %v8151_v46 = vmax.f32 %v7561_v51, 0.0  ;;  %v8153_v41 = vmax.f32 %v7674_v29, 0.0  ;;  %9504 = vmatprep.mubr.bf16.mxu1 %v15343_v4  ;;  %9601 = vmatprep.mubr.bf16.mxu0 %v15345_v45  ;;  %v15472_v4 = vld [vmem:[#allocation4 + $0x7a8] sm:$0xff]  }
 0xaf0   : > { %v15462_v47 = vpack.c.bf16 %v8150_v2, %v8134_v8  ;;  %v15464_v11 = vpack.c.bf16 %v8152_v22, %v8136_v60  ;;  %11709 = vmatpush3.bf16.msra.mxu1 %v12233_v31  ;;  %11772 = vmatprep.subr.bf16.mxu0 %v15445_v34  ;;  %v12242_v22 = vld [vmem:[#allocation4 + $0x730] sm:$0xff]  }
 0xaf1   : > { %v15467_v7 = vpack.c.bf16 %v8151_v46, %v8135_v23  ;;  %v15469_v57 = vpack.c.bf16 %v8153_v41, %v8137_v32  ;;  %v7710_v53 = vpop.f32.mrb[112].mxu1  ;;  %v7823_v42 = vpop.f32.mrb[128].mxu0  ;;  %11710 = vmatprep.subr.bf16.mxu1 %v12235_v50  ;;  %11773 = vmatpush3.bf16.msra.mxu0 %v15454_v55  ;;  %v15481_v23 = vld [vmem:[#allocation4 + $0x7f0] sm:$0xff]   ;;  %v12247_v41 = vld [vmem:[#allocation4 + $0x778] sm:$0xff]  }
 0xaf2   : > { %v7711_v45 = vadd.f32 %v7710_v53, %v15433_v36  ;;  %v7824_v21 = vadd.f32 %v7823_v42, %v15439_v35  ;;  %v7712_v20 = vpop.f32.mrb[113].mxu1  ;;  %v7825_v25 = vpop.f32.mrb[129].mxu0  ;;  %11774 = vmatprep.subr.bf16.mxu0 %v15458_v39  ;;  %v15486_v53 = vld [vmem:[#allocation4 + $0x7b0] sm:$0xff]  }
 0xaf3   : > { %v7713_v59 = vadd.f32 %v7712_v20, %v15443_v30  ;;  %v7826_v31 = vadd.f32 %v7825_v25, %v15451_v52  ;;  %v7714_v51 = vpop.f32.mrb[114].mxu1  ;;  %v7827_v29 = vpop.f32.mrb[130].mxu0 }
 0xaf4   : > { %v7715_v50 = vadd.f32 %v7714_v51, %v15433_v36  ;;  %v7828_v8 = vadd.f32 %v7827_v29, %v15439_v35  ;;  %v7716_v60 = vpop.f32.mrb[115].mxu1  ;;  %v7829_v2 = vpop.f32.mrb[131].mxu0  ;;  %11711 = vmatpush3.bf16.msra.mxu1 %v12237_v63  ;;  %v7914_v42 = vmax.f32 %v7711_v45, 0.0  ;;  %v7916_v20 = vmax.f32 %v7824_v21, 0.0  ;;  %v15490_v63 = vld [vmem:[#allocation4 + $0x7f8] sm:$0xff]  }
 0xaf5   : > { %v7717_v32 = vadd.f32 %v7716_v60, %v15443_v30  ;;  %v7830_v46 = vadd.f32 %v7829_v2, %v15451_v52  ;;  %11712 = vmatprep.subr.bf16.mxu1 %v12241_v16  ;;  %11775 = vmatpush3.bf16.msra.mxu0 %v15472_v4  ;;  %v7915_v29 = vmax.f32 %v7713_v59, 0.0  ;;  %v7917_v60 = vmax.f32 %v7826_v31, 0.0  ;;  %v12248_v21 = vld [vmem:[#allocation4 + $0x738] sm:$0xff]  }
 0xaf6   : > { %v7930_v25 = vmax.f32 %v7715_v50, 0.0  ;;  %v7932_v51 = vmax.f32 %v7828_v8, 0.0  ;;  %9505 = vmatmul.mubr.bf16.gmra.mrb[220].mxu1 %v15339_v6  ;;  %9602 = vmatmul.mubr.bf16.gmra.mrb[236].mxu0 %v15341_v28 }
 0xaf7   : > { %v7931_v9 = vmax.f32 %v7717_v32, 0.0  ;;  %v7933_v2 = vmax.f32 %v7830_v46, 0.0  ;;  %9512 = vmatprep.mubr.bf16.mxu1 %v15363_v27  ;;  %9609 = vmatprep.mubr.bf16.mxu0 %v15365_v0  ;;  %v15504_v27 = vld [vmem:[#allocation4 + $0x7b8] sm:$0xff]  }
 0xaf8   : > { %v15494_v16 = vpack.c.bf16 %v7930_v25, %v7914_v42  ;;  %v15496_v45 = vpack.c.bf16 %v7932_v51, %v7916_v20  ;;  %11713 = vmatpush3.bf16.msra.mxu1 %v12242_v22  ;;  %11776 = vmatprep.subr.bf16.mxu0 %v15481_v23 }
 0xaf9   : > { %v15499_v6 = vpack.c.bf16 %v7931_v9, %v7915_v29  ;;  %v15501_v28 = vpack.c.bf16 %v7933_v2, %v7917_v60  ;;  %v7720_v59 = vpop.f32.mrb[116].mxu1  ;;  %v7833_v31 = vpop.f32.mrb[132].mxu0  ;;  %11714 = vmatprep.subr.bf16.mxu1 %v12247_v41  ;;  %11777 = vmatpush3.bf16.msra.mxu0 %v15486_v53 }
 0xafa   : > { %v7721_v0 = vadd.f32 %v7720_v59, %v15433_v36  ;;  %v7834_v50 = vadd.f32 %v7833_v31, %v15439_v35  ;;  %v7722_v8 = vpop.f32.mrb[117].mxu1  ;;  %v7835_v22 = vpop.f32.mrb[133].mxu0  ;;  %11778 = vmatprep.subr.bf16.mxu0 %v15490_v63 }
 0xafb   : > { %v7723_v9 = vadd.f32 %v7722_v8, %v15443_v30  ;;  %v7836_v32 = vadd.f32 %v7835_v22, %v15451_v52  ;;  %v7724_v46 = vpop.f32.mrb[118].mxu1  ;;  %v7837_v42 = vpop.f32.mrb[134].mxu0 }
 0xafc   : > { %v7725_v41 = vadd.f32 %v7724_v46, %v15433_v36  ;;  %v7838_v20 = vadd.f32 %v7837_v42, %v15439_v35  ;;  %v7726_v25 = vpop.f32.mrb[119].mxu1  ;;  %v7839_v51 = vpop.f32.mrb[135].mxu0  ;;  %11715 = vmatpush3.bf16.msra.mxu1 %v12248_v21  ;;  %v7946_v2 = vmax.f32 %v7721_v0, 0.0  ;;  %v7948_v59 = vmax.f32 %v7834_v50, 0.0 }
 0xafd   : > { %v7727_v29 = vadd.f32 %v7726_v25, %v15443_v30  ;;  %v7840_v60 = vadd.f32 %v7839_v51, %v15451_v52  ;;  %11779 = vmatpush3.bf16.msra.mxu0 %v15504_v27  ;;  %11924 = vmatprep.subr.bf16.mxu1 %v15290_v5  ;;  %v7947_v22 = vmax.f32 %v7723_v9, 0.0  ;;  %v7949_v46 = vmax.f32 %v7836_v32, 0.0 }
 0xafe   : > { %v7962_v31 = vmax.f32 %v7725_v41, 0.0  ;;  %v7964_v8 = vmax.f32 %v7838_v20, 0.0  ;;  %9513 = vmatmul.mubr.bf16.gmra.mrb[224].mxu1 %v15359_v37  ;;  %9610 = vmatmul.mubr.bf16.gmra.mrb[240].mxu0 %v15361_v56 }
 0xaff   : > { %v7963_v42 = vmax.f32 %v7727_v29, 0.0  ;;  %v7965_v21 = vmax.f32 %v7840_v60, 0.0  ;;  %9520 = vmatprep.mubr.bf16.mxu1 %v15387_v44  ;;  %9617 = vmatprep.mubr.bf16.mxu0 %v15389_v1 }
 0xb00   : > { %v15521_v25 = vpack.c.bf16 %v7962_v31, %v7946_v2  ;;  %v15523_v51 = vpack.c.bf16 %v7964_v8, %v7948_v59 }
 0xb01   : > { %v15525_v5 = vpack.c.bf16 %v7963_v42, %v7947_v22  ;;  %v15527_v0 = vpack.c.bf16 %v7965_v21, %v7949_v46  ;;  %v7730_v50 = vpop.f32.mrb[120].mxu1  ;;  %v7843_v37 = vpop.f32.mrb[136].mxu0 }
 0xb02   : > { %v7731_v56 = vadd.f32 %v7730_v50, %v15433_v36  ;;  %v7844_v9 = vadd.f32 %v7843_v37, %v15439_v35  ;;  %v7732_v32 = vpop.f32.mrb[121].mxu1  ;;  %v7845_v41 = vpop.f32.mrb[137].mxu0 }
 0xb03   : > { %v7733_v44 = vadd.f32 %v7732_v32, %v15443_v30  ;;  %v7846_v1 = vadd.f32 %v7845_v41, %v15451_v52  ;;  %v7734_v20 = vpop.f32.mrb[122].mxu1  ;;  %v7847_v29 = vpop.f32.mrb[138].mxu0 }
 0xb04   : > { %v7735_v60 = vadd.f32 %v7734_v20, %v15433_v36  ;;  %v7848_v2 = vadd.f32 %v7847_v29, %v15439_v35  ;;  %v7736_v59 = vpop.f32.mrb[123].mxu1  ;;  %v7849_v31 = vpop.f32.mrb[139].mxu0  ;;  %v7978_v46 = vmax.f32 %v7731_v56, 0.0  ;;  %v7980_v42 = vmax.f32 %v7844_v9, 0.0 }
 0xb05   : > { %v7737_v8 = vadd.f32 %v7736_v59, %v15443_v30  ;;  %v7850_v22 = vadd.f32 %v7849_v31, %v15451_v52  ;;  %v7979_v37 = vmax.f32 %v7733_v44, 0.0  ;;  %v7981_v32 = vmax.f32 %v7846_v1, 0.0 }
 0xb06   : > { %v7994_v21 = vmax.f32 %v7735_v60, 0.0  ;;  %v7996_v50 = vmax.f32 %v7848_v2, 0.0  ;;  %9521 = vmatmul.mubr.bf16.gmra.mrb[228].mxu1 %v15382_v38  ;;  %9618 = vmatmul.mubr.bf16.gmra.mrb[244].mxu0 %v15384_v15 }
 0xb07   : > { %v7995_v41 = vmax.f32 %v7737_v8, 0.0  ;;  %v7997_v20 = vmax.f32 %v7850_v22, 0.0  ;;  %9528 = vmatprep.mubr.bf16.mxu1 %v15419_v17  ;;  %9625 = vmatprep.mubr.bf16.mxu0 %v15421_v61 }
 0xb08   : > { %v15541_v29 = vpack.c.bf16 %v7994_v21, %v7978_v46  ;;  %v15543_v59 = vpack.c.bf16 %v7996_v50, %v7980_v42 }
 0xb09   : > { %v15545_v56 = vpack.c.bf16 %v7995_v41, %v7979_v37  ;;  %v15547_v9 = vpack.c.bf16 %v7997_v20, %v7981_v32  ;;  %v7740_v60 = vpop.f32.mrb[124].mxu1  ;;  %v7853_v38 = vpop.f32.mrb[140].mxu0 }
 0xb0a   : > { %v7741_v15 = vadd.f32 %v7740_v60, %v15433_v36  ;;  %v7854_v44 = vadd.f32 %v7853_v38, %v15439_v35  ;;  %v7742_v1 = vpop.f32.mrb[125].mxu1  ;;  %v7855_v2 = vpop.f32.mrb[141].mxu0 }
 0xb0b   : > { %v7743_v17 = vadd.f32 %v7742_v1, %v15443_v30  ;;  %v7856_v61 = vadd.f32 %v7855_v2, %v15451_v52  ;;  %v7744_v31 = vpop.f32.mrb[126].mxu1  ;;  %v7857_v8 = vpop.f32.mrb[142].mxu0 }
 0xb0c   : > { %v7745_v22 = vadd.f32 %v7744_v31, %v15433_v36  ;;  %v7858_v46 = vadd.f32 %v7857_v8, %v15439_v35  ;;  %v7746_v42 = vpop.f32.mrb[127].mxu1  ;;  %v7859_v21 = vpop.f32.mrb[143].mxu0  ;;  %v8010_v32 = vmax.f32 %v7741_v15, 0.0  ;;  %v8012_v41 = vmax.f32 %v7854_v44, 0.0 }
 0xb0d   : > { %v7747_v50 = vadd.f32 %v7746_v42, %v15443_v30  ;;  %v7860_v37 = vadd.f32 %v7859_v21, %v15451_v52  ;;  %v8011_v38 = vmax.f32 %v7743_v17, 0.0  ;;  %v8013_v1 = vmax.f32 %v7856_v61, 0.0 }
 0xb0e   : > { %v8026_v20 = vmax.f32 %v7745_v22, 0.0  ;;  %v8028_v60 = vmax.f32 %v7858_v46, 0.0  ;;  %9529 = vmatmul.mubr.bf16.gmra.mrb[232].mxu1 %v15414_v19  ;;  %9626 = vmatmul.mubr.bf16.gmra.mrb[248].mxu0 %v15416_v58 }
 0xb0f   : > { %v8027_v2 = vmax.f32 %v7747_v50, 0.0  ;;  %v8029_v31 = vmax.f32 %v7860_v37, 0.0  ;;  %9536 = vmatprep.mubr.bf16.mxu1 %v15467_v7  ;;  %9633 = vmatprep.mubr.bf16.mxu0 %v15469_v57 }
 0xb10   : > { %v15561_v8 = vpack.c.bf16 %v8026_v20, %v8010_v32  ;;  %v15563_v42 = vpack.c.bf16 %v8028_v60, %v8012_v41 }
 0xb11   : > { %v15565_v15 = vpack.c.bf16 %v8027_v2, %v8011_v38  ;;  %v15567_v44 = vpack.c.bf16 %v8029_v31, %v8013_v1  ;;  %v7750_v22 = vpop.f32.mrb[128].mxu1  ;;  %v7863_v19 = vpop.f32.mrb[144].mxu0 }
 0xb12   : > { %v7751_v58 = vadd.f32 %v7750_v22, %v15433_v36  ;;  %v7864_v17 = vadd.f32 %v7863_v19, %v15439_v35  ;;  %v7752_v61 = vpop.f32.mrb[129].mxu1  ;;  %v7865_v46 = vpop.f32.mrb[145].mxu0 }
 0xb13   : > { %v7753_v7 = vadd.f32 %v7752_v61, %v15443_v30  ;;  %v7866_v57 = vadd.f32 %v7865_v46, %v15451_v52  ;;  %v7754_v21 = vpop.f32.mrb[130].mxu1  ;;  %v7867_v50 = vpop.f32.mrb[146].mxu0 }
 0xb14   : > { %v7755_v37 = vadd.f32 %v7754_v21, %v15433_v36  ;;  %v7868_v32 = vadd.f32 %v7867_v50, %v15439_v35  ;;  %v7756_v41 = vpop.f32.mrb[131].mxu1  ;;  %v7869_v20 = vpop.f32.mrb[147].mxu0  ;;  %v8042_v1 = vmax.f32 %v7751_v58, 0.0  ;;  %v8044_v2 = vmax.f32 %v7864_v17, 0.0 }
 0xb15   : > { %v7757_v60 = vadd.f32 %v7756_v41, %v15443_v30  ;;  %v7870_v38 = vadd.f32 %v7869_v20, %v15451_v52  ;;  %v8043_v19 = vmax.f32 %v7753_v7, 0.0  ;;  %v8045_v61 = vmax.f32 %v7866_v57, 0.0 }
 0xb16   : > { %v8058_v31 = vmax.f32 %v7755_v37, 0.0  ;;  %v8060_v22 = vmax.f32 %v7868_v32, 0.0  ;;  %9537 = vmatmul.mubr.bf16.gmra.mrb[236].mxu1 %v15462_v47  ;;  %9634 = vmatmul.mubr.bf16.gmra.mrb[252].mxu0 %v15464_v11 }
 0xb17   : > { %v8059_v46 = vmax.f32 %v7757_v60, 0.0  ;;  %v8061_v21 = vmax.f32 %v7870_v38, 0.0  ;;  %9674 = vmatprep.mubr.bf16.mxu1 %v15499_v6  ;;  %9771 = vmatprep.mubr.bf16.mxu0 %v15501_v28 }
 0xb18   : > { %v15581_v50 = vpack.c.bf16 %v8058_v31, %v8042_v1  ;;  %v15583_v41 = vpack.c.bf16 %v8060_v22, %v8044_v2 }
 0xb19   : > { %v15585_v58 = vpack.c.bf16 %v8059_v46, %v8043_v19  ;;  %v15587_v17 = vpack.c.bf16 %v8061_v21, %v8045_v61  ;;  %v7760_v37 = vpop.f32.mrb[132].mxu1  ;;  %v7873_v47 = vpop.f32.mrb[148].mxu0 }
 0xb1a   : > { %v7761_v11 = vadd.f32 %v7760_v37, %v15433_v36  ;;  %v7874_v7 = vadd.f32 %v7873_v47, %v15439_v35  ;;  %v7762_v57 = vpop.f32.mrb[133].mxu1  ;;  %v7875_v32 = vpop.f32.mrb[149].mxu0 }
 0xb1b   : > { %v7763_v6 = vadd.f32 %v7762_v57, %v15443_v30  ;;  %v7876_v28 = vadd.f32 %v7875_v32, %v15451_v52  ;;  %v7764_v20 = vpop.f32.mrb[134].mxu1  ;;  %v7877_v60 = vpop.f32.mrb[150].mxu0 }
 0xb1c   : > { %v7765_v38 = vadd.f32 %v7764_v20, %v15433_v36  ;;  %v7878_v1 = vadd.f32 %v7877_v60, %v15439_v35  ;;  %v7766_v2 = vpop.f32.mrb[135].mxu1  ;;  %v7879_v31 = vpop.f32.mrb[151].mxu0  ;;  %v8074_v61 = vmax.f32 %v7761_v11, 0.0  ;;  %v8076_v46 = vmax.f32 %v7874_v7, 0.0 }
 0xb1d   : > { %v7767_v22 = vadd.f32 %v7766_v2, %v15443_v30  ;;  %v7880_v19 = vadd.f32 %v7879_v31, %v15451_v52  ;;  %v8075_v47 = vmax.f32 %v7763_v6, 0.0  ;;  %v8077_v57 = vmax.f32 %v7876_v28, 0.0 }
 0xb1e   : > { %v8090_v21 = vmax.f32 %v7765_v38, 0.0  ;;  %v8092_v37 = vmax.f32 %v7878_v1, 0.0  ;;  %9675 = vmatmul.mubr.bf16.vlgmr.msra.gmra.mrb[240].mxu1 %v15494_v16  ;;  %9772 = vmatmul.mubr.bf16.vlgmr.msra.gmra.mrb[0].mxu0 %v15496_v45 }
 0xb1f   : > { %v8091_v32 = vmax.f32 %v7767_v22, 0.0  ;;  %v8093_v20 = vmax.f32 %v7880_v19, 0.0  ;;  %11932 = vmatpush3.bf16.msra.mxu1 %v15375_v54  ;;  %9682 = vmatprep.mubr.bf16.mxu1 %v15525_v5 }
 0xb20   : > { %v15601_v60 = vpack.c.bf16 %v8090_v21, %v8074_v61  ;;  %v15603_v2 = vpack.c.bf16 %v8092_v37, %v8076_v46  ;;  %9779 = vmatprep.mubr.bf16.mxu0 %v15527_v0  ;;  %11925 = vmatprep.subr.bf16.mxu1 %v15379_v13 }
 0xb21   : > { %v15607_v11 = vpack.c.bf16 %v8091_v32, %v8075_v47  ;;  %v15609_v16 = vpack.c.bf16 %v8093_v20, %v8077_v57  ;;  %v7770_v45 = vpop.f32.mrb[136].mxu1  ;;  %v7883_v7 = vpop.f32.mrb[152].mxu0 }
 0xb22   : > { %v7771_v6 = vadd.f32 %v7770_v45, %v15433_v36  ;;  %v7884_v54 = vadd.f32 %v7883_v7, %v15439_v35  ;;  %v7772_v28 = vpop.f32.mrb[137].mxu1  ;;  %v7885_v5 = vpop.f32.mrb[153].mxu0 }
 0xb23   : > { %v7773_v38 = vadd.f32 %v7772_v28, %v15443_v30  ;;  %v7886_v1 = vadd.f32 %v7885_v5, %v15451_v52  ;;  %v7774_v31 = vpop.f32.mrb[138].mxu1  ;;  %v7887_v0 = vpop.f32.mrb[154].mxu0  ;;  %11933 = vmatpush3.bf16.msra.mxu1 %v15392_v62 }
 0xb24   : > { %v7775_v13 = vadd.f32 %v7774_v31, %v15433_v36  ;;  %v7888_v22 = vadd.f32 %v7887_v0, %v15439_v35  ;;  %v7776_v19 = vpop.f32.mrb[139].mxu1  ;;  %v7889_v61 = vpop.f32.mrb[155].mxu0  ;;  %11926 = vmatprep.subr.bf16.mxu1 %v15401_v12  ;;  %v8106_v37 = vmax.f32 %v7771_v6, 0.0  ;;  %v8108_v47 = vmax.f32 %v7884_v54, 0.0 }
 0xb25   : > { %v7777_v46 = vadd.f32 %v7776_v19, %v15443_v30  ;;  %v7890_v21 = vadd.f32 %v7889_v61, %v15451_v52  ;;  %v8107_v62 = vmax.f32 %v7773_v38, 0.0  ;;  %v8109_v20 = vmax.f32 %v7886_v1, 0.0 }
 0xb26   : > { %v8122_v57 = vmax.f32 %v7775_v13, 0.0  ;;  %v8124_v32 = vmax.f32 %v7888_v22, 0.0  ;;  %9683 = vmatmul.mubr.bf16.gmra.mrb[244].mxu1 %v15521_v25  ;;  %9780 = vmatmul.mubr.bf16.gmra.mrb[4].mxu0 %v15523_v51 }
 0xb27   : > { %v8123_v45 = vmax.f32 %v7777_v46, 0.0  ;;  %v8125_v7 = vmax.f32 %v7890_v21, 0.0  ;;  %9690 = vmatprep.mubr.bf16.mxu1 %v15545_v56  ;;  %9787 = vmatprep.mubr.bf16.mxu0 %v15547_v9 }
 0xb28   : > { %v15625_v12 = vpack.c.bf16 %v8122_v57, %v8106_v37  ;;  %v15627_v28 = vpack.c.bf16 %v8124_v32, %v8108_v47  ;;  %11934 = vmatpush3.bf16.msra.mxu1 %v15406_v49 }
 0xb29   : > { %v15630_v6 = vpack.c.bf16 %v8123_v45, %v8107_v62  ;;  %v15632_v54 = vpack.c.bf16 %v8125_v7, %v8109_v20  ;;  %v7780_v25 = vpop.f32.mrb[140].mxu1  ;;  %v7893_v51 = vpop.f32.mrb[156].mxu0  ;;  %11927 = vmatprep.subr.bf16.mxu1 %v15410_v18 }
 0xb2a   : > { %v7781_v5 = vadd.f32 %v7780_v25, %v15433_v36  ;;  %v7894_v56 = vadd.f32 %v7893_v51, %v15439_v35  ;;  %v7782_v38 = vpop.f32.mrb[141].mxu1  ;;  %v7895_v9 = vpop.f32.mrb[157].mxu0 }
 0xb2b   : > { %v7783_v1 = vadd.f32 %v7782_v38, %v15443_v30  ;;  %v7896_v31 = vadd.f32 %v7895_v9, %v15451_v52  ;;  %v7784_v0 = vpop.f32.mrb[142].mxu1  ;;  %v7897_v49 = vpop.f32.mrb[158].mxu0 }
 0xb2c   : > { %v7785_v13 = vadd.f32 %v7784_v0, %v15433_v36  ;;  %v7898_v22 = vadd.f32 %v7897_v49, %v15439_v35  ;;  %v7786_v19 = vpop.f32.mrb[143].mxu1  ;;  %v7899_v61 = vpop.f32.mrb[159].mxu0  ;;  %11935 = vmatpush3.bf16.msra.mxu1 %v15424_v10  ;;  %v8138_v21 = vmax.f32 %v7781_v5, 0.0  ;;  %v8140_v37 = vmax.f32 %v7894_v56, 0.0 }
 0xb2d   : > { %v7787_v18 = vadd.f32 %v7786_v19, %v15443_v30  ;;  %v7900_v46 = vadd.f32 %v7899_v61, %v15451_v52  ;;  %11928 = vmatprep.subr.bf16.mxu1 %v15445_v34  ;;  %v8139_v36 = vmax.f32 %v7783_v1, 0.0  ;;  %v8141_v35 = vmax.f32 %v7896_v31, 0.0 }
 0xb2e   : > { %v8154_v47 = vmax.f32 %v7785_v13, 0.0  ;;  %v8156_v57 = vmax.f32 %v7898_v22, 0.0  ;;  %9691 = vmatmul.mubr.bf16.gmra.mrb[248].mxu1 %v15541_v29  ;;  %9788 = vmatmul.mubr.bf16.gmra.mrb[8].mxu0 %v15543_v59 }
 0xb2f   : > { %v8155_v32 = vmax.f32 %v7787_v18, 0.0  ;;  %v8157_v62 = vmax.f32 %v7900_v46, 0.0  ;;  %9698 = vmatprep.mubr.bf16.mxu1 %v15565_v15  ;;  %9795 = vmatprep.mubr.bf16.mxu0 %v15567_v44  ;;  %v15662_v15 = vld [vmem:[%s16087_s12 + $0x1] ss:$0 sm:$0xff] }
 0xb30   : > { %v15649_v10 = vpack.c.bf16 %v8154_v47, %v8138_v21  ;;  %v15651_v30 = vpack.c.bf16 %v8156_v57, %v8140_v37  ;;  %11936 = vmatpush3.bf16.msra.mxu1 %v15454_v55 }
 0xb31   : > { %v15654_v34 = vpack.c.bf16 %v8155_v32, %v8139_v36  ;;  %v15656_v52 = vpack.c.bf16 %v8157_v62, %v8141_v35  ;;  %v11332_v29 = vpop.f32.mrb[144].mxu1  ;;  %v11396_v59 = vpop.f32.mrb[160].mxu0  ;;  %11929 = vmatprep.subr.bf16.mxu1 %v15458_v39 }
 0xb32   : > { %v11333_v44 = vpop.f32.mrb[145].mxu1  ;;  %v11397_v20 = vpop.f32.mrb[161].mxu0 }
 0xb33   : > { %v11334_v45 = vadd.f32 %v11333_v44, %v11332_v29  ;;  %v11398_v7 = vadd.f32 %v11397_v20, %v11396_v59  ;;  %v11335_v25 = vpop.f32.mrb[146].mxu1  ;;  %v11399_v51 = vpop.f32.mrb[162].mxu0 }
 0xb34   : > { %v11336_v55 = vpop.f32.mrb[147].mxu1  ;;  %v11400_v5 = vpop.f32.mrb[163].mxu0  ;;  %11937 = vmatpush3.bf16.msra.mxu1 %v15472_v4 }
 0xb35   : > { %v9095_v56 = vadd.f32 %v11334_v45, %v15662_v15  ;;  %v11337_v38 = vadd.f32 %v11336_v55, %v11335_v25  ;;  %v11401_v9 = vadd.f32 %v11400_v5, %v11399_v51  ;;  %11930 = vmatprep.subr.bf16.mxu1 %v15481_v23 }
 0xb36   : > { %9699 = vmatmul.mubr.bf16.gmra.mrb[252].mxu1 %v15561_v8  ;;  %9796 = vmatmul.mubr.bf16.gmra.mrb[12].mxu0 %v15563_v42 }
 0xb37   : > { %v15669_v39 = vadd.f32 %v11398_v7, %v9095_v56  ;;  %v9098_v1 = vadd.f32 %v11337_v38, %v15662_v15  ;;  %9706 = vmatprep.mubr.bf16.mxu1 %v15585_v58  ;;  %9803 = vmatprep.mubr.bf16.mxu0 %v15587_v17 }
 0xb38   : > { %11938 = vmatpush3.bf16.msra.mxu1 %v15486_v53 }
 0xb39   : > { %v15675_v4 = vadd.f32 %v11401_v9, %v9098_v1  ;;  %v11338_v31 = vpop.f32.mrb[148].mxu1  ;;  %v11402_v0 = vpop.f32.mrb[164].mxu0  ;;  %11931 = vmatprep.subr.bf16.mxu1 %v15490_v63 }
 0xb3a   : > { %v11339_v23 = vpop.f32.mrb[149].mxu1  ;;  %v11403_v8 = vpop.f32.mrb[165].mxu0 }
 0xb3b   : > { %v11340_v49 = vadd.f32 %v11339_v23, %v11338_v31  ;;  %v11404_v42 = vadd.f32 %v11403_v8, %v11402_v0  ;;  %v11341_v13 = vpop.f32.mrb[150].mxu1  ;;  %v11405_v22 = vpop.f32.mrb[166].mxu0 }
 0xb3c   : > { %v11342_v19 = vpop.f32.mrb[151].mxu1  ;;  %v11406_v61 = vpop.f32.mrb[167].mxu0  ;;  %11939 = vmatpush3.bf16.msra.mxu1 %v15504_v27 }
 0xb3d   : > { %v9103_v58 = vadd.f32 %v11340_v49, %v15662_v15  ;;  %v11343_v17 = vadd.f32 %v11342_v19, %v11341_v13  ;;  %v11407_v53 = vadd.f32 %v11406_v61, %v11405_v22 }
 0xb3e   : > { %9707 = vmatmul.mubr.bf16.gmra.mrb[0].mxu1 %v15581_v50  ;;  %9804 = vmatmul.mubr.bf16.gmra.mrb[16].mxu0 %v15583_v41 }
 0xb3f   : > { %v15682_v18 = vadd.f32 %v11404_v42, %v9103_v58  ;;  %v9106_v63 = vadd.f32 %v11343_v17, %v15662_v15  ;;  %9714 = vmatprep.mubr.bf16.mxu1 %v15607_v11  ;;  %9811 = vmatprep.mubr.bf16.mxu0 %v15609_v16 }
 0xb41   : > { %v15687_v46 = vadd.f32 %v11407_v53, %v9106_v63  ;;  %v11344_v21 = vpop.f32.mrb[152].mxu1  ;;  %v11408_v27 = vpop.f32.mrb[168].mxu0 }
 0xb42   : > { %v11345_v37 = vpop.f32.mrb[153].mxu1  ;;  %v11409_v47 = vpop.f32.mrb[169].mxu0 }
 0xb43   : > { %v11346_v57 = vadd.f32 %v11345_v37, %v11344_v21  ;;  %v11410_v36 = vadd.f32 %v11409_v47, %v11408_v27  ;;  %v11347_v35 = vpop.f32.mrb[154].mxu1  ;;  %v11411_v50 = vpop.f32.mrb[170].mxu0 }
 0xb44   : > { %v11348_v32 = vpop.f32.mrb[155].mxu1  ;;  %v11412_v41 = vpop.f32.mrb[171].mxu0 }
 0xb45   : > { %v9111_v62 = vadd.f32 %v11346_v57, %v15662_v15  ;;  %v11349_v29 = vadd.f32 %v11348_v32, %v11347_v35  ;;  %v11413_v59 = vadd.f32 %v11412_v41, %v11411_v50 }
 0xb46   : > { %9715 = vmatmul.mubr.bf16.gmra.mrb[4].mxu1 %v15601_v60  ;;  %9812 = vmatmul.mubr.bf16.gmra.mrb[20].mxu0 %v15603_v2 }
 0xb47   : > { %v15692_v11 = vadd.f32 %v11410_v36, %v9111_v62  ;;  %v9114_v16 = vadd.f32 %v11349_v29, %v15662_v15  ;;  %9722 = vmatprep.mubr.bf16.mxu1 %v15630_v6 }
 0xb49   : > { %v15696_v44 = vadd.f32 %v11413_v59, %v9114_v16  ;;  %v11350_v20 = vpop.f32.mrb[156].mxu1  ;;  %v11414_v45 = vpop.f32.mrb[172].mxu0 }
 0xb4a   : > { %v11351_v7 = vpop.f32.mrb[157].mxu1  ;;  %v11415_v25 = vpop.f32.mrb[173].mxu0 }
 0xb4b   : > { %v11352_v51 = vadd.f32 %v11351_v7, %v11350_v20  ;;  %v11416_v55 = vadd.f32 %v11415_v25, %v11414_v45  ;;  %v11353_v5 = vpop.f32.mrb[158].mxu1  ;;  %v11417_v56 = vpop.f32.mrb[174].mxu0 }
 0xb4c   : > { %v11354_v38 = vpop.f32.mrb[159].mxu1  ;;  %v11418_v60 = vpop.f32.mrb[175].mxu0 }
 0xb4d   : > { %v9119_v2 = vadd.f32 %v11352_v51, %v15662_v15  ;;  %v11355_v9 = vadd.f32 %v11354_v38, %v11353_v5  ;;  %v11419_v1 = vadd.f32 %v11418_v60, %v11417_v56 }
 0xb4e   : > { %9723 = vmatmul.mubr.bf16.gmra.mrb[8].mxu1 %v15625_v12 }
 0xb4f   : > { %v15700_v31 = vadd.f32 %v11416_v55, %v9119_v2  ;;  %v9122_v6 = vadd.f32 %v11355_v9, %v15662_v15  ;;  %9730 = vmatprep.mubr.bf16.mxu1 %v15654_v34 }
 0xb51   : > { %v15704_v0 = vadd.f32 %v11419_v1, %v9122_v6  ;;  %v11356_v23 = vpop.f32.mrb[160].mxu1  ;;  %v11420_v8 = vpop.f32.mrb[176].mxu0 }
 0xb52   : > { %v11357_v49 = vpop.f32.mrb[161].mxu1  ;;  %v11421_v42 = vpop.f32.mrb[177].mxu0 }
 0xb53   : > { %v11358_v13 = vadd.f32 %v11357_v49, %v11356_v23  ;;  %v11422_v22 = vadd.f32 %v11421_v42, %v11420_v8  ;;  %v11359_v19 = vpop.f32.mrb[162].mxu1  ;;  %v11423_v61 = vpop.f32.mrb[178].mxu0 }
 0xb54   : > { %v11360_v58 = vpop.f32.mrb[163].mxu1  ;;  %v11424_v17 = vpop.f32.mrb[179].mxu0 }
 0xb55   : > { %v9127_v12 = vadd.f32 %v11358_v13, %v15662_v15  ;;  %v11361_v53 = vadd.f32 %v11360_v58, %v11359_v19  ;;  %v11425_v63 = vadd.f32 %v11424_v17, %v11423_v61 }
 0xb56   : > { %9731 = vmatmul.mubr.bf16.gmra.mrb[12].mxu1 %v15649_v10 }
 0xb57   : > { %v15708_v21 = vadd.f32 %v11422_v22, %v9127_v12  ;;  %v9130_v34 = vadd.f32 %v11361_v53, %v15662_v15  ;;  %9819 = vmatprep.mubr.bf16.mxu1 %v15632_v54 }
 0xb59   : > { %v15712_v27 = vadd.f32 %v11425_v63, %v9130_v34  ;;  %v11362_v37 = vpop.f32.mrb[164].mxu1  ;;  %v11426_v47 = vpop.f32.mrb[180].mxu0 }
 0xb5a   : > { %v11363_v57 = vpop.f32.mrb[165].mxu1  ;;  %v11427_v36 = vpop.f32.mrb[181].mxu0 }
 0xb5b   : > { %v11364_v35 = vadd.f32 %v11363_v57, %v11362_v37  ;;  %v11428_v50 = vadd.f32 %v11427_v36, %v11426_v47  ;;  %v11365_v32 = vpop.f32.mrb[166].mxu1  ;;  %v11429_v41 = vpop.f32.mrb[182].mxu0 }
 0xb5c   : > { %v11366_v62 = vpop.f32.mrb[167].mxu1  ;;  %v11430_v29 = vpop.f32.mrb[183].mxu0 }
 0xb5d   : > { %v9135_v10 = vadd.f32 %v11364_v35, %v15662_v15  ;;  %v11367_v59 = vadd.f32 %v11366_v62, %v11365_v32  ;;  %v11431_v16 = vadd.f32 %v11430_v29, %v11429_v41 }
 0xb5e   : > { %9820 = vmatmul.mubr.bf16.vlgmr.msra.gmra.mrb[16].mxu1 %v15627_v28 }
 0xb5f   : > { %v15716_v20 = vadd.f32 %v11428_v50, %v9135_v10  ;;  %v9138_v54 = vadd.f32 %v11367_v59, %v15662_v15  ;;  %9827 = vmatprep.mubr.bf16.mxu1 %v15656_v52 }
 0xb61   : > { %v15720_v45 = vadd.f32 %v11431_v16, %v9138_v54  ;;  %v11368_v7 = vpop.f32.mrb[168].mxu1  ;;  %v11432_v25 = vpop.f32.mrb[184].mxu0 }
 0xb62   : > { %v11369_v51 = vpop.f32.mrb[169].mxu1  ;;  %v11433_v55 = vpop.f32.mrb[185].mxu0 }
 0xb63   : > { %v11370_v5 = vadd.f32 %v11369_v51, %v11368_v7  ;;  %v11434_v56 = vadd.f32 %v11433_v55, %v11432_v25  ;;  %v11371_v38 = vpop.f32.mrb[170].mxu1  ;;  %v11435_v60 = vpop.f32.mrb[186].mxu0 }
 0xb64   : > { %v11372_v2 = vpop.f32.mrb[171].mxu1  ;;  %v11436_v9 = vpop.f32.mrb[187].mxu0 }
 0xb65   : > { %v9143_v28 = vadd.f32 %v11370_v5, %v15662_v15  ;;  %v11373_v1 = vadd.f32 %v11372_v2, %v11371_v38  ;;  %v11437_v6 = vadd.f32 %v11436_v9, %v11435_v60 }
 0xb66   : > { %9828 = vmatmul.mubr.bf16.gmra.mrb[20].mxu1 %v15651_v30 }
 0xb67   : > { %v15724_v23 = vadd.f32 %v11434_v56, %v9143_v28  ;;  %v9146_v52 = vadd.f32 %v11373_v1, %v15662_v15 }
 0xb69   : > { %v15727_v8 = vadd.f32 %v11437_v6, %v9146_v52  ;;  %v11374_v49 = vpop.f32.mrb[172].mxu1  ;;  %v11438_v42 = vpop.f32.mrb[188].mxu0 }
 0xb6a   : > { %v11375_v13 = vpop.f32.mrb[173].mxu1  ;;  %v11439_v22 = vpop.f32.mrb[189].mxu0 }
 0xb6b   : > { %v11376_v19 = vadd.f32 %v11375_v13, %v11374_v49  ;;  %v11440_v61 = vadd.f32 %v11439_v22, %v11438_v42  ;;  %v11377_v58 = vpop.f32.mrb[174].mxu1  ;;  %v11441_v17 = vpop.f32.mrb[190].mxu0 }
 0xb6c   : > { %v11378_v12 = vpop.f32.mrb[175].mxu1  ;;  %v11442_v53 = vpop.f32.mrb[191].mxu0 }
 0xb6d   : > { %v9151_v63 = vadd.f32 %v11376_v19, %v15662_v15  ;;  %v11379_v34 = vadd.f32 %v11378_v12, %v11377_v58  ;;  %v11443_v30 = vadd.f32 %v11442_v53, %v11441_v17 }
 0xb6f   : > { %v15730_v37 = vadd.f32 %v11440_v61, %v9151_v63  ;;  %v9154_v47 = vadd.f32 %v11379_v34, %v15662_v15 }
 0xb71   : > { %v15733_v57 = vadd.f32 %v11443_v30, %v9154_v47  ;;  %v11460_v36 = vpop.f32.mrb[176].mxu1  ;;  %v11524_v35 = vpop.f32.mrb[192].mxu0 }
 0xb72   : > { %v11461_v50 = vpop.f32.mrb[177].mxu1  ;;  %v11525_v32 = vpop.f32.mrb[193].mxu0 }
 0xb73   : > { %v11462_v41 = vadd.f32 %v11461_v50, %v11460_v36  ;;  %v11526_v62 = vadd.f32 %v11525_v32, %v11524_v35  ;;  %v11463_v29 = vpop.f32.mrb[178].mxu1  ;;  %v11527_v10 = vpop.f32.mrb[194].mxu0 }
 0xb74   : > { %v11464_v59 = vpop.f32.mrb[179].mxu1  ;;  %v11528_v16 = vpop.f32.mrb[195].mxu0 }
 0xb75   : > { %v9289_v54 = vadd.f32 %v11462_v41, %v15669_v39  ;;  %v11465_v7 = vadd.f32 %v11464_v59, %v11463_v29  ;;  %v11529_v25 = vadd.f32 %v11528_v16, %v11527_v10 }
 0xb77   : > { %v15736_v51 = vadd.f32 %v11526_v62, %v9289_v54  ;;  %v9292_v15 = vadd.f32 %v11465_v7, %v15675_v4 }
 0xb79   : > { %v15739_v55 = vadd.f32 %v11529_v25, %v9292_v15  ;;  %v11466_v5 = vpop.f32.mrb[180].mxu1  ;;  %v11530_v56 = vpop.f32.mrb[196].mxu0 }
 0xb7a   : > { %v11467_v38 = vpop.f32.mrb[181].mxu1  ;;  %v11531_v60 = vpop.f32.mrb[197].mxu0 }
 0xb7b   : > { %v11468_v2 = vadd.f32 %v11467_v38, %v11466_v5  ;;  %v11532_v9 = vadd.f32 %v11531_v60, %v11530_v56  ;;  %v11469_v28 = vpop.f32.mrb[182].mxu1  ;;  %v11533_v1 = vpop.f32.mrb[198].mxu0 }
 0xb7c   : > { %v11470_v6 = vpop.f32.mrb[183].mxu1  ;;  %v11534_v52 = vpop.f32.mrb[199].mxu0 }
 0xb7d   : > { %v9297_v39 = vadd.f32 %v11468_v2, %v15682_v18  ;;  %v11471_v49 = vadd.f32 %v11470_v6, %v11469_v28  ;;  %v11535_v42 = vadd.f32 %v11534_v52, %v11533_v1 }
 0xb7f   : > { %v15742_v13 = vadd.f32 %v11532_v9, %v9297_v39  ;;  %v9300_v4 = vadd.f32 %v11471_v49, %v15687_v46 }
 0xb81   : > { %v15745_v22 = vadd.f32 %v11535_v42, %v9300_v4  ;;  %v11472_v19 = vpop.f32.mrb[184].mxu1  ;;  %v11536_v61 = vpop.f32.mrb[200].mxu0 }
 0xb82   : > { %v11473_v58 = vpop.f32.mrb[185].mxu1  ;;  %v11537_v17 = vpop.f32.mrb[201].mxu0 }
 0xb83   : > { %v11474_v12 = vadd.f32 %v11473_v58, %v11472_v19  ;;  %v11538_v53 = vadd.f32 %v11537_v17, %v11536_v61  ;;  %v11475_v63 = vpop.f32.mrb[186].mxu1  ;;  %v11539_v34 = vpop.f32.mrb[202].mxu0 }
 0xb84   : > { %v11476_v30 = vpop.f32.mrb[187].mxu1  ;;  %v11540_v47 = vpop.f32.mrb[203].mxu0 }
 0xb85   : > { %v9305_v18 = vadd.f32 %v11474_v12, %v15692_v11  ;;  %v11477_v36 = vadd.f32 %v11476_v30, %v11475_v63  ;;  %v11541_v35 = vadd.f32 %v11540_v47, %v11539_v34 }
 0xb87   : > { %v15748_v50 = vadd.f32 %v11538_v53, %v9305_v18  ;;  %v9308_v46 = vadd.f32 %v11477_v36, %v15696_v44 }
 0xb89   : > { %v15751_v32 = vadd.f32 %v11541_v35, %v9308_v46  ;;  %v11478_v41 = vpop.f32.mrb[188].mxu1  ;;  %v11542_v62 = vpop.f32.mrb[204].mxu0 }
 0xb8a   : > { %v11479_v29 = vpop.f32.mrb[189].mxu1  ;;  %v11543_v10 = vpop.f32.mrb[205].mxu0 }
 0xb8b   : > { %v11480_v59 = vadd.f32 %v11479_v29, %v11478_v41  ;;  %v11544_v16 = vadd.f32 %v11543_v10, %v11542_v62  ;;  %v11481_v54 = vpop.f32.mrb[190].mxu1  ;;  %v11545_v7 = vpop.f32.mrb[206].mxu0 }
 0xb8c   : > { %v11482_v25 = vpop.f32.mrb[191].mxu1  ;;  %v11546_v15 = vpop.f32.mrb[207].mxu0 }
 0xb8d   : > { %v9313_v11 = vadd.f32 %v11480_v59, %v15700_v31  ;;  %v11483_v5 = vadd.f32 %v11482_v25, %v11481_v54  ;;  %v11547_v56 = vadd.f32 %v11546_v15, %v11545_v7 }
 0xb8f   : > { %v15754_v38 = vadd.f32 %v11544_v16, %v9313_v11  ;;  %v9316_v44 = vadd.f32 %v11483_v5, %v15704_v0 }
 0xb91   : > { %v15757_v60 = vadd.f32 %v11547_v56, %v9316_v44  ;;  %v11484_v2 = vpop.f32.mrb[192].mxu1  ;;  %v11548_v9 = vpop.f32.mrb[208].mxu0 }
 0xb92   : > { %v11485_v28 = vpop.f32.mrb[193].mxu1  ;;  %v11549_v1 = vpop.f32.mrb[209].mxu0 }
 0xb93   : > { %v11486_v6 = vadd.f32 %v11485_v28, %v11484_v2  ;;  %v11550_v52 = vadd.f32 %v11549_v1, %v11548_v9  ;;  %v11487_v39 = vpop.f32.mrb[194].mxu1  ;;  %v11551_v49 = vpop.f32.mrb[210].mxu0 }
 0xb94   : > { %v11488_v42 = vpop.f32.mrb[195].mxu1  ;;  %v11552_v4 = vpop.f32.mrb[211].mxu0 }
 0xb95   : > { %v9321_v31 = vadd.f32 %v11486_v6, %v15708_v21  ;;  %v11489_v19 = vadd.f32 %v11488_v42, %v11487_v39  ;;  %v11553_v61 = vadd.f32 %v11552_v4, %v11551_v49 }
 0xb97   : > { %v15760_v58 = vadd.f32 %v11550_v52, %v9321_v31  ;;  %v9324_v0 = vadd.f32 %v11489_v19, %v15712_v27 }
 0xb99   : > { %v15763_v17 = vadd.f32 %v11553_v61, %v9324_v0  ;;  %v11490_v12 = vpop.f32.mrb[196].mxu1  ;;  %v11554_v53 = vpop.f32.mrb[212].mxu0 }
 0xb9a   : > { %v11491_v63 = vpop.f32.mrb[197].mxu1  ;;  %v11555_v34 = vpop.f32.mrb[213].mxu0 }
 0xb9b   : > { %v11492_v30 = vadd.f32 %v11491_v63, %v11490_v12  ;;  %v11556_v47 = vadd.f32 %v11555_v34, %v11554_v53  ;;  %v11493_v18 = vpop.f32.mrb[198].mxu1  ;;  %v11557_v36 = vpop.f32.mrb[214].mxu0 }
 0xb9c   : > { %v11494_v35 = vpop.f32.mrb[199].mxu1  ;;  %v11558_v46 = vpop.f32.mrb[215].mxu0 }
 0xb9d   : > { %v9329_v21 = vadd.f32 %v11492_v30, %v15716_v20  ;;  %v11495_v41 = vadd.f32 %v11494_v35, %v11493_v18  ;;  %v11559_v62 = vadd.f32 %v11558_v46, %v11557_v36 }
 0xb9f   : > { %v15766_v29 = vadd.f32 %v11556_v47, %v9329_v21  ;;  %v9332_v27 = vadd.f32 %v11495_v41, %v15720_v45 }
 0xba1   : > { %v15769_v10 = vadd.f32 %v11559_v62, %v9332_v27  ;;  %v11496_v59 = vpop.f32.mrb[200].mxu1  ;;  %v11560_v16 = vpop.f32.mrb[216].mxu0 }
 0xba2   : > { %v11497_v54 = vpop.f32.mrb[201].mxu1  ;;  %v11561_v7 = vpop.f32.mrb[217].mxu0 }
 0xba3   : > { %v11498_v25 = vadd.f32 %v11497_v54, %v11496_v59  ;;  %v11562_v15 = vadd.f32 %v11561_v7, %v11560_v16  ;;  %v11499_v11 = vpop.f32.mrb[202].mxu1  ;;  %v11563_v5 = vpop.f32.mrb[218].mxu0 }
 0xba4   : > { %v11500_v56 = vpop.f32.mrb[203].mxu1  ;;  %v11564_v44 = vpop.f32.mrb[219].mxu0 }
 0xba5   : > { %v9337_v20 = vadd.f32 %v11498_v25, %v15724_v23  ;;  %v11501_v2 = vadd.f32 %v11500_v56, %v11499_v11  ;;  %v11565_v9 = vadd.f32 %v11564_v44, %v11563_v5 }
 0xba7   : > { %v15772_v28 = vadd.f32 %v11562_v15, %v9337_v20  ;;  %v9340_v45 = vadd.f32 %v11501_v2, %v15727_v8 }
 0xba9   : > { %v15775_v1 = vadd.f32 %v11565_v9, %v9340_v45  ;;  %v11502_v6 = vpop.f32.mrb[204].mxu1  ;;  %v11566_v52 = vpop.f32.mrb[220].mxu0 }
 0xbaa   : > { %v11503_v39 = vpop.f32.mrb[205].mxu1  ;;  %v11567_v49 = vpop.f32.mrb[221].mxu0 }
 0xbab   : > { %v11504_v42 = vadd.f32 %v11503_v39, %v11502_v6  ;;  %v11568_v4 = vadd.f32 %v11567_v49, %v11566_v52  ;;  %v11505_v31 = vpop.f32.mrb[206].mxu1  ;;  %v11569_v19 = vpop.f32.mrb[222].mxu0 }
 0xbac   : > { %v11506_v61 = vpop.f32.mrb[207].mxu1  ;;  %v11570_v0 = vpop.f32.mrb[223].mxu0 }
 0xbad   : > { %v9345_v23 = vadd.f32 %v11504_v42, %v15730_v37  ;;  %v11507_v12 = vadd.f32 %v11506_v61, %v11505_v31  ;;  %v11571_v53 = vadd.f32 %v11570_v0, %v11569_v19 }
 0xbaf   : > { %v15778_v63 = vadd.f32 %v11568_v4, %v9345_v23  ;;  %v9348_v8 = vadd.f32 %v11507_v12, %v15733_v57 }
 0xbb1   : > { %v15781_v34 = vadd.f32 %v11571_v53, %v9348_v8  ;;  %v11588_v30 = vpop.f32.mrb[208].mxu1  ;;  %v11652_v47 = vpop.f32.mrb[224].mxu0 }
 0xbb2   : > { %v11589_v18 = vpop.f32.mrb[209].mxu1  ;;  %v11653_v36 = vpop.f32.mrb[225].mxu0 }
 0xbb3   : > { %v11590_v35 = vadd.f32 %v11589_v18, %v11588_v30  ;;  %v11654_v46 = vadd.f32 %v11653_v36, %v11652_v47  ;;  %v11591_v21 = vpop.f32.mrb[210].mxu1  ;;  %v11655_v41 = vpop.f32.mrb[226].mxu0 }
 0xbb4   : > { %v11592_v62 = vpop.f32.mrb[211].mxu1  ;;  %v11656_v27 = vpop.f32.mrb[227].mxu0 }
 0xbb5   : > { %v9483_v37 = vadd.f32 %v11590_v35, %v15736_v51  ;;  %v11593_v59 = vadd.f32 %v11592_v62, %v11591_v21  ;;  %v11657_v16 = vadd.f32 %v11656_v27, %v11655_v41 }
 0xbb7   : > { %v15784_v54 = vadd.f32 %v11654_v46, %v9483_v37  ;;  %v9486_v57 = vadd.f32 %v11593_v59, %v15739_v55 }
 0xbb9   : > { %v15787_v7 = vadd.f32 %v11657_v16, %v9486_v57  ;;  %v11594_v25 = vpop.f32.mrb[212].mxu1  ;;  %v11658_v15 = vpop.f32.mrb[228].mxu0 }
 0xbba   : > { %v11595_v11 = vpop.f32.mrb[213].mxu1  ;;  %v11659_v5 = vpop.f32.mrb[229].mxu0 }
 0xbbb   : > { %v11596_v56 = vadd.f32 %v11595_v11, %v11594_v25  ;;  %v11660_v44 = vadd.f32 %v11659_v5, %v11658_v15  ;;  %v11597_v20 = vpop.f32.mrb[214].mxu1  ;;  %v11661_v2 = vpop.f32.mrb[230].mxu0 }
 0xbbc   : > { %v11598_v9 = vpop.f32.mrb[215].mxu1  ;;  %v11662_v45 = vpop.f32.mrb[231].mxu0 }
 0xbbd   : > { %v9491_v51 = vadd.f32 %v11596_v56, %v15742_v13  ;;  %v11599_v6 = vadd.f32 %v11598_v9, %v11597_v20  ;;  %v11663_v52 = vadd.f32 %v11662_v45, %v11661_v2 }
 0xbbf   : > { %v15790_v39 = vadd.f32 %v11660_v44, %v9491_v51  ;;  %v9494_v55 = vadd.f32 %v11599_v6, %v15745_v22 }
 0xbc1   : > { %v15793_v49 = vadd.f32 %v11663_v52, %v9494_v55  ;;  %v11600_v42 = vpop.f32.mrb[216].mxu1  ;;  %v11664_v4 = vpop.f32.mrb[232].mxu0 }
 0xbc2   : > { %v11601_v31 = vpop.f32.mrb[217].mxu1  ;;  %v11665_v19 = vpop.f32.mrb[233].mxu0 }
 0xbc3   : > { %v11602_v61 = vadd.f32 %v11601_v31, %v11600_v42  ;;  %v11666_v0 = vadd.f32 %v11665_v19, %v11664_v4  ;;  %v11603_v23 = vpop.f32.mrb[218].mxu1  ;;  %v11667_v12 = vpop.f32.mrb[234].mxu0 }
 0xbc4   : > { %v11604_v53 = vpop.f32.mrb[219].mxu1  ;;  %v11668_v8 = vpop.f32.mrb[235].mxu0 }
 0xbc5   : > { %v9499_v13 = vadd.f32 %v11602_v61, %v15748_v50  ;;  %v11605_v30 = vadd.f32 %v11604_v53, %v11603_v23  ;;  %v11669_v47 = vadd.f32 %v11668_v8, %v11667_v12 }
 0xbc7   : > { %v15796_v18 = vadd.f32 %v11666_v0, %v9499_v13  ;;  %v9502_v22 = vadd.f32 %v11605_v30, %v15751_v32 }
 0xbc9   : > { %v15799_v36 = vadd.f32 %v11669_v47, %v9502_v22  ;;  %v11606_v35 = vpop.f32.mrb[220].mxu1  ;;  %v11670_v46 = vpop.f32.mrb[236].mxu0 }
 0xbca   : > { %v11607_v21 = vpop.f32.mrb[221].mxu1  ;;  %v11671_v41 = vpop.f32.mrb[237].mxu0 }
 0xbcb   : > { %v11608_v62 = vadd.f32 %v11607_v21, %v11606_v35  ;;  %v11672_v27 = vadd.f32 %v11671_v41, %v11670_v46  ;;  %v11609_v37 = vpop.f32.mrb[222].mxu1  ;;  %v11673_v59 = vpop.f32.mrb[238].mxu0 }
 0xbcc   : > { %v11610_v16 = vpop.f32.mrb[223].mxu1  ;;  %v11674_v57 = vpop.f32.mrb[239].mxu0 }
 0xbcd   : > { %v9507_v50 = vadd.f32 %v11608_v62, %v15754_v38  ;;  %v11611_v25 = vadd.f32 %v11610_v16, %v11609_v37  ;;  %v11675_v15 = vadd.f32 %v11674_v57, %v11673_v59 }
 0xbcf   : > { %v15802_v11 = vadd.f32 %v11672_v27, %v9507_v50  ;;  %v9510_v32 = vadd.f32 %v11611_v25, %v15757_v60 }
 0xbd1   : > { %v15805_v5 = vadd.f32 %v11675_v15, %v9510_v32  ;;  %v11612_v56 = vpop.f32.mrb[224].mxu1  ;;  %v11676_v44 = vpop.f32.mrb[240].mxu0 }
 0xbd2   : > { %v11613_v20 = vpop.f32.mrb[225].mxu1  ;;  %v11677_v2 = vpop.f32.mrb[241].mxu0 }
 0xbd3   : > { %v11614_v9 = vadd.f32 %v11613_v20, %v11612_v56  ;;  %v11678_v45 = vadd.f32 %v11677_v2, %v11676_v44  ;;  %v11615_v51 = vpop.f32.mrb[226].mxu1  ;;  %v11679_v6 = vpop.f32.mrb[242].mxu0 }
 0xbd4   : > { %v11616_v52 = vpop.f32.mrb[227].mxu1  ;;  %v11680_v55 = vpop.f32.mrb[243].mxu0 }
 0xbd5   : > { %v9515_v38 = vadd.f32 %v11614_v9, %v15760_v58  ;;  %v11617_v42 = vadd.f32 %v11616_v52, %v11615_v51  ;;  %v11681_v4 = vadd.f32 %v11680_v55, %v11679_v6 }
 0xbd7   : > { %v15808_v31 = vadd.f32 %v11678_v45, %v9515_v38  ;;  %v9518_v60 = vadd.f32 %v11617_v42, %v15763_v17 }
 0xbd9   : > { %v15811_v19 = vadd.f32 %v11681_v4, %v9518_v60  ;;  %v11618_v61 = vpop.f32.mrb[228].mxu1  ;;  %v11682_v0 = vpop.f32.mrb[244].mxu0 }
 0xbda   : > { %v11619_v23 = vpop.f32.mrb[229].mxu1  ;;  %v11683_v12 = vpop.f32.mrb[245].mxu0 }
 0xbdb   : > { %v11620_v53 = vadd.f32 %v11619_v23, %v11618_v61  ;;  %v11684_v8 = vadd.f32 %v11683_v12, %v11682_v0  ;;  %v11621_v13 = vpop.f32.mrb[230].mxu1  ;;  %v11685_v30 = vpop.f32.mrb[246].mxu0 }
 0xbdc   : > { %v11622_v47 = vpop.f32.mrb[231].mxu1  ;;  %v11686_v22 = vpop.f32.mrb[247].mxu0 }
 0xbdd   : > { %v9523_v58 = vadd.f32 %v11620_v53, %v15766_v29  ;;  %v11623_v35 = vadd.f32 %v11622_v47, %v11621_v13  ;;  %v11687_v46 = vadd.f32 %v11686_v22, %v11685_v30 }
 0xbdf   : > { %v15814_v21 = vadd.f32 %v11684_v8, %v9523_v58  ;;  %v9526_v17 = vadd.f32 %v11623_v35, %v15769_v10 }
 0xbe1   : > { %v15817_v41 = vadd.f32 %v11687_v46, %v9526_v17  ;;  %v11624_v62 = vpop.f32.mrb[232].mxu1  ;;  %v11688_v27 = vpop.f32.mrb[248].mxu0 }
 0xbe2   : > { %v11625_v37 = vpop.f32.mrb[233].mxu1  ;;  %v11689_v59 = vpop.f32.mrb[249].mxu0 }
 0xbe3   : > { %v11626_v16 = vadd.f32 %v11625_v37, %v11624_v62  ;;  %v11690_v57 = vadd.f32 %v11689_v59, %v11688_v27  ;;  %v11627_v50 = vpop.f32.mrb[234].mxu1  ;;  %v11691_v25 = vpop.f32.mrb[250].mxu0 }
 0xbe4   : > { %v11628_v15 = vpop.f32.mrb[235].mxu1  ;;  %v11692_v32 = vpop.f32.mrb[251].mxu0 }
 0xbe5   : > { %v9531_v29 = vadd.f32 %v11626_v16, %v15772_v28  ;;  %v11629_v56 = vadd.f32 %v11628_v15, %v11627_v50  ;;  %v11693_v44 = vadd.f32 %v11692_v32, %v11691_v25 }
 0xbe7   : > { %v15820_v20 = vadd.f32 %v11690_v57, %v9531_v29  ;;  %v9534_v10 = vadd.f32 %v11629_v56, %v15775_v1 }
 0xbe9   : > { %v15823_v2 = vadd.f32 %v11693_v44, %v9534_v10  ;;  %v11630_v9 = vpop.f32.mrb[236].mxu1  ;;  %v11694_v45 = vpop.f32.mrb[252].mxu0 }
 0xbea   : > { %v11631_v51 = vpop.f32.mrb[237].mxu1  ;;  %v11695_v6 = vpop.f32.mrb[253].mxu0 }
 0xbeb   : > { %v11632_v52 = vadd.f32 %v11631_v51, %v11630_v9  ;;  %v11696_v55 = vadd.f32 %v11695_v6, %v11694_v45  ;;  %v11633_v38 = vpop.f32.mrb[238].mxu1  ;;  %v11697_v42 = vpop.f32.mrb[254].mxu0 }
 0xbec   : > { %v11634_v4 = vpop.f32.mrb[239].mxu1  ;;  %v11698_v60 = vpop.f32.mrb[255].mxu0 }
 0xbed   : > { %v9539_v28 = vadd.f32 %v11632_v52, %v15778_v63  ;;  %v11635_v61 = vadd.f32 %v11634_v4, %v11633_v38  ;;  %v11699_v0 = vadd.f32 %v11698_v60, %v11697_v42 }
 0xbef   : > { %v15826_v23 = vadd.f32 %v11696_v55, %v9539_v28  ;;  %v9542_v1 = vadd.f32 %v11635_v61, %v15781_v34 }
 0xbf1   : > { %v15829_v12 = vadd.f32 %v11699_v0, %v9542_v1  ;;  %v11716_v53 = vpop.f32.mrb[240].mxu1  ;;  %v11780_v8 = vpop.f32.mrb[0].mxu0 }
 0xbf2   : > { %v11717_v13 = vpop.f32.mrb[241].mxu1  ;;  %v11781_v30 = vpop.f32.mrb[1].mxu0 }
 0xbf3   : > { %v11718_v47 = vadd.f32 %v11717_v13, %v11716_v53  ;;  %v11782_v22 = vadd.f32 %v11781_v30, %v11780_v8  ;;  %v11719_v58 = vpop.f32.mrb[242].mxu1  ;;  %v11783_v35 = vpop.f32.mrb[2].mxu0 }
 0xbf4   : > { %v11720_v46 = vpop.f32.mrb[243].mxu1  ;;  %v11784_v17 = vpop.f32.mrb[3].mxu0 }
 0xbf5   : > { %v9677_v63 = vadd.f32 %v11718_v47, %v15784_v54  ;;  %v11721_v62 = vadd.f32 %v11720_v46, %v11719_v58  ;;  %v11785_v27 = vadd.f32 %v11784_v17, %v11783_v35 }
 0xbf7   : > { %v9774_v37 = vadd.f32 %v11782_v22, %v9677_v63  ;;  %v9680_v59 = vadd.f32 %v11721_v62, %v15787_v7 }
 0xbf9   : > { %v9777_v34 = vadd.f32 %v11785_v27, %v9680_v59  ;;  %v11722_v16 = vpop.f32.mrb[244].mxu1  ;;  %v11786_v57 = vpop.f32.mrb[4].mxu0  ;;  %v15834_v50 = vadd.f32 %v9774_v37, %v14645_v43 }
 0xbfa   : > { %v11723_v25 = vpop.f32.mrb[245].mxu1  ;;  %v11787_v15 = vpop.f32.mrb[5].mxu0 }
 0xbfb   : > { %v11724_v32 = vadd.f32 %v11723_v25, %v11722_v16  ;;  %v11788_v29 = vadd.f32 %v11787_v15, %v11786_v57  ;;  %v11725_v56 = vpop.f32.mrb[246].mxu1  ;;  %v11789_v44 = vpop.f32.mrb[6].mxu0  ;;  %9852 = vadd.xlane.f32.xlu0 %v15834_v50  ;;  %v15838_v54 = vadd.f32 %v9777_v34, %v14648_v3 }
 0xbfc   : > { %v11726_v10 = vpop.f32.mrb[247].mxu1  ;;  %v11790_v9 = vpop.f32.mrb[7].mxu0 }
 0xbfd   : > { %v9685_v7 = vadd.f32 %v11724_v32, %v15790_v39  ;;  %v11727_v45 = vadd.f32 %v11726_v10, %v11725_v56  ;;  %v11791_v51 = vadd.f32 %v11790_v9, %v11789_v44  ;;  %9854 = vadd.xlane.f32.xlu1 %v15838_v54 }
 0xbff   : > { %v9782_v43 = vadd.f32 %v11788_v29, %v9685_v7  ;;  %v9688_v6 = vadd.f32 %v11727_v45, %v15793_v49 }
 0xc01   : > { %v9785_v52 = vadd.f32 %v11791_v51, %v9688_v6  ;;  %v11728_v55 = vpop.f32.mrb[248].mxu1  ;;  %v11792_v38 = vpop.f32.mrb[8].mxu0  ;;  %v15844_v42 = vadd.f32 %v9782_v43, %v14672_v48 }
 0xc02   : > { %v11729_v4 = vpop.f32.mrb[249].mxu1  ;;  %v11793_v3 = vpop.f32.mrb[9].mxu0 }
 0xc03   : > { %v11730_v60 = vadd.f32 %v11729_v4, %v11728_v55  ;;  %v11794_v28 = vadd.f32 %v11793_v3, %v11792_v38  ;;  %v11731_v61 = vpop.f32.mrb[250].mxu1  ;;  %v11795_v0 = vpop.f32.mrb[10].mxu0  ;;  %9856 = vadd.xlane.f32.xlu0 %v15844_v42  ;;  %v15848_v39 = vadd.f32 %v9785_v52, %v14665_v26  ;;  %v16145_v3 = vld [vmem:[#allocation8_spill] sm:$0xff] }
 0xc04   : > { %v11732_v1 = vpop.f32.mrb[251].mxu1  ;;  %v11796_v53 = vpop.f32.mrb[11].mxu0 }
 0xc05   : > { %v9693_v49 = vadd.f32 %v11730_v60, %v15796_v18  ;;  %v11733_v8 = vadd.f32 %v11732_v1, %v11731_v61  ;;  %v11797_v13 = vadd.f32 %v11796_v53, %v11795_v0  ;;  %9858 = vadd.xlane.f32.xlu1 %v15848_v39 }
 0xc07   : > { %v9790_v48 = vadd.f32 %v11794_v28, %v9693_v49  ;;  %v9696_v30 = vadd.f32 %v11733_v8, %v15799_v36 }
 0xc09   : > { %v9793_v47 = vadd.f32 %v11797_v13, %v9696_v30  ;;  %v11734_v22 = vpop.f32.mrb[252].mxu1  ;;  %v11798_v58 = vpop.f32.mrb[12].mxu0  ;;  %v15854_v35 = vadd.f32 %v9790_v48, %v14691_v40 }
 0xc0a   : > { %v11735_v46 = vpop.f32.mrb[253].mxu1  ;;  %v11799_v26 = vpop.f32.mrb[13].mxu0 }
 0xc0b   : > { %v11736_v17 = vadd.f32 %v11735_v46, %v11734_v22  ;;  %v11800_v63 = vadd.f32 %v11799_v26, %v11798_v58  ;;  %v11737_v62 = vpop.f32.mrb[254].mxu1  ;;  %v11801_v27 = vpop.f32.mrb[14].mxu0  ;;  %9860 = vadd.xlane.f32.xlu0 %v15854_v35  ;;  %v15858_v18 = vadd.f32 %v9793_v47, %v14694_v33  ;;  %v16147_v26 = vld [vmem:[#allocation12_spill] sm:$0xff] }
 0xc0c   : > { %v11738_v37 = vpop.f32.mrb[255].mxu1  ;;  %v11802_v59 = vpop.f32.mrb[15].mxu0 }
 0xc0d   : > { %v9701_v36 = vadd.f32 %v11736_v17, %v15802_v11  ;;  %v11739_v34 = vadd.f32 %v11738_v37, %v11737_v62  ;;  %v11803_v16 = vadd.f32 %v11802_v59, %v11801_v27  ;;  %9862 = vadd.xlane.f32.xlu1 %v15858_v18  ;;  %v16148_v37 = vld [vmem:[#allocation9_spill] sm:$0xff] }
 0xc0f   : > { %v9798_v40 = vadd.f32 %v11800_v63, %v9701_v36  ;;  %v9704_v57 = vadd.f32 %v11739_v34, %v15805_v5 }
 0xc11   : > { %v9801_v25 = vadd.f32 %v11803_v16, %v9704_v57  ;;  %v11740_v15 = vpop.f32.mrb[0].mxu1  ;;  %v11804_v32 = vpop.f32.mrb[16].mxu0  ;;  %v15864_v29 = vadd.f32 %v9798_v40, %v14712_v24 }
 0xc12   : > { %v11741_v56 = vpop.f32.mrb[1].mxu1  ;;  %v11805_v33 = vpop.f32.mrb[17].mxu0 }
 0xc13   : > { %v11742_v44 = vadd.f32 %v11741_v56, %v11740_v15  ;;  %v11806_v10 = vadd.f32 %v11805_v33, %v11804_v32  ;;  %v11743_v9 = vpop.f32.mrb[2].mxu1  ;;  %v11807_v7 = vpop.f32.mrb[18].mxu0  ;;  %9864 = vadd.xlane.f32.xlu0 %v15864_v29  ;;  %v15868_v11 = vadd.f32 %v9801_v25, %v14709_v14 }
 0xc14   : > { %v11744_v45 = vpop.f32.mrb[3].mxu1  ;;  %v11808_v51 = vpop.f32.mrb[19].mxu0 }
 0xc15   : > { %v9709_v5 = vadd.f32 %v11742_v44, %v15808_v31  ;;  %v11745_v43 = vadd.f32 %v11744_v45, %v11743_v9  ;;  %v11809_v6 = vadd.f32 %v11808_v51, %v11807_v7  ;;  %9866 = vadd.xlane.f32.xlu1 %v15868_v11  ;;  %v16146_v31 = vld [vmem:[#allocation10_spill] sm:$0xff] }
 0xc17   : > { %v9806_v24 = vadd.f32 %v11806_v10, %v9709_v5  ;;  %v9712_v52 = vadd.f32 %v11745_v43, %v15811_v19  ;;  %v16149_v43 = vld [vmem:[#allocation11_spill] sm:$0xff] }
 0xc19   : > { %v9809_v55 = vadd.f32 %v11809_v6, %v9712_v52  ;;  %v11746_v38 = vpop.f32.mrb[4].mxu1  ;;  %v11810_v4 = vpop.f32.mrb[20].mxu0  ;;  %v15874_v60 = vadd.f32 %v9806_v24, %v16145_v3  ;;  %v16150_v24 = vld [vmem:[#allocation14_spill] sm:$0xff] }
 0xc1a   : > { %v11747_v28 = vpop.f32.mrb[5].mxu1  ;;  %v11811_v14 = vpop.f32.mrb[21].mxu0 }
 0xc1b   : > { %v11748_v61 = vadd.f32 %v11747_v28, %v11746_v38  ;;  %v11812_v0 = vadd.f32 %v11811_v14, %v11810_v4  ;;  %v11749_v1 = vpop.f32.mrb[6].mxu1  ;;  %v11813_v53 = vpop.f32.mrb[22].mxu0  ;;  %9868 = vadd.xlane.f32.xlu0 %v15874_v60  ;;  %v15878_v49 = vadd.f32 %v9809_v55, %v16146_v31  ;;  %v16151_v14 = vld [vmem:[#allocation15_spill] sm:$0xff] }
 0xc1c   : > { %v11750_v8 = vpop.f32.mrb[7].mxu1  ;;  %v11814_v13 = vpop.f32.mrb[23].mxu0 }
 0xc1d   : > { %v9717_v19 = vadd.f32 %v11748_v61, %v15814_v21  ;;  %v11751_v48 = vadd.f32 %v11750_v8, %v11749_v1  ;;  %v11815_v30 = vadd.f32 %v11814_v13, %v11813_v53  ;;  %9870 = vadd.xlane.f32.xlu1 %v15878_v49 }
 0xc1f   : > { %v9814_v47 = vadd.f32 %v11812_v0, %v9717_v19  ;;  %v9720_v22 = vadd.f32 %v11751_v48, %v15817_v41  ;;  %v16152_v0 = vld [vmem:[#allocation13_spill] sm:$0xff] }
 0xc21   : > { %v9817_v58 = vadd.f32 %v11815_v30, %v9720_v22  ;;  %v11752_v46 = vpop.f32.mrb[8].mxu1  ;;  %v15884_v17 = vadd.f32 %v9814_v47, %v16147_v26 }
 0xc22   : > { %v11753_v63 = vpop.f32.mrb[9].mxu1 }
 0xc23   : > { %v11754_v62 = vadd.f32 %v11753_v63, %v11752_v46  ;;  %v11755_v27 = vpop.f32.mrb[10].mxu1  ;;  %9872 = vadd.xlane.f32.xlu0 %v15884_v17  ;;  %v15888_v59 = vadd.f32 %v9817_v58, %v16148_v37 }
 0xc24   : > { %v11756_v21 = vpop.f32.mrb[11].mxu1 }
 0xc25   : > { %v9725_v36 = vadd.f32 %v11754_v62, %v15820_v20  ;;  %v11757_v34 = vadd.f32 %v11756_v21, %v11755_v27  ;;  %9874 = vadd.xlane.f32.xlu1 %v15888_v59 }
 0xc27   : > { %v9728_v41 = vadd.f32 %v11757_v34, %v15823_v2 }
 0xc29   : > { %v11758_v16 = vpop.f32.mrb[12].mxu1 }
 0xc2a   : > { %v11759_v40 = vpop.f32.mrb[13].mxu1 }
 0xc2b   : > { %v11760_v57 = vadd.f32 %v11759_v40, %v11758_v16  ;;  %v11761_v25 = vpop.f32.mrb[14].mxu1 }
 0xc2c   : > { %v11762_v15 = vpop.f32.mrb[15].mxu1 }
 0xc2d   : > { %v9733_v32 = vadd.f32 %v11760_v57, %v15826_v23  ;;  %v11763_v56 = vadd.f32 %v11762_v15, %v11761_v25 }
 0xc2f   : > { %v9736_v33 = vadd.f32 %v11763_v56, %v15829_v12 }
 0xc31   : > { %v11816_v44 = vpop.f32.mrb[16].mxu1 }
 0xc32   : > { %v11817_v10 = vpop.f32.mrb[17].mxu1 }
 0xc33   : > { %v11818_v9 = vadd.f32 %v11817_v10, %v11816_v44  ;;  %v11819_v7 = vpop.f32.mrb[18].mxu1 }
 0xc34   : > { %v11820_v20 = vpop.f32.mrb[19].mxu1 }
 0xc35   : > { %v9822_v45 = vadd.f32 %v11818_v9, %v9725_v36  ;;  %v11821_v51 = vadd.f32 %v11820_v20, %v11819_v7 }
 0xc37   : > { %v9825_v5 = vadd.f32 %v11821_v51, %v9728_v41  ;;  %v15896_v2 = vadd.f32 %v9822_v45, %v16149_v43 }
 0xc39   : > { %v11822_v6 = vpop.f32.mrb[20].mxu1  ;;  %9876 = vadd.xlane.f32.xlu0 %v15896_v2  ;;  %v15900_v52 = vadd.f32 %v9825_v5, %v16150_v24 }
 0xc3a   : > { %v11823_v23 = vpop.f32.mrb[21].mxu1 }
 0xc3b   : > { %v11824_v55 = vadd.f32 %v11823_v23, %v11822_v6  ;;  %v11825_v12 = vpop.f32.mrb[22].mxu1  ;;  %9878 = vadd.xlane.f32.xlu1 %v15900_v52 }
 0xc3c   : > { %v11826_v38 = vpop.f32.mrb[23].mxu1 }
 0xc3d   : > { %v9830_v4 = vadd.f32 %v11824_v55, %v9733_v32  ;;  %v11827_v3 = vadd.f32 %v11826_v38, %v11825_v12 }
 0xc3f   : > { %v9833_v28 = vadd.f32 %v11827_v3, %v9736_v33  ;;  %v15904_v61 = vadd.f32 %v9830_v4, %v16151_v14 }
 0xc41   : > { %9880 = vadd.xlane.f32.xlu0 %v15904_v61  ;;  %v15908_v1 = vadd.f32 %v9833_v28, %v16152_v0 }
 0xc43   : > { %9882 = vadd.xlane.f32.xlu1 %v15908_v1 }
 0xc88   : > { %v9853_v53 = vpop.xlane.xlu0 %9852 }
 0xc89   : > { %v9884_v31 = vmul.f32 0.0078125, %v9853_v53 }
 0xc8a   : > { %v9855_v8 = vpop.xlane.xlu1 %9854 }
 0xc8b   : > { %v15912_v13 = vsub.f32 %v15834_v50, %v9884_v31  ;;  %v9885_v19 = vmul.f32 0.0078125, %v9855_v8 }
 0xc8d   : > { %v15915_v48 = vsub.f32 %v15838_v54, %v9885_v19  ;;  %v9916_v30 = vmul.f32 %v15912_v13, %v15912_v13 }
 0xc8f   : > { %9932 = vadd.xlane.f32.xlu0 %v9916_v30  ;;  %v9917_v47 = vmul.f32 %v15915_v48, %v15915_v48 }
 0xc90   : > { %v9857_v22 = vpop.xlane.xlu0 %9856 }
 0xc91   : > { %v9886_v58 = vmul.f32 0.0078125, %v9857_v22  ;;  %9934 = vadd.xlane.f32.xlu1 %v9917_v47 }
 0xc92   : > { %v9859_v46 = vpop.xlane.xlu1 %9858 }
 0xc93   : > { %v15922_v26 = vsub.f32 %v15844_v42, %v9886_v58  ;;  %v9887_v50 = vmul.f32 0.0078125, %v9859_v46 }
 0xc95   : > { %v15925_v63 = vsub.f32 %v15848_v39, %v9887_v50  ;;  %v9918_v54 = vmul.f32 %v15922_v26, %v15922_v26 }
 0xc97   : > { %9936 = vadd.xlane.f32.xlu0 %v9918_v54  ;;  %v9919_v62 = vmul.f32 %v15925_v63, %v15925_v63 }
 0xc98   : > { %v9861_v27 = vpop.xlane.xlu0 %9860 }
 0xc99   : > { %v9888_v37 = vmul.f32 0.0078125, %v9861_v27  ;;  %9938 = vadd.xlane.f32.xlu1 %v9919_v62 }
 0xc9a   : > { %v9863_v21 = vpop.xlane.xlu1 %9862 }
 0xc9b   : > { %v15932_v36 = vsub.f32 %v15854_v35, %v9888_v37  ;;  %v9889_v42 = vmul.f32 0.0078125, %v9863_v21  ;;  %v15994_v37 = vld [vmem:[%s16088_s13 + $0x1] ss:$0 sm:$0xff] }
 0xc9d   : > { %v15935_v34 = vsub.f32 %v15858_v18, %v9889_v42  ;;  %v9920_v39 = vmul.f32 %v15932_v36, %v15932_v36 }
 0xc9f   : > { %9940 = vadd.xlane.f32.xlu0 %v9920_v39  ;;  %v9921_v41 = vmul.f32 %v15935_v34, %v15935_v34 }
 0xca0   : > { %v9865_v16 = vpop.xlane.xlu0 %9864 }
 0xca1   : > { %v9890_v40 = vmul.f32 0.0078125, %v9865_v16  ;;  %9942 = vadd.xlane.f32.xlu1 %v9921_v41  ;;  %v16000_v41 = vld [vmem:[%s16136_s29 + $0x1] ss:$0 sm:$0xff] }
 0xca2   : > { %v9867_v57 = vpop.xlane.xlu1 %9866 }
 0xca3   : > { %v15942_v25 = vsub.f32 %v15864_v29, %v9890_v40  ;;  %v9891_v35 = vmul.f32 0.0078125, %v9867_v57 }
 0xca5   : > { %v15945_v15 = vsub.f32 %v15868_v11, %v9891_v35  ;;  %v9922_v18 = vmul.f32 %v15942_v25, %v15942_v25 }
 0xca7   : > { %9944 = vadd.xlane.f32.xlu0 %v9922_v18  ;;  %v9923_v32 = vmul.f32 %v15945_v15, %v15945_v15 }
 0xca8   : > { %v9869_v56 = vpop.xlane.xlu0 %9868 }
 0xca9   : > { %v9892_v33 = vmul.f32 0.0078125, %v9869_v56  ;;  %9946 = vadd.xlane.f32.xlu1 %v9923_v32 }
 0xcaa   : > { %v9871_v44 = vpop.xlane.xlu1 %9870 }
 0xcab   : > { %v15952_v10 = vsub.f32 %v15874_v60, %v9892_v33  ;;  %v9893_v29 = vmul.f32 0.0078125, %v9871_v44 }
 0xcad   : > { %v15955_v9 = vsub.f32 %v15878_v49, %v9893_v29  ;;  %v9924_v11 = vmul.f32 %v15952_v10, %v15952_v10 }
 0xcaf   : > { %9948 = vadd.xlane.f32.xlu0 %v9924_v11  ;;  %v9925_v7 = vmul.f32 %v15955_v9, %v15955_v9 }
 0xcb0   : > { %v9873_v20 = vpop.xlane.xlu0 %9872 }
 0xcb1   : > { %v9894_v45 = vmul.f32 0.0078125, %v9873_v20  ;;  %9950 = vadd.xlane.f32.xlu1 %v9925_v7 }
 0xcb2   : > { %v9875_v51 = vpop.xlane.xlu1 %9874 }
 0xcb3   : > { %v15962_v5 = vsub.f32 %v15884_v17, %v9894_v45  ;;  %v9895_v60 = vmul.f32 0.0078125, %v9875_v51 }
 0xcb5   : > { %v15965_v43 = vsub.f32 %v15888_v59, %v9895_v60  ;;  %v9926_v49 = vmul.f32 %v15962_v5, %v15962_v5 }
 0xcb7   : > { %9952 = vadd.xlane.f32.xlu0 %v9926_v49  ;;  %v9927_v6 = vmul.f32 %v15965_v43, %v15965_v43 }
 0xcb9   : > { %9954 = vadd.xlane.f32.xlu1 %v9927_v6 }
 0xcc6   : > { %v9877_v24 = vpop.xlane.xlu0 %9876 }
 0xcc7   : > { %v9896_v23 = vmul.f32 0.0078125, %v9877_v24 }
 0xcc8   : > { %v9879_v55 = vpop.xlane.xlu1 %9878 }
 0xcc9   : > { %v15972_v12 = vsub.f32 %v15896_v2, %v9896_v23  ;;  %v9897_v17 = vmul.f32 0.0078125, %v9879_v55 }
 0xccb   : > { %v15975_v38 = vsub.f32 %v15900_v52, %v9897_v17  ;;  %v9928_v59 = vmul.f32 %v15972_v12, %v15972_v12 }
 0xccd   : > { %9956 = vadd.xlane.f32.xlu0 %v9928_v59  ;;  %v9929_v4 = vmul.f32 %v15975_v38, %v15975_v38 }
 0xcce   : > { %v9881_v3 = vpop.xlane.xlu0 %9880 }
 0xccf   : > { %v9898_v28 = vmul.f32 0.0078125, %v9881_v3  ;;  %9958 = vadd.xlane.f32.xlu1 %v9929_v4 }
 0xcd0   : > { %v9883_v14 = vpop.xlane.xlu1 %9882 }
 0xcd1   : > { %v15982_v0 = vsub.f32 %v15904_v61, %v9898_v28  ;;  %v9899_v2 = vmul.f32 0.0078125, %v9883_v14 }
 0xcd3   : > { %v15985_v53 = vsub.f32 %v15908_v1, %v9899_v2  ;;  %v9930_v52 = vmul.f32 %v15982_v0, %v15982_v0 }
 0xcd5   : > { %9960 = vadd.xlane.f32.xlu0 %v9930_v52  ;;  %v9931_v31 = vmul.f32 %v15985_v53, %v15985_v53 }
 0xcd7   : > { %9962 = vadd.xlane.f32.xlu1 %v9931_v31 }
 0xd1c   : > { %v9933_v8 = vpop.xlane.xlu0 %9932 }
 0xd1d   : > { %v9964_v19 = vmul.f32 0.0078125, %v9933_v8 }
 0xd1e   : > { %v9935_v30 = vpop.xlane.xlu1 %9934 }
 0xd1f   : > { %v9980_v47 = vadd.f32 1e-05, %v9964_v19  ;;  %v9965_v22 = vmul.f32 0.0078125, %v9935_v30 }
 0xd21   : > { %12381 = vrsqrt.f32 %v9980_v47  ;;  %v9981_v61 = vadd.f32 1e-05, %v9965_v22 }
 0xd23   : > { %12383 = vrsqrt.f32 %v9981_v61 }
 0xd24   : > { %v9937_v58 = vpop.xlane.xlu0 %9936 }
 0xd25   : > { %v9966_v46 = vmul.f32 0.0078125, %v9937_v58 }
 0xd26   : > { %v9939_v1 = vpop.xlane.xlu1 %9938 }
 0xd27   : > { %v9982_v50 = vadd.f32 1e-05, %v9966_v46  ;;  %v9967_v54 = vmul.f32 0.0078125, %v9939_v1 }
 0xd29   : > { %12385 = vrsqrt.f32 %v9982_v50  ;;  %v9983_v62 = vadd.f32 1e-05, %v9967_v54 }
 0xd2b   : > { %v12382_v27 = vpop.eup %12381  ;;  %12387 = vrsqrt.f32 %v9983_v62 }
 0xd2c   : > { %v10012_v21 = vmul.f32 %v12382_v27, %v15912_v13  ;;  %v9941_v42 = vpop.xlane.xlu0 %9940 }
 0xd2d   : > { %v12384_v39 = vpop.eup %12383  ;;  %v9968_v16 = vmul.f32 0.0078125, %v9941_v42 }
 0xd2e   : > { %v10034_v40 = vmul.f32 %v15994_v37, %v10012_v21  ;;  %v10013_v57 = vmul.f32 %v12384_v39, %v15915_v48  ;;  %v9943_v35 = vpop.xlane.xlu1 %9942 }
 0xd2f   : > { %v9984_v13 = vadd.f32 1e-05, %v9968_v16  ;;  %v9969_v18 = vmul.f32 0.0078125, %v9943_v35 }
 0xd30   : > { %v10056_v32 = vadd.f32 %v16000_v41, %v10034_v40  ;;  %v10035_v56 = vmul.f32 %v15994_v37, %v10013_v57 }
 0xd31   : > { %12389 = vrsqrt.f32 %v9984_v13  ;;  %v9985_v33 = vadd.f32 1e-05, %v9969_v18 }
 0xd32   : > { %10072 = vst [vmem:[%s16009_s15] sm:$0xff] %v10056_v32  ;;  %v10057_v48 = vadd.f32 %v16000_v41, %v10035_v56 }
 0xd33   : > { %v12386_v44 = vpop.eup %12385  ;;  %12391 = vrsqrt.f32 %v9985_v33 }
 0xd34   : > { %10073 = vst [vmem:[%s16009_s15 + $0x8] sm:$0xff] %v10057_v48  ;;  %v10014_v29 = vmul.f32 %v12386_v44, %v15922_v26  ;;  %v9945_v11 = vpop.xlane.xlu0 %9944 }
 0xd35   : > { %v12388_v7 = vpop.eup %12387  ;;  %v9970_v20 = vmul.f32 0.0078125, %v9945_v11 }
 0xd36   : > { %v10036_v45 = vmul.f32 %v15994_v37, %v10014_v29  ;;  %v10015_v51 = vmul.f32 %v12388_v7, %v15925_v63  ;;  %v9947_v60 = vpop.xlane.xlu1 %9946 }
 0xd37   : > { %v9986_v49 = vadd.f32 1e-05, %v9970_v20  ;;  %v9971_v6 = vmul.f32 0.0078125, %v9947_v60 }
 0xd38   : > { %v10058_v24 = vadd.f32 %v16000_v41, %v10036_v45  ;;  %v10037_v23 = vmul.f32 %v15994_v37, %v10015_v51 }
 0xd39   : > { %12393 = vrsqrt.f32 %v9986_v49  ;;  %v9987_v55 = vadd.f32 1e-05, %v9971_v6 }
 0xd3a   : > { %10074 = vst [vmem:[%s16009_s15 + $0x10] sm:$0xff] %v10058_v24  ;;  %v10059_v26 = vadd.f32 %v16000_v41, %v10037_v23 }
 0xd3b   : > { %v12390_v17 = vpop.eup %12389  ;;  %12395 = vrsqrt.f32 %v9987_v55 }
 0xd3c   : > { %10075 = vst [vmem:[%s16009_s15 + $0x18] sm:$0xff] %v10059_v26  ;;  %v10016_v59 = vmul.f32 %v12390_v17, %v15932_v36  ;;  %v9949_v4 = vpop.xlane.xlu0 %9948 }
 0xd3d   : > { %v12392_v63 = vpop.eup %12391  ;;  %v9972_v3 = vmul.f32 0.0078125, %v9949_v4 }
 0xd3e   : > { %v10038_v28 = vmul.f32 %v15994_v37, %v10016_v59  ;;  %v10017_v14 = vmul.f32 %v12392_v63, %v15935_v34  ;;  %v9951_v2 = vpop.xlane.xlu1 %9950 }
 0xd3f   : > { %v9988_v52 = vadd.f32 1e-05, %v9972_v3  ;;  %v9973_v31 = vmul.f32 0.0078125, %v9951_v2 }
 0xd40   : > { %v10060_v8 = vadd.f32 %v16000_v41, %v10038_v28  ;;  %v10039_v19 = vmul.f32 %v15994_v37, %v10017_v14 }
 0xd41   : > { %12397 = vrsqrt.f32 %v9988_v52  ;;  %v9989_v30 = vadd.f32 1e-05, %v9973_v31 }
 0xd42   : > { %10076 = vst [vmem:[%s16009_s15 + $0x20] sm:$0xff] %v10060_v8  ;;  %v10061_v36 = vadd.f32 %v16000_v41, %v10039_v19 }
 0xd43   : > { %v12394_v47 = vpop.eup %12393  ;;  %12399 = vrsqrt.f32 %v9989_v30 }
 0xd44   : > { %10077 = vst [vmem:[%s16009_s15 + $0x28] sm:$0xff] %v10061_v36  ;;  %v10018_v22 = vmul.f32 %v12394_v47, %v15942_v25  ;;  %v9953_v61 = vpop.xlane.xlu0 %9952 }
 0xd45   : > { %v12396_v34 = vpop.eup %12395  ;;  %v9974_v58 = vmul.f32 0.0078125, %v9953_v61 }
 0xd46   : > { %v10040_v46 = vmul.f32 %v15994_v37, %v10018_v22  ;;  %v10019_v1 = vmul.f32 %v12396_v34, %v15945_v15  ;;  %v9955_v50 = vpop.xlane.xlu1 %9954 }
 0xd47   : > { %v9990_v54 = vadd.f32 1e-05, %v9974_v58  ;;  %v9975_v62 = vmul.f32 0.0078125, %v9955_v50 }
 0xd48   : > { %v10062_v27 = vadd.f32 %v16000_v41, %v10040_v46  ;;  %v10041_v21 = vmul.f32 %v15994_v37, %v10019_v1 }
 0xd49   : > { %12401 = vrsqrt.f32 %v9990_v54  ;;  %v9991_v42 = vadd.f32 1e-05, %v9975_v62 }
 0xd4a   : > { %10078 = vst [vmem:[%s16009_s15 + $0x30] sm:$0xff] %v10062_v27  ;;  %v10063_v25 = vadd.f32 %v16000_v41, %v10041_v21 }
 0xd4b   : > { %v12398_v39 = vpop.eup %12397  ;;  %12403 = vrsqrt.f32 %v9991_v42 }
 0xd4c   : > { %10079 = vst [vmem:[%s16009_s15 + $0x38] sm:$0xff] %v10063_v25  ;;  %v10020_v16 = vmul.f32 %v12398_v39, %v15952_v10 }
 0xd4d   : > { %v12400_v15 = vpop.eup %12399 }
 0xd4e   : > { %v10042_v40 = vmul.f32 %v15994_v37, %v10020_v16  ;;  %v10021_v57 = vmul.f32 %v12400_v15, %v15955_v9 }
 0xd50   : > { %v10064_v35 = vadd.f32 %v16000_v41, %v10042_v40  ;;  %v10043_v13 = vmul.f32 %v15994_v37, %v10021_v57 }
 0xd52   : > { %10080 = vst [vmem:[%s16009_s15 + $0x40] sm:$0xff] %v10064_v35  ;;  %v10065_v18 = vadd.f32 %v16000_v41, %v10043_v13 }
 0xd53   : > { %v12402_v32 = vpop.eup %12401 }
 0xd54   : > { %10081 = vst [vmem:[%s16009_s15 + $0x48] sm:$0xff] %v10065_v18  ;;  %v10022_v56 = vmul.f32 %v12402_v32, %v15962_v5 }
 0xd55   : > { %v12404_v33 = vpop.eup %12403 }
 0xd56   : > { %v10044_v10 = vmul.f32 %v15994_v37, %v10022_v56  ;;  %v10023_v48 = vmul.f32 %v12404_v33, %v15965_v43 }
 0xd58   : > { %v10066_v44 = vadd.f32 %v16000_v41, %v10044_v10  ;;  %v10045_v9 = vmul.f32 %v15994_v37, %v10023_v48 }
 0xd5a   : > { %10082 = vst [vmem:[%s16009_s15 + $0x50] sm:$0xff] %v10066_v44  ;;  %v10067_v29 = vadd.f32 %v16000_v41, %v10045_v9  ;;  %v9957_v11 = vpop.xlane.xlu0 %9956 }
 0xd5b   : > { %v9976_v7 = vmul.f32 0.0078125, %v9957_v11 }
 0xd5c   : > { %10083 = vst [vmem:[%s16009_s15 + $0x58] sm:$0xff] %v10067_v29  ;;  %v9959_v20 = vpop.xlane.xlu1 %9958 }
 0xd5d   : > { %v9992_v45 = vadd.f32 1e-05, %v9976_v7  ;;  %v9977_v51 = vmul.f32 0.0078125, %v9959_v20 }
 0xd5f   : > { %12405 = vrsqrt.f32 %v9992_v45  ;;  %v9993_v5 = vadd.f32 1e-05, %v9977_v51 }
 0xd61   : > { %12407 = vrsqrt.f32 %v9993_v5 }
 0xd62   : > { %v9961_v60 = vpop.xlane.xlu0 %9960 }
 0xd63   : > { %v9978_v49 = vmul.f32 0.0078125, %v9961_v60 }
 0xd64   : > { %v9963_v43 = vpop.xlane.xlu1 %9962 }
 0xd65   : > { %v9994_v6 = vadd.f32 1e-05, %v9978_v49  ;;  %v9979_v24 = vmul.f32 0.0078125, %v9963_v43 }
 0xd67   : > { %12409 = vrsqrt.f32 %v9994_v6  ;;  %v9995_v23 = vadd.f32 1e-05, %v9979_v24 }
 0xd69   : > { %v12406_v55 = vpop.eup %12405  ;;  %12411 = vrsqrt.f32 %v9995_v23 }
 0xd6a   : > { %v10024_v26 = vmul.f32 %v12406_v55, %v15972_v12 }
 0xd6b   : > { %v12408_v17 = vpop.eup %12407 }
 0xd6c   : > { %v10046_v59 = vmul.f32 %v15994_v37, %v10024_v26  ;;  %v10025_v4 = vmul.f32 %v12408_v17, %v15975_v38 }
 0xd6e   : > { %v10068_v63 = vadd.f32 %v16000_v41, %v10046_v59  ;;  %v10047_v3 = vmul.f32 %v15994_v37, %v10025_v4 }
 0xd70   : > { %10084 = vst [vmem:[%s16009_s15 + $0x60] sm:$0xff] %v10068_v63  ;;  %v10069_v28 = vadd.f32 %v16000_v41, %v10047_v3 }
 0xd71   : > { %v12410_v14 = vpop.eup %12409 }
 0xd72   : > { %10085 = vst [vmem:[%s16009_s15 + $0x68] sm:$0xff] %v10069_v28  ;;  %v10026_v2 = vmul.f32 %v12410_v14, %v15982_v0 }
 0xd73   : > { %v12412_v52 = vpop.eup %12411 }
 0xd74   : > { %v10048_v12 = vmul.f32 %v15994_v37, %v10026_v2  ;;  %v10027_v31 = vmul.f32 %v12412_v52, %v15985_v53 }
 0xd76   : > { %v10070_v8 = vadd.f32 %v16000_v41, %v10048_v12  ;;  %v10049_v38 = vmul.f32 %v15994_v37, %v10027_v31 }
 0xd78   : > { %10086 = vst [vmem:[%s16009_s15 + $0x70] sm:$0xff] %v10070_v8  ;;  %v10071_v19 = vadd.f32 %v16000_v41, %v10049_v38 }
 0xd7a   : > { %10087 = vst [vmem:[%s16009_s15 + $0x78] sm:$0xff] %v10071_v19 }
 0xd7b PF: > { %s27_s18 = sadd.s32 1, %s12483_s18  }
 0xd7c   : > { %p24_p5 = scmp.ge.s32.totalorder %s27_s18, 4  }
 0xd7e   :  { %26 = sbr.rel (!%p24_p5) target bundleno = 5 (0x5), region = 129 }
 0xd85   :  { %10110 = vsyncpa [#allocation3], 1 }
 0xd86   :  { %10112 = vsyncpa [#allocation3 + $0x1], 1 }
 0xd87   :  { %10113 = vsyncpa [#allocation5], 1 }

</bundles_post_ra>
